<compile_context>
chip_gen: v7x
topology: tpu7x:2x2x1
jax: 0.10.0
libtpu: 0.0.40
codegen_flags: <defaults>
</compile_context>

<pallas_src>
import functools
import math

import numpy as np
import jax
import jax.numpy as jnp
from jax.experimental import pallas as pl

# ----------------------------- configuration --------------------------------
B = 2            # batch
T_ENC = 8        # encoder sequence length
LABEL_LEN = 4
PRED_LEN = 4
T_DEC = LABEL_LEN + PRED_LEN
N_NODES = 10     # graph nodes -> N_NODES * 3 == 30 (matches view(.., 30))
NODE_F = 3       # per-node features (value, wind_speed_norm, wind_direc_norm)
E_EDGES = 20     # number of directed edges
N_MARKS = 4      # time-feature channels
D_MODEL = 32
N_HEADS = 4
D_HEAD = D_MODEL // N_HEADS
D_FF = 32        # kept == D_MODEL so all dense weights share one 32-wide slab
E_LAYERS = 2
D_LAYERS = 1
C_OUT = 10
ENC_IN = N_NODES * 3 + N_NODES   # = 40 (gnn output concat raw value channel)
DEC_IN = ENC_IN
GNN_EH = 16
GNN_EO = 30
GNN_NO = 3


# ------------------------------ fused kernel ---------------------------------
def _forward_kernel(xe_ref, me_ref, xd_ref, md_ref,
                    gin_ref, gl1_ref, gw2b_ref, gb2_ref, gl3_ref,
                    w32_ref, v32_ref, conv_ref, sel_ref, proj_ref,
                    out_ref, *, off):
    """Whole GNN_Transfomer forward; batch folded into matmul rows, no grid."""
    f32 = jnp.float32
    woff, voff, goff = off["w32"], off["v32"], off["gnn"]

    def blk(ref, entry):
        o, n = entry
        return ref[o:o + n, :]

    def W(name):
        return blk(w32_ref, woff[name])

    def V(name):
        return blk(v32_ref, voff[name])

    def dot(a, b):
        return jnp.dot(a, b, preferred_element_type=f32)

    def layer_norm(x, pre):
        mu = jnp.mean(x, axis=-1, keepdims=True)
        xc = x - mu
        var = jnp.mean(xc * xc, axis=-1, keepdims=True)
        return xc * jax.lax.rsqrt(var + 1e-5) * V(pre + "_g") + V(pre + "_b")

    # --------------------------- GraphGNN ------------------------------------
    def graph_gnn(x):
        """GraphGNN.forward for all (batch, time) rows at once; x: (R, N_NODES*NODE_F)."""
        wsd = blk(gin_ref, goff["Wsd"])                    # wind gather * std
        csd = blk(gin_ref, goff["Csd"])                    # + wind mean
        ec = blk(gin_ref, goff["EC"])                      # [city_direc | 3/dist]
        sd = dot(x, wsd) + csd                             # (R, 2E) de-normalised wind
        speed = sd[:, :E_EDGES]
        direc = sd[:, E_EDGES:]
        theta = jnp.abs(ec[:, :E_EDGES] - direc)
        edge_w = jnp.maximum(speed * jnp.cos(theta) * ec[:, E_EDGES:], 0.0)
        a1 = blk(gl1_ref, goff["A1"])                      # src/tgt gather folded into L1
        b1 = blk(gl1_ref, goff["B1"])                      # bias + edge_attr_norm part
        wexp = blk(gl1_ref, goff["Wexp"])                  # edge-weight column of L1
        h = jax.nn.sigmoid(dot(x, a1) + dot(edge_w, wexp) + b1)    # (R, E*16)
        # edge-MLP layer 2: block-diagonal weight stored bf16, f32 accumulate on MXU
        e = jax.nn.sigmoid(
            jnp.dot(h.astype(jnp.bfloat16), gw2b_ref[...], preferred_element_type=f32)
            + gb2_ref[...])                                # (R, E*30)
        m3 = blk(gl3_ref, goff["M3"])                      # (scatter +tgt/-src) @ node-MLP W
        b3 = blk(gl3_ref, goff["B3"])
        return jax.nn.sigmoid(dot(e, m3) + b3)             # (R, N*3)

    # --------------------------- embedding -----------------------------------
    def embed(x, marks, pre):
        # TODO(synk): DataEmbedding source not provided; linear value embedding + linear
        # temporal embedding + sinusoidal positional embedding assumed (dropout = 0).
        g = graph_gnn(x)
        y = dot(g, W(pre + "_Wg")) + dot(x, W(pre + "_Wx")) + dot(marks, W(pre + "_Wt"))
        return y + V(pre + "_b") + V(pre + "_pe")

    # --------------------------- attention -----------------------------------
    def attention(xq, xkv, pre, t_q, t_k, causal):
        # TODO(synk): ProbAttention (attn='prob') source not provided; full (optionally
        # causal) attention used; decoder mix=True head re-interleave not reproduced.
        lq, lk = xq.shape[0], xkv.shape[0]
        q = dot(xq, W(pre + "_Wq")) + V(pre + "_bq")
        k = dot(xkv, W(pre + "_Wk")) + V(pre + "_bk")
        row = jax.lax.broadcasted_iota(jnp.int32, (lq, lk), 0)
        col = jax.lax.broadcasted_iota(jnp.int32, (lq, lk), 1)
        # block-diagonal (same-batch) mask without integer division
        bq = jnp.floor(row.astype(f32) * (1.0 / float(t_q)))
        bk = jnp.floor(col.astype(f32) * (1.0 / float(t_k)))
        allow = bq == bk
        if causal:
            allow = jnp.logical_and(allow, col <= row)
        lane = jax.lax.broadcasted_iota(jnp.int32, (1, D_MODEL), 1)
        wvwo = W(pre + "_WvWo")                            # (N_HEADS*D, D), Wo folded in
        scale = 1.0 / math.sqrt(D_HEAD)
        acc = jnp.zeros((lq, D_MODEL), f32)
        for h in range(N_HEADS):
            in_head = jnp.logical_and(lane >= h * D_HEAD, lane < (h + 1) * D_HEAD)
            k_h = jnp.where(in_head, k, 0.0)               # lane mask instead of 8-lane slice
            s = jax.lax.dot_general(q, k_h, (((1,), (1,)), ((), ())),
                                    preferred_element_type=f32) * scale
            s = jnp.where(allow, s, -1e30)
            m = jnp.max(s, axis=-1, keepdims=True)
            p = jnp.exp(s - m)
            p = p * pl.reciprocal(jnp.sum(p, axis=-1, keepdims=True), approx=True)
            v_h = dot(xkv, wvwo[h * D_MODEL:(h + 1) * D_MODEL, :])
            acc = acc + dot(p, v_h)
        return acc + V(pre + "_bo")                        # = bv @ Wo + bo (folded host-side)

    def ffn(x, pre):
        # TODO(synk): torch F.gelu is the exact erf GELU; tanh approximation used here.
        y = jax.nn.gelu(dot(x, W(pre + "_Wff1")) + V(pre + "_bff1"), approximate=True)
        return dot(y, W(pre + "_Wff2")) + V(pre + "_bff2")

    def encoder_layer(x, pre, t_cur):
        # TODO(synk): Informer EncoderLayer source not provided; standard structure assumed.
        x = layer_norm(x + attention(x, x, pre + "_sa", t_cur, t_cur, False), pre + "_n1")
        return layer_norm(x + ffn(x, pre), pre + "_n2")

    def conv_layer(x, meta, pre):
        # TODO(synk): Informer ConvLayer source not provided; circular Conv1d(k=3) + ELU +
        # MaxPool1d(3, stride=2, pad=1) assumed; BatchNorm1d treated as identity.
        rin = meta["Rin"]

        def sel(name):
            o, r = meta[name]
            return conv_ref[o:o + r, :rin]

        prev = dot(sel("Pprev"), x)                        # x[t-1] (circular, per batch)
        nxt = dot(sel("Pnext"), x)                         # x[t+1] (circular, per batch)
        y = (dot(prev, W(pre + "_W1")) + dot(x, W(pre + "_W2"))
             + dot(nxt, W(pre + "_W3")) + V(pre + "_b"))
        y = jnp.where(y > 0, y, jnp.exp(jnp.minimum(y, 0.0)) - 1.0)     # ELU
        a = dot(sel("Sa"), y)
        b = dot(sel("Sb"), y)
        c = dot(sel("Sc"), y)
        return jnp.maximum(jnp.maximum(a, b), c)           # MaxPool1d(3,2,1) per batch

    def decoder_layer(x, cross, pre, t_dec, t_enc):
        # TODO(synk): Informer DecoderLayer source not provided; standard structure assumed.
        x = layer_norm(x + attention(x, x, pre + "_sa", t_dec, t_dec, True), pre + "_n1")
        x = layer_norm(x + attention(x, cross, pre + "_ca", t_dec, t_enc, False), pre + "_n2")
        return layer_norm(x + ffn(x, pre), pre + "_n3")

    # ------------------------------ encoder -----------------------------------
    enc = embed(xe_ref[...], me_ref[...], "eemb")          # (B*T_ENC, D)
    t_cur = T_ENC
    for i in range(E_LAYERS - 1):
        enc = encoder_layer(enc, f"enc{i}", t_cur)
        enc = conv_layer(enc, off["conv"][i], f"conv{i}")
        t_cur = off["conv"][i]["Lout"]
    enc = encoder_layer(enc, f"enc{E_LAYERS - 1}", t_cur)
    enc = layer_norm(enc, "enc_norm")

    # ------------------------------ decoder -----------------------------------
    dec = embed(xd_ref[...], md_ref[...], "demb")          # (B*T_DEC, D)
    for i in range(D_LAYERS):
        dec = decoder_layer(dec, enc, f"dec{i}", T_DEC, t_cur)
    # keep only the last PRED_LEN rows of each batch block (row selection commutes with
    # the per-row final LayerNorm / projection), then norm + project + lane-dense store.
    dec = dot(sel_ref[...], dec)                           # (B*PRED_LEN, D)
    dec = layer_norm(dec, "dec_norm")
    pw = blk(proj_ref, off["proj_w"])
    pb = blk(proj_ref, off["proj_b"])
    out_ref[...] = dot(dec, pw) + pb                       # (B*PRED_LEN, C_OUT)


def gnn_transformer_forward(packed, off, x_enc, x_mark_enc, x_dec, x_mark_dec):
    bx, te, n, f = x_enc.shape
    td = x_dec.shape[1]
    xe = x_enc.reshape(bx * te, n * f)
    me = x_mark_enc.reshape(bx * te, -1)
    xd = x_dec.reshape(bx * td, n * f)
    md = x_mark_dec.reshape(bx * td, -1)

    kernel = functools.partial(_forward_kernel, off=off)
    out = pl.pallas_call(
        kernel,
        out_shape=jax.ShapeDtypeStruct((bx * PRED_LEN, C_OUT), jnp.float32),
    )(xe, me, xd, md,
      packed["gnn_in"], packed["gnn_l1"], packed["gnn_w2b"], packed["gnn_b2"],
      packed["gnn_l3"], packed["w32"], packed["vec32"], packed["convsel"],
      packed["sel_out"], packed["proj"])
    return out.reshape(bx, PRED_LEN, C_OUT)


# ------------------------- host-side weight packing --------------------------
def _make_builder(width):
    state = {"rows": [], "off": {}, "cur": 0}

    def add(name, arr):
        a = np.asarray(arr, np.float32)
        if a.ndim == 1:
            a = a.reshape(1, -1)
        r, c = a.shape
        assert c == width, (name, c, width)
        pr = -(-r // 8) * 8                    # 8-sublane aligned offsets
        blkm = np.zeros((pr, width), np.float32)
        blkm[:r] = a
        state["off"][name] = (state["cur"], r)
        state["rows"].append(blkm)
        state["cur"] += pr

    def done():
        if not state["rows"]:
            return np.zeros((8, width), np.float32), state["off"]
        return np.concatenate(state["rows"], 0), state["off"]

    return add, done


def pack_params(params):
    """Flatten the module parameter tree into a handful of kernel-ready slabs."""
    gp = params["gnn"]
    src, tgt = np.asarray(gp["src"]), np.asarray(gp["tgt"])
    ea, ean = np.asarray(gp["edge_attr"]), np.asarray(gp["edge_attr_norm"])
    wm, ws = np.asarray(gp["wind_mean"]), np.asarray(gp["wind_std"])
    w1, b1 = np.asarray(gp["w1"]), np.asarray(gp["b1"])
    w2, b2 = np.asarray(gp["w2"]), np.asarray(gp["b2"])
    w3, b3 = np.asarray(gp["w3"]), np.asarray(gp["b3"])
    E, N, F = src.shape[0], N_NODES, NODE_F
    eh, eo, no = w1.shape[1], w2.shape[1], w3.shape[1]
    NF = N * F

    # ---- GNN slab 1: wind de-normalisation gather + edge geometry constants
    gin = np.zeros((48, 2 * E), np.float32)
    for e in range(E):
        gin[src[e] * F + 1, e] = ws[0]
        gin[src[e] * F + 2, E + e] = ws[1]
        gin[32, e] = wm[0]
        gin[32, E + e] = wm[1]
        gin[40, e] = ea[e, 1]             # city_direc
        gin[40, E + e] = 3.0 / ea[e, 0]   # 3 / dist
    gnn_off = {"Wsd": (0, NF), "Csd": (32, 1), "EC": (40, 1)}

    # ---- GNN slab 2: edge-MLP layer-1 gather, bias (incl. edge_attr_norm), edge-weight col
    gl1 = np.zeros((64, E * eh), np.float32)
    for e in range(E):
        cols = slice(e * eh, (e + 1) * eh)
        for ff in range(F):
            gl1[src[e] * F + ff, cols] += w1[ff, :]
            gl1[tgt[e] * F + ff, cols] += w1[F + ff, :]
        gl1[32, cols] = ean[e, 0] * w1[2 * F, :] + ean[e, 1] * w1[2 * F + 1, :] + b1
        gl1[40 + e, cols] = w1[2 * F + 2, :]
    gnn_off.update({"A1": (0, NF), "B1": (32, 1), "Wexp": (40, E)})

    # ---- GNN slab 3: block-diagonal edge-MLP layer-2 weight (bf16) + bias
    w2b = np.zeros((E * eh, E * eo), np.float32)
    b2t = np.zeros((1, E * eo), np.float32)
    for e in range(E):
        w2b[e * eh:(e + 1) * eh, e * eo:(e + 1) * eo] = w2
        b2t[0, e * eo:(e + 1) * eo] = b2

    # ---- GNN slab 4: (scatter_add +tgt / -src) fused with node-MLP weight, + bias
    gl3 = np.zeros((E * eo + 8, N * no), np.float32)
    for e in range(E):
        gl3[e * eo:(e + 1) * eo, tgt[e] * no:(tgt[e] + 1) * no] += w3
        gl3[e * eo:(e + 1) * eo, src[e] * no:(src[e] + 1) * no] -= w3
    gl3[E * eo, :] = np.tile(b3, N)
    gnn_off.update({"M3": (0, E * eo), "B3": (E * eo, 1)})

    Gval = np.zeros((NF, N), np.float32)          # selects raw value channel of each node
    for nn in range(N):
        Gval[nn * F, nn] = 1.0

    add_w, done_w = _make_builder(D_MODEL)        # all 32-wide dense weights
    add_v, done_v = _make_builder(D_MODEL)        # all 32-wide vectors (biases/norms/PE)

    for prefix, key, L in (("eemb", "enc_emb", T_ENC), ("demb", "dec_emb", T_DEC)):
        p = params[key]
        wv = np.asarray(p["w_val"])               # (ENC_IN, D)
        add_w(prefix + "_Wg", wv[:NF, :])
        add_w(prefix + "_Wx", Gval @ wv[NF:, :])  # raw-value channel folded host-side
        add_w(prefix + "_Wt", np.asarray(p["w_tmp"]))
        add_v(prefix + "_b", np.asarray(p["b_val"]) + np.asarray(p["b_tmp"]))
        add_v(prefix + "_pe", np.tile(np.asarray(p["pe"])[:L, :], (B, 1)))

    def add_attention(pre, a):
        wq, bq = np.asarray(a["wq"]), np.asarray(a["bq"])
        wk, bk = np.asarray(a["wk"]), np.asarray(a["bk"])
        wv_, bv = np.asarray(a["wv"]), np.asarray(a["bv"])
        wo, bo = np.asarray(a["wo"]), np.asarray(a["bo"])
        add_w(pre + "_Wq", wq)
        add_w(pre + "_Wk", wk)
        wvwo = np.concatenate(
            [wv_[:, h * D_HEAD:(h + 1) * D_HEAD] @ wo[h * D_HEAD:(h + 1) * D_HEAD, :]
             for h in range(N_HEADS)], axis=0)
        add_w(pre + "_WvWo", wvwo)                # Wo folded into V, per head
        add_v(pre + "_bq", bq)
        add_v(pre + "_bk", bk)
        add_v(pre + "_bo", bv @ wo + bo)          # softmax rows sum to 1 -> bias folds out

    for i, p in enumerate(params["enc_layers"]):
        pre = f"enc{i}"
        add_attention(pre + "_sa", p["attn"])
        add_w(pre + "_Wff1", np.asarray(p["w_ff1"]))
        add_w(pre + "_Wff2", np.asarray(p["w_ff2"]))
        add_v(pre + "_bff1", np.asarray(p["b_ff1"]))
        add_v(pre + "_bff2", np.asarray(p["b_ff2"]))
        for nm in ("n1", "n2"):
            add_v(pre + f"_{nm}_g", np.asarray(p[nm + "_g"]))
            add_v(pre + f"_{nm}_b", np.asarray(p[nm + "_b"]))

    # distil conv layers: conv weight split into 3 DxD blocks; shift / pool selectors are
    # tiny per-batch block matrices stacked in one slab.
    conv_meta = []
    conv_blocks = []
    conv_width = B * T_ENC
    cur = 0
    Lcur = T_ENC
    for i, p in enumerate(params["conv_layers"]):
        pre = f"conv{i}"
        w = np.asarray(p["w"])                    # (3*D, D): [prev; cur; next]
        add_w(pre + "_W1", w[:D_MODEL])
        add_w(pre + "_W2", w[D_MODEL:2 * D_MODEL])
        add_w(pre + "_W3", w[2 * D_MODEL:])
        add_v(pre + "_b", np.asarray(p["b"]))
        Rin = B * Lcur
        Lout = (Lcur + 2 - 3) // 2 + 1
        Rout = B * Lout
        Pprev = np.zeros((Rin, Rin), np.float32)
        Pnext = np.zeros((Rin, Rin), np.float32)
        for bb in range(B):
            for t in range(Lcur):
                Pprev[bb * Lcur + t, bb * Lcur + (t - 1) % Lcur] = 1.0
                Pnext[bb * Lcur + t, bb * Lcur + (t + 1) % Lcur] = 1.0
        Sa = np.zeros((Rout, Rin), np.float32)
        Sb = np.zeros((Rout, Rin), np.float32)
        Sc = np.zeros((Rout, Rin), np.float32)
        for bb in range(B):
            for j in range(Lout):
                Sa[bb * Lout + j, bb * Lcur + max(2 * j - 1, 0)] = 1.0
                Sb[bb * Lout + j, bb * Lcur + min(2 * j, Lcur - 1)] = 1.0
                Sc[bb * Lout + j, bb * Lcur + min(2 * j + 1, Lcur - 1)] = 1.0
        meta = {"Rin": Rin, "Rout": Rout, "Lin": Lcur, "Lout": Lout}
        for name, mat in (("Pprev", Pprev), ("Pnext", Pnext),
                          ("Sa", Sa), ("Sb", Sb), ("Sc", Sc)):
            r = mat.shape[0]
            pr = -(-r // 8) * 8
            slab = np.zeros((pr, conv_width), np.float32)
            slab[:r, :Rin] = mat
            meta[name] = (cur, r)
            conv_blocks.append(slab)
            cur += pr
        conv_meta.append(meta)
        Lcur = Lout
    convsel = (np.concatenate(conv_blocks, 0) if conv_blocks
               else np.zeros((8, conv_width), np.float32))

    for i, p in enumerate(params["dec_layers"]):
        pre = f"dec{i}"
        add_attention(pre + "_sa", p["self_attn"])
        add_attention(pre + "_ca", p["cross_attn"])
        add_w(pre + "_Wff1", np.asarray(p["w_ff1"]))
        add_w(pre + "_Wff2", np.asarray(p["w_ff2"]))
        add_v(pre + "_bff1", np.asarray(p["b_ff1"]))
        add_v(pre + "_bff2", np.asarray(p["b_ff2"]))
        for nm in ("n1", "n2", "n3"):
            add_v(pre + f"_{nm}_g", np.asarray(p[nm + "_g"]))
            add_v(pre + f"_{nm}_b", np.asarray(p[nm + "_b"]))

    add_v("enc_norm_g", np.asarray(params["enc_norm_g"]))
    add_v("enc_norm_b", np.asarray(params["enc_norm_b"]))
    add_v("dec_norm_g", np.asarray(params["dec_norm_g"]))
    add_v("dec_norm_b", np.asarray(params["dec_norm_b"]))

    proj = np.zeros((D_MODEL + 1, C_OUT), np.float32)
    proj[:D_MODEL] = np.asarray(params["proj_w"])
    proj[D_MODEL] = np.asarray(params["proj_b"])

    sel = np.zeros((B * PRED_LEN, B * T_DEC), np.float32)
    for bb in range(B):
        for j in range(PRED_LEN):
            sel[bb * PRED_LEN + j, bb * T_DEC + LABEL_LEN + j] = 1.0

    w32, off_w = done_w()
    vec32, off_v = done_v()

    packed = {
        "gnn_in": jnp.asarray(gin, jnp.float32),
        "gnn_l1": jnp.asarray(gl1, jnp.float32),
        "gnn_w2b": jnp.asarray(w2b, jnp.bfloat16),     # largest constant stored bf16
        "gnn_b2": jnp.asarray(b2t, jnp.float32),
        "gnn_l3": jnp.asarray(gl3, jnp.float32),
        "w32": jnp.asarray(w32, jnp.float32),
        "vec32": jnp.asarray(vec32, jnp.float32),
        "convsel": jnp.asarray(convsel, jnp.float32),
        "sel_out": jnp.asarray(sel, jnp.float32),
        "proj": jnp.asarray(proj, jnp.float32),
    }
    off = {"gnn": gnn_off, "w32": off_w, "v32": off_v, "conv": conv_meta,
           "proj_w": (0, D_MODEL), "proj_b": (D_MODEL, 1)}
    return packed, off


# ---------------------------- parameter creation -----------------------------
def init_linear(key, fan_in, fan_out):
    kw, kb = jax.random.split(key)
    bound = 1.0 / float(np.sqrt(fan_in))
    w = jax.random.uniform(kw, (fan_in, fan_out), jnp.float32, -bound, bound)
    b = jax.random.uniform(kb, (fan_out,), jnp.float32, -bound, bound)
    return w, b


def init_attn(key, d):
    ks = jax.random.split(key, 4)
    p = {}
    p["wq"], p["bq"] = init_linear(ks[0], d, d)
    p["wk"], p["bk"] = init_linear(ks[1], d, d)
    p["wv"], p["bv"] = init_linear(ks[2], d, d)
    p["wo"], p["bo"] = init_linear(ks[3], d, d)
    return p


def init_enc_layer(key, d, d_ff):
    ks = jax.random.split(key, 3)
    p = {"attn": init_attn(ks[0], d)}
    p["w_ff1"], p["b_ff1"] = init_linear(ks[1], d, d_ff)
    p["w_ff2"], p["b_ff2"] = init_linear(ks[2], d_ff, d)
    p["n1_g"], p["n1_b"] = jnp.ones((d,)), jnp.zeros((d,))
    p["n2_g"], p["n2_b"] = jnp.ones((d,)), jnp.zeros((d,))
    return p


def init_dec_layer(key, d, d_ff):
    ks = jax.random.split(key, 4)
    p = {"self_attn": init_attn(ks[0], d), "cross_attn": init_attn(ks[1], d)}
    p["w_ff1"], p["b_ff1"] = init_linear(ks[2], d, d_ff)
    p["w_ff2"], p["b_ff2"] = init_linear(ks[3], d_ff, d)
    for n in ("n1", "n2", "n3"):
        p[n + "_g"], p[n + "_b"] = jnp.ones((d,)), jnp.zeros((d,))
    return p


def sinusoidal_pe(length, d_model):
    pos = np.arange(length)[:, None].astype(np.float32)
    div = np.exp(np.arange(0, d_model, 2).astype(np.float32) * -(np.log(10000.0) / d_model))
    pe = np.zeros((length, d_model), np.float32)
    pe[:, 0::2] = np.sin(pos * div)
    pe[:, 1::2] = np.cos(pos * div)
    return jnp.asarray(pe)


def init_embedding(key, c_in, d, n_marks, max_len):
    ks = jax.random.split(key, 2)
    w_val, _ = init_linear(ks[0], c_in, d)
    w_tmp, _ = init_linear(ks[1], n_marks, d)
    return {"w_val": w_val, "b_val": jnp.zeros((d,)),
            "w_tmp": w_tmp, "b_tmp": jnp.zeros((d,)),
            "pe": sinusoidal_pe(max_len, d)}


def init_gnn(key, n_nodes, n_edges):
    src = np.concatenate([np.arange(n_nodes), np.arange(n_nodes)])
    tgt = np.concatenate([(np.arange(n_nodes) + 1) % n_nodes,
                          (np.arange(n_nodes) + 3) % n_nodes])
    assert len(src) == n_edges
    dist = 1.0 + 0.5 * (np.arange(n_edges) % 7)
    direc = 0.3 * np.arange(n_edges)
    edge_attr = np.stack([dist, direc], axis=1).astype(np.float32)
    edge_attr_norm = ((edge_attr - edge_attr.mean(0, keepdims=True))
                      / edge_attr.std(0, ddof=1, keepdims=True))   # torch std: unbiased
    ks = jax.random.split(key, 3)
    w1, b1 = init_linear(ks[0], NODE_F * 2 + 2 + 1, GNN_EH)   # edge_mlp layer 1
    w2, b2 = init_linear(ks[1], GNN_EH, GNN_EO)               # edge_mlp layer 2
    w3, b3 = init_linear(ks[2], GNN_EO, GNN_NO)               # node_mlp
    # NOTE: GraphGNN.w / GraphGNN.b are defined in __init__ but unused in forward.
    return {"src": src, "tgt": tgt,
            "edge_attr": edge_attr, "edge_attr_norm": edge_attr_norm,
            "wind_mean": np.array([2.0, 3.1], np.float32),
            "wind_std": np.array([1.5, 1.0], np.float32),
            "w1": w1, "b1": b1, "w2": w2, "b2": b2, "w3": w3, "b3": b3}


def init_params(key):
    ks = jax.random.split(key, 7)
    params = {"gnn": init_gnn(ks[0], N_NODES, E_EDGES)}
    max_len = max(T_ENC, T_DEC)
    params["enc_emb"] = init_embedding(ks[1], ENC_IN, D_MODEL, N_MARKS, max_len)
    params["dec_emb"] = init_embedding(ks[2], DEC_IN, D_MODEL, N_MARKS, max_len)
    params["enc_layers"] = [init_enc_layer(k, D_MODEL, D_FF)
                            for k in jax.random.split(ks[3], E_LAYERS)]
    params["conv_layers"] = []
    for k in jax.random.split(ks[4], max(E_LAYERS - 1, 1))[:E_LAYERS - 1]:
        w, b = init_linear(k, 3 * D_MODEL, D_MODEL)
        params["conv_layers"].append({"w": w, "b": b})
    params["dec_layers"] = [init_dec_layer(k, D_MODEL, D_FF)
                            for k in jax.random.split(ks[5], D_LAYERS)]
    params["enc_norm_g"], params["enc_norm_b"] = jnp.ones((D_MODEL,)), jnp.zeros((D_MODEL,))
    params["dec_norm_g"], params["dec_norm_b"] = jnp.ones((D_MODEL,)), jnp.zeros((D_MODEL,))
    params["proj_w"], params["proj_b"] = init_linear(ks[6], D_MODEL, C_OUT)
    return params


# ----------------------------------- main ------------------------------------
if __name__ == "__main__":
    key = jax.random.PRNGKey(0)
    k_param, k_xe, k_me, k_xd, k_md = jax.random.split(key, 5)
    params = init_params(k_param)
    packed, off = pack_params(params)

    x_enc = jax.random.normal(k_xe, (B, T_ENC, N_NODES, NODE_F), jnp.float32)
    x_mark_enc = jax.random.normal(k_me, (B, T_ENC, N_MARKS), jnp.float32)
    x_dec = jax.random.normal(k_xd, (B, T_DEC, N_NODES, NODE_F), jnp.float32)
    x_mark_dec = jax.random.normal(k_md, (B, T_DEC, N_MARKS), jnp.float32)

    out = gnn_transformer_forward(packed, off, x_enc, x_mark_enc, x_dec, x_mark_dec)
    out = jax.block_until_ready(out)

    assert out.shape == (B, PRED_LEN, C_OUT), out.shape
    assert bool(jnp.all(jnp.isfinite(out)))
    print("KERNEL_OK")
</pallas_src>

<mosaic_0001>
module attributes {stable_mosaic.version = 11 : i64} {
  func.func @_forward_kernel(%arg0: memref<16x30xf32, #tpu.memory_space<vmem>>, %arg1: memref<16x4xf32, #tpu.memory_space<vmem>>, %arg2: memref<16x30xf32, #tpu.memory_space<vmem>>, %arg3: memref<16x4xf32, #tpu.memory_space<vmem>>, %arg4: memref<48x40xf32, #tpu.memory_space<vmem>>, %arg5: memref<64x320xf32, #tpu.memory_space<vmem>>, %arg6: memref<320x600xbf16, #tpu.memory_space<vmem>>, %arg7: memref<1x600xf32, #tpu.memory_space<vmem>>, %arg8: memref<608x30xf32, #tpu.memory_space<vmem>>, %arg9: memref<1200x32xf32, #tpu.memory_space<vmem>>, %arg10: memref<344x32xf32, #tpu.memory_space<vmem>>, %arg11: memref<56x16xf32, #tpu.memory_space<vmem>>, %arg12: memref<8x16xf32, #tpu.memory_space<vmem>>, %arg13: memref<33x10xf32, #tpu.memory_space<vmem>>, %arg14: memref<8x10xf32, #tpu.memory_space<vmem>>) attributes {dimension_semantics = [], scalar_prefetch = 0 : i64, scratch_operands = 0 : i64, tpu.core_type = #tpu.core_type<tc>} {
    %c0 = arith.constant 0 : index
    %c0_0 = arith.constant 0 : index
    %0 = vector.load %arg0[%c0, %c0_0] : memref<16x30xf32, #tpu.memory_space<vmem>>, vector<16x30xf32>
    %c0_1 = arith.constant 0 : index
    %c0_2 = arith.constant 0 : index
    %1 = vector.load %arg1[%c0_1, %c0_2] : memref<16x4xf32, #tpu.memory_space<vmem>>, vector<16x4xf32>
    %c0_3 = arith.constant 0 : index
    %c0_4 = arith.constant 0 : index
    %2 = vector.load %arg4[%c0_3, %c0_4] : memref<48x40xf32, #tpu.memory_space<vmem>>, vector<30x40xf32>
    %c32 = arith.constant 32 : index
    %c0_5 = arith.constant 0 : index
    %3 = vector.load %arg4[%c32, %c0_5] : memref<48x40xf32, #tpu.memory_space<vmem>>, vector<1x40xf32>
    %c40 = arith.constant 40 : index
    %c0_6 = arith.constant 0 : index
    %4 = vector.load %arg4[%c40, %c0_6] : memref<48x40xf32, #tpu.memory_space<vmem>>, vector<1x40xf32>
    %cst = arith.constant dense<0.000000e+00> : vector<16x40xf32>
    %5 = tpu.matmul %0, %2, %cst {dimension_numbers = #tpu.dot_dimension_numbers<[1], [0], [0], [1], [0, 0, 1, 1], [], []>} : vector<16x30xf32>, vector<30x40xf32>, vector<16x40xf32> -> vector<16x40xf32>
    %6 = vector.broadcast %3 : vector<1x40xf32> to vector<16x40xf32>
    %7 = arith.addf %5, %6 : vector<16x40xf32>
    %8 = vector.extract_strided_slice %7 {offsets = [0, 0], sizes = [16, 20], strides = [1, 1]} : vector<16x40xf32> to vector<16x20xf32>
    %9 = vector.extract_strided_slice %7 {offsets = [0, 20], sizes = [16, 20], strides = [1, 1]} : vector<16x40xf32> to vector<16x20xf32>
    %10 = vector.extract_strided_slice %4 {offsets = [0, 0], sizes = [1, 20], strides = [1, 1]} : vector<1x40xf32> to vector<1x20xf32>
    %11 = vector.broadcast %10 : vector<1x20xf32> to vector<16x20xf32>
    %12 = arith.subf %11, %9 : vector<16x20xf32>
    %13 = math.absf %12 : vector<16x20xf32>
    %14 = math.cos %13 : vector<16x20xf32>
    %15 = arith.mulf %8, %14 : vector<16x20xf32>
    %16 = vector.extract_strided_slice %4 {offsets = [0, 20], sizes = [1, 20], strides = [1, 1]} : vector<1x40xf32> to vector<1x20xf32>
    %17 = vector.broadcast %16 : vector<1x20xf32> to vector<16x20xf32>
    %18 = arith.mulf %15, %17 : vector<16x20xf32>
    %cst_7 = arith.constant 0.000000e+00 : f32
    %19 = vector.broadcast %cst_7 : f32 to vector<16x20xf32>
    %20 = arith.maximumf %18, %19 : vector<16x20xf32>
    %c0_8 = arith.constant 0 : index
    %c0_9 = arith.constant 0 : index
    %21 = vector.load %arg5[%c0_8, %c0_9] : memref<64x320xf32, #tpu.memory_space<vmem>>, vector<30x320xf32>
    %c32_10 = arith.constant 32 : index
    %c0_11 = arith.constant 0 : index
    %22 = vector.load %arg5[%c32_10, %c0_11] : memref<64x320xf32, #tpu.memory_space<vmem>>, vector<1x320xf32>
    %c40_12 = arith.constant 40 : index
    %c0_13 = arith.constant 0 : index
    %23 = vector.load %arg5[%c40_12, %c0_13] : memref<64x320xf32, #tpu.memory_space<vmem>>, vector<20x320xf32>
    %cst_14 = arith.constant dense<0.000000e+00> : vector<16x320xf32>
    %24 = tpu.matmul %0, %21, %cst_14 {dimension_numbers = #tpu.dot_dimension_numbers<[1], [0], [0], [1], [0, 0, 1, 1], [], []>} : vector<16x30xf32>, vector<30x320xf32>, vector<16x320xf32> -> vector<16x320xf32>
    %cst_15 = arith.constant dense<0.000000e+00> : vector<16x320xf32>
    %25 = tpu.matmul %20, %23, %cst_15 {dimension_numbers = #tpu.dot_dimension_numbers<[1], [0], [0], [1], [0, 0, 1, 1], [], []>} : vector<16x20xf32>, vector<20x320xf32>, vector<16x320xf32> -> vector<16x320xf32>
    %26 = arith.addf %24, %25 : vector<16x320xf32>
    %27 = vector.broadcast %22 : vector<1x320xf32> to vector<16x320xf32>
    %28 = arith.addf %26, %27 : vector<16x320xf32>
    %29 = arith.negf %28 : vector<16x320xf32>
    %30 = math.exp %29 : vector<16x320xf32>
    %cst_16 = arith.constant 1.000000e+00 : f32
    %31 = vector.broadcast %cst_16 : f32 to vector<16x320xf32>
    %32 = arith.addf %31, %30 : vector<16x320xf32>
    %33 = arith.divf %31, %32 : vector<16x320xf32>
    %34 = arith.truncf %33 : vector<16x320xf32> to vector<16x320xbf16>
    %c0_17 = arith.constant 0 : index
    %c0_18 = arith.constant 0 : index
    %35 = vector.load %arg6[%c0_17, %c0_18] : memref<320x600xbf16, #tpu.memory_space<vmem>>, vector<320x600xbf16>
    %cst_19 = arith.constant dense<0.000000e+00> : vector<16x600xf32>
    %36 = tpu.matmul %34, %35, %cst_19 {dimension_numbers = #tpu.dot_dimension_numbers<[1], [0], [0], [1], [0, 0, 1, 1], [], []>} : vector<16x320xbf16>, vector<320x600xbf16>, vector<16x600xf32> -> vector<16x600xf32>
    %c0_20 = arith.constant 0 : index
    %c0_21 = arith.constant 0 : index
    %37 = vector.load %arg7[%c0_20, %c0_21] : memref<1x600xf32, #tpu.memory_space<vmem>>, vector<1x600xf32>
    %38 = vector.broadcast %37 : vector<1x600xf32> to vector<16x600xf32>
    %39 = arith.addf %36, %38 : vector<16x600xf32>
    %40 = arith.negf %39 : vector<16x600xf32>
    %41 = math.exp %40 : vector<16x600xf32>
    %cst_22 = arith.constant 1.000000e+00 : f32
    %42 = vector.broadcast %cst_22 : f32 to vector<16x600xf32>
    %43 = arith.addf %42, %41 : vector<16x600xf32>
    %44 = arith.divf %42, %43 : vector<16x600xf32>
    %c0_23 = arith.constant 0 : index
    %c0_24 = arith.constant 0 : index
    %45 = vector.load %arg8[%c0_23, %c0_24] : memref<608x30xf32, #tpu.memory_space<vmem>>, vector<600x30xf32>
    %c600 = arith.constant 600 : index
    %c0_25 = arith.constant 0 : index
    %46 = vector.load %arg8[%c600, %c0_25] : memref<608x30xf32, #tpu.memory_space<vmem>>, vector<1x30xf32>
    %cst_26 = arith.constant dense<0.000000e+00> : vector<16x30xf32>
    %47 = tpu.matmul %44, %45, %cst_26 {dimension_numbers = #tpu.dot_dimension_numbers<[1], [0], [0], [1], [0, 0, 1, 1], [], []>} : vector<16x600xf32>, vector<600x30xf32>, vector<16x30xf32> -> vector<16x30xf32>
    %48 = vector.broadcast %46 : vector<1x30xf32> to vector<16x30xf32>
    %49 = arith.addf %47, %48 : vector<16x30xf32>
    %50 = arith.negf %49 : vector<16x30xf32>
    %51 = math.exp %50 : vector<16x30xf32>
    %cst_27 = arith.constant 1.000000e+00 : f32
    %52 = vector.broadcast %cst_27 : f32 to vector<16x30xf32>
    %53 = arith.addf %52, %51 : vector<16x30xf32>
    %54 = arith.divf %52, %53 : vector<16x30xf32>
    %c0_28 = arith.constant 0 : index
    %c0_29 = arith.constant 0 : index
    %55 = vector.load %arg9[%c0_28, %c0_29] : memref<1200x32xf32, #tpu.memory_space<vmem>>, vector<30x32xf32>
    %cst_30 = arith.constant dense<0.000000e+00> : vector<16x32xf32>
    %56 = tpu.matmul %54, %55, %cst_30 {dimension_numbers = #tpu.dot_dimension_numbers<[1], [0], [0], [1], [0, 0, 1, 1], [], []>} : vector<16x30xf32>, vector<30x32xf32>, vector<16x32xf32> -> vector<16x32xf32>
    %c32_31 = arith.constant 32 : index
    %c0_32 = arith.constant 0 : index
    %57 = vector.load %arg9[%c32_31, %c0_32] : memref<1200x32xf32, #tpu.memory_space<vmem>>, vector<30x32xf32>
    %cst_33 = arith.constant dense<0.000000e+00> : vector<16x32xf32>
    %58 = tpu.matmul %0, %57, %cst_33 {dimension_numbers = #tpu.dot_dimension_numbers<[1], [0], [0], [1], [0, 0, 1, 1], [], []>} : vector<16x30xf32>, vector<30x32xf32>, vector<16x32xf32> -> vector<16x32xf32>
    %59 = arith.addf %56, %58 : vector<16x32xf32>
    %c64 = arith.constant 64 : index
    %c0_34 = arith.constant 0 : index
    %60 = vector.load %arg9[%c64, %c0_34] : memref<1200x32xf32, #tpu.memory_space<vmem>>, vector<4x32xf32>
    %cst_35 = arith.constant dense<0.000000e+00> : vector<16x32xf32>
    %61 = tpu.matmul %1, %60, %cst_35 {dimension_numbers = #tpu.dot_dimension_numbers<[1], [0], [0], [1], [0, 0, 1, 1], [], []>} : vector<16x4xf32>, vector<4x32xf32>, vector<16x32xf32> -> vector<16x32xf32>
    %62 = arith.addf %59, %61 : vector<16x32xf32>
    %c0_36 = arith.constant 0 : index
    %c0_37 = arith.constant 0 : index
    %63 = vector.load %arg10[%c0_36, %c0_37] : memref<344x32xf32, #tpu.memory_space<vmem>>, vector<1x32xf32>
    %64 = vector.broadcast %63 : vector<1x32xf32> to vector<16x32xf32>
    %65 = arith.addf %62, %64 : vector<16x32xf32>
    %c8 = arith.constant 8 : index
    %c0_38 = arith.constant 0 : index
    %66 = vector.load %arg10[%c8, %c0_38] : memref<344x32xf32, #tpu.memory_space<vmem>>, vector<16x32xf32>
    %67 = arith.addf %65, %66 : vector<16x32xf32>
    %c144 = arith.constant 144 : index
    %c0_39 = arith.constant 0 : index
    %68 = vector.load %arg9[%c144, %c0_39] : memref<1200x32xf32, #tpu.memory_space<vmem>>, vector<32x32xf32>
    %cst_40 = arith.constant dense<0.000000e+00> : vector<16x32xf32>
    %69 = tpu.matmul %67, %68, %cst_40 {dimension_numbers = #tpu.dot_dimension_numbers<[1], [0], [0], [1], [0, 0, 1, 1], [], []>} : vector<16x32xf32>, vector<32x32xf32>, vector<16x32xf32> -> vector<16x32xf32>
    %c48 = arith.constant 48 : index
    %c0_41 = arith.constant 0 : index
    %70 = vector.load %arg10[%c48, %c0_41] : memref<344x32xf32, #tpu.memory_space<vmem>>, vector<1x32xf32>
    %71 = vector.broadcast %70 : vector<1x32xf32> to vector<16x32xf32>
    %72 = arith.addf %69, %71 : vector<16x32xf32>
    %c176 = arith.constant 176 : index
    %c0_42 = arith.constant 0 : index
    %73 = vector.load %arg9[%c176, %c0_42] : memref<1200x32xf32, #tpu.memory_space<vmem>>, vector<32x32xf32>
    %cst_43 = arith.constant dense<0.000000e+00> : vector<16x32xf32>
    %74 = tpu.matmul %67, %73, %cst_43 {dimension_numbers = #tpu.dot_dimension_numbers<[1], [0], [0], [1], [0, 0, 1, 1], [], []>} : vector<16x32xf32>, vector<32x32xf32>, vector<16x32xf32> -> vector<16x32xf32>
    %c56 = arith.constant 56 : index
    %c0_44 = arith.constant 0 : index
    %75 = vector.load %arg10[%c56, %c0_44] : memref<344x32xf32, #tpu.memory_space<vmem>>, vector<1x32xf32>
    %76 = vector.broadcast %75 : vector<1x32xf32> to vector<16x32xf32>
    %77 = arith.addf %74, %76 : vector<16x32xf32>
    %78 = tpu.iota {dimensions = array<i32: 0>} : vector<16x16xi32>
    %79 = tpu.iota {dimensions = array<i32: 1>} : vector<16x16xi32>
    %80 = arith.sitofp %78 : vector<16x16xi32> to vector<16x16xf32>
    %cst_45 = arith.constant 1.250000e-01 : f32
    %81 = vector.broadcast %cst_45 : f32 to vector<16x16xf32>
    %82 = arith.mulf %80, %81 : vector<16x16xf32>
    %83 = math.floor %82 : vector<16x16xf32>
    %84 = arith.sitofp %79 : vector<16x16xi32> to vector<16x16xf32>
    %cst_46 = arith.constant 1.250000e-01 : f32
    %85 = vector.broadcast %cst_46 : f32 to vector<16x16xf32>
    %86 = arith.mulf %84, %85 : vector<16x16xf32>
    %87 = math.floor %86 : vector<16x16xf32>
    %88 = arith.cmpf oeq, %83, %87 : vector<16x16xf32>
    %89 = tpu.iota {dimensions = array<i32: 1>} : vector<1x32xi32>
    %c208 = arith.constant 208 : index
    %c0_47 = arith.constant 0 : index
    %90 = vector.load %arg9[%c208, %c0_47] : memref<1200x32xf32, #tpu.memory_space<vmem>>, vector<128x32xf32>
    %cst_48 = arith.constant 0.000000e+00 : f32
    %91 = vector.broadcast %cst_48 : f32 to vector<16x32xf32>
    %c0_i32 = arith.constant 0 : i32
    %92 = vector.broadcast %c0_i32 : i32 to vector<1x32xi32>
    %93 = arith.cmpi sge, %89, %92 : vector<1x32xi32>
    %c8_i32 = arith.constant 8 : i32
    %94 = vector.broadcast %c8_i32 : i32 to vector<1x32xi32>
    %95 = arith.cmpi slt, %89, %94 : vector<1x32xi32>
    %96 = arith.andi %93, %95 : vector<1x32xi1>
    %cst_49 = arith.constant 0.000000e+00 : f32
    %97 = vector.shape_cast %96 : vector<1x32xi1> to vector<1x32xi1>
    %98 = vector.broadcast %97 : vector<1x32xi1> to vector<16x32xi1>
    %99 = vector.broadcast %cst_49 : f32 to vector<16x32xf32>
    %100 = arith.select %98, %77, %99 : vector<16x32xi1>, vector<16x32xf32>
    %cst_50 = arith.constant dense<0.000000e+00> : vector<16x16xf32>
    %101 = tpu.matmul %72, %100, %cst_50 {dimension_numbers = #tpu.dot_dimension_numbers<[1], [1], [0], [0], [0, 0, 1, 0], [], []>} : vector<16x32xf32>, vector<16x32xf32>, vector<16x16xf32> -> vector<16x16xf32>
    %cst_51 = arith.constant 0.353553385 : f32
    %102 = vector.broadcast %cst_51 : f32 to vector<16x16xf32>
    %103 = arith.mulf %101, %102 : vector<16x16xf32>
    %cst_52 = arith.constant -1.000000e+30 : f32
    %104 = vector.broadcast %cst_52 : f32 to vector<16x16xf32>
    %105 = arith.select %88, %103, %104 : vector<16x16xi1>, vector<16x16xf32>
    %cst_53 = arith.constant dense<0xFF800000> : vector<16xf32>
    %106 = vector.multi_reduction <maximumf>, %105, %cst_53 [1] : vector<16x16xf32> to vector<16xf32>
    %107 = vector.shape_cast %106 : vector<16xf32> to vector<16x1xf32>
    %108 = vector.broadcast %107 : vector<16x1xf32> to vector<16x16xf32>
    %109 = arith.subf %105, %108 : vector<16x16xf32>
    %110 = math.exp %109 : vector<16x16xf32>
    %cst_54 = arith.constant dense<0.000000e+00> : vector<16xf32>
    %111 = vector.multi_reduction <add>, %110, %cst_54 [1] : vector<16x16xf32> to vector<16xf32>
    %112 = vector.shape_cast %111 : vector<16xf32> to vector<16x1xf32>
    %113 = tpu.reciprocal %112 {approx = true} : vector<16x1xf32> -> vector<16x1xf32>
    %114 = vector.broadcast %113 : vector<16x1xf32> to vector<16x16xf32>
    %115 = arith.mulf %110, %114 : vector<16x16xf32>
    %116 = vector.extract_strided_slice %90 {offsets = [0, 0], sizes = [32, 32], strides = [1, 1]} : vector<128x32xf32> to vector<32x32xf32>
    %cst_55 = arith.constant dense<0.000000e+00> : vector<16x32xf32>
    %117 = tpu.matmul %67, %116, %cst_55 {dimension_numbers = #tpu.dot_dimension_numbers<[1], [0], [0], [1], [0, 0, 1, 1], [], []>} : vector<16x32xf32>, vector<32x32xf32>, vector<16x32xf32> -> vector<16x32xf32>
    %cst_56 = arith.constant dense<0.000000e+00> : vector<16x32xf32>
    %118 = tpu.matmul %115, %117, %cst_56 {dimension_numbers = #tpu.dot_dimension_numbers<[1], [0], [0], [1], [0, 0, 1, 1], [], []>} : vector<16x16xf32>, vector<16x32xf32>, vector<16x32xf32> -> vector<16x32xf32>
    %119 = arith.addf %91, %118 : vector<16x32xf32>
    %c8_i32_57 = arith.constant 8 : i32
    %120 = vector.broadcast %c8_i32_57 : i32 to vector<1x32xi32>
    %121 = arith.cmpi sge, %89, %120 : vector<1x32xi32>
    %c16_i32 = arith.constant 16 : i32
    %122 = vector.broadcast %c16_i32 : i32 to vector<1x32xi32>
    %123 = arith.cmpi slt, %89, %122 : vector<1x32xi32>
    %124 = arith.andi %121, %123 : vector<1x32xi1>
    %cst_58 = arith.constant 0.000000e+00 : f32
    %125 = vector.shape_cast %124 : vector<1x32xi1> to vector<1x32xi1>
    %126 = vector.broadcast %125 : vector<1x32xi1> to vector<16x32xi1>
    %127 = vector.broadcast %cst_58 : f32 to vector<16x32xf32>
    %128 = arith.select %126, %77, %127 : vector<16x32xi1>, vector<16x32xf32>
    %cst_59 = arith.constant dense<0.000000e+00> : vector<16x16xf32>
    %129 = tpu.matmul %72, %128, %cst_59 {dimension_numbers = #tpu.dot_dimension_numbers<[1], [1], [0], [0], [0, 0, 1, 0], [], []>} : vector<16x32xf32>, vector<16x32xf32>, vector<16x16xf32> -> vector<16x16xf32>
    %cst_60 = arith.constant 0.353553385 : f32
    %130 = vector.broadcast %cst_60 : f32 to vector<16x16xf32>
    %131 = arith.mulf %129, %130 : vector<16x16xf32>
    %cst_61 = arith.constant -1.000000e+30 : f32
    %132 = vector.broadcast %cst_61 : f32 to vector<16x16xf32>
    %133 = arith.select %88, %131, %132 : vector<16x16xi1>, vector<16x16xf32>
    %cst_62 = arith.constant dense<0xFF800000> : vector<16xf32>
    %134 = vector.multi_reduction <maximumf>, %133, %cst_62 [1] : vector<16x16xf32> to vector<16xf32>
    %135 = vector.shape_cast %134 : vector<16xf32> to vector<16x1xf32>
    %136 = vector.broadcast %135 : vector<16x1xf32> to vector<16x16xf32>
    %137 = arith.subf %133, %136 : vector<16x16xf32>
    %138 = math.exp %137 : vector<16x16xf32>
    %cst_63 = arith.constant dense<0.000000e+00> : vector<16xf32>
    %139 = vector.multi_reduction <add>, %138, %cst_63 [1] : vector<16x16xf32> to vector<16xf32>
    %140 = vector.shape_cast %139 : vector<16xf32> to vector<16x1xf32>
    %141 = tpu.reciprocal %140 {approx = true} : vector<16x1xf32> -> vector<16x1xf32>
    %142 = vector.broadcast %141 : vector<16x1xf32> to vector<16x16xf32>
    %143 = arith.mulf %138, %142 : vector<16x16xf32>
    %144 = vector.extract_strided_slice %90 {offsets = [32, 0], sizes = [32, 32], strides = [1, 1]} : vector<128x32xf32> to vector<32x32xf32>
    %cst_64 = arith.constant dense<0.000000e+00> : vector<16x32xf32>
    %145 = tpu.matmul %67, %144, %cst_64 {dimension_numbers = #tpu.dot_dimension_numbers<[1], [0], [0], [1], [0, 0, 1, 1], [], []>} : vector<16x32xf32>, vector<32x32xf32>, vector<16x32xf32> -> vector<16x32xf32>
    %cst_65 = arith.constant dense<0.000000e+00> : vector<16x32xf32>
    %146 = tpu.matmul %143, %145, %cst_65 {dimension_numbers = #tpu.dot_dimension_numbers<[1], [0], [0], [1], [0, 0, 1, 1], [], []>} : vector<16x16xf32>, vector<16x32xf32>, vector<16x32xf32> -> vector<16x32xf32>
    %147 = arith.addf %119, %146 : vector<16x32xf32>
    %c16_i32_66 = arith.constant 16 : i32
    %148 = vector.broadcast %c16_i32_66 : i32 to vector<1x32xi32>
    %149 = arith.cmpi sge, %89, %148 : vector<1x32xi32>
    %c24_i32 = arith.constant 24 : i32
    %150 = vector.broadcast %c24_i32 : i32 to vector<1x32xi32>
    %151 = arith.cmpi slt, %89, %150 : vector<1x32xi32>
    %152 = arith.andi %149, %151 : vector<1x32xi1>
    %cst_67 = arith.constant 0.000000e+00 : f32
    %153 = vector.shape_cast %152 : vector<1x32xi1> to vector<1x32xi1>
    %154 = vector.broadcast %153 : vector<1x32xi1> to vector<16x32xi1>
    %155 = vector.broadcast %cst_67 : f32 to vector<16x32xf32>
    %156 = arith.select %154, %77, %155 : vector<16x32xi1>, vector<16x32xf32>
    %cst_68 = arith.constant dense<0.000000e+00> : vector<16x16xf32>
    %157 = tpu.matmul %72, %156, %cst_68 {dimension_numbers = #tpu.dot_dimension_numbers<[1], [1], [0], [0], [0, 0, 1, 0], [], []>} : vector<16x32xf32>, vector<16x32xf32>, vector<16x16xf32> -> vector<16x16xf32>
    %cst_69 = arith.constant 0.353553385 : f32
    %158 = vector.broadcast %cst_69 : f32 to vector<16x16xf32>
    %159 = arith.mulf %157, %158 : vector<16x16xf32>
    %cst_70 = arith.constant -1.000000e+30 : f32
    %160 = vector.broadcast %cst_70 : f32 to vector<16x16xf32>
    %161 = arith.select %88, %159, %160 : vector<16x16xi1>, vector<16x16xf32>
    %cst_71 = arith.constant dense<0xFF800000> : vector<16xf32>
    %162 = vector.multi_reduction <maximumf>, %161, %cst_71 [1] : vector<16x16xf32> to vector<16xf32>
    %163 = vector.shape_cast %162 : vector<16xf32> to vector<16x1xf32>
    %164 = vector.broadcast %163 : vector<16x1xf32> to vector<16x16xf32>
    %165 = arith.subf %161, %164 : vector<16x16xf32>
    %166 = math.exp %165 : vector<16x16xf32>
    %cst_72 = arith.constant dense<0.000000e+00> : vector<16xf32>
    %167 = vector.multi_reduction <add>, %166, %cst_72 [1] : vector<16x16xf32> to vector<16xf32>
    %168 = vector.shape_cast %167 : vector<16xf32> to vector<16x1xf32>
    %169 = tpu.reciprocal %168 {approx = true} : vector<16x1xf32> -> vector<16x1xf32>
    %170 = vector.broadcast %169 : vector<16x1xf32> to vector<16x16xf32>
    %171 = arith.mulf %166, %170 : vector<16x16xf32>
    %172 = vector.extract_strided_slice %90 {offsets = [64, 0], sizes = [32, 32], strides = [1, 1]} : vector<128x32xf32> to vector<32x32xf32>
    %cst_73 = arith.constant dense<0.000000e+00> : vector<16x32xf32>
    %173 = tpu.matmul %67, %172, %cst_73 {dimension_numbers = #tpu.dot_dimension_numbers<[1], [0], [0], [1], [0, 0, 1, 1], [], []>} : vector<16x32xf32>, vector<32x32xf32>, vector<16x32xf32> -> vector<16x32xf32>
    %cst_74 = arith.constant dense<0.000000e+00> : vector<16x32xf32>
    %174 = tpu.matmul %171, %173, %cst_74 {dimension_numbers = #tpu.dot_dimension_numbers<[1], [0], [0], [1], [0, 0, 1, 1], [], []>} : vector<16x16xf32>, vector<16x32xf32>, vector<16x32xf32> -> vector<16x32xf32>
    %175 = arith.addf %147, %174 : vector<16x32xf32>
    %c24_i32_75 = arith.constant 24 : i32
    %176 = vector.broadcast %c24_i32_75 : i32 to vector<1x32xi32>
    %177 = arith.cmpi sge, %89, %176 : vector<1x32xi32>
    %c32_i32 = arith.constant 32 : i32
    %178 = vector.broadcast %c32_i32 : i32 to vector<1x32xi32>
    %179 = arith.cmpi slt, %89, %178 : vector<1x32xi32>
    %180 = arith.andi %177, %179 : vector<1x32xi1>
    %cst_76 = arith.constant 0.000000e+00 : f32
    %181 = vector.shape_cast %180 : vector<1x32xi1> to vector<1x32xi1>
    %182 = vector.broadcast %181 : vector<1x32xi1> to vector<16x32xi1>
    %183 = vector.broadcast %cst_76 : f32 to vector<16x32xf32>
    %184 = arith.select %182, %77, %183 : vector<16x32xi1>, vector<16x32xf32>
    %cst_77 = arith.constant dense<0.000000e+00> : vector<16x16xf32>
    %185 = tpu.matmul %72, %184, %cst_77 {dimension_numbers = #tpu.dot_dimension_numbers<[1], [1], [0], [0], [0, 0, 1, 0], [], []>} : vector<16x32xf32>, vector<16x32xf32>, vector<16x16xf32> -> vector<16x16xf32>
    %cst_78 = arith.constant 0.353553385 : f32
    %186 = vector.broadcast %cst_78 : f32 to vector<16x16xf32>
    %187 = arith.mulf %185, %186 : vector<16x16xf32>
    %cst_79 = arith.constant -1.000000e+30 : f32
    %188 = vector.broadcast %cst_79 : f32 to vector<16x16xf32>
    %189 = arith.select %88, %187, %188 : vector<16x16xi1>, vector<16x16xf32>
    %cst_80 = arith.constant dense<0xFF800000> : vector<16xf32>
    %190 = vector.multi_reduction <maximumf>, %189, %cst_80 [1] : vector<16x16xf32> to vector<16xf32>
    %191 = vector.shape_cast %190 : vector<16xf32> to vector<16x1xf32>
    %192 = vector.broadcast %191 : vector<16x1xf32> to vector<16x16xf32>
    %193 = arith.subf %189, %192 : vector<16x16xf32>
    %194 = math.exp %193 : vector<16x16xf32>
    %cst_81 = arith.constant dense<0.000000e+00> : vector<16xf32>
    %195 = vector.multi_reduction <add>, %194, %cst_81 [1] : vector<16x16xf32> to vector<16xf32>
    %196 = vector.shape_cast %195 : vector<16xf32> to vector<16x1xf32>
    %197 = tpu.reciprocal %196 {approx = true} : vector<16x1xf32> -> vector<16x1xf32>
    %198 = vector.broadcast %197 : vector<16x1xf32> to vector<16x16xf32>
    %199 = arith.mulf %194, %198 : vector<16x16xf32>
    %200 = vector.extract_strided_slice %90 {offsets = [96, 0], sizes = [32, 32], strides = [1, 1]} : vector<128x32xf32> to vector<32x32xf32>
    %cst_82 = arith.constant dense<0.000000e+00> : vector<16x32xf32>
    %201 = tpu.matmul %67, %200, %cst_82 {dimension_numbers = #tpu.dot_dimension_numbers<[1], [0], [0], [1], [0, 0, 1, 1], [], []>} : vector<16x32xf32>, vector<32x32xf32>, vector<16x32xf32> -> vector<16x32xf32>
    %cst_83 = arith.constant dense<0.000000e+00> : vector<16x32xf32>
    %202 = tpu.matmul %199, %201, %cst_83 {dimension_numbers = #tpu.dot_dimension_numbers<[1], [0], [0], [1], [0, 0, 1, 1], [], []>} : vector<16x16xf32>, vector<16x32xf32>, vector<16x32xf32> -> vector<16x32xf32>
    %203 = arith.addf %175, %202 : vector<16x32xf32>
    %c64_84 = arith.constant 64 : index
    %c0_85 = arith.constant 0 : index
    %204 = vector.load %arg10[%c64_84, %c0_85] : memref<344x32xf32, #tpu.memory_space<vmem>>, vector<1x32xf32>
    %205 = vector.broadcast %204 : vector<1x32xf32> to vector<16x32xf32>
    %206 = arith.addf %203, %205 : vector<16x32xf32>
    %207 = arith.addf %67, %206 : vector<16x32xf32>
    %cst_86 = arith.constant dense<0.000000e+00> : vector<16xf32>
    %208 = vector.multi_reduction <add>, %207, %cst_86 [1] : vector<16x32xf32> to vector<16xf32>
    %209 = vector.shape_cast %208 : vector<16xf32> to vector<16x1xf32>
    %cst_87 = arith.constant 3.200000e+01 : f32
    %210 = vector.broadcast %cst_87 : f32 to vector<16x1xf32>
    %211 = arith.divf %209, %210 : vector<16x1xf32>
    %212 = vector.broadcast %211 : vector<16x1xf32> to vector<16x32xf32>
    %213 = arith.subf %207, %212 : vector<16x32xf32>
    %214 = arith.mulf %213, %213 : vector<16x32xf32>
    %cst_88 = arith.constant dense<0.000000e+00> : vector<16xf32>
    %215 = vector.multi_reduction <add>, %214, %cst_88 [1] : vector<16x32xf32> to vector<16xf32>
    %216 = vector.shape_cast %215 : vector<16xf32> to vector<16x1xf32>
    %cst_89 = arith.constant 3.200000e+01 : f32
    %217 = vector.broadcast %cst_89 : f32 to vector<16x1xf32>
    %218 = arith.divf %216, %217 : vector<16x1xf32>
    %cst_90 = arith.constant 9.99999974E-6 : f32
    %219 = vector.broadcast %cst_90 : f32 to vector<16x1xf32>
    %220 = arith.addf %218, %219 : vector<16x1xf32>
    %221 = math.rsqrt %220 : vector<16x1xf32>
    %222 = vector.broadcast %221 : vector<16x1xf32> to vector<16x32xf32>
    %223 = arith.mulf %213, %222 : vector<16x32xf32>
    %c88 = arith.constant 88 : index
    %c0_91 = arith.constant 0 : index
    %224 = vector.load %arg10[%c88, %c0_91] : memref<344x32xf32, #tpu.memory_space<vmem>>, vector<1x32xf32>
    %225 = vector.broadcast %224 : vector<1x32xf32> to vector<16x32xf32>
    %226 = arith.mulf %223, %225 : vector<16x32xf32>
    %c96 = arith.constant 96 : index
    %c0_92 = arith.constant 0 : index
    %227 = vector.load %arg10[%c96, %c0_92] : memref<344x32xf32, #tpu.memory_space<vmem>>, vector<1x32xf32>
    %228 = vector.broadcast %227 : vector<1x32xf32> to vector<16x32xf32>
    %229 = arith.addf %226, %228 : vector<16x32xf32>
    %c336 = arith.constant 336 : index
    %c0_93 = arith.constant 0 : index
    %230 = vector.load %arg9[%c336, %c0_93] : memref<1200x32xf32, #tpu.memory_space<vmem>>, vector<32x32xf32>
    %cst_94 = arith.constant dense<0.000000e+00> : vector<16x32xf32>
    %231 = tpu.matmul %229, %230, %cst_94 {dimension_numbers = #tpu.dot_dimension_numbers<[1], [0], [0], [1], [0, 0, 1, 1], [], []>} : vector<16x32xf32>, vector<32x32xf32>, vector<16x32xf32> -> vector<16x32xf32>
    %c72 = arith.constant 72 : index
    %c0_95 = arith.constant 0 : index
    %232 = vector.load %arg10[%c72, %c0_95] : memref<344x32xf32, #tpu.memory_space<vmem>>, vector<1x32xf32>
    %233 = vector.broadcast %232 : vector<1x32xf32> to vector<16x32xf32>
    %234 = arith.addf %231, %233 : vector<16x32xf32>
    %235 = arith.mulf %234, %234 : vector<16x32xf32>
    %236 = arith.mulf %234, %235 : vector<16x32xf32>
    %cst_96 = arith.constant 4.471500e-02 : f32
    %237 = vector.broadcast %cst_96 : f32 to vector<16x32xf32>
    %238 = arith.mulf %237, %236 : vector<16x32xf32>
    %239 = arith.addf %234, %238 : vector<16x32xf32>
    %cst_97 = arith.constant 0.797884583 : f32
    %240 = vector.broadcast %cst_97 : f32 to vector<16x32xf32>
    %241 = arith.mulf %240, %239 : vector<16x32xf32>
    %242 = math.tanh %241 : vector<16x32xf32>
    %cst_98 = arith.constant 1.000000e+00 : f32
    %243 = vector.broadcast %cst_98 : f32 to vector<16x32xf32>
    %244 = arith.addf %243, %242 : vector<16x32xf32>
    %cst_99 = arith.constant 5.000000e-01 : f32
    %245 = vector.broadcast %cst_99 : f32 to vector<16x32xf32>
    %246 = arith.mulf %245, %244 : vector<16x32xf32>
    %247 = arith.mulf %234, %246 : vector<16x32xf32>
    %c368 = arith.constant 368 : index
    %c0_100 = arith.constant 0 : index
    %248 = vector.load %arg9[%c368, %c0_100] : memref<1200x32xf32, #tpu.memory_space<vmem>>, vector<32x32xf32>
    %cst_101 = arith.constant dense<0.000000e+00> : vector<16x32xf32>
    %249 = tpu.matmul %247, %248, %cst_101 {dimension_numbers = #tpu.dot_dimension_numbers<[1], [0], [0], [1], [0, 0, 1, 1], [], []>} : vector<16x32xf32>, vector<32x32xf32>, vector<16x32xf32> -> vector<16x32xf32>
    %c80 = arith.constant 80 : index
    %c0_102 = arith.constant 0 : index
    %250 = vector.load %arg10[%c80, %c0_102] : memref<344x32xf32, #tpu.memory_space<vmem>>, vector<1x32xf32>
    %251 = vector.broadcast %250 : vector<1x32xf32> to vector<16x32xf32>
    %252 = arith.addf %249, %251 : vector<16x32xf32>
    %253 = arith.addf %229, %252 : vector<16x32xf32>
    %cst_103 = arith.constant dense<0.000000e+00> : vector<16xf32>
    %254 = vector.multi_reduction <add>, %253, %cst_103 [1] : vector<16x32xf32> to vector<16xf32>
    %255 = vector.shape_cast %254 : vector<16xf32> to vector<16x1xf32>
    %cst_104 = arith.constant 3.200000e+01 : f32
    %256 = vector.broadcast %cst_104 : f32 to vector<16x1xf32>
    %257 = arith.divf %255, %256 : vector<16x1xf32>
    %258 = vector.broadcast %257 : vector<16x1xf32> to vector<16x32xf32>
    %259 = arith.subf %253, %258 : vector<16x32xf32>
    %260 = arith.mulf %259, %259 : vector<16x32xf32>
    %cst_105 = arith.constant dense<0.000000e+00> : vector<16xf32>
    %261 = vector.multi_reduction <add>, %260, %cst_105 [1] : vector<16x32xf32> to vector<16xf32>
    %262 = vector.shape_cast %261 : vector<16xf32> to vector<16x1xf32>
    %cst_106 = arith.constant 3.200000e+01 : f32
    %263 = vector.broadcast %cst_106 : f32 to vector<16x1xf32>
    %264 = arith.divf %262, %263 : vector<16x1xf32>
    %cst_107 = arith.constant 9.99999974E-6 : f32
    %265 = vector.broadcast %cst_107 : f32 to vector<16x1xf32>
    %266 = arith.addf %264, %265 : vector<16x1xf32>
    %267 = math.rsqrt %266 : vector<16x1xf32>
    %268 = vector.broadcast %267 : vector<16x1xf32> to vector<16x32xf32>
    %269 = arith.mulf %259, %268 : vector<16x32xf32>
    %c104 = arith.constant 104 : index
    %c0_108 = arith.constant 0 : index
    %270 = vector.load %arg10[%c104, %c0_108] : memref<344x32xf32, #tpu.memory_space<vmem>>, vector<1x32xf32>
    %271 = vector.broadcast %270 : vector<1x32xf32> to vector<16x32xf32>
    %272 = arith.mulf %269, %271 : vector<16x32xf32>
    %c112 = arith.constant 112 : index
    %c0_109 = arith.constant 0 : index
    %273 = vector.load %arg10[%c112, %c0_109] : memref<344x32xf32, #tpu.memory_space<vmem>>, vector<1x32xf32>
    %274 = vector.broadcast %273 : vector<1x32xf32> to vector<16x32xf32>
    %275 = arith.addf %272, %274 : vector<16x32xf32>
    %c0_110 = arith.constant 0 : index
    %c0_111 = arith.constant 0 : index
    %276 = vector.load %arg11[%c0_110, %c0_111] : memref<56x16xf32, #tpu.memory_space<vmem>>, vector<16x16xf32>
    %cst_112 = arith.constant dense<0.000000e+00> : vector<16x32xf32>
    %277 = tpu.matmul %276, %275, %cst_112 {dimension_numbers = #tpu.dot_dimension_numbers<[1], [0], [0], [1], [0, 0, 1, 1], [], []>} : vector<16x16xf32>, vector<16x32xf32>, vector<16x32xf32> -> vector<16x32xf32>
    %c16 = arith.constant 16 : index
    %c0_113 = arith.constant 0 : index
    %278 = vector.load %arg11[%c16, %c0_113] : memref<56x16xf32, #tpu.memory_space<vmem>>, vector<16x16xf32>
    %cst_114 = arith.constant dense<0.000000e+00> : vector<16x32xf32>
    %279 = tpu.matmul %278, %275, %cst_114 {dimension_numbers = #tpu.dot_dimension_numbers<[1], [0], [0], [1], [0, 0, 1, 1], [], []>} : vector<16x16xf32>, vector<16x32xf32>, vector<16x32xf32> -> vector<16x32xf32>
    %c656 = arith.constant 656 : index
    %c0_115 = arith.constant 0 : index
    %280 = vector.load %arg9[%c656, %c0_115] : memref<1200x32xf32, #tpu.memory_space<vmem>>, vector<32x32xf32>
    %cst_116 = arith.constant dense<0.000000e+00> : vector<16x32xf32>
    %281 = tpu.matmul %277, %280, %cst_116 {dimension_numbers = #tpu.dot_dimension_numbers<[1], [0], [0], [1], [0, 0, 1, 1], [], []>} : vector<16x32xf32>, vector<32x32xf32>, vector<16x32xf32> -> vector<16x32xf32>
    %c688 = arith.constant 688 : index
    %c0_117 = arith.constant 0 : index
    %282 = vector.load %arg9[%c688, %c0_117] : memref<1200x32xf32, #tpu.memory_space<vmem>>, vector<32x32xf32>
    %cst_118 = arith.constant dense<0.000000e+00> : vector<16x32xf32>
    %283 = tpu.matmul %275, %282, %cst_118 {dimension_numbers = #tpu.dot_dimension_numbers<[1], [0], [0], [1], [0, 0, 1, 1], [], []>} : vector<16x32xf32>, vector<32x32xf32>, vector<16x32xf32> -> vector<16x32xf32>
    %284 = arith.addf %281, %283 : vector<16x32xf32>
    %c720 = arith.constant 720 : index
    %c0_119 = arith.constant 0 : index
    %285 = vector.load %arg9[%c720, %c0_119] : memref<1200x32xf32, #tpu.memory_space<vmem>>, vector<32x32xf32>
    %cst_120 = arith.constant dense<0.000000e+00> : vector<16x32xf32>
    %286 = tpu.matmul %279, %285, %cst_120 {dimension_numbers = #tpu.dot_dimension_numbers<[1], [0], [0], [1], [0, 0, 1, 1], [], []>} : vector<16x32xf32>, vector<32x32xf32>, vector<16x32xf32> -> vector<16x32xf32>
    %287 = arith.addf %284, %286 : vector<16x32xf32>
    %c192 = arith.constant 192 : index
    %c0_121 = arith.constant 0 : index
    %288 = vector.load %arg10[%c192, %c0_121] : memref<344x32xf32, #tpu.memory_space<vmem>>, vector<1x32xf32>
    %289 = vector.broadcast %288 : vector<1x32xf32> to vector<16x32xf32>
    %290 = arith.addf %287, %289 : vector<16x32xf32>
    %cst_122 = arith.constant 0.000000e+00 : f32
    %291 = vector.broadcast %cst_122 : f32 to vector<16x32xf32>
    %292 = arith.cmpf ogt, %290, %291 : vector<16x32xf32>
    %cst_123 = arith.constant 0.000000e+00 : f32
    %293 = vector.broadcast %cst_123 : f32 to vector<16x32xf32>
    %294 = arith.minimumf %290, %293 : vector<16x32xf32>
    %295 = math.exp %294 : vector<16x32xf32>
    %cst_124 = arith.constant 1.000000e+00 : f32
    %296 = vector.broadcast %cst_124 : f32 to vector<16x32xf32>
    %297 = arith.subf %295, %296 : vector<16x32xf32>
    %298 = arith.select %292, %290, %297 : vector<16x32xi1>, vector<16x32xf32>
    %c32_125 = arith.constant 32 : index
    %c0_126 = arith.constant 0 : index
    %299 = vector.load %arg11[%c32_125, %c0_126] : memref<56x16xf32, #tpu.memory_space<vmem>>, vector<8x16xf32>
    %cst_127 = arith.constant dense<0.000000e+00> : vector<8x32xf32>
    %300 = tpu.matmul %299, %298, %cst_127 {dimension_numbers = #tpu.dot_dimension_numbers<[1], [0], [0], [1], [0, 0, 1, 1], [], []>} : vector<8x16xf32>, vector<16x32xf32>, vector<8x32xf32> -> vector<8x32xf32>
    %c40_128 = arith.constant 40 : index
    %c0_129 = arith.constant 0 : index
    %301 = vector.load %arg11[%c40_128, %c0_129] : memref<56x16xf32, #tpu.memory_space<vmem>>, vector<8x16xf32>
    %cst_130 = arith.constant dense<0.000000e+00> : vector<8x32xf32>
    %302 = tpu.matmul %301, %298, %cst_130 {dimension_numbers = #tpu.dot_dimension_numbers<[1], [0], [0], [1], [0, 0, 1, 1], [], []>} : vector<8x16xf32>, vector<16x32xf32>, vector<8x32xf32> -> vector<8x32xf32>
    %c48_131 = arith.constant 48 : index
    %c0_132 = arith.constant 0 : index
    %303 = vector.load %arg11[%c48_131, %c0_132] : memref<56x16xf32, #tpu.memory_space<vmem>>, vector<8x16xf32>
    %cst_133 = arith.constant dense<0.000000e+00> : vector<8x32xf32>
    %304 = tpu.matmul %303, %298, %cst_133 {dimension_numbers = #tpu.dot_dimension_numbers<[1], [0], [0], [1], [0, 0, 1, 1], [], []>} : vector<8x16xf32>, vector<16x32xf32>, vector<8x32xf32> -> vector<8x32xf32>
    %305 = arith.maximumf %300, %302 : vector<8x32xf32>
    %306 = arith.maximumf %305, %304 : vector<8x32xf32>
    %c400 = arith.constant 400 : index
    %c0_134 = arith.constant 0 : index
    %307 = vector.load %arg9[%c400, %c0_134] : memref<1200x32xf32, #tpu.memory_space<vmem>>, vector<32x32xf32>
    %cst_135 = arith.constant dense<0.000000e+00> : vector<8x32xf32>
    %308 = tpu.matmul %306, %307, %cst_135 {dimension_numbers = #tpu.dot_dimension_numbers<[1], [0], [0], [1], [0, 0, 1, 1], [], []>} : vector<8x32xf32>, vector<32x32xf32>, vector<8x32xf32> -> vector<8x32xf32>
    %c120 = arith.constant 120 : index
    %c0_136 = arith.constant 0 : index
    %309 = vector.load %arg10[%c120, %c0_136] : memref<344x32xf32, #tpu.memory_space<vmem>>, vector<1x32xf32>
    %310 = vector.broadcast %309 : vector<1x32xf32> to vector<8x32xf32>
    %311 = arith.addf %308, %310 : vector<8x32xf32>
    %c432 = arith.constant 432 : index
    %c0_137 = arith.constant 0 : index
    %312 = vector.load %arg9[%c432, %c0_137] : memref<1200x32xf32, #tpu.memory_space<vmem>>, vector<32x32xf32>
    %cst_138 = arith.constant dense<0.000000e+00> : vector<8x32xf32>
    %313 = tpu.matmul %306, %312, %cst_138 {dimension_numbers = #tpu.dot_dimension_numbers<[1], [0], [0], [1], [0, 0, 1, 1], [], []>} : vector<8x32xf32>, vector<32x32xf32>, vector<8x32xf32> -> vector<8x32xf32>
    %c128 = arith.constant 128 : index
    %c0_139 = arith.constant 0 : index
    %314 = vector.load %arg10[%c128, %c0_139] : memref<344x32xf32, #tpu.memory_space<vmem>>, vector<1x32xf32>
    %315 = vector.broadcast %314 : vector<1x32xf32> to vector<8x32xf32>
    %316 = arith.addf %313, %315 : vector<8x32xf32>
    %317 = tpu.iota {dimensions = array<i32: 0>} : vector<8x8xi32>
    %318 = tpu.iota {dimensions = array<i32: 1>} : vector<8x8xi32>
    %319 = arith.sitofp %317 : vector<8x8xi32> to vector<8x8xf32>
    %cst_140 = arith.constant 2.500000e-01 : f32
    %320 = vector.broadcast %cst_140 : f32 to vector<8x8xf32>
    %321 = arith.mulf %319, %320 : vector<8x8xf32>
    %322 = math.floor %321 : vector<8x8xf32>
    %323 = arith.sitofp %318 : vector<8x8xi32> to vector<8x8xf32>
    %cst_141 = arith.constant 2.500000e-01 : f32
    %324 = vector.broadcast %cst_141 : f32 to vector<8x8xf32>
    %325 = arith.mulf %323, %324 : vector<8x8xf32>
    %326 = math.floor %325 : vector<8x8xf32>
    %327 = arith.cmpf oeq, %322, %326 : vector<8x8xf32>
    %328 = tpu.iota {dimensions = array<i32: 1>} : vector<1x32xi32>
    %c464 = arith.constant 464 : index
    %c0_142 = arith.constant 0 : index
    %329 = vector.load %arg9[%c464, %c0_142] : memref<1200x32xf32, #tpu.memory_space<vmem>>, vector<128x32xf32>
    %cst_143 = arith.constant 0.000000e+00 : f32
    %330 = vector.broadcast %cst_143 : f32 to vector<8x32xf32>
    %c0_i32_144 = arith.constant 0 : i32
    %331 = vector.broadcast %c0_i32_144 : i32 to vector<1x32xi32>
    %332 = arith.cmpi sge, %328, %331 : vector<1x32xi32>
    %c8_i32_145 = arith.constant 8 : i32
    %333 = vector.broadcast %c8_i32_145 : i32 to vector<1x32xi32>
    %334 = arith.cmpi slt, %328, %333 : vector<1x32xi32>
    %335 = arith.andi %332, %334 : vector<1x32xi1>
    %cst_146 = arith.constant 0.000000e+00 : f32
    %336 = vector.shape_cast %335 : vector<1x32xi1> to vector<1x32xi1>
    %337 = vector.broadcast %336 : vector<1x32xi1> to vector<8x32xi1>
    %338 = vector.broadcast %cst_146 : f32 to vector<8x32xf32>
    %339 = arith.select %337, %316, %338 : vector<8x32xi1>, vector<8x32xf32>
    %cst_147 = arith.constant dense<0.000000e+00> : vector<8x8xf32>
    %340 = tpu.matmul %311, %339, %cst_147 {dimension_numbers = #tpu.dot_dimension_numbers<[1], [1], [0], [0], [0, 0, 1, 0], [], []>} : vector<8x32xf32>, vector<8x32xf32>, vector<8x8xf32> -> vector<8x8xf32>
    %cst_148 = arith.constant 0.353553385 : f32
    %341 = vector.broadcast %cst_148 : f32 to vector<8x8xf32>
    %342 = arith.mulf %340, %341 : vector<8x8xf32>
    %cst_149 = arith.constant -1.000000e+30 : f32
    %343 = vector.broadcast %cst_149 : f32 to vector<8x8xf32>
    %344 = arith.select %327, %342, %343 : vector<8x8xi1>, vector<8x8xf32>
    %cst_150 = arith.constant dense<0xFF800000> : vector<8xf32>
    %345 = vector.multi_reduction <maximumf>, %344, %cst_150 [1] : vector<8x8xf32> to vector<8xf32>
    %346 = vector.shape_cast %345 : vector<8xf32> to vector<8x1xf32>
    %347 = vector.broadcast %346 : vector<8x1xf32> to vector<8x8xf32>
    %348 = arith.subf %344, %347 : vector<8x8xf32>
    %349 = math.exp %348 : vector<8x8xf32>
    %cst_151 = arith.constant dense<0.000000e+00> : vector<8xf32>
    %350 = vector.multi_reduction <add>, %349, %cst_151 [1] : vector<8x8xf32> to vector<8xf32>
    %351 = vector.shape_cast %350 : vector<8xf32> to vector<8x1xf32>
    %352 = tpu.reciprocal %351 {approx = true} : vector<8x1xf32> -> vector<8x1xf32>
    %353 = vector.broadcast %352 : vector<8x1xf32> to vector<8x8xf32>
    %354 = arith.mulf %349, %353 : vector<8x8xf32>
    %355 = vector.extract_strided_slice %329 {offsets = [0, 0], sizes = [32, 32], strides = [1, 1]} : vector<128x32xf32> to vector<32x32xf32>
    %cst_152 = arith.constant dense<0.000000e+00> : vector<8x32xf32>
    %356 = tpu.matmul %306, %355, %cst_152 {dimension_numbers = #tpu.dot_dimension_numbers<[1], [0], [0], [1], [0, 0, 1, 1], [], []>} : vector<8x32xf32>, vector<32x32xf32>, vector<8x32xf32> -> vector<8x32xf32>
    %cst_153 = arith.constant dense<0.000000e+00> : vector<8x32xf32>
    %357 = tpu.matmul %354, %356, %cst_153 {dimension_numbers = #tpu.dot_dimension_numbers<[1], [0], [0], [1], [0, 0, 1, 1], [], []>} : vector<8x8xf32>, vector<8x32xf32>, vector<8x32xf32> -> vector<8x32xf32>
    %358 = arith.addf %330, %357 : vector<8x32xf32>
    %c8_i32_154 = arith.constant 8 : i32
    %359 = vector.broadcast %c8_i32_154 : i32 to vector<1x32xi32>
    %360 = arith.cmpi sge, %328, %359 : vector<1x32xi32>
    %c16_i32_155 = arith.constant 16 : i32
    %361 = vector.broadcast %c16_i32_155 : i32 to vector<1x32xi32>
    %362 = arith.cmpi slt, %328, %361 : vector<1x32xi32>
    %363 = arith.andi %360, %362 : vector<1x32xi1>
    %cst_156 = arith.constant 0.000000e+00 : f32
    %364 = vector.shape_cast %363 : vector<1x32xi1> to vector<1x32xi1>
    %365 = vector.broadcast %364 : vector<1x32xi1> to vector<8x32xi1>
    %366 = vector.broadcast %cst_156 : f32 to vector<8x32xf32>
    %367 = arith.select %365, %316, %366 : vector<8x32xi1>, vector<8x32xf32>
    %cst_157 = arith.constant dense<0.000000e+00> : vector<8x8xf32>
    %368 = tpu.matmul %311, %367, %cst_157 {dimension_numbers = #tpu.dot_dimension_numbers<[1], [1], [0], [0], [0, 0, 1, 0], [], []>} : vector<8x32xf32>, vector<8x32xf32>, vector<8x8xf32> -> vector<8x8xf32>
    %cst_158 = arith.constant 0.353553385 : f32
    %369 = vector.broadcast %cst_158 : f32 to vector<8x8xf32>
    %370 = arith.mulf %368, %369 : vector<8x8xf32>
    %cst_159 = arith.constant -1.000000e+30 : f32
    %371 = vector.broadcast %cst_159 : f32 to vector<8x8xf32>
    %372 = arith.select %327, %370, %371 : vector<8x8xi1>, vector<8x8xf32>
    %cst_160 = arith.constant dense<0xFF800000> : vector<8xf32>
    %373 = vector.multi_reduction <maximumf>, %372, %cst_160 [1] : vector<8x8xf32> to vector<8xf32>
    %374 = vector.shape_cast %373 : vector<8xf32> to vector<8x1xf32>
    %375 = vector.broadcast %374 : vector<8x1xf32> to vector<8x8xf32>
    %376 = arith.subf %372, %375 : vector<8x8xf32>
    %377 = math.exp %376 : vector<8x8xf32>
    %cst_161 = arith.constant dense<0.000000e+00> : vector<8xf32>
    %378 = vector.multi_reduction <add>, %377, %cst_161 [1] : vector<8x8xf32> to vector<8xf32>
    %379 = vector.shape_cast %378 : vector<8xf32> to vector<8x1xf32>
    %380 = tpu.reciprocal %379 {approx = true} : vector<8x1xf32> -> vector<8x1xf32>
    %381 = vector.broadcast %380 : vector<8x1xf32> to vector<8x8xf32>
    %382 = arith.mulf %377, %381 : vector<8x8xf32>
    %383 = vector.extract_strided_slice %329 {offsets = [32, 0], sizes = [32, 32], strides = [1, 1]} : vector<128x32xf32> to vector<32x32xf32>
    %cst_162 = arith.constant dense<0.000000e+00> : vector<8x32xf32>
    %384 = tpu.matmul %306, %383, %cst_162 {dimension_numbers = #tpu.dot_dimension_numbers<[1], [0], [0], [1], [0, 0, 1, 1], [], []>} : vector<8x32xf32>, vector<32x32xf32>, vector<8x32xf32> -> vector<8x32xf32>
    %cst_163 = arith.constant dense<0.000000e+00> : vector<8x32xf32>
    %385 = tpu.matmul %382, %384, %cst_163 {dimension_numbers = #tpu.dot_dimension_numbers<[1], [0], [0], [1], [0, 0, 1, 1], [], []>} : vector<8x8xf32>, vector<8x32xf32>, vector<8x32xf32> -> vector<8x32xf32>
    %386 = arith.addf %358, %385 : vector<8x32xf32>
    %c16_i32_164 = arith.constant 16 : i32
    %387 = vector.broadcast %c16_i32_164 : i32 to vector<1x32xi32>
    %388 = arith.cmpi sge, %328, %387 : vector<1x32xi32>
    %c24_i32_165 = arith.constant 24 : i32
    %389 = vector.broadcast %c24_i32_165 : i32 to vector<1x32xi32>
    %390 = arith.cmpi slt, %328, %389 : vector<1x32xi32>
    %391 = arith.andi %388, %390 : vector<1x32xi1>
    %cst_166 = arith.constant 0.000000e+00 : f32
    %392 = vector.shape_cast %391 : vector<1x32xi1> to vector<1x32xi1>
    %393 = vector.broadcast %392 : vector<1x32xi1> to vector<8x32xi1>
    %394 = vector.broadcast %cst_166 : f32 to vector<8x32xf32>
    %395 = arith.select %393, %316, %394 : vector<8x32xi1>, vector<8x32xf32>
    %cst_167 = arith.constant dense<0.000000e+00> : vector<8x8xf32>
    %396 = tpu.matmul %311, %395, %cst_167 {dimension_numbers = #tpu.dot_dimension_numbers<[1], [1], [0], [0], [0, 0, 1, 0], [], []>} : vector<8x32xf32>, vector<8x32xf32>, vector<8x8xf32> -> vector<8x8xf32>
    %cst_168 = arith.constant 0.353553385 : f32
    %397 = vector.broadcast %cst_168 : f32 to vector<8x8xf32>
    %398 = arith.mulf %396, %397 : vector<8x8xf32>
    %cst_169 = arith.constant -1.000000e+30 : f32
    %399 = vector.broadcast %cst_169 : f32 to vector<8x8xf32>
    %400 = arith.select %327, %398, %399 : vector<8x8xi1>, vector<8x8xf32>
    %cst_170 = arith.constant dense<0xFF800000> : vector<8xf32>
    %401 = vector.multi_reduction <maximumf>, %400, %cst_170 [1] : vector<8x8xf32> to vector<8xf32>
    %402 = vector.shape_cast %401 : vector<8xf32> to vector<8x1xf32>
    %403 = vector.broadcast %402 : vector<8x1xf32> to vector<8x8xf32>
    %404 = arith.subf %400, %403 : vector<8x8xf32>
    %405 = math.exp %404 : vector<8x8xf32>
    %cst_171 = arith.constant dense<0.000000e+00> : vector<8xf32>
    %406 = vector.multi_reduction <add>, %405, %cst_171 [1] : vector<8x8xf32> to vector<8xf32>
    %407 = vector.shape_cast %406 : vector<8xf32> to vector<8x1xf32>
    %408 = tpu.reciprocal %407 {approx = true} : vector<8x1xf32> -> vector<8x1xf32>
    %409 = vector.broadcast %408 : vector<8x1xf32> to vector<8x8xf32>
    %410 = arith.mulf %405, %409 : vector<8x8xf32>
    %411 = vector.extract_strided_slice %329 {offsets = [64, 0], sizes = [32, 32], strides = [1, 1]} : vector<128x32xf32> to vector<32x32xf32>
    %cst_172 = arith.constant dense<0.000000e+00> : vector<8x32xf32>
    %412 = tpu.matmul %306, %411, %cst_172 {dimension_numbers = #tpu.dot_dimension_numbers<[1], [0], [0], [1], [0, 0, 1, 1], [], []>} : vector<8x32xf32>, vector<32x32xf32>, vector<8x32xf32> -> vector<8x32xf32>
    %cst_173 = arith.constant dense<0.000000e+00> : vector<8x32xf32>
    %413 = tpu.matmul %410, %412, %cst_173 {dimension_numbers = #tpu.dot_dimension_numbers<[1], [0], [0], [1], [0, 0, 1, 1], [], []>} : vector<8x8xf32>, vector<8x32xf32>, vector<8x32xf32> -> vector<8x32xf32>
    %414 = arith.addf %386, %413 : vector<8x32xf32>
    %c24_i32_174 = arith.constant 24 : i32
    %415 = vector.broadcast %c24_i32_174 : i32 to vector<1x32xi32>
    %416 = arith.cmpi sge, %328, %415 : vector<1x32xi32>
    %c32_i32_175 = arith.constant 32 : i32
    %417 = vector.broadcast %c32_i32_175 : i32 to vector<1x32xi32>
    %418 = arith.cmpi slt, %328, %417 : vector<1x32xi32>
    %419 = arith.andi %416, %418 : vector<1x32xi1>
    %cst_176 = arith.constant 0.000000e+00 : f32
    %420 = vector.shape_cast %419 : vector<1x32xi1> to vector<1x32xi1>
    %421 = vector.broadcast %420 : vector<1x32xi1> to vector<8x32xi1>
    %422 = vector.broadcast %cst_176 : f32 to vector<8x32xf32>
    %423 = arith.select %421, %316, %422 : vector<8x32xi1>, vector<8x32xf32>
    %cst_177 = arith.constant dense<0.000000e+00> : vector<8x8xf32>
    %424 = tpu.matmul %311, %423, %cst_177 {dimension_numbers = #tpu.dot_dimension_numbers<[1], [1], [0], [0], [0, 0, 1, 0], [], []>} : vector<8x32xf32>, vector<8x32xf32>, vector<8x8xf32> -> vector<8x8xf32>
    %cst_178 = arith.constant 0.353553385 : f32
    %425 = vector.broadcast %cst_178 : f32 to vector<8x8xf32>
    %426 = arith.mulf %424, %425 : vector<8x8xf32>
    %cst_179 = arith.constant -1.000000e+30 : f32
    %427 = vector.broadcast %cst_179 : f32 to vector<8x8xf32>
    %428 = arith.select %327, %426, %427 : vector<8x8xi1>, vector<8x8xf32>
    %cst_180 = arith.constant dense<0xFF800000> : vector<8xf32>
    %429 = vector.multi_reduction <maximumf>, %428, %cst_180 [1] : vector<8x8xf32> to vector<8xf32>
    %430 = vector.shape_cast %429 : vector<8xf32> to vector<8x1xf32>
    %431 = vector.broadcast %430 : vector<8x1xf32> to vector<8x8xf32>
    %432 = arith.subf %428, %431 : vector<8x8xf32>
    %433 = math.exp %432 : vector<8x8xf32>
    %cst_181 = arith.constant dense<0.000000e+00> : vector<8xf32>
    %434 = vector.multi_reduction <add>, %433, %cst_181 [1] : vector<8x8xf32> to vector<8xf32>
    %435 = vector.shape_cast %434 : vector<8xf32> to vector<8x1xf32>
    %436 = tpu.reciprocal %435 {approx = true} : vector<8x1xf32> -> vector<8x1xf32>
    %437 = vector.broadcast %436 : vector<8x1xf32> to vector<8x8xf32>
    %438 = arith.mulf %433, %437 : vector<8x8xf32>
    %439 = vector.extract_strided_slice %329 {offsets = [96, 0], sizes = [32, 32], strides = [1, 1]} : vector<128x32xf32> to vector<32x32xf32>
    %cst_182 = arith.constant dense<0.000000e+00> : vector<8x32xf32>
    %440 = tpu.matmul %306, %439, %cst_182 {dimension_numbers = #tpu.dot_dimension_numbers<[1], [0], [0], [1], [0, 0, 1, 1], [], []>} : vector<8x32xf32>, vector<32x32xf32>, vector<8x32xf32> -> vector<8x32xf32>
    %cst_183 = arith.constant dense<0.000000e+00> : vector<8x32xf32>
    %441 = tpu.matmul %438, %440, %cst_183 {dimension_numbers = #tpu.dot_dimension_numbers<[1], [0], [0], [1], [0, 0, 1, 1], [], []>} : vector<8x8xf32>, vector<8x32xf32>, vector<8x32xf32> -> vector<8x32xf32>
    %442 = arith.addf %414, %441 : vector<8x32xf32>
    %c136 = arith.constant 136 : index
    %c0_184 = arith.constant 0 : index
    %443 = vector.load %arg10[%c136, %c0_184] : memref<344x32xf32, #tpu.memory_space<vmem>>, vector<1x32xf32>
    %444 = vector.broadcast %443 : vector<1x32xf32> to vector<8x32xf32>
    %445 = arith.addf %442, %444 : vector<8x32xf32>
    %446 = arith.addf %306, %445 : vector<8x32xf32>
    %cst_185 = arith.constant dense<0.000000e+00> : vector<8xf32>
    %447 = vector.multi_reduction <add>, %446, %cst_185 [1] : vector<8x32xf32> to vector<8xf32>
    %448 = vector.shape_cast %447 : vector<8xf32> to vector<8x1xf32>
    %cst_186 = arith.constant 3.200000e+01 : f32
    %449 = vector.broadcast %cst_186 : f32 to vector<8x1xf32>
    %450 = arith.divf %448, %449 : vector<8x1xf32>
    %451 = vector.broadcast %450 : vector<8x1xf32> to vector<8x32xf32>
    %452 = arith.subf %446, %451 : vector<8x32xf32>
    %453 = arith.mulf %452, %452 : vector<8x32xf32>
    %cst_187 = arith.constant dense<0.000000e+00> : vector<8xf32>
    %454 = vector.multi_reduction <add>, %453, %cst_187 [1] : vector<8x32xf32> to vector<8xf32>
    %455 = vector.shape_cast %454 : vector<8xf32> to vector<8x1xf32>
    %cst_188 = arith.constant 3.200000e+01 : f32
    %456 = vector.broadcast %cst_188 : f32 to vector<8x1xf32>
    %457 = arith.divf %455, %456 : vector<8x1xf32>
    %cst_189 = arith.constant 9.99999974E-6 : f32
    %458 = vector.broadcast %cst_189 : f32 to vector<8x1xf32>
    %459 = arith.addf %457, %458 : vector<8x1xf32>
    %460 = math.rsqrt %459 : vector<8x1xf32>
    %461 = vector.broadcast %460 : vector<8x1xf32> to vector<8x32xf32>
    %462 = arith.mulf %452, %461 : vector<8x32xf32>
    %c160 = arith.constant 160 : index
    %c0_190 = arith.constant 0 : index
    %463 = vector.load %arg10[%c160, %c0_190] : memref<344x32xf32, #tpu.memory_space<vmem>>, vector<1x32xf32>
    %464 = vector.broadcast %463 : vector<1x32xf32> to vector<8x32xf32>
    %465 = arith.mulf %462, %464 : vector<8x32xf32>
    %c168 = arith.constant 168 : index
    %c0_191 = arith.constant 0 : index
    %466 = vector.load %arg10[%c168, %c0_191] : memref<344x32xf32, #tpu.memory_space<vmem>>, vector<1x32xf32>
    %467 = vector.broadcast %466 : vector<1x32xf32> to vector<8x32xf32>
    %468 = arith.addf %465, %467 : vector<8x32xf32>
    %c592 = arith.constant 592 : index
    %c0_192 = arith.constant 0 : index
    %469 = vector.load %arg9[%c592, %c0_192] : memref<1200x32xf32, #tpu.memory_space<vmem>>, vector<32x32xf32>
    %cst_193 = arith.constant dense<0.000000e+00> : vector<8x32xf32>
    %470 = tpu.matmul %468, %469, %cst_193 {dimension_numbers = #tpu.dot_dimension_numbers<[1], [0], [0], [1], [0, 0, 1, 1], [], []>} : vector<8x32xf32>, vector<32x32xf32>, vector<8x32xf32> -> vector<8x32xf32>
    %c144_194 = arith.constant 144 : index
    %c0_195 = arith.constant 0 : index
    %471 = vector.load %arg10[%c144_194, %c0_195] : memref<344x32xf32, #tpu.memory_space<vmem>>, vector<1x32xf32>
    %472 = vector.broadcast %471 : vector<1x32xf32> to vector<8x32xf32>
    %473 = arith.addf %470, %472 : vector<8x32xf32>
    %474 = arith.mulf %473, %473 : vector<8x32xf32>
    %475 = arith.mulf %473, %474 : vector<8x32xf32>
    %cst_196 = arith.constant 4.471500e-02 : f32
    %476 = vector.broadcast %cst_196 : f32 to vector<8x32xf32>
    %477 = arith.mulf %476, %475 : vector<8x32xf32>
    %478 = arith.addf %473, %477 : vector<8x32xf32>
    %cst_197 = arith.constant 0.797884583 : f32
    %479 = vector.broadcast %cst_197 : f32 to vector<8x32xf32>
    %480 = arith.mulf %479, %478 : vector<8x32xf32>
    %481 = math.tanh %480 : vector<8x32xf32>
    %cst_198 = arith.constant 1.000000e+00 : f32
    %482 = vector.broadcast %cst_198 : f32 to vector<8x32xf32>
    %483 = arith.addf %482, %481 : vector<8x32xf32>
    %cst_199 = arith.constant 5.000000e-01 : f32
    %484 = vector.broadcast %cst_199 : f32 to vector<8x32xf32>
    %485 = arith.mulf %484, %483 : vector<8x32xf32>
    %486 = arith.mulf %473, %485 : vector<8x32xf32>
    %c624 = arith.constant 624 : index
    %c0_200 = arith.constant 0 : index
    %487 = vector.load %arg9[%c624, %c0_200] : memref<1200x32xf32, #tpu.memory_space<vmem>>, vector<32x32xf32>
    %cst_201 = arith.constant dense<0.000000e+00> : vector<8x32xf32>
    %488 = tpu.matmul %486, %487, %cst_201 {dimension_numbers = #tpu.dot_dimension_numbers<[1], [0], [0], [1], [0, 0, 1, 1], [], []>} : vector<8x32xf32>, vector<32x32xf32>, vector<8x32xf32> -> vector<8x32xf32>
    %c152 = arith.constant 152 : index
    %c0_202 = arith.constant 0 : index
    %489 = vector.load %arg10[%c152, %c0_202] : memref<344x32xf32, #tpu.memory_space<vmem>>, vector<1x32xf32>
    %490 = vector.broadcast %489 : vector<1x32xf32> to vector<8x32xf32>
    %491 = arith.addf %488, %490 : vector<8x32xf32>
    %492 = arith.addf %468, %491 : vector<8x32xf32>
    %cst_203 = arith.constant dense<0.000000e+00> : vector<8xf32>
    %493 = vector.multi_reduction <add>, %492, %cst_203 [1] : vector<8x32xf32> to vector<8xf32>
    %494 = vector.shape_cast %493 : vector<8xf32> to vector<8x1xf32>
    %cst_204 = arith.constant 3.200000e+01 : f32
    %495 = vector.broadcast %cst_204 : f32 to vector<8x1xf32>
    %496 = arith.divf %494, %495 : vector<8x1xf32>
    %497 = vector.broadcast %496 : vector<8x1xf32> to vector<8x32xf32>
    %498 = arith.subf %492, %497 : vector<8x32xf32>
    %499 = arith.mulf %498, %498 : vector<8x32xf32>
    %cst_205 = arith.constant dense<0.000000e+00> : vector<8xf32>
    %500 = vector.multi_reduction <add>, %499, %cst_205 [1] : vector<8x32xf32> to vector<8xf32>
    %501 = vector.shape_cast %500 : vector<8xf32> to vector<8x1xf32>
    %cst_206 = arith.constant 3.200000e+01 : f32
    %502 = vector.broadcast %cst_206 : f32 to vector<8x1xf32>
    %503 = arith.divf %501, %502 : vector<8x1xf32>
    %cst_207 = arith.constant 9.99999974E-6 : f32
    %504 = vector.broadcast %cst_207 : f32 to vector<8x1xf32>
    %505 = arith.addf %503, %504 : vector<8x1xf32>
    %506 = math.rsqrt %505 : vector<8x1xf32>
    %507 = vector.broadcast %506 : vector<8x1xf32> to vector<8x32xf32>
    %508 = arith.mulf %498, %507 : vector<8x32xf32>
    %c176_208 = arith.constant 176 : index
    %c0_209 = arith.constant 0 : index
    %509 = vector.load %arg10[%c176_208, %c0_209] : memref<344x32xf32, #tpu.memory_space<vmem>>, vector<1x32xf32>
    %510 = vector.broadcast %509 : vector<1x32xf32> to vector<8x32xf32>
    %511 = arith.mulf %508, %510 : vector<8x32xf32>
    %c184 = arith.constant 184 : index
    %c0_210 = arith.constant 0 : index
    %512 = vector.load %arg10[%c184, %c0_210] : memref<344x32xf32, #tpu.memory_space<vmem>>, vector<1x32xf32>
    %513 = vector.broadcast %512 : vector<1x32xf32> to vector<8x32xf32>
    %514 = arith.addf %511, %513 : vector<8x32xf32>
    %cst_211 = arith.constant dense<0.000000e+00> : vector<8xf32>
    %515 = vector.multi_reduction <add>, %514, %cst_211 [1] : vector<8x32xf32> to vector<8xf32>
    %516 = vector.shape_cast %515 : vector<8xf32> to vector<8x1xf32>
    %cst_212 = arith.constant 3.200000e+01 : f32
    %517 = vector.broadcast %cst_212 : f32 to vector<8x1xf32>
    %518 = arith.divf %516, %517 : vector<8x1xf32>
    %519 = vector.broadcast %518 : vector<8x1xf32> to vector<8x32xf32>
    %520 = arith.subf %514, %519 : vector<8x32xf32>
    %521 = arith.mulf %520, %520 : vector<8x32xf32>
    %cst_213 = arith.constant dense<0.000000e+00> : vector<8xf32>
    %522 = vector.multi_reduction <add>, %521, %cst_213 [1] : vector<8x32xf32> to vector<8xf32>
    %523 = vector.shape_cast %522 : vector<8xf32> to vector<8x1xf32>
    %cst_214 = arith.constant 3.200000e+01 : f32
    %524 = vector.broadcast %cst_214 : f32 to vector<8x1xf32>
    %525 = arith.divf %523, %524 : vector<8x1xf32>
    %cst_215 = arith.constant 9.99999974E-6 : f32
    %526 = vector.broadcast %cst_215 : f32 to vector<8x1xf32>
    %527 = arith.addf %525, %526 : vector<8x1xf32>
    %528 = math.rsqrt %527 : vector<8x1xf32>
    %529 = vector.broadcast %528 : vector<8x1xf32> to vector<8x32xf32>
    %530 = arith.mulf %520, %529 : vector<8x32xf32>
    %c312 = arith.constant 312 : index
    %c0_216 = arith.constant 0 : index
    %531 = vector.load %arg10[%c312, %c0_216] : memref<344x32xf32, #tpu.memory_space<vmem>>, vector<1x32xf32>
    %532 = vector.broadcast %531 : vector<1x32xf32> to vector<8x32xf32>
    %533 = arith.mulf %530, %532 : vector<8x32xf32>
    %c320 = arith.constant 320 : index
    %c0_217 = arith.constant 0 : index
    %534 = vector.load %arg10[%c320, %c0_217] : memref<344x32xf32, #tpu.memory_space<vmem>>, vector<1x32xf32>
    %535 = vector.broadcast %534 : vector<1x32xf32> to vector<8x32xf32>
    %536 = arith.addf %533, %535 : vector<8x32xf32>
    %c0_218 = arith.constant 0 : index
    %c0_219 = arith.constant 0 : index
    %537 = vector.load %arg2[%c0_218, %c0_219] : memref<16x30xf32, #tpu.memory_space<vmem>>, vector<16x30xf32>
    %c0_220 = arith.constant 0 : index
    %c0_221 = arith.constant 0 : index
    %538 = vector.load %arg3[%c0_220, %c0_221] : memref<16x4xf32, #tpu.memory_space<vmem>>, vector<16x4xf32>
    %c0_222 = arith.constant 0 : index
    %c0_223 = arith.constant 0 : index
    %539 = vector.load %arg4[%c0_222, %c0_223] : memref<48x40xf32, #tpu.memory_space<vmem>>, vector<30x40xf32>
    %c32_224 = arith.constant 32 : index
    %c0_225 = arith.constant 0 : index
    %540 = vector.load %arg4[%c32_224, %c0_225] : memref<48x40xf32, #tpu.memory_space<vmem>>, vector<1x40xf32>
    %c40_226 = arith.constant 40 : index
    %c0_227 = arith.constant 0 : index
    %541 = vector.load %arg4[%c40_226, %c0_227] : memref<48x40xf32, #tpu.memory_space<vmem>>, vector<1x40xf32>
    %cst_228 = arith.constant dense<0.000000e+00> : vector<16x40xf32>
    %542 = tpu.matmul %537, %539, %cst_228 {dimension_numbers = #tpu.dot_dimension_numbers<[1], [0], [0], [1], [0, 0, 1, 1], [], []>} : vector<16x30xf32>, vector<30x40xf32>, vector<16x40xf32> -> vector<16x40xf32>
    %543 = vector.broadcast %540 : vector<1x40xf32> to vector<16x40xf32>
    %544 = arith.addf %542, %543 : vector<16x40xf32>
    %545 = vector.extract_strided_slice %544 {offsets = [0, 0], sizes = [16, 20], strides = [1, 1]} : vector<16x40xf32> to vector<16x20xf32>
    %546 = vector.extract_strided_slice %544 {offsets = [0, 20], sizes = [16, 20], strides = [1, 1]} : vector<16x40xf32> to vector<16x20xf32>
    %547 = vector.extract_strided_slice %541 {offsets = [0, 0], sizes = [1, 20], strides = [1, 1]} : vector<1x40xf32> to vector<1x20xf32>
    %548 = vector.broadcast %547 : vector<1x20xf32> to vector<16x20xf32>
    %549 = arith.subf %548, %546 : vector<16x20xf32>
    %550 = math.absf %549 : vector<16x20xf32>
    %551 = math.cos %550 : vector<16x20xf32>
    %552 = arith.mulf %545, %551 : vector<16x20xf32>
    %553 = vector.extract_strided_slice %541 {offsets = [0, 20], sizes = [1, 20], strides = [1, 1]} : vector<1x40xf32> to vector<1x20xf32>
    %554 = vector.broadcast %553 : vector<1x20xf32> to vector<16x20xf32>
    %555 = arith.mulf %552, %554 : vector<16x20xf32>
    %cst_229 = arith.constant 0.000000e+00 : f32
    %556 = vector.broadcast %cst_229 : f32 to vector<16x20xf32>
    %557 = arith.maximumf %555, %556 : vector<16x20xf32>
    %c0_230 = arith.constant 0 : index
    %c0_231 = arith.constant 0 : index
    %558 = vector.load %arg5[%c0_230, %c0_231] : memref<64x320xf32, #tpu.memory_space<vmem>>, vector<30x320xf32>
    %c32_232 = arith.constant 32 : index
    %c0_233 = arith.constant 0 : index
    %559 = vector.load %arg5[%c32_232, %c0_233] : memref<64x320xf32, #tpu.memory_space<vmem>>, vector<1x320xf32>
    %c40_234 = arith.constant 40 : index
    %c0_235 = arith.constant 0 : index
    %560 = vector.load %arg5[%c40_234, %c0_235] : memref<64x320xf32, #tpu.memory_space<vmem>>, vector<20x320xf32>
    %cst_236 = arith.constant dense<0.000000e+00> : vector<16x320xf32>
    %561 = tpu.matmul %537, %558, %cst_236 {dimension_numbers = #tpu.dot_dimension_numbers<[1], [0], [0], [1], [0, 0, 1, 1], [], []>} : vector<16x30xf32>, vector<30x320xf32>, vector<16x320xf32> -> vector<16x320xf32>
    %cst_237 = arith.constant dense<0.000000e+00> : vector<16x320xf32>
    %562 = tpu.matmul %557, %560, %cst_237 {dimension_numbers = #tpu.dot_dimension_numbers<[1], [0], [0], [1], [0, 0, 1, 1], [], []>} : vector<16x20xf32>, vector<20x320xf32>, vector<16x320xf32> -> vector<16x320xf32>
    %563 = arith.addf %561, %562 : vector<16x320xf32>
    %564 = vector.broadcast %559 : vector<1x320xf32> to vector<16x320xf32>
    %565 = arith.addf %563, %564 : vector<16x320xf32>
    %566 = arith.negf %565 : vector<16x320xf32>
    %567 = math.exp %566 : vector<16x320xf32>
    %cst_238 = arith.constant 1.000000e+00 : f32
    %568 = vector.broadcast %cst_238 : f32 to vector<16x320xf32>
    %569 = arith.addf %568, %567 : vector<16x320xf32>
    %570 = arith.divf %568, %569 : vector<16x320xf32>
    %571 = arith.truncf %570 : vector<16x320xf32> to vector<16x320xbf16>
    %c0_239 = arith.constant 0 : index
    %c0_240 = arith.constant 0 : index
    %572 = vector.load %arg6[%c0_239, %c0_240] : memref<320x600xbf16, #tpu.memory_space<vmem>>, vector<320x600xbf16>
    %cst_241 = arith.constant dense<0.000000e+00> : vector<16x600xf32>
    %573 = tpu.matmul %571, %572, %cst_241 {dimension_numbers = #tpu.dot_dimension_numbers<[1], [0], [0], [1], [0, 0, 1, 1], [], []>} : vector<16x320xbf16>, vector<320x600xbf16>, vector<16x600xf32> -> vector<16x600xf32>
    %c0_242 = arith.constant 0 : index
    %c0_243 = arith.constant 0 : index
    %574 = vector.load %arg7[%c0_242, %c0_243] : memref<1x600xf32, #tpu.memory_space<vmem>>, vector<1x600xf32>
    %575 = vector.broadcast %574 : vector<1x600xf32> to vector<16x600xf32>
    %576 = arith.addf %573, %575 : vector<16x600xf32>
    %577 = arith.negf %576 : vector<16x600xf32>
    %578 = math.exp %577 : vector<16x600xf32>
    %cst_244 = arith.constant 1.000000e+00 : f32
    %579 = vector.broadcast %cst_244 : f32 to vector<16x600xf32>
    %580 = arith.addf %579, %578 : vector<16x600xf32>
    %581 = arith.divf %579, %580 : vector<16x600xf32>
    %c0_245 = arith.constant 0 : index
    %c0_246 = arith.constant 0 : index
    %582 = vector.load %arg8[%c0_245, %c0_246] : memref<608x30xf32, #tpu.memory_space<vmem>>, vector<600x30xf32>
    %c600_247 = arith.constant 600 : index
    %c0_248 = arith.constant 0 : index
    %583 = vector.load %arg8[%c600_247, %c0_248] : memref<608x30xf32, #tpu.memory_space<vmem>>, vector<1x30xf32>
    %cst_249 = arith.constant dense<0.000000e+00> : vector<16x30xf32>
    %584 = tpu.matmul %581, %582, %cst_249 {dimension_numbers = #tpu.dot_dimension_numbers<[1], [0], [0], [1], [0, 0, 1, 1], [], []>} : vector<16x600xf32>, vector<600x30xf32>, vector<16x30xf32> -> vector<16x30xf32>
    %585 = vector.broadcast %583 : vector<1x30xf32> to vector<16x30xf32>
    %586 = arith.addf %584, %585 : vector<16x30xf32>
    %587 = arith.negf %586 : vector<16x30xf32>
    %588 = math.exp %587 : vector<16x30xf32>
    %cst_250 = arith.constant 1.000000e+00 : f32
    %589 = vector.broadcast %cst_250 : f32 to vector<16x30xf32>
    %590 = arith.addf %589, %588 : vector<16x30xf32>
    %591 = arith.divf %589, %590 : vector<16x30xf32>
    %c72_251 = arith.constant 72 : index
    %c0_252 = arith.constant 0 : index
    %592 = vector.load %arg9[%c72_251, %c0_252] : memref<1200x32xf32, #tpu.memory_space<vmem>>, vector<30x32xf32>
    %cst_253 = arith.constant dense<0.000000e+00> : vector<16x32xf32>
    %593 = tpu.matmul %591, %592, %cst_253 {dimension_numbers = #tpu.dot_dimension_numbers<[1], [0], [0], [1], [0, 0, 1, 1], [], []>} : vector<16x30xf32>, vector<30x32xf32>, vector<16x32xf32> -> vector<16x32xf32>
    %c104_254 = arith.constant 104 : index
    %c0_255 = arith.constant 0 : index
    %594 = vector.load %arg9[%c104_254, %c0_255] : memref<1200x32xf32, #tpu.memory_space<vmem>>, vector<30x32xf32>
    %cst_256 = arith.constant dense<0.000000e+00> : vector<16x32xf32>
    %595 = tpu.matmul %537, %594, %cst_256 {dimension_numbers = #tpu.dot_dimension_numbers<[1], [0], [0], [1], [0, 0, 1, 1], [], []>} : vector<16x30xf32>, vector<30x32xf32>, vector<16x32xf32> -> vector<16x32xf32>
    %596 = arith.addf %593, %595 : vector<16x32xf32>
    %c136_257 = arith.constant 136 : index
    %c0_258 = arith.constant 0 : index
    %597 = vector.load %arg9[%c136_257, %c0_258] : memref<1200x32xf32, #tpu.memory_space<vmem>>, vector<4x32xf32>
    %cst_259 = arith.constant dense<0.000000e+00> : vector<16x32xf32>
    %598 = tpu.matmul %538, %597, %cst_259 {dimension_numbers = #tpu.dot_dimension_numbers<[1], [0], [0], [1], [0, 0, 1, 1], [], []>} : vector<16x4xf32>, vector<4x32xf32>, vector<16x32xf32> -> vector<16x32xf32>
    %599 = arith.addf %596, %598 : vector<16x32xf32>
    %c24 = arith.constant 24 : index
    %c0_260 = arith.constant 0 : index
    %600 = vector.load %arg10[%c24, %c0_260] : memref<344x32xf32, #tpu.memory_space<vmem>>, vector<1x32xf32>
    %601 = vector.broadcast %600 : vector<1x32xf32> to vector<16x32xf32>
    %602 = arith.addf %599, %601 : vector<16x32xf32>
    %c32_261 = arith.constant 32 : index
    %c0_262 = arith.constant 0 : index
    %603 = vector.load %arg10[%c32_261, %c0_262] : memref<344x32xf32, #tpu.memory_space<vmem>>, vector<16x32xf32>
    %604 = arith.addf %602, %603 : vector<16x32xf32>
    %c752 = arith.constant 752 : index
    %c0_263 = arith.constant 0 : index
    %605 = vector.load %arg9[%c752, %c0_263] : memref<1200x32xf32, #tpu.memory_space<vmem>>, vector<32x32xf32>
    %cst_264 = arith.constant dense<0.000000e+00> : vector<16x32xf32>
    %606 = tpu.matmul %604, %605, %cst_264 {dimension_numbers = #tpu.dot_dimension_numbers<[1], [0], [0], [1], [0, 0, 1, 1], [], []>} : vector<16x32xf32>, vector<32x32xf32>, vector<16x32xf32> -> vector<16x32xf32>
    %c200 = arith.constant 200 : index
    %c0_265 = arith.constant 0 : index
    %607 = vector.load %arg10[%c200, %c0_265] : memref<344x32xf32, #tpu.memory_space<vmem>>, vector<1x32xf32>
    %608 = vector.broadcast %607 : vector<1x32xf32> to vector<16x32xf32>
    %609 = arith.addf %606, %608 : vector<16x32xf32>
    %c784 = arith.constant 784 : index
    %c0_266 = arith.constant 0 : index
    %610 = vector.load %arg9[%c784, %c0_266] : memref<1200x32xf32, #tpu.memory_space<vmem>>, vector<32x32xf32>
    %cst_267 = arith.constant dense<0.000000e+00> : vector<16x32xf32>
    %611 = tpu.matmul %604, %610, %cst_267 {dimension_numbers = #tpu.dot_dimension_numbers<[1], [0], [0], [1], [0, 0, 1, 1], [], []>} : vector<16x32xf32>, vector<32x32xf32>, vector<16x32xf32> -> vector<16x32xf32>
    %c208_268 = arith.constant 208 : index
    %c0_269 = arith.constant 0 : index
    %612 = vector.load %arg10[%c208_268, %c0_269] : memref<344x32xf32, #tpu.memory_space<vmem>>, vector<1x32xf32>
    %613 = vector.broadcast %612 : vector<1x32xf32> to vector<16x32xf32>
    %614 = arith.addf %611, %613 : vector<16x32xf32>
    %615 = tpu.iota {dimensions = array<i32: 0>} : vector<16x16xi32>
    %616 = tpu.iota {dimensions = array<i32: 1>} : vector<16x16xi32>
    %617 = arith.sitofp %615 : vector<16x16xi32> to vector<16x16xf32>
    %cst_270 = arith.constant 1.250000e-01 : f32
    %618 = vector.broadcast %cst_270 : f32 to vector<16x16xf32>
    %619 = arith.mulf %617, %618 : vector<16x16xf32>
    %620 = math.floor %619 : vector<16x16xf32>
    %621 = arith.sitofp %616 : vector<16x16xi32> to vector<16x16xf32>
    %cst_271 = arith.constant 1.250000e-01 : f32
    %622 = vector.broadcast %cst_271 : f32 to vector<16x16xf32>
    %623 = arith.mulf %621, %622 : vector<16x16xf32>
    %624 = math.floor %623 : vector<16x16xf32>
    %625 = arith.cmpf oeq, %620, %624 : vector<16x16xf32>
    %626 = arith.cmpi sle, %616, %615 : vector<16x16xi32>
    %627 = arith.andi %625, %626 : vector<16x16xi1>
    %628 = tpu.iota {dimensions = array<i32: 1>} : vector<1x32xi32>
    %c816 = arith.constant 816 : index
    %c0_272 = arith.constant 0 : index
    %629 = vector.load %arg9[%c816, %c0_272] : memref<1200x32xf32, #tpu.memory_space<vmem>>, vector<128x32xf32>
    %cst_273 = arith.constant 0.000000e+00 : f32
    %630 = vector.broadcast %cst_273 : f32 to vector<16x32xf32>
    %c0_i32_274 = arith.constant 0 : i32
    %631 = vector.broadcast %c0_i32_274 : i32 to vector<1x32xi32>
    %632 = arith.cmpi sge, %628, %631 : vector<1x32xi32>
    %c8_i32_275 = arith.constant 8 : i32
    %633 = vector.broadcast %c8_i32_275 : i32 to vector<1x32xi32>
    %634 = arith.cmpi slt, %628, %633 : vector<1x32xi32>
    %635 = arith.andi %632, %634 : vector<1x32xi1>
    %cst_276 = arith.constant 0.000000e+00 : f32
    %636 = vector.shape_cast %635 : vector<1x32xi1> to vector<1x32xi1>
    %637 = vector.broadcast %636 : vector<1x32xi1> to vector<16x32xi1>
    %638 = vector.broadcast %cst_276 : f32 to vector<16x32xf32>
    %639 = arith.select %637, %614, %638 : vector<16x32xi1>, vector<16x32xf32>
    %cst_277 = arith.constant dense<0.000000e+00> : vector<16x16xf32>
    %640 = tpu.matmul %609, %639, %cst_277 {dimension_numbers = #tpu.dot_dimension_numbers<[1], [1], [0], [0], [0, 0, 1, 0], [], []>} : vector<16x32xf32>, vector<16x32xf32>, vector<16x16xf32> -> vector<16x16xf32>
    %cst_278 = arith.constant 0.353553385 : f32
    %641 = vector.broadcast %cst_278 : f32 to vector<16x16xf32>
    %642 = arith.mulf %640, %641 : vector<16x16xf32>
    %cst_279 = arith.constant -1.000000e+30 : f32
    %643 = vector.broadcast %cst_279 : f32 to vector<16x16xf32>
    %644 = arith.select %627, %642, %643 : vector<16x16xi1>, vector<16x16xf32>
    %cst_280 = arith.constant dense<0xFF800000> : vector<16xf32>
    %645 = vector.multi_reduction <maximumf>, %644, %cst_280 [1] : vector<16x16xf32> to vector<16xf32>
    %646 = vector.shape_cast %645 : vector<16xf32> to vector<16x1xf32>
    %647 = vector.broadcast %646 : vector<16x1xf32> to vector<16x16xf32>
    %648 = arith.subf %644, %647 : vector<16x16xf32>
    %649 = math.exp %648 : vector<16x16xf32>
    %cst_281 = arith.constant dense<0.000000e+00> : vector<16xf32>
    %650 = vector.multi_reduction <add>, %649, %cst_281 [1] : vector<16x16xf32> to vector<16xf32>
    %651 = vector.shape_cast %650 : vector<16xf32> to vector<16x1xf32>
    %652 = tpu.reciprocal %651 {approx = true} : vector<16x1xf32> -> vector<16x1xf32>
    %653 = vector.broadcast %652 : vector<16x1xf32> to vector<16x16xf32>
    %654 = arith.mulf %649, %653 : vector<16x16xf32>
    %655 = vector.extract_strided_slice %629 {offsets = [0, 0], sizes = [32, 32], strides = [1, 1]} : vector<128x32xf32> to vector<32x32xf32>
    %cst_282 = arith.constant dense<0.000000e+00> : vector<16x32xf32>
    %656 = tpu.matmul %604, %655, %cst_282 {dimension_numbers = #tpu.dot_dimension_numbers<[1], [0], [0], [1], [0, 0, 1, 1], [], []>} : vector<16x32xf32>, vector<32x32xf32>, vector<16x32xf32> -> vector<16x32xf32>
    %cst_283 = arith.constant dense<0.000000e+00> : vector<16x32xf32>
    %657 = tpu.matmul %654, %656, %cst_283 {dimension_numbers = #tpu.dot_dimension_numbers<[1], [0], [0], [1], [0, 0, 1, 1], [], []>} : vector<16x16xf32>, vector<16x32xf32>, vector<16x32xf32> -> vector<16x32xf32>
    %658 = arith.addf %630, %657 : vector<16x32xf32>
    %c8_i32_284 = arith.constant 8 : i32
    %659 = vector.broadcast %c8_i32_284 : i32 to vector<1x32xi32>
    %660 = arith.cmpi sge, %628, %659 : vector<1x32xi32>
    %c16_i32_285 = arith.constant 16 : i32
    %661 = vector.broadcast %c16_i32_285 : i32 to vector<1x32xi32>
    %662 = arith.cmpi slt, %628, %661 : vector<1x32xi32>
    %663 = arith.andi %660, %662 : vector<1x32xi1>
    %cst_286 = arith.constant 0.000000e+00 : f32
    %664 = vector.shape_cast %663 : vector<1x32xi1> to vector<1x32xi1>
    %665 = vector.broadcast %664 : vector<1x32xi1> to vector<16x32xi1>
    %666 = vector.broadcast %cst_286 : f32 to vector<16x32xf32>
    %667 = arith.select %665, %614, %666 : vector<16x32xi1>, vector<16x32xf32>
    %cst_287 = arith.constant dense<0.000000e+00> : vector<16x16xf32>
    %668 = tpu.matmul %609, %667, %cst_287 {dimension_numbers = #tpu.dot_dimension_numbers<[1], [1], [0], [0], [0, 0, 1, 0], [], []>} : vector<16x32xf32>, vector<16x32xf32>, vector<16x16xf32> -> vector<16x16xf32>
    %cst_288 = arith.constant 0.353553385 : f32
    %669 = vector.broadcast %cst_288 : f32 to vector<16x16xf32>
    %670 = arith.mulf %668, %669 : vector<16x16xf32>
    %cst_289 = arith.constant -1.000000e+30 : f32
    %671 = vector.broadcast %cst_289 : f32 to vector<16x16xf32>
    %672 = arith.select %627, %670, %671 : vector<16x16xi1>, vector<16x16xf32>
    %cst_290 = arith.constant dense<0xFF800000> : vector<16xf32>
    %673 = vector.multi_reduction <maximumf>, %672, %cst_290 [1] : vector<16x16xf32> to vector<16xf32>
    %674 = vector.shape_cast %673 : vector<16xf32> to vector<16x1xf32>
    %675 = vector.broadcast %674 : vector<16x1xf32> to vector<16x16xf32>
    %676 = arith.subf %672, %675 : vector<16x16xf32>
    %677 = math.exp %676 : vector<16x16xf32>
    %cst_291 = arith.constant dense<0.000000e+00> : vector<16xf32>
    %678 = vector.multi_reduction <add>, %677, %cst_291 [1] : vector<16x16xf32> to vector<16xf32>
    %679 = vector.shape_cast %678 : vector<16xf32> to vector<16x1xf32>
    %680 = tpu.reciprocal %679 {approx = true} : vector<16x1xf32> -> vector<16x1xf32>
    %681 = vector.broadcast %680 : vector<16x1xf32> to vector<16x16xf32>
    %682 = arith.mulf %677, %681 : vector<16x16xf32>
    %683 = vector.extract_strided_slice %629 {offsets = [32, 0], sizes = [32, 32], strides = [1, 1]} : vector<128x32xf32> to vector<32x32xf32>
    %cst_292 = arith.constant dense<0.000000e+00> : vector<16x32xf32>
    %684 = tpu.matmul %604, %683, %cst_292 {dimension_numbers = #tpu.dot_dimension_numbers<[1], [0], [0], [1], [0, 0, 1, 1], [], []>} : vector<16x32xf32>, vector<32x32xf32>, vector<16x32xf32> -> vector<16x32xf32>
    %cst_293 = arith.constant dense<0.000000e+00> : vector<16x32xf32>
    %685 = tpu.matmul %682, %684, %cst_293 {dimension_numbers = #tpu.dot_dimension_numbers<[1], [0], [0], [1], [0, 0, 1, 1], [], []>} : vector<16x16xf32>, vector<16x32xf32>, vector<16x32xf32> -> vector<16x32xf32>
    %686 = arith.addf %658, %685 : vector<16x32xf32>
    %c16_i32_294 = arith.constant 16 : i32
    %687 = vector.broadcast %c16_i32_294 : i32 to vector<1x32xi32>
    %688 = arith.cmpi sge, %628, %687 : vector<1x32xi32>
    %c24_i32_295 = arith.constant 24 : i32
    %689 = vector.broadcast %c24_i32_295 : i32 to vector<1x32xi32>
    %690 = arith.cmpi slt, %628, %689 : vector<1x32xi32>
    %691 = arith.andi %688, %690 : vector<1x32xi1>
    %cst_296 = arith.constant 0.000000e+00 : f32
    %692 = vector.shape_cast %691 : vector<1x32xi1> to vector<1x32xi1>
    %693 = vector.broadcast %692 : vector<1x32xi1> to vector<16x32xi1>
    %694 = vector.broadcast %cst_296 : f32 to vector<16x32xf32>
    %695 = arith.select %693, %614, %694 : vector<16x32xi1>, vector<16x32xf32>
    %cst_297 = arith.constant dense<0.000000e+00> : vector<16x16xf32>
    %696 = tpu.matmul %609, %695, %cst_297 {dimension_numbers = #tpu.dot_dimension_numbers<[1], [1], [0], [0], [0, 0, 1, 0], [], []>} : vector<16x32xf32>, vector<16x32xf32>, vector<16x16xf32> -> vector<16x16xf32>
    %cst_298 = arith.constant 0.353553385 : f32
    %697 = vector.broadcast %cst_298 : f32 to vector<16x16xf32>
    %698 = arith.mulf %696, %697 : vector<16x16xf32>
    %cst_299 = arith.constant -1.000000e+30 : f32
    %699 = vector.broadcast %cst_299 : f32 to vector<16x16xf32>
    %700 = arith.select %627, %698, %699 : vector<16x16xi1>, vector<16x16xf32>
    %cst_300 = arith.constant dense<0xFF800000> : vector<16xf32>
    %701 = vector.multi_reduction <maximumf>, %700, %cst_300 [1] : vector<16x16xf32> to vector<16xf32>
    %702 = vector.shape_cast %701 : vector<16xf32> to vector<16x1xf32>
    %703 = vector.broadcast %702 : vector<16x1xf32> to vector<16x16xf32>
    %704 = arith.subf %700, %703 : vector<16x16xf32>
    %705 = math.exp %704 : vector<16x16xf32>
    %cst_301 = arith.constant dense<0.000000e+00> : vector<16xf32>
    %706 = vector.multi_reduction <add>, %705, %cst_301 [1] : vector<16x16xf32> to vector<16xf32>
    %707 = vector.shape_cast %706 : vector<16xf32> to vector<16x1xf32>
    %708 = tpu.reciprocal %707 {approx = true} : vector<16x1xf32> -> vector<16x1xf32>
    %709 = vector.broadcast %708 : vector<16x1xf32> to vector<16x16xf32>
    %710 = arith.mulf %705, %709 : vector<16x16xf32>
    %711 = vector.extract_strided_slice %629 {offsets = [64, 0], sizes = [32, 32], strides = [1, 1]} : vector<128x32xf32> to vector<32x32xf32>
    %cst_302 = arith.constant dense<0.000000e+00> : vector<16x32xf32>
    %712 = tpu.matmul %604, %711, %cst_302 {dimension_numbers = #tpu.dot_dimension_numbers<[1], [0], [0], [1], [0, 0, 1, 1], [], []>} : vector<16x32xf32>, vector<32x32xf32>, vector<16x32xf32> -> vector<16x32xf32>
    %cst_303 = arith.constant dense<0.000000e+00> : vector<16x32xf32>
    %713 = tpu.matmul %710, %712, %cst_303 {dimension_numbers = #tpu.dot_dimension_numbers<[1], [0], [0], [1], [0, 0, 1, 1], [], []>} : vector<16x16xf32>, vector<16x32xf32>, vector<16x32xf32> -> vector<16x32xf32>
    %714 = arith.addf %686, %713 : vector<16x32xf32>
    %c24_i32_304 = arith.constant 24 : i32
    %715 = vector.broadcast %c24_i32_304 : i32 to vector<1x32xi32>
    %716 = arith.cmpi sge, %628, %715 : vector<1x32xi32>
    %c32_i32_305 = arith.constant 32 : i32
    %717 = vector.broadcast %c32_i32_305 : i32 to vector<1x32xi32>
    %718 = arith.cmpi slt, %628, %717 : vector<1x32xi32>
    %719 = arith.andi %716, %718 : vector<1x32xi1>
    %cst_306 = arith.constant 0.000000e+00 : f32
    %720 = vector.shape_cast %719 : vector<1x32xi1> to vector<1x32xi1>
    %721 = vector.broadcast %720 : vector<1x32xi1> to vector<16x32xi1>
    %722 = vector.broadcast %cst_306 : f32 to vector<16x32xf32>
    %723 = arith.select %721, %614, %722 : vector<16x32xi1>, vector<16x32xf32>
    %cst_307 = arith.constant dense<0.000000e+00> : vector<16x16xf32>
    %724 = tpu.matmul %609, %723, %cst_307 {dimension_numbers = #tpu.dot_dimension_numbers<[1], [1], [0], [0], [0, 0, 1, 0], [], []>} : vector<16x32xf32>, vector<16x32xf32>, vector<16x16xf32> -> vector<16x16xf32>
    %cst_308 = arith.constant 0.353553385 : f32
    %725 = vector.broadcast %cst_308 : f32 to vector<16x16xf32>
    %726 = arith.mulf %724, %725 : vector<16x16xf32>
    %cst_309 = arith.constant -1.000000e+30 : f32
    %727 = vector.broadcast %cst_309 : f32 to vector<16x16xf32>
    %728 = arith.select %627, %726, %727 : vector<16x16xi1>, vector<16x16xf32>
    %cst_310 = arith.constant dense<0xFF800000> : vector<16xf32>
    %729 = vector.multi_reduction <maximumf>, %728, %cst_310 [1] : vector<16x16xf32> to vector<16xf32>
    %730 = vector.shape_cast %729 : vector<16xf32> to vector<16x1xf32>
    %731 = vector.broadcast %730 : vector<16x1xf32> to vector<16x16xf32>
    %732 = arith.subf %728, %731 : vector<16x16xf32>
    %733 = math.exp %732 : vector<16x16xf32>
    %cst_311 = arith.constant dense<0.000000e+00> : vector<16xf32>
    %734 = vector.multi_reduction <add>, %733, %cst_311 [1] : vector<16x16xf32> to vector<16xf32>
    %735 = vector.shape_cast %734 : vector<16xf32> to vector<16x1xf32>
    %736 = tpu.reciprocal %735 {approx = true} : vector<16x1xf32> -> vector<16x1xf32>
    %737 = vector.broadcast %736 : vector<16x1xf32> to vector<16x16xf32>
    %738 = arith.mulf %733, %737 : vector<16x16xf32>
    %739 = vector.extract_strided_slice %629 {offsets = [96, 0], sizes = [32, 32], strides = [1, 1]} : vector<128x32xf32> to vector<32x32xf32>
    %cst_312 = arith.constant dense<0.000000e+00> : vector<16x32xf32>
    %740 = tpu.matmul %604, %739, %cst_312 {dimension_numbers = #tpu.dot_dimension_numbers<[1], [0], [0], [1], [0, 0, 1, 1], [], []>} : vector<16x32xf32>, vector<32x32xf32>, vector<16x32xf32> -> vector<16x32xf32>
    %cst_313 = arith.constant dense<0.000000e+00> : vector<16x32xf32>
    %741 = tpu.matmul %738, %740, %cst_313 {dimension_numbers = #tpu.dot_dimension_numbers<[1], [0], [0], [1], [0, 0, 1, 1], [], []>} : vector<16x16xf32>, vector<16x32xf32>, vector<16x32xf32> -> vector<16x32xf32>
    %742 = arith.addf %714, %741 : vector<16x32xf32>
    %c216 = arith.constant 216 : index
    %c0_314 = arith.constant 0 : index
    %743 = vector.load %arg10[%c216, %c0_314] : memref<344x32xf32, #tpu.memory_space<vmem>>, vector<1x32xf32>
    %744 = vector.broadcast %743 : vector<1x32xf32> to vector<16x32xf32>
    %745 = arith.addf %742, %744 : vector<16x32xf32>
    %746 = arith.addf %604, %745 : vector<16x32xf32>
    %cst_315 = arith.constant dense<0.000000e+00> : vector<16xf32>
    %747 = vector.multi_reduction <add>, %746, %cst_315 [1] : vector<16x32xf32> to vector<16xf32>
    %748 = vector.shape_cast %747 : vector<16xf32> to vector<16x1xf32>
    %cst_316 = arith.constant 3.200000e+01 : f32
    %749 = vector.broadcast %cst_316 : f32 to vector<16x1xf32>
    %750 = arith.divf %748, %749 : vector<16x1xf32>
    %751 = vector.broadcast %750 : vector<16x1xf32> to vector<16x32xf32>
    %752 = arith.subf %746, %751 : vector<16x32xf32>
    %753 = arith.mulf %752, %752 : vector<16x32xf32>
    %cst_317 = arith.constant dense<0.000000e+00> : vector<16xf32>
    %754 = vector.multi_reduction <add>, %753, %cst_317 [1] : vector<16x32xf32> to vector<16xf32>
    %755 = vector.shape_cast %754 : vector<16xf32> to vector<16x1xf32>
    %cst_318 = arith.constant 3.200000e+01 : f32
    %756 = vector.broadcast %cst_318 : f32 to vector<16x1xf32>
    %757 = arith.divf %755, %756 : vector<16x1xf32>
    %cst_319 = arith.constant 9.99999974E-6 : f32
    %758 = vector.broadcast %cst_319 : f32 to vector<16x1xf32>
    %759 = arith.addf %757, %758 : vector<16x1xf32>
    %760 = math.rsqrt %759 : vector<16x1xf32>
    %761 = vector.broadcast %760 : vector<16x1xf32> to vector<16x32xf32>
    %762 = arith.mulf %752, %761 : vector<16x32xf32>
    %c264 = arith.constant 264 : index
    %c0_320 = arith.constant 0 : index
    %763 = vector.load %arg10[%c264, %c0_320] : memref<344x32xf32, #tpu.memory_space<vmem>>, vector<1x32xf32>
    %764 = vector.broadcast %763 : vector<1x32xf32> to vector<16x32xf32>
    %765 = arith.mulf %762, %764 : vector<16x32xf32>
    %c272 = arith.constant 272 : index
    %c0_321 = arith.constant 0 : index
    %766 = vector.load %arg10[%c272, %c0_321] : memref<344x32xf32, #tpu.memory_space<vmem>>, vector<1x32xf32>
    %767 = vector.broadcast %766 : vector<1x32xf32> to vector<16x32xf32>
    %768 = arith.addf %765, %767 : vector<16x32xf32>
    %c944 = arith.constant 944 : index
    %c0_322 = arith.constant 0 : index
    %769 = vector.load %arg9[%c944, %c0_322] : memref<1200x32xf32, #tpu.memory_space<vmem>>, vector<32x32xf32>
    %cst_323 = arith.constant dense<0.000000e+00> : vector<16x32xf32>
    %770 = tpu.matmul %768, %769, %cst_323 {dimension_numbers = #tpu.dot_dimension_numbers<[1], [0], [0], [1], [0, 0, 1, 1], [], []>} : vector<16x32xf32>, vector<32x32xf32>, vector<16x32xf32> -> vector<16x32xf32>
    %c224 = arith.constant 224 : index
    %c0_324 = arith.constant 0 : index
    %771 = vector.load %arg10[%c224, %c0_324] : memref<344x32xf32, #tpu.memory_space<vmem>>, vector<1x32xf32>
    %772 = vector.broadcast %771 : vector<1x32xf32> to vector<16x32xf32>
    %773 = arith.addf %770, %772 : vector<16x32xf32>
    %c976 = arith.constant 976 : index
    %c0_325 = arith.constant 0 : index
    %774 = vector.load %arg9[%c976, %c0_325] : memref<1200x32xf32, #tpu.memory_space<vmem>>, vector<32x32xf32>
    %cst_326 = arith.constant dense<0.000000e+00> : vector<8x32xf32>
    %775 = tpu.matmul %536, %774, %cst_326 {dimension_numbers = #tpu.dot_dimension_numbers<[1], [0], [0], [1], [0, 0, 1, 1], [], []>} : vector<8x32xf32>, vector<32x32xf32>, vector<8x32xf32> -> vector<8x32xf32>
    %c232 = arith.constant 232 : index
    %c0_327 = arith.constant 0 : index
    %776 = vector.load %arg10[%c232, %c0_327] : memref<344x32xf32, #tpu.memory_space<vmem>>, vector<1x32xf32>
    %777 = vector.broadcast %776 : vector<1x32xf32> to vector<8x32xf32>
    %778 = arith.addf %775, %777 : vector<8x32xf32>
    %779 = tpu.iota {dimensions = array<i32: 0>} : vector<16x8xi32>
    %780 = tpu.iota {dimensions = array<i32: 1>} : vector<16x8xi32>
    %781 = arith.sitofp %779 : vector<16x8xi32> to vector<16x8xf32>
    %cst_328 = arith.constant 1.250000e-01 : f32
    %782 = vector.broadcast %cst_328 : f32 to vector<16x8xf32>
    %783 = arith.mulf %781, %782 : vector<16x8xf32>
    %784 = math.floor %783 : vector<16x8xf32>
    %785 = arith.sitofp %780 : vector<16x8xi32> to vector<16x8xf32>
    %cst_329 = arith.constant 2.500000e-01 : f32
    %786 = vector.broadcast %cst_329 : f32 to vector<16x8xf32>
    %787 = arith.mulf %785, %786 : vector<16x8xf32>
    %788 = math.floor %787 : vector<16x8xf32>
    %789 = arith.cmpf oeq, %784, %788 : vector<16x8xf32>
    %790 = tpu.iota {dimensions = array<i32: 1>} : vector<1x32xi32>
    %c1008 = arith.constant 1008 : index
    %c0_330 = arith.constant 0 : index
    %791 = vector.load %arg9[%c1008, %c0_330] : memref<1200x32xf32, #tpu.memory_space<vmem>>, vector<128x32xf32>
    %cst_331 = arith.constant 0.000000e+00 : f32
    %792 = vector.broadcast %cst_331 : f32 to vector<16x32xf32>
    %c0_i32_332 = arith.constant 0 : i32
    %793 = vector.broadcast %c0_i32_332 : i32 to vector<1x32xi32>
    %794 = arith.cmpi sge, %790, %793 : vector<1x32xi32>
    %c8_i32_333 = arith.constant 8 : i32
    %795 = vector.broadcast %c8_i32_333 : i32 to vector<1x32xi32>
    %796 = arith.cmpi slt, %790, %795 : vector<1x32xi32>
    %797 = arith.andi %794, %796 : vector<1x32xi1>
    %cst_334 = arith.constant 0.000000e+00 : f32
    %798 = vector.shape_cast %797 : vector<1x32xi1> to vector<1x32xi1>
    %799 = vector.broadcast %798 : vector<1x32xi1> to vector<8x32xi1>
    %800 = vector.broadcast %cst_334 : f32 to vector<8x32xf32>
    %801 = arith.select %799, %778, %800 : vector<8x32xi1>, vector<8x32xf32>
    %cst_335 = arith.constant dense<0.000000e+00> : vector<16x8xf32>
    %802 = tpu.matmul %773, %801, %cst_335 {dimension_numbers = #tpu.dot_dimension_numbers<[1], [1], [0], [0], [0, 0, 1, 0], [], []>} : vector<16x32xf32>, vector<8x32xf32>, vector<16x8xf32> -> vector<16x8xf32>
    %cst_336 = arith.constant 0.353553385 : f32
    %803 = vector.broadcast %cst_336 : f32 to vector<16x8xf32>
    %804 = arith.mulf %802, %803 : vector<16x8xf32>
    %cst_337 = arith.constant -1.000000e+30 : f32
    %805 = vector.broadcast %cst_337 : f32 to vector<16x8xf32>
    %806 = arith.select %789, %804, %805 : vector<16x8xi1>, vector<16x8xf32>
    %cst_338 = arith.constant dense<0xFF800000> : vector<16xf32>
    %807 = vector.multi_reduction <maximumf>, %806, %cst_338 [1] : vector<16x8xf32> to vector<16xf32>
    %808 = vector.shape_cast %807 : vector<16xf32> to vector<16x1xf32>
    %809 = vector.broadcast %808 : vector<16x1xf32> to vector<16x8xf32>
    %810 = arith.subf %806, %809 : vector<16x8xf32>
    %811 = math.exp %810 : vector<16x8xf32>
    %cst_339 = arith.constant dense<0.000000e+00> : vector<16xf32>
    %812 = vector.multi_reduction <add>, %811, %cst_339 [1] : vector<16x8xf32> to vector<16xf32>
    %813 = vector.shape_cast %812 : vector<16xf32> to vector<16x1xf32>
    %814 = tpu.reciprocal %813 {approx = true} : vector<16x1xf32> -> vector<16x1xf32>
    %815 = vector.broadcast %814 : vector<16x1xf32> to vector<16x8xf32>
    %816 = arith.mulf %811, %815 : vector<16x8xf32>
    %817 = vector.extract_strided_slice %791 {offsets = [0, 0], sizes = [32, 32], strides = [1, 1]} : vector<128x32xf32> to vector<32x32xf32>
    %cst_340 = arith.constant dense<0.000000e+00> : vector<8x32xf32>
    %818 = tpu.matmul %536, %817, %cst_340 {dimension_numbers = #tpu.dot_dimension_numbers<[1], [0], [0], [1], [0, 0, 1, 1], [], []>} : vector<8x32xf32>, vector<32x32xf32>, vector<8x32xf32> -> vector<8x32xf32>
    %cst_341 = arith.constant dense<0.000000e+00> : vector<16x32xf32>
    %819 = tpu.matmul %816, %818, %cst_341 {dimension_numbers = #tpu.dot_dimension_numbers<[1], [0], [0], [1], [0, 0, 1, 1], [], []>} : vector<16x8xf32>, vector<8x32xf32>, vector<16x32xf32> -> vector<16x32xf32>
    %820 = arith.addf %792, %819 : vector<16x32xf32>
    %c8_i32_342 = arith.constant 8 : i32
    %821 = vector.broadcast %c8_i32_342 : i32 to vector<1x32xi32>
    %822 = arith.cmpi sge, %790, %821 : vector<1x32xi32>
    %c16_i32_343 = arith.constant 16 : i32
    %823 = vector.broadcast %c16_i32_343 : i32 to vector<1x32xi32>
    %824 = arith.cmpi slt, %790, %823 : vector<1x32xi32>
    %825 = arith.andi %822, %824 : vector<1x32xi1>
    %cst_344 = arith.constant 0.000000e+00 : f32
    %826 = vector.shape_cast %825 : vector<1x32xi1> to vector<1x32xi1>
    %827 = vector.broadcast %826 : vector<1x32xi1> to vector<8x32xi1>
    %828 = vector.broadcast %cst_344 : f32 to vector<8x32xf32>
    %829 = arith.select %827, %778, %828 : vector<8x32xi1>, vector<8x32xf32>
    %cst_345 = arith.constant dense<0.000000e+00> : vector<16x8xf32>
    %830 = tpu.matmul %773, %829, %cst_345 {dimension_numbers = #tpu.dot_dimension_numbers<[1], [1], [0], [0], [0, 0, 1, 0], [], []>} : vector<16x32xf32>, vector<8x32xf32>, vector<16x8xf32> -> vector<16x8xf32>
    %cst_346 = arith.constant 0.353553385 : f32
    %831 = vector.broadcast %cst_346 : f32 to vector<16x8xf32>
    %832 = arith.mulf %830, %831 : vector<16x8xf32>
    %cst_347 = arith.constant -1.000000e+30 : f32
    %833 = vector.broadcast %cst_347 : f32 to vector<16x8xf32>
    %834 = arith.select %789, %832, %833 : vector<16x8xi1>, vector<16x8xf32>
    %cst_348 = arith.constant dense<0xFF800000> : vector<16xf32>
    %835 = vector.multi_reduction <maximumf>, %834, %cst_348 [1] : vector<16x8xf32> to vector<16xf32>
    %836 = vector.shape_cast %835 : vector<16xf32> to vector<16x1xf32>
    %837 = vector.broadcast %836 : vector<16x1xf32> to vector<16x8xf32>
    %838 = arith.subf %834, %837 : vector<16x8xf32>
    %839 = math.exp %838 : vector<16x8xf32>
    %cst_349 = arith.constant dense<0.000000e+00> : vector<16xf32>
    %840 = vector.multi_reduction <add>, %839, %cst_349 [1] : vector<16x8xf32> to vector<16xf32>
    %841 = vector.shape_cast %840 : vector<16xf32> to vector<16x1xf32>
    %842 = tpu.reciprocal %841 {approx = true} : vector<16x1xf32> -> vector<16x1xf32>
    %843 = vector.broadcast %842 : vector<16x1xf32> to vector<16x8xf32>
    %844 = arith.mulf %839, %843 : vector<16x8xf32>
    %845 = vector.extract_strided_slice %791 {offsets = [32, 0], sizes = [32, 32], strides = [1, 1]} : vector<128x32xf32> to vector<32x32xf32>
    %cst_350 = arith.constant dense<0.000000e+00> : vector<8x32xf32>
    %846 = tpu.matmul %536, %845, %cst_350 {dimension_numbers = #tpu.dot_dimension_numbers<[1], [0], [0], [1], [0, 0, 1, 1], [], []>} : vector<8x32xf32>, vector<32x32xf32>, vector<8x32xf32> -> vector<8x32xf32>
    %cst_351 = arith.constant dense<0.000000e+00> : vector<16x32xf32>
    %847 = tpu.matmul %844, %846, %cst_351 {dimension_numbers = #tpu.dot_dimension_numbers<[1], [0], [0], [1], [0, 0, 1, 1], [], []>} : vector<16x8xf32>, vector<8x32xf32>, vector<16x32xf32> -> vector<16x32xf32>
    %848 = arith.addf %820, %847 : vector<16x32xf32>
    %c16_i32_352 = arith.constant 16 : i32
    %849 = vector.broadcast %c16_i32_352 : i32 to vector<1x32xi32>
    %850 = arith.cmpi sge, %790, %849 : vector<1x32xi32>
    %c24_i32_353 = arith.constant 24 : i32
    %851 = vector.broadcast %c24_i32_353 : i32 to vector<1x32xi32>
    %852 = arith.cmpi slt, %790, %851 : vector<1x32xi32>
    %853 = arith.andi %850, %852 : vector<1x32xi1>
    %cst_354 = arith.constant 0.000000e+00 : f32
    %854 = vector.shape_cast %853 : vector<1x32xi1> to vector<1x32xi1>
    %855 = vector.broadcast %854 : vector<1x32xi1> to vector<8x32xi1>
    %856 = vector.broadcast %cst_354 : f32 to vector<8x32xf32>
    %857 = arith.select %855, %778, %856 : vector<8x32xi1>, vector<8x32xf32>
    %cst_355 = arith.constant dense<0.000000e+00> : vector<16x8xf32>
    %858 = tpu.matmul %773, %857, %cst_355 {dimension_numbers = #tpu.dot_dimension_numbers<[1], [1], [0], [0], [0, 0, 1, 0], [], []>} : vector<16x32xf32>, vector<8x32xf32>, vector<16x8xf32> -> vector<16x8xf32>
    %cst_356 = arith.constant 0.353553385 : f32
    %859 = vector.broadcast %cst_356 : f32 to vector<16x8xf32>
    %860 = arith.mulf %858, %859 : vector<16x8xf32>
    %cst_357 = arith.constant -1.000000e+30 : f32
    %861 = vector.broadcast %cst_357 : f32 to vector<16x8xf32>
    %862 = arith.select %789, %860, %861 : vector<16x8xi1>, vector<16x8xf32>
    %cst_358 = arith.constant dense<0xFF800000> : vector<16xf32>
    %863 = vector.multi_reduction <maximumf>, %862, %cst_358 [1] : vector<16x8xf32> to vector<16xf32>
    %864 = vector.shape_cast %863 : vector<16xf32> to vector<16x1xf32>
    %865 = vector.broadcast %864 : vector<16x1xf32> to vector<16x8xf32>
    %866 = arith.subf %862, %865 : vector<16x8xf32>
    %867 = math.exp %866 : vector<16x8xf32>
    %cst_359 = arith.constant dense<0.000000e+00> : vector<16xf32>
    %868 = vector.multi_reduction <add>, %867, %cst_359 [1] : vector<16x8xf32> to vector<16xf32>
    %869 = vector.shape_cast %868 : vector<16xf32> to vector<16x1xf32>
    %870 = tpu.reciprocal %869 {approx = true} : vector<16x1xf32> -> vector<16x1xf32>
    %871 = vector.broadcast %870 : vector<16x1xf32> to vector<16x8xf32>
    %872 = arith.mulf %867, %871 : vector<16x8xf32>
    %873 = vector.extract_strided_slice %791 {offsets = [64, 0], sizes = [32, 32], strides = [1, 1]} : vector<128x32xf32> to vector<32x32xf32>
    %cst_360 = arith.constant dense<0.000000e+00> : vector<8x32xf32>
    %874 = tpu.matmul %536, %873, %cst_360 {dimension_numbers = #tpu.dot_dimension_numbers<[1], [0], [0], [1], [0, 0, 1, 1], [], []>} : vector<8x32xf32>, vector<32x32xf32>, vector<8x32xf32> -> vector<8x32xf32>
    %cst_361 = arith.constant dense<0.000000e+00> : vector<16x32xf32>
    %875 = tpu.matmul %872, %874, %cst_361 {dimension_numbers = #tpu.dot_dimension_numbers<[1], [0], [0], [1], [0, 0, 1, 1], [], []>} : vector<16x8xf32>, vector<8x32xf32>, vector<16x32xf32> -> vector<16x32xf32>
    %876 = arith.addf %848, %875 : vector<16x32xf32>
    %c24_i32_362 = arith.constant 24 : i32
    %877 = vector.broadcast %c24_i32_362 : i32 to vector<1x32xi32>
    %878 = arith.cmpi sge, %790, %877 : vector<1x32xi32>
    %c32_i32_363 = arith.constant 32 : i32
    %879 = vector.broadcast %c32_i32_363 : i32 to vector<1x32xi32>
    %880 = arith.cmpi slt, %790, %879 : vector<1x32xi32>
    %881 = arith.andi %878, %880 : vector<1x32xi1>
    %cst_364 = arith.constant 0.000000e+00 : f32
    %882 = vector.shape_cast %881 : vector<1x32xi1> to vector<1x32xi1>
    %883 = vector.broadcast %882 : vector<1x32xi1> to vector<8x32xi1>
    %884 = vector.broadcast %cst_364 : f32 to vector<8x32xf32>
    %885 = arith.select %883, %778, %884 : vector<8x32xi1>, vector<8x32xf32>
    %cst_365 = arith.constant dense<0.000000e+00> : vector<16x8xf32>
    %886 = tpu.matmul %773, %885, %cst_365 {dimension_numbers = #tpu.dot_dimension_numbers<[1], [1], [0], [0], [0, 0, 1, 0], [], []>} : vector<16x32xf32>, vector<8x32xf32>, vector<16x8xf32> -> vector<16x8xf32>
    %cst_366 = arith.constant 0.353553385 : f32
    %887 = vector.broadcast %cst_366 : f32 to vector<16x8xf32>
    %888 = arith.mulf %886, %887 : vector<16x8xf32>
    %cst_367 = arith.constant -1.000000e+30 : f32
    %889 = vector.broadcast %cst_367 : f32 to vector<16x8xf32>
    %890 = arith.select %789, %888, %889 : vector<16x8xi1>, vector<16x8xf32>
    %cst_368 = arith.constant dense<0xFF800000> : vector<16xf32>
    %891 = vector.multi_reduction <maximumf>, %890, %cst_368 [1] : vector<16x8xf32> to vector<16xf32>
    %892 = vector.shape_cast %891 : vector<16xf32> to vector<16x1xf32>
    %893 = vector.broadcast %892 : vector<16x1xf32> to vector<16x8xf32>
    %894 = arith.subf %890, %893 : vector<16x8xf32>
    %895 = math.exp %894 : vector<16x8xf32>
    %cst_369 = arith.constant dense<0.000000e+00> : vector<16xf32>
    %896 = vector.multi_reduction <add>, %895, %cst_369 [1] : vector<16x8xf32> to vector<16xf32>
    %897 = vector.shape_cast %896 : vector<16xf32> to vector<16x1xf32>
    %898 = tpu.reciprocal %897 {approx = true} : vector<16x1xf32> -> vector<16x1xf32>
    %899 = vector.broadcast %898 : vector<16x1xf32> to vector<16x8xf32>
    %900 = arith.mulf %895, %899 : vector<16x8xf32>
    %901 = vector.extract_strided_slice %791 {offsets = [96, 0], sizes = [32, 32], strides = [1, 1]} : vector<128x32xf32> to vector<32x32xf32>
    %cst_370 = arith.constant dense<0.000000e+00> : vector<8x32xf32>
    %902 = tpu.matmul %536, %901, %cst_370 {dimension_numbers = #tpu.dot_dimension_numbers<[1], [0], [0], [1], [0, 0, 1, 1], [], []>} : vector<8x32xf32>, vector<32x32xf32>, vector<8x32xf32> -> vector<8x32xf32>
    %cst_371 = arith.constant dense<0.000000e+00> : vector<16x32xf32>
    %903 = tpu.matmul %900, %902, %cst_371 {dimension_numbers = #tpu.dot_dimension_numbers<[1], [0], [0], [1], [0, 0, 1, 1], [], []>} : vector<16x8xf32>, vector<8x32xf32>, vector<16x32xf32> -> vector<16x32xf32>
    %904 = arith.addf %876, %903 : vector<16x32xf32>
    %c240 = arith.constant 240 : index
    %c0_372 = arith.constant 0 : index
    %905 = vector.load %arg10[%c240, %c0_372] : memref<344x32xf32, #tpu.memory_space<vmem>>, vector<1x32xf32>
    %906 = vector.broadcast %905 : vector<1x32xf32> to vector<16x32xf32>
    %907 = arith.addf %904, %906 : vector<16x32xf32>
    %908 = arith.addf %768, %907 : vector<16x32xf32>
    %cst_373 = arith.constant dense<0.000000e+00> : vector<16xf32>
    %909 = vector.multi_reduction <add>, %908, %cst_373 [1] : vector<16x32xf32> to vector<16xf32>
    %910 = vector.shape_cast %909 : vector<16xf32> to vector<16x1xf32>
    %cst_374 = arith.constant 3.200000e+01 : f32
    %911 = vector.broadcast %cst_374 : f32 to vector<16x1xf32>
    %912 = arith.divf %910, %911 : vector<16x1xf32>
    %913 = vector.broadcast %912 : vector<16x1xf32> to vector<16x32xf32>
    %914 = arith.subf %908, %913 : vector<16x32xf32>
    %915 = arith.mulf %914, %914 : vector<16x32xf32>
    %cst_375 = arith.constant dense<0.000000e+00> : vector<16xf32>
    %916 = vector.multi_reduction <add>, %915, %cst_375 [1] : vector<16x32xf32> to vector<16xf32>
    %917 = vector.shape_cast %916 : vector<16xf32> to vector<16x1xf32>
    %cst_376 = arith.constant 3.200000e+01 : f32
    %918 = vector.broadcast %cst_376 : f32 to vector<16x1xf32>
    %919 = arith.divf %917, %918 : vector<16x1xf32>
    %cst_377 = arith.constant 9.99999974E-6 : f32
    %920 = vector.broadcast %cst_377 : f32 to vector<16x1xf32>
    %921 = arith.addf %919, %920 : vector<16x1xf32>
    %922 = math.rsqrt %921 : vector<16x1xf32>
    %923 = vector.broadcast %922 : vector<16x1xf32> to vector<16x32xf32>
    %924 = arith.mulf %914, %923 : vector<16x32xf32>
    %c280 = arith.constant 280 : index
    %c0_378 = arith.constant 0 : index
    %925 = vector.load %arg10[%c280, %c0_378] : memref<344x32xf32, #tpu.memory_space<vmem>>, vector<1x32xf32>
    %926 = vector.broadcast %925 : vector<1x32xf32> to vector<16x32xf32>
    %927 = arith.mulf %924, %926 : vector<16x32xf32>
    %c288 = arith.constant 288 : index
    %c0_379 = arith.constant 0 : index
    %928 = vector.load %arg10[%c288, %c0_379] : memref<344x32xf32, #tpu.memory_space<vmem>>, vector<1x32xf32>
    %929 = vector.broadcast %928 : vector<1x32xf32> to vector<16x32xf32>
    %930 = arith.addf %927, %929 : vector<16x32xf32>
    %c1136 = arith.constant 1136 : index
    %c0_380 = arith.constant 0 : index
    %931 = vector.load %arg9[%c1136, %c0_380] : memref<1200x32xf32, #tpu.memory_space<vmem>>, vector<32x32xf32>
    %cst_381 = arith.constant dense<0.000000e+00> : vector<16x32xf32>
    %932 = tpu.matmul %930, %931, %cst_381 {dimension_numbers = #tpu.dot_dimension_numbers<[1], [0], [0], [1], [0, 0, 1, 1], [], []>} : vector<16x32xf32>, vector<32x32xf32>, vector<16x32xf32> -> vector<16x32xf32>
    %c248 = arith.constant 248 : index
    %c0_382 = arith.constant 0 : index
    %933 = vector.load %arg10[%c248, %c0_382] : memref<344x32xf32, #tpu.memory_space<vmem>>, vector<1x32xf32>
    %934 = vector.broadcast %933 : vector<1x32xf32> to vector<16x32xf32>
    %935 = arith.addf %932, %934 : vector<16x32xf32>
    %936 = arith.mulf %935, %935 : vector<16x32xf32>
    %937 = arith.mulf %935, %936 : vector<16x32xf32>
    %cst_383 = arith.constant 4.471500e-02 : f32
    %938 = vector.broadcast %cst_383 : f32 to vector<16x32xf32>
    %939 = arith.mulf %938, %937 : vector<16x32xf32>
    %940 = arith.addf %935, %939 : vector<16x32xf32>
    %cst_384 = arith.constant 0.797884583 : f32
    %941 = vector.broadcast %cst_384 : f32 to vector<16x32xf32>
    %942 = arith.mulf %941, %940 : vector<16x32xf32>
    %943 = math.tanh %942 : vector<16x32xf32>
    %cst_385 = arith.constant 1.000000e+00 : f32
    %944 = vector.broadcast %cst_385 : f32 to vector<16x32xf32>
    %945 = arith.addf %944, %943 : vector<16x32xf32>
    %cst_386 = arith.constant 5.000000e-01 : f32
    %946 = vector.broadcast %cst_386 : f32 to vector<16x32xf32>
    %947 = arith.mulf %946, %945 : vector<16x32xf32>
    %948 = arith.mulf %935, %947 : vector<16x32xf32>
    %c1168 = arith.constant 1168 : index
    %c0_387 = arith.constant 0 : index
    %949 = vector.load %arg9[%c1168, %c0_387] : memref<1200x32xf32, #tpu.memory_space<vmem>>, vector<32x32xf32>
    %cst_388 = arith.constant dense<0.000000e+00> : vector<16x32xf32>
    %950 = tpu.matmul %948, %949, %cst_388 {dimension_numbers = #tpu.dot_dimension_numbers<[1], [0], [0], [1], [0, 0, 1, 1], [], []>} : vector<16x32xf32>, vector<32x32xf32>, vector<16x32xf32> -> vector<16x32xf32>
    %c256 = arith.constant 256 : index
    %c0_389 = arith.constant 0 : index
    %951 = vector.load %arg10[%c256, %c0_389] : memref<344x32xf32, #tpu.memory_space<vmem>>, vector<1x32xf32>
    %952 = vector.broadcast %951 : vector<1x32xf32> to vector<16x32xf32>
    %953 = arith.addf %950, %952 : vector<16x32xf32>
    %954 = arith.addf %930, %953 : vector<16x32xf32>
    %cst_390 = arith.constant dense<0.000000e+00> : vector<16xf32>
    %955 = vector.multi_reduction <add>, %954, %cst_390 [1] : vector<16x32xf32> to vector<16xf32>
    %956 = vector.shape_cast %955 : vector<16xf32> to vector<16x1xf32>
    %cst_391 = arith.constant 3.200000e+01 : f32
    %957 = vector.broadcast %cst_391 : f32 to vector<16x1xf32>
    %958 = arith.divf %956, %957 : vector<16x1xf32>
    %959 = vector.broadcast %958 : vector<16x1xf32> to vector<16x32xf32>
    %960 = arith.subf %954, %959 : vector<16x32xf32>
    %961 = arith.mulf %960, %960 : vector<16x32xf32>
    %cst_392 = arith.constant dense<0.000000e+00> : vector<16xf32>
    %962 = vector.multi_reduction <add>, %961, %cst_392 [1] : vector<16x32xf32> to vector<16xf32>
    %963 = vector.shape_cast %962 : vector<16xf32> to vector<16x1xf32>
    %cst_393 = arith.constant 3.200000e+01 : f32
    %964 = vector.broadcast %cst_393 : f32 to vector<16x1xf32>
    %965 = arith.divf %963, %964 : vector<16x1xf32>
    %cst_394 = arith.constant 9.99999974E-6 : f32
    %966 = vector.broadcast %cst_394 : f32 to vector<16x1xf32>
    %967 = arith.addf %965, %966 : vector<16x1xf32>
    %968 = math.rsqrt %967 : vector<16x1xf32>
    %969 = vector.broadcast %968 : vector<16x1xf32> to vector<16x32xf32>
    %970 = arith.mulf %960, %969 : vector<16x32xf32>
    %c296 = arith.constant 296 : index
    %c0_395 = arith.constant 0 : index
    %971 = vector.load %arg10[%c296, %c0_395] : memref<344x32xf32, #tpu.memory_space<vmem>>, vector<1x32xf32>
    %972 = vector.broadcast %971 : vector<1x32xf32> to vector<16x32xf32>
    %973 = arith.mulf %970, %972 : vector<16x32xf32>
    %c304 = arith.constant 304 : index
    %c0_396 = arith.constant 0 : index
    %974 = vector.load %arg10[%c304, %c0_396] : memref<344x32xf32, #tpu.memory_space<vmem>>, vector<1x32xf32>
    %975 = vector.broadcast %974 : vector<1x32xf32> to vector<16x32xf32>
    %976 = arith.addf %973, %975 : vector<16x32xf32>
    %c0_397 = arith.constant 0 : index
    %c0_398 = arith.constant 0 : index
    %977 = vector.load %arg12[%c0_397, %c0_398] : memref<8x16xf32, #tpu.memory_space<vmem>>, vector<8x16xf32>
    %cst_399 = arith.constant dense<0.000000e+00> : vector<8x32xf32>
    %978 = tpu.matmul %977, %976, %cst_399 {dimension_numbers = #tpu.dot_dimension_numbers<[1], [0], [0], [1], [0, 0, 1, 1], [], []>} : vector<8x16xf32>, vector<16x32xf32>, vector<8x32xf32> -> vector<8x32xf32>
    %cst_400 = arith.constant dense<0.000000e+00> : vector<8xf32>
    %979 = vector.multi_reduction <add>, %978, %cst_400 [1] : vector<8x32xf32> to vector<8xf32>
    %980 = vector.shape_cast %979 : vector<8xf32> to vector<8x1xf32>
    %cst_401 = arith.constant 3.200000e+01 : f32
    %981 = vector.broadcast %cst_401 : f32 to vector<8x1xf32>
    %982 = arith.divf %980, %981 : vector<8x1xf32>
    %983 = vector.broadcast %982 : vector<8x1xf32> to vector<8x32xf32>
    %984 = arith.subf %978, %983 : vector<8x32xf32>
    %985 = arith.mulf %984, %984 : vector<8x32xf32>
    %cst_402 = arith.constant dense<0.000000e+00> : vector<8xf32>
    %986 = vector.multi_reduction <add>, %985, %cst_402 [1] : vector<8x32xf32> to vector<8xf32>
    %987 = vector.shape_cast %986 : vector<8xf32> to vector<8x1xf32>
    %cst_403 = arith.constant 3.200000e+01 : f32
    %988 = vector.broadcast %cst_403 : f32 to vector<8x1xf32>
    %989 = arith.divf %987, %988 : vector<8x1xf32>
    %cst_404 = arith.constant 9.99999974E-6 : f32
    %990 = vector.broadcast %cst_404 : f32 to vector<8x1xf32>
    %991 = arith.addf %989, %990 : vector<8x1xf32>
    %992 = math.rsqrt %991 : vector<8x1xf32>
    %993 = vector.broadcast %992 : vector<8x1xf32> to vector<8x32xf32>
    %994 = arith.mulf %984, %993 : vector<8x32xf32>
    %c328 = arith.constant 328 : index
    %c0_405 = arith.constant 0 : index
    %995 = vector.load %arg10[%c328, %c0_405] : memref<344x32xf32, #tpu.memory_space<vmem>>, vector<1x32xf32>
    %996 = vector.broadcast %995 : vector<1x32xf32> to vector<8x32xf32>
    %997 = arith.mulf %994, %996 : vector<8x32xf32>
    %c336_406 = arith.constant 336 : index
    %c0_407 = arith.constant 0 : index
    %998 = vector.load %arg10[%c336_406, %c0_407] : memref<344x32xf32, #tpu.memory_space<vmem>>, vector<1x32xf32>
    %999 = vector.broadcast %998 : vector<1x32xf32> to vector<8x32xf32>
    %1000 = arith.addf %997, %999 : vector<8x32xf32>
    %c0_408 = arith.constant 0 : index
    %c0_409 = arith.constant 0 : index
    %1001 = vector.load %arg13[%c0_408, %c0_409] : memref<33x10xf32, #tpu.memory_space<vmem>>, vector<32x10xf32>
    %c32_410 = arith.constant 32 : index
    %c0_411 = arith.constant 0 : index
    %1002 = vector.load %arg13[%c32_410, %c0_411] : memref<33x10xf32, #tpu.memory_space<vmem>>, vector<1x10xf32>
    %cst_412 = arith.constant dense<0.000000e+00> : vector<8x10xf32>
    %1003 = tpu.matmul %1000, %1001, %cst_412 {dimension_numbers = #tpu.dot_dimension_numbers<[1], [0], [0], [1], [0, 0, 1, 1], [], []>} : vector<8x32xf32>, vector<32x10xf32>, vector<8x10xf32> -> vector<8x10xf32>
    %1004 = vector.broadcast %1002 : vector<1x10xf32> to vector<8x10xf32>
    %1005 = arith.addf %1003, %1004 : vector<8x10xf32>
    %c0_413 = arith.constant 0 : index
    %c0_414 = arith.constant 0 : index
    %1006 = vector.load %arg14[%c0_413, %c0_414] : memref<8x10xf32, #tpu.memory_space<vmem>>, vector<8x10xf32>
    tpu.vector_store %arg14[%c0_413, %c0_414], %1005 {strides = array<i32>} : memref<8x10xf32, #tpu.memory_space<vmem>>, vector<8x10xf32>,
    return
  }
}

</mosaic_0001>

<bundles_post_ra>
// kernel: tpu_custom_call.1
= control target key start
LH: loop header
LB: loop body
LE: loop exit
PB: predicated region body
PF: predicated region fallthrough
CT: control target
= control target key end

     0   :  { %vm70_vm0 = vcmask 1045504   ;;  %vm16708_vm1 = vcmask 244736   ;;  %vm13624_vm2 = vmmov 1   ;;  %s16600_s0 = inlined_call_operand.vmem [shape: f32[16,30], index: 0, kind: input, shape index: {}]   ;;  %s16601_s1 = inlined_call_operand.vmem [shape: f32[16,4], index: 1, kind: input, shape index: {}]   ;;  %s16602_s2 = inlined_call_operand.vmem [shape: f32[16,30], index: 2, kind: input, shape index: {}]   ;;  %s16603_s3 = inlined_call_operand.vmem [shape: f32[16,4], index: 3, kind: input, shape index: {}]   ;;  %s16604_s4 = inlined_call_operand.vmem [shape: f32[48,40], index: 4, kind: input, shape index: {}]   ;;  %s16605_s5 = inlined_call_operand.vmem [shape: f32[64,320], index: 5, kind: input, shape index: {}]   ;;  %s16606_s6 = inlined_call_operand.vmem [shape: bf16[320,600], index: 6, kind: input, shape index: {}]   ;;  %s16607_s7 = inlined_call_operand.vmem [shape: f32[1,600], index: 7, kind: input, shape index: {}]   ;;  %s16608_s8 = inlined_call_operand.vmem [shape: f32[608,30], index: 8, kind: input, shape index: {}]   ;;  %s16609_s9 = inlined_call_operand.vmem [shape: f32[1200,32], index: 9, kind: input, shape index: {}]   ;;  %s16610_s10 = inlined_call_operand.vmem [shape: f32[344,32], index: 10, kind: input, shape index: {}]   ;;  %s16611_s11 = inlined_call_operand.vmem [shape: f32[56,16], index: 11, kind: input, shape index: {}]   ;;  %s16612_s12 = inlined_call_operand.vmem [shape: f32[8,16], index: 12, kind: input, shape index: {}]   ;;  %s16613_s13 = inlined_call_operand.vmem [shape: f32[33,10], index: 13, kind: input, shape index: {}]   ;;  %s16614_s14 = inlined_call_operand.hbm [shape: f32[8,10], index: 14, kind: output, shape index: {}]  }
   0x1   :  { %v53_v0 = vld [vmem:[%s16604_s4] sm:$0xff]  ;;  %v54_v1 = vld [vmem:[%s16604_s4 + $0x8] sm:$0xff]  ;;  %v55_v2 = vld [vmem:[%s16604_s4 + $0x10] sm:$0xff] }
   0x2   :  { %v13721_v3 = vpack.c.bf16 %v54_v1, %v53_v0  ;;  %v56_v4 = vld [vmem:[%s16604_s4 + $0x18] sm:$0x3f]  ;;  %v13729_v5 = vld [vmem:[%s16600_s0] sm:$0xff]  ;;  %vm13733_vm3 = vmpackc.low %vm70_vm0, %vm13624_vm2 }
   0x3   :  { %v13731_v6 = vpack.c.bf16 %v56_v4, %v55_v2  ;;  %11514 = vmatprep.mubr.msk.f32.mxu0 %vm16708_vm1, %v13729_v5  ;;  %v13747_v8 = vld [vmem:[%s16600_s0 + $0x8] sm:$0xff] }
   0x4   :  { %12305 = vmatprep.subr.bf16.mxu0 %v13721_v3 }
   0x5   :  { %12307 = vmatpush3.bf16.msra.mxu0 %v13721_v3 }
   0x6   :  { %12310 = vmatprep.subr.msk.bf16.mxu0 %vm13733_vm3, %v13731_v6 }
   0x9   :  { %12313 = vmatpush3.bf16.msk.msra.mxu0 %vm13733_vm3, %v13731_v6 }
   0xc   :  { %11515 = vmatmul.mubr.msk.f32.vlgmr.msra.gmra.mrb[0].mxu0 %vm16708_vm1, %v13747_v8 }
   0xd   :  { %19 = vsyncpa [#allocation3], 0  ;;  %v10498_v9 = vld [vmem:[%s16604_s4 + $0x28] ss:$0 sm:$0xff]  ;;  %s13625_s27 = smov 108   ;;  %v390_v15 = vld [vmem:[%s16605_s5 + $0x80] sm:$0xff] }
   0xe   :  { %368 = vrot.lane.b32.xlu1 %v10498_v9, %s13625_s27  ;;  %v10494_v10 = vld [vmem:[%s16604_s4 + $0x20] ss:$0 sm:$0xff]  ;;  %v393_v16 = vld [vmem:[%s16605_s5 + $0x98] sm:$0xff]  ;;  %v392_v19 = vld [vmem:[%s16605_s5 + $0x90] sm:$0xff]  ;;  %vm16705_vm4 = vcmask 1043456   ;;  %v16629_v29 = vmov 0.0  }
   0xf   :  { %v389_v17 = vld [vmem:[%s16605_s5 + $0x78] sm:$0xff]  ;;  %v13778_v18 = vpack.c.bf16 %v393_v16, %v390_v15  ;;  %v391_v21 = vld [vmem:[%s16605_s5 + $0x88] sm:$0xff]  ;;  %v394_v22 = vld [vmem:[%s16605_s5 + $0xa0] sm:$0xff]  ;;  %479 = vmatprep.mubr.f32.mxu1 %v16629_v29  ;;  %v16627_v54 = vmov 683565275   ;;  %s13636_s25 = smov [#allocation2]  }
  0x10   :  { %v13783_v20 = vpack.c.bf16 %v392_v19, %v389_v17  ;;  %v13793_v23 = vpack.c.bf16 %v394_v22, %v391_v21  ;;  %v396_v24 = vld [vmem:[%s16605_s5 + $0xb0] sm:$0xf]  ;;  %v376_v25 = vld [vmem:[%s16605_s5 + $0x8] sm:$0xff]  ;;  %v379_v26 = vld [vmem:[%s16605_s5 + $0x20] sm:$0xff]  ;;  %v16625_v58 = vmov 2475754826  }
  0x11   :  { %12315 = vmatprep.subr.bf16.mxu1 %v13778_v18  ;;  %v395_v27 = vld [vmem:[%s16605_s5 + $0xa8] sm:$0xf]  ;;  %v13809_v28 = vpack.c.bf16 %v379_v26, %v376_v25  ;;  %v397_v30 = vld [vmem:[%s16605_s5 + $0xb8] sm:$0xf]  ;;  %v377_v31 = vld [vmem:[%s16605_s5 + $0x10] sm:$0xff] }
  0x12   :  { %12317 = vmatpush1.bf16.msra.mxu1 %v13783_v20  ;;  %12319 = vmatprep.subr.bf16.mxu0 %v13793_v23  ;;  %v380_v32 = vld [vmem:[%s16605_s5 + $0x28] sm:$0xff]  ;;  %v16623_v60 = vmov 2131351028   ;;  %v16621_v62 = vmov 2102212464  }
  0x13   :  { %10508 = vmatprep.subr.msk.mxu1 %vm16705_vm4, %v396_v24  ;;  %12321 = vmatpush3.bf16.msra.mxu0 %v13793_v23  ;;  %v13825_v33 = vpack.c.bf16 %v380_v32, %v377_v31  ;;  %v16619_v0 = vmov 920167782  }
  0x14   :  { %11521 = vmatprep.subr.msk.mxu0 %vm16705_vm4, %v397_v30 }
  0x16   :  { %10509 = vmatpush1.msk.msra.mxu1 %vm16705_vm4, %v395_v27 }
  0x17   :  { %12323 = vmatprep.subr.bf16.mxu1 %v13809_v28  ;;  %11522 = vmatpush3.msk.msra.mxu0 %vm16705_vm4, %v397_v30 }
  0x18   :  { %12333 = vmatprep.subr.bf16.mxu0 %v13825_v33 }
  0xdf   :  { %v11516_v11 = vpop.f32.mrb[0].mxu0 }
  0xe0   :  { %v140_v12 = vpop.f32.mrb[1].mxu0  ;;  %v13765_v14 = vadd.f32 %v11516_v11, %v10494_v10 }
  0xe1   :  { %v13761_v13 = vadd.f32 %v10494_v10, %v140_v12  ;;  %v16617_v12 = vmov 1326507024  }
  0xe3   :  { %155 = vrot.lane.b32.xlu0 %v13761_v13, %s13625_s27 }
  0xe7   :  { %157 = vrot.lane.b32.xlu0 %v13765_v14, %s13625_s27 }
 0x155   :  { %v156_v34 = vpop.permute.xlu0 %155 }
 0x156   :  { %v161_v35 = vsub.f32 %v10498_v9, %v156_v34 }
 0x158   :  { %v13829_v36 = vand.u32 2147483647, %v161_v35 }
 0x159   :  { %v158_v37 = vpop.permute.xlu0 %157 }
 0x15a   :  { %v167_v38 = vand.u32 2139095040, %v13829_v36  ;;  %v162_v39 = vsub.f32 %v10498_v9, %v158_v37  ;;  %v171_v42 = vand.u32 8388607, %v13829_v36 }
 0x15c   :  { %v168_v40 = vshrl.u32 %v167_v38, 23  ;;  %v13832_v41 = vand.u32 2147483647, %v162_v39  ;;  %v172_v47 = vor.u32 8388608, %v171_v42 }
 0x15e   :  { %v10499_v43 = vadd.s32 4294967169, %v168_v40  ;;  %v267_v44 = vand.u32 2139095040, %v13832_v41  ;;  %v13836_v52 = vshll.u32 %v172_v47, 8  ;;  %v271_v56 = vand.u32 8388607, %v13832_v41 }
 0x160   :  { %v174_v45 = vadd.s32 1, %v10499_v43  ;;  %v268_v46 = vshrl.u32 %v267_v44, 23  ;;  %v272_v35 = vor.u32 8388608, %v271_v56 }
 0x162   :  { %vm175_vm5 = vcmp.gt.s32.totalorder %v174_v45, 0  ;;  %v10503_v48 = vadd.s32 4294967169, %v268_v46 }
 0x163   :  { %v176_v49 = vsel %vm175_vm5, %v174_v45, 0 }
 0x164   :  { %v177_v50 = vshrl.u32 %v176_v49, 5  ;;  %v178_v51 = vand.u32 31, %v176_v49  ;;  %v274_v57 = vadd.s32 1, %v10503_v48 }
 0x166   :  { %v179_v53 = vsub.s32 32, %v178_v51  ;;  %v181_v55 = vshll.u32 %v16627_v54, %v178_v51  ;;  %v184_v59 = vshll.u32 %v16625_v58, %v178_v51  ;;  %v187_v61 = vshll.u32 %v16623_v60, %v178_v51 }
 0x167   :  { %v190_v63 = vshll.u32 %v16621_v62, %v178_v51  ;;  %v193_v1 = vshll.u32 %v16619_v0, %v178_v51  ;;  %vm196_vm6 = vcmp.lt.s32.totalorder %v177_v50, 1  ;;  %vm198_vm7 = vcmp.lt.s32.totalorder %v177_v50, 3 }
 0x168   :  { %v182_v2 = vshrl.u32 %v16625_v58, %v179_v53  ;;  %v185_v4 = vshrl.u32 %v16623_v60, %v179_v53  ;;  %v188_v9 = vshrl.u32 %v16621_v62, %v179_v53  ;;  %v180_v10 = vshrl.u32 %v16627_v54, %v179_v53 }
 0x169   :  { %v191_v11 = vshrl.u32 %v16619_v0, %v179_v53  ;;  %v194_v15 = vshrl.u32 %v16617_v12, %v179_v53  ;;  %vm275_vm8 = vcmp.gt.s32.totalorder %v274_v57, 0  ;;  %vm199_vm9 = vcmp.lt.s32.totalorder %v177_v50, 4 }
 0x16a   :  { %v183_v16 = vor.u32 %v182_v2, %v181_v55  ;;  %v186_v17 = vor.u32 %v185_v4, %v184_v59  ;;  %v189_v19 = vor.u32 %v188_v9, %v187_v61  ;;  %v276_v24 = vsel %vm275_vm8, %v274_v57, 0 }
 0x16b   :  { %v192_v21 = vor.u32 %v191_v11, %v190_v63  ;;  %v195_v22 = vor.u32 %v194_v15, %v193_v1  ;;  %vm197_vm10 = vcmp.lt.s32.totalorder %v177_v50, 2  ;;  %v278_v39 = vand.u32 31, %v276_v24 }
 0x16c   :  { %v200_v25 = vsel %vm196_vm6, %v180_v10, %v183_v16  ;;  %v201_v26 = vsel %vm199_vm9, %v189_v19, 2102212464  ;;  %v204_v27 = vsel %vm196_vm6, %v183_v16, %v186_v17  ;;  %v208_v30 = vsel %vm196_vm6, %v186_v17, %v189_v19 }
 0x16d   :  { %v202_v31 = vsel %vm198_vm7, %v186_v17, %v201_v26  ;;  %v205_v32 = vsel %vm199_vm9, %v192_v21, 920167782  ;;  %v209_v34 = vsel %vm199_vm9, %v195_v22, 1326507024  ;;  %v277_v48 = vshrl.u32 %v276_v24, 5 }
 0x16e   :  { %v206_v37 = vsel %vm198_vm7, %v189_v19, %v205_v32  ;;  %v210_v38 = vsel %vm198_vm7, %v192_v21, %v209_v34  ;;  %v203_v40 = vsel %vm197_vm10, %v200_v25, %v202_v31  ;;  %v279_v49 = vsub.s32 32, %v278_v39 }
 0x16f   :  { %v207_v42 = vsel %vm197_vm10, %v204_v27, %v206_v37  ;;  %v211_v43 = vsel %vm197_vm10, %v208_v30, %v210_v38  ;;  %v312_v51 = vshll.u32 %v272_v35, 8  ;;  %v219_v53 = vmul.u32 %v13836_v52, %v203_v40 }
 0x170   :  { %v13857_v44 = vmul.u32.u64.low %v13836_v52, %v211_v43  ;;  %v13858_v45 = vmul.u32.u64.high %v13836_v52, %v211_v43, %v13857_v44  ;;  %v13861_v46 = vmul.u32.u64.low %v13836_v52, %v207_v42  ;;  %v13862_v47 = vmul.u32.u64.high %v13836_v52, %v207_v42, %v13861_v46 }
 0x171   :  { %v281_v50 = vshll.u32 %v16627_v54, %v278_v39  ;;  %v284_v55 = vshll.u32 %v16625_v58, %v278_v39  ;;  %v287_v56 = vshll.u32 %v16623_v60, %v278_v39  ;;  %v282_v57 = vshrl.u32 %v16625_v58, %v279_v49 }
 0x172   :  { %v285_v59 = vshrl.u32 %v16623_v60, %v279_v49  ;;  %v288_v61 = vshrl.u32 %v16621_v62, %v279_v49  ;;  %v290_v63 = vshll.u32 %v16621_v62, %v278_v39  ;;  %vm221_vm11 = vc.u32 %v13858_v45, %v13861_v46 }
 0x173   :  { %v222_v1 = vadd.s32 1, %v13862_v47  ;;  %v291_v52 = vshrl.u32 %v16619_v0, %v279_v49  ;;  %v293_v2 = vshll.u32 %v16619_v0, %v278_v39  ;;  %v283_v4 = vor.u32 %v282_v57, %v281_v50 }
 0x174   :  { %v286_v9 = vor.u32 %v285_v59, %v284_v55  ;;  %v289_v10 = vor.u32 %v288_v61, %v287_v56  ;;  %v294_v11 = vshrl.u32 %v16617_v12, %v279_v49  ;;  %vm296_vm12 = vcmp.lt.s32.totalorder %v277_v48, 1  ;;  %v1820_v12 = vld [vmem:[%s16608_s8 + $0x170] sm:$0xff] }
 0x175   :  { %v223_v15 = vsel %vm221_vm11, %v222_v1, %v13862_v47  ;;  %v292_v16 = vor.u32 %v291_v52, %v290_v63  ;;  %vm299_vm13 = vcmp.lt.s32.totalorder %v277_v48, 4  ;;  %vm298_vm14 = vcmp.lt.s32.totalorder %v277_v48, 3 }
 0x176   :  { %v224_v17 = vadd.s32 %v223_v15, %v219_v53  ;;  %v295_v19 = vor.u32 %v294_v11, %v293_v2  ;;  %v301_v21 = vsel %vm299_vm13, %v289_v10, 2102212464  ;;  %v280_v22 = vshrl.u32 %v16627_v54, %v279_v49 }
 0x177   :  { %v304_v24 = vsel %vm296_vm12, %v283_v4, %v286_v9  ;;  %v305_v25 = vsel %vm299_vm13, %v292_v16, 920167782  ;;  %v308_v26 = vsel %vm296_vm12, %v286_v9, %v289_v10  ;;  %vm297_vm15 = vcmp.lt.s32.totalorder %v277_v48, 2 }
 0x178   :  { %v13881_v27 = vadd.s32 536870912, %v224_v17  ;;  %v306_v30 = vsel %vm298_vm14, %v289_v10, %v305_v25  ;;  %v309_v31 = vsel %vm299_vm13, %v295_v19, 1326507024  ;;  %v300_v32 = vsel %vm296_vm12, %v280_v22, %v283_v4 }
 0x179   :  { %v302_v34 = vsel %vm298_vm14, %v286_v9, %v301_v21  ;;  %v307_v35 = vsel %vm297_vm15, %v304_v24, %v306_v30  ;;  %v310_v37 = vsel %vm298_vm14, %v292_v16, %v309_v31  ;;  %v220_v10 = vadd.s32 %v13861_v46, %v13858_v45 }
 0x17a   :  { %v226_v38 = vshrl.u32 %v13881_v27, 30  ;;  %v311_v39 = vsel %vm297_vm15, %v308_v26, %v310_v37  ;;  %v13884_v40 = vmul.u32.u64.low %v312_v51, %v307_v35  ;;  %v13885_v42 = vmul.u32.u64.high %v312_v51, %v307_v35, %v13884_v40 }
 0x17b   :  { %v13887_v43 = vmul.u32.u64.low %v312_v51, %v311_v39  ;;  %v13888_v44 = vmul.u32.u64.high %v312_v51, %v311_v39, %v13887_v43  ;;  %v303_v49 = vsel %vm297_vm15, %v300_v32, %v302_v34  ;;  %vm166_vm6 = vcmp.le.f32.partialorder %v13829_v36, 0.7853982 }
 0x17c   :  { %v227_v47 = vshll.u32 %v226_v38, 30  ;;  %v322_v48 = vadd.s32 1, %v13885_v42  ;;  %v319_v50 = vmul.u32 %v312_v51, %v303_v49  ;;  %vm266_vm7 = vcmp.le.f32.partialorder %v13832_v41, 0.7853982 }
 0x17d   :  { %vm321_vm0 = vc.u32 %v13888_v44, %v13884_v40  ;;  %v320_v45 = vadd.s32 %v13884_v40, %v13888_v44  ;;  %vm254_vm11 = vweird.f32 %v13829_v36  ;;  %vm398_vm12 = vcmask 162816  }
 0x17e   :  { %v228_v53 = vsub.s32 %v224_v17, %v227_v47  ;;  %v323_v56 = vsel %vm321_vm0, %v322_v48, %v13885_v42  ;;  %v251_v48 = vsel %vm166_vm6, 0, %v226_v38  ;;  %vm354_vm0 = vweird.f32 %v13832_v41 }
 0x17f   :  { %v324_v57 = vadd.s32 %v323_v56, %v319_v50  ;;  %v255_v56 = vand.u32 3, %v251_v48  ;;  %v13038_v48 = vld [vmem:[%s16606_s6 + $0x8] ss:$20 sps:$4 sm:$0xff]  }
 0x180   :  { %v230_v55 = vsub.s32 0, %v228_v53 }
 0x181   :  { %v325_v61 = vadd.s32 536870912, %v324_v57  ;;  %vm260_vm8 = vcmp.eq.s32.totalorder %v255_v56, 2  ;;  %vm257_vm9 = vcmp.eq.s32.totalorder %v255_v56, 0  ;;  %vm256_vm10 = vcmp.lt.s32.totalorder %v255_v56, 2  ;;  %v13044_v56 = vld [vmem:[%s16606_s6 + $0x30] ss:$20 sps:$4 sm:$0xff]  }
 0x182   :  { %v10500_v59 = vmin.u32 %v230_v55, %v228_v53 }
 0x183   :  { %v326_v1 = vshrl.u32 %v325_v61, 30 }
 0x184   :  { %v232_v63 = vclz %v10500_v59 }
 0x185   :  { %v327_v2 = vshll.u32 %v326_v1, 30 }
 0x186   :  { %v10501_v52 = vadd.s32 4294967294, %v232_v63 }
 0x187   :  { %v328_v9 = vsub.s32 %v324_v57, %v327_v2 }
 0x188   :  { %vm10502_vm2 = vcmp.lt.s32.totalorder %v10501_v52, 0 }
 0x189   :  { %v235_v4 = vsel %vm10502_vm2, 0, %v10501_v52  ;;  %v330_v15 = vsub.s32 0, %v328_v9  ;;  %vm16662_vm2 = vcmask 523264  }
 0x18a   :  { %v236_v11 = vsub.s32 32, %v235_v4  ;;  %v240_v51 = vsub.s32 4294967266, %v235_v4  ;;  %v237_v16 = vshll.u32 %v228_v53, %v235_v4  ;;  %v351_v4 = vsel %vm266_vm7, 0, %v326_v1 }
 0x18b   :  { %v10504_v21 = vmin.u32 %v330_v15, %v328_v9  ;;  %v378_v15 = vld [vmem:[%s16605_s5 + $0x18] sm:$0xff]  ;;  %v355_v1 = vand.u32 3, %v351_v4  ;;  %v13067_v4 = vld [vmem:[%s16606_s6 + $0xcc] ss:$20 sps:$4 sm:$0xff]  }
 0x18c   :  { %v238_v17 = vshrl.u32 %v220_v10, %v236_v11  ;;  %v241_v19 = vadd.s32 127, %v240_v51  ;;  %v375_v51 = vld [vmem:[%s16605_s5] sm:$0xff] }
 0x18d   :  { %v332_v25 = vclz %v10504_v21  ;;  %vm360_vm13 = vcmp.eq.s32.totalorder %v355_v1, 2  ;;  %vm357_vm14 = vcmp.eq.s32.totalorder %v355_v1, 0  ;;  %vm356_vm15 = vcmp.lt.s32.totalorder %v355_v1, 2  ;;  %v13076_v1 = vld [vmem:[%s16606_s6 + $0xfc] ss:$20 sps:$4 sm:$0xff]  }
 0x18e   :  { %v239_v22 = vor.u32 %v238_v17, %v237_v16  ;;  %v242_v24 = vshll.u32 %v241_v19, 23  ;;  %v382_v16 = vld [vmem:[%s16605_s5 + $0x38] sm:$0xff] }
 0x18f   :  { %v10505_v27 = vadd.s32 4294967294, %v332_v25  ;;  %v384_v25 = vld [vmem:[%s16605_s5 + $0x48] sm:$0x3f] }
 0x190   :  { %v243_v26 = vor.u32 4788187, %v242_v24  ;;  %v246_v31 = vcvt.s32.f32 %v239_v22  ;;  %v381_v24 = vld [vmem:[%s16605_s5 + $0x30] sm:$0xff] }
 0x191   :  { %vm10506_vm5 = vcmp.lt.s32.totalorder %v10505_v27, 0 }
 0x192   :  { %v244_v30 = vand.u32 2147483647, %v243_v26  ;;  %v335_v34 = vsel %vm10506_vm5, 0, %v10505_v27  ;;  %vm16706_vm5 = vmmov 0  }
 0x193   :  { %v336_v46 = vsub.s32 32, %v335_v34  ;;  %v340_v35 = vsub.s32 4294967266, %v335_v34  ;;  %v337_v39 = vshll.u32 %v328_v9, %v335_v34  ;;  %v13901_v9 = vpop.permute.xlu1 %368 }
 0x194   :  { %v247_v32 = vmul.f32 %v246_v31, %v244_v30 }
 0x195   :  { %v338_v42 = vshrl.u32 %v320_v45, %v336_v46  ;;  %v341_v43 = vadd.s32 127, %v340_v35  ;;  %v13037_v45 = vld [vmem:[%s16606_s6 + $0x4] ss:$20 sps:$4 sm:$0xff]  }
 0x196   :  { %v250_v37 = vsel %vm166_vm6, %v13829_v36, %v247_v32  ;;  %v385_v36 = vld [vmem:[%s16605_s5 + $0x50] sm:$0x3f]  ;;  %v13931_v32 = vpack.c.bf16 %v384_v25, %v381_v24  ;;  %v13077_v24 = vld [vmem:[%s16606_s6 + $0x118] ss:$20 sps:$4 sm:$0xff]   ;;  %vm16661_vm6 = vcmask 719872  }
 0x197   :  { %13175 = vcosq.f32 %v250_v37  ;;  %v339_v47 = vor.u32 %v338_v42, %v337_v39  ;;  %v342_v49 = vshll.u32 %v341_v43, 23  ;;  %v13919_v22 = vpack.c.bf16 %v385_v36, %v382_v16  ;;  %v383_v39 = vld [vmem:[%s16605_s5 + $0x40] sm:$0xff]  ;;  %v386_v42 = vld [vmem:[%s16605_s5 + $0x58] sm:$0x3f] }
 0x198   :  { %13177 = vsinq.f32 %v250_v37  ;;  %v13068_v16 = vld [vmem:[%s16606_s6 + $0xd0] ss:$20 sps:$4 sm:$0xff]   ;;  %v13080_v25 = vld [vmem:[%s16606_s6 + $0x120] ss:$20 sps:$4 sm:$0xff]  }
 0x199   :  { %v343_v53 = vor.u32 4788187, %v342_v49  ;;  %v346_v55 = vcvt.s32.f32 %v339_v47  ;;  %v13951_v47 = vpack.c.bf16 %v386_v42, %v383_v39  ;;  %v13040_v49 = vld [vmem:[%s16606_s6 + $0xc] ss:$20 sps:$4 sm:$0xff]   ;;  %v13071_v36 = vld [vmem:[%s16606_s6 + $0xf0] ss:$20 sps:$4 sm:$0xff]  }
 0x19a   :  { %v13100_v39 = vld [vmem:[%s16606_s6 + $0x19c] ss:$20 sps:$4 sm:$0xff]  }
 0x19b   :  { %v344_v50 = vand.u32 2147483647, %v343_v53  ;;  %v13043_v53 = vld [vmem:[%s16606_s6 + $0x2c] ss:$20 sps:$4 sm:$0xff]   ;;  %v13095_v42 = vld [vmem:[%s16606_s6 + $0x190] ss:$20 sps:$4 sm:$0xff]  }
 0x19d   :  { %v347_v57 = vmul.f32 %v346_v55, %v344_v50  ;;  %v13041_v50 = vld [vmem:[%s16606_s6 + $0x28] ss:$20 sps:$4 sm:$0xff]  }
 0x19e   :  { %v13049_v55 = vld [vmem:[%s16606_s6 + $0x54] ss:$20 sps:$4 sm:$0xff]  }
 0x19f   :  { %v350_v44 = vsel %vm266_vm7, %v13832_v41, %v347_v57  ;;  %v13047_v57 = vld [vmem:[%s16606_s6 + $0x50] ss:$20 sps:$4 sm:$0xff]   ;;  %vm16660_vm7 = vcmask 31744  }
 0x1a0   :  { %13179 = vcosq.f32 %v350_v44 }
 0x1a1   :  { %v13176_v40 = vpop.eup %13175  ;;  %13181 = vsinq.f32 %v350_v44  ;;  %v13050_v44 = vld [vmem:[%s16606_s6 + $0x58] ss:$20 sps:$4 sm:$0xff]  }
 0x1a2   :  { %v13178_v59 = vpop.eup %13177  ;;  %v261_v61 = vxor.u32 2147483648, %v13176_v40 }
 0x1a3   :  { %v258_v63 = vxor.u32 2147483648, %v13178_v59 }
 0x1a4   :  { %v262_v52 = vsel %vm260_vm8, %v261_v61, %v13178_v59  ;;  %v13053_v59 = vld [vmem:[%s16606_s6 + $0x78] ss:$20 sps:$4 sm:$0xff]   ;;  %vm16704_vm8 = vcmask 261120  }
 0x1a5   :  { %v259_v2 = vsel %vm257_vm9, %v13176_v40, %v258_v63  ;;  %v13052_v40 = vld [vmem:[%s16606_s6 + $0x5c] ss:$20 sps:$4 sm:$0xff]   ;;  %v13058_v61 = vld [vmem:[%s16606_s6 + $0x84] ss:$20 sps:$4 sm:$0xff]  }
 0x1a6   :  { %v263_v38 = vsel %vm256_vm10, %v259_v2, %v262_v52  ;;  %v13061_v63 = vld [vmem:[%s16606_s6 + $0xa4] ss:$20 sps:$4 sm:$0xff]   ;;  %v13056_v52 = vld [vmem:[%s16606_s6 + $0x80] ss:$20 sps:$4 sm:$0xff]  }
 0x1a7   :  { %v264_v10 = vsel %vm254_vm11, nan, %v263_v38  ;;  %v13059_v2 = vld [vmem:[%s16606_s6 + $0xa0] ss:$20 sps:$4 sm:$0xff]  }
 0x1a8   :  { %v365_v11 = vmul.f32 %v264_v10, %v13761_v13  ;;  %v13917_v13 = vpack.c.bf16 %v378_v15, %v375_v51  ;;  %v13064_v38 = vld [vmem:[%s16606_s6 + $0xac] ss:$20 sps:$4 sm:$0xff]   ;;  %v13062_v10 = vld [vmem:[%s16606_s6 + $0xa8] ss:$20 sps:$4 sm:$0xff]  }
 0x1a9   :  { %v13070_v51 = vld [vmem:[%s16606_s6 + $0xd4] ss:$20 sps:$4 sm:$0xff]  }
 0x1aa   :  { %v371_v17 = vmul.f32 %v13901_v9, %v365_v11  ;;  %v13180_v19 = vpop.eup %13179  ;;  %v13065_v11 = vld [vmem:[%s16606_s6 + $0xc8] ss:$20 sps:$4 sm:$0xff]  }
 0x1ab   :  { %v13182_v26 = vpop.eup %13181  ;;  %v361_v27 = vxor.u32 2147483648, %v13180_v19  ;;  %v13073_v15 = vld [vmem:[%s16606_s6 + $0xf4] ss:$20 sps:$4 sm:$0xff]  }
 0x1ac   :  { %v373_v21 = vmax.f32 %v371_v17, 0.0  ;;  %v358_v30 = vxor.u32 2147483648, %v13182_v26  ;;  %v13074_v17 = vld [vmem:[%s16606_s6 + $0xf8] ss:$20 sps:$4 sm:$0xff]  }
 0x1ad   :  { %v362_v31 = vsel %vm360_vm13, %v361_v27, %v13182_v26  ;;  %v13085_v26 = vld [vmem:[%s16606_s6 + $0x144] ss:$20 sps:$4 sm:$0xff]   ;;  %v13088_v27 = vld [vmem:[%s16606_s6 + $0x14c] ss:$20 sps:$4 sm:$0xff]  }
 0x1ae   :  { %10510 = vmatmul.mubr.msk.f32.vlgmr.msra.gmra.mrb[0].mxu1 %vm398_vm12, %v373_v21  ;;  %11523 = vmatprep.mubr.msk.f32.mxu0 %vm398_vm12, %v373_v21  ;;  %v359_v34 = vsel %vm357_vm14, %v13180_v19, %v358_v30  ;;  %v13079_v19 = vld [vmem:[%s16606_s6 + $0x11c] ss:$20 sps:$4 sm:$0xff]   ;;  %v13082_v21 = vld [vmem:[%s16606_s6 + $0x124] ss:$20 sps:$4 sm:$0xff]   ;;  %v13083_v30 = vld [vmem:[%s16606_s6 + $0x140] ss:$20 sps:$4 sm:$0xff]  }
 0x1af   :  { %12325 = vmatpush1.bf16.msra.mxu1 %v13917_v13  ;;  %485 = vmatprep.mubr.f32.mxu1 %v16629_v29  ;;  %v363_v46 = vsel %vm356_vm15, %v359_v34, %v362_v31  ;;  %v13086_v31 = vld [vmem:[%s16606_s6 + $0x148] ss:$20 sps:$4 sm:$0xff]   ;;  %v13091_v34 = vld [vmem:[%s16606_s6 + $0x16c] ss:$20 sps:$4 sm:$0xff]  }
 0x1b0   :  { %12328 = vmatprep.subr.msk.bf16.mxu1 %vm13733_vm3, %v13919_v22  ;;  %v364_v35 = vsel %vm354_vm0, nan, %v363_v46  ;;  %v13089_v46 = vld [vmem:[%s16606_s6 + $0x168] ss:$20 sps:$4 sm:$0xff]  }
 0x1b1   :  { %v366_v37 = vmul.f32 %v364_v35, %v13765_v14  ;;  %v13035_v14 = vld [vmem:[%s16606_s6] ss:$20 sps:$4 sm:$0xff]   ;;  %v13092_v35 = vld [vmem:[%s16606_s6 + $0x170] ss:$20 sps:$4 sm:$0xff]  }
 0x1b3   :  { %12331 = vmatpush1.bf16.msk.msra.mxu1 %vm13733_vm3, %v13931_v32  ;;  %v372_v43 = vmul.f32 %v13901_v9, %v366_v37  ;;  %v13097_v37 = vld [vmem:[%s16606_s6 + $0x194] ss:$20 sps:$4 sm:$0xff]  }
 0x1b4   :  { %1460 = vmatprep.subr.bf16.mxu1 %v13037_v45  ;;  %v13094_v45 = vld [vmem:[%s16606_s6 + $0x174] ss:$20 sps:$4 sm:$0xff]  }
 0x1b5   :  { %v374_v41 = vmax.f32 %v372_v43, 0.0  ;;  %v13098_v43 = vld [vmem:[%s16606_s6 + $0x198] ss:$20 sps:$4 sm:$0xff]  }
 0x1b7   :  { %10511 = vmatmul.mubr.msk.f32.gmra.mrb[2].mxu1 %vm398_vm12, %v374_v41  ;;  %11524 = vmatmul.mubr.msk.f32.vlgmr.msra.gmra.mrb[2].mxu0 %vm398_vm12, %v374_v41  ;;  %v13103_v41 = vld [vmem:[%s16606_s6 + $0x1bc] ss:$20 sps:$4 sm:$0xff]  }
 0x1b8   :  { %12335 = vmatpush3.bf16.msra.mxu0 %v13825_v33  ;;  %640 = vmatprep.mubr.f32.mxu1 %v16629_v29 }
 0x1b9   :  { %12338 = vmatprep.subr.msk.bf16.mxu0 %vm13733_vm3, %v13951_v47  ;;  %11534 = vmatprep.mubr.msk.f32.mxu0 %vm16708_vm1, %v13729_v5 }
 0x1bb   :  { %10517 = vmatmul.mubr.msk.f32.vlgmr.msra.gmra.mrb[0].mxu1 %vm16708_vm1, %v13729_v5  ;;  %v13046_v5 = vld [vmem:[%s16606_s6 + $0x34] ss:$20 sps:$4 sm:$0xff]  }
 0x1bc   :  { %12341 = vmatpush3.bf16.msk.msra.mxu0 %vm13733_vm3, %v13951_v47  ;;  %646 = vmatprep.mubr.f32.mxu1 %v16629_v29 }
 0x1bd   :  { %1546 = vmatprep.subr.bf16.mxu0 %v13040_v49  ;;  %1461 = vmatpush1.bf16.msra.mxu1 %v13035_v14  ;;  %v13106_v14 = vld [vmem:[%s16606_s6 + $0x1c4] ss:$20 sps:$4 sm:$0xff]  }
 0x1be   :  { %1462 = vmatprep.subr.bf16.mxu1 %v13043_v53  ;;  %v13101_v49 = vld [vmem:[%s16606_s6 + $0x1b8] ss:$20 sps:$4 sm:$0xff]   ;;  %v13104_v53 = vld [vmem:[%s16606_s6 + $0x1c0] ss:$20 sps:$4 sm:$0xff]  }
 0x1bf   :  { %10518 = vmatmul.mubr.msk.f32.gmra.mrb[2].mxu1 %vm16708_vm1, %v13747_v8  ;;  %11535 = vmatmul.mubr.msk.f32.vlgmr.msra.gmra.mrb[2].mxu0 %vm16708_vm1, %v13747_v8  ;;  %v13055_v8 = vld [vmem:[%s16606_s6 + $0x7c] ss:$20 sps:$4 sm:$0xff]  }
 0x1c0   :  { %1547 = vmatpush1.bf16.msra.mxu0 %v13038_v48  ;;  %v13109_v48 = vld [vmem:[%s16606_s6 + $0x1e4] ss:$20 sps:$4 sm:$0xff]  }
 0x1c1   :  { %1548 = vmatprep.subr.bf16.mxu0 %v13046_v5  ;;  %1463 = vmatpush1.bf16.msra.mxu1 %v13041_v50  ;;  %v13112_v50 = vld [vmem:[%s16606_s6 + $0x1ec] ss:$20 sps:$4 sm:$0xff]  }
 0x1c2   :  { %1464 = vmatprep.subr.bf16.mxu1 %v13049_v55  ;;  %v13107_v5 = vld [vmem:[%s16606_s6 + $0x1e0] ss:$20 sps:$4 sm:$0xff]   ;;  %v13110_v55 = vld [vmem:[%s16606_s6 + $0x1e8] ss:$20 sps:$4 sm:$0xff]  }
 0x1c4   :  { %1549 = vmatpush1.bf16.msra.mxu0 %v13044_v56  ;;  %v13113_v56 = vld [vmem:[%s16606_s6 + $0x208] ss:$20 sps:$4 sm:$0xff]  }
 0x1c5   :  { %1550 = vmatprep.subr.bf16.mxu0 %v13052_v40  ;;  %1465 = vmatpush1.bf16.msra.mxu1 %v13047_v57  ;;  %v13115_v57 = vld [vmem:[%s16606_s6 + $0x20c] ss:$20 sps:$4 sm:$0xff]   ;;  %v13116_v40 = vld [vmem:[%s16606_s6 + $0x210] ss:$20 sps:$4 sm:$0xff]  }
 0x1c6   :  { %1466 = vmatprep.subr.bf16.mxu1 %v13055_v8  ;;  %v13118_v8 = vld [vmem:[%s16606_s6 + $0x214] ss:$20 sps:$4 sm:$0xff]  }
 0x1c8   :  { %1551 = vmatpush1.bf16.msra.mxu0 %v13050_v44  ;;  %v13121_v44 = vld [vmem:[%s16606_s6 + $0x234] ss:$20 sps:$4 sm:$0xff]  }
 0x1c9   :  { %1552 = vmatprep.subr.bf16.mxu0 %v13058_v61  ;;  %1467 = vmatpush1.bf16.msra.mxu1 %v13053_v59  ;;  %v13124_v59 = vld [vmem:[%s16606_s6 + $0x23c] ss:$20 sps:$4 sm:$0xff]  }
 0x1ca   :  { %1468 = vmatprep.subr.bf16.mxu1 %v13061_v63  ;;  %v13119_v61 = vld [vmem:[%s16606_s6 + $0x230] ss:$20 sps:$4 sm:$0xff]   ;;  %v13122_v63 = vld [vmem:[%s16606_s6 + $0x238] ss:$20 sps:$4 sm:$0xff]  }
 0x1cc   :  { %1553 = vmatpush1.bf16.msra.mxu0 %v13056_v52  ;;  %v13127_v52 = vld [vmem:[%s16606_s6 + $0x25c] ss:$20 sps:$4 sm:$0xff]  }
 0x1cd   :  { %1554 = vmatprep.subr.bf16.mxu0 %v13064_v38  ;;  %1469 = vmatpush1.bf16.msra.mxu1 %v13059_v2  ;;  %v13130_v2 = vld [vmem:[%s16606_s6 + $0x264] ss:$20 sps:$4 sm:$0xff]  }
 0x1ce   :  { %1470 = vmatprep.subr.bf16.mxu1 %v13067_v4  ;;  %v13125_v38 = vld [vmem:[%s16606_s6 + $0x258] ss:$20 sps:$4 sm:$0xff]   ;;  %v13128_v4 = vld [vmem:[%s16606_s6 + $0x260] ss:$20 sps:$4 sm:$0xff]  }
 0x1d0   :  { %1555 = vmatpush1.bf16.msra.mxu0 %v13062_v10  ;;  %v13133_v10 = vld [vmem:[%s16606_s6 + $0x284] ss:$20 sps:$4 sm:$0xff]  }
 0x1d1   :  { %1556 = vmatprep.subr.bf16.mxu0 %v13070_v51  ;;  %1471 = vmatpush1.bf16.msra.mxu1 %v13065_v11  ;;  %v13136_v11 = vld [vmem:[%s16606_s6 + $0x28c] ss:$20 sps:$4 sm:$0xff]   ;;  %v16631_v51 = vlaneseq }
 0x1d2   :  { %1472 = vmatprep.subr.bf16.mxu1 %v13073_v15 }
 0x1d3   :  { %v14168_v15 = vshrl.u32 %v16631_v51, 7 }
 0x1d4   :  { %1557 = vmatpush1.bf16.msra.mxu0 %v13068_v16 }
 0x1d5   :  { %1558 = vmatprep.subr.bf16.mxu0 %v13076_v1  ;;  %1473 = vmatpush1.bf16.msra.mxu1 %v13071_v36  ;;  %16711 = vst [vmem:[#allocation5_spill] sm:$0xff] %v14168_v15  ;;  %v731_v16 = vsub.s32 0, %v14168_v15  ;;  %v10507_v36 = vld [vmem:[%s16605_s5 + $0x60] ss:$8 sm:$0x7]  ;;  %v735_v1 = vsub.s32 1, %v14168_v15 }
 0x1d6   :  { %1474 = vmatprep.subr.bf16.mxu1 %v13079_v19  ;;  %v739_v19 = vsub.s32 2, %v14168_v15 }
 0x1d8   :  { %1559 = vmatpush1.bf16.msra.mxu0 %v13074_v17  ;;  %v14177_v17 = vrot.slane %v10507_v36, %v731_v16 }
 0x1d9   :  { %1560 = vmatprep.subr.bf16.mxu0 %v13082_v21  ;;  %1475 = vmatpush1.bf16.msra.mxu1 %v13077_v24  ;;  %v14182_v21 = vrot.slane %v10507_v36, %v735_v1 }
 0x1da   :  { %1476 = vmatprep.subr.bf16.mxu1 %v13085_v26 }
 0x1dc   :  { %1561 = vmatpush1.bf16.msra.mxu0 %v13080_v25 }
 0x1dd   :  { %1562 = vmatprep.subr.bf16.mxu0 %v13088_v27  ;;  %1477 = vmatpush1.bf16.msra.mxu1 %v13083_v30  ;;  %v14187_v27 = vrot.slane %v10507_v36, %v739_v19 }
 0x1de   :  { %1478 = vmatprep.subr.bf16.mxu1 %v13091_v34 }
 0x1e0   :  { %1563 = vmatpush1.bf16.msra.mxu0 %v13086_v31 }
 0x1e1   :  { %1564 = vmatprep.subr.bf16.mxu0 %v13094_v45  ;;  %1479 = vmatpush1.bf16.msra.mxu1 %v13089_v46 }
 0x1e2   :  { %1480 = vmatprep.subr.bf16.mxu1 %v13097_v37 }
 0x1e4   :  { %1565 = vmatpush1.bf16.msra.mxu0 %v13092_v35 }
 0x1e5   :  { %1566 = vmatprep.subr.bf16.mxu0 %v13100_v39  ;;  %1481 = vmatpush1.bf16.msra.mxu1 %v13095_v42 }
 0x1e6   :  { %1482 = vmatprep.subr.bf16.mxu1 %v13103_v41 }
 0x1e8   :  { %1567 = vmatpush1.bf16.msra.mxu0 %v13098_v43 }
 0x1e9   :  { %1568 = vmatprep.subr.bf16.mxu0 %v13106_v14  ;;  %1483 = vmatpush1.bf16.msra.mxu1 %v13101_v49 }
 0x1ea   :  { %1484 = vmatprep.subr.bf16.mxu1 %v13109_v48 }
 0x1ec   :  { %1569 = vmatpush1.bf16.msra.mxu0 %v13104_v53 }
 0x1ed   :  { %1570 = vmatprep.subr.bf16.mxu0 %v13112_v50  ;;  %1485 = vmatpush1.bf16.msra.mxu1 %v13107_v5 }
 0x1ee   :  { %1486 = vmatprep.subr.bf16.mxu1 %v13115_v57 }
 0x1f0   :  { %1571 = vmatpush1.bf16.msra.mxu0 %v13110_v55 }
 0x1f1   :  { %1572 = vmatprep.subr.bf16.mxu0 %v13118_v8  ;;  %1487 = vmatpush1.bf16.msra.mxu1 %v13113_v56 }
 0x1f2   :  { %1488 = vmatprep.subr.bf16.mxu1 %v13121_v44 }
 0x1f4   :  { %1573 = vmatpush1.bf16.msra.mxu0 %v13116_v40 }
 0x1f5   :  { %1574 = vmatprep.subr.bf16.mxu0 %v13124_v59  ;;  %1489 = vmatpush1.bf16.msra.mxu1 %v13119_v61 }
 0x1f6   :  { %1490 = vmatprep.subr.bf16.mxu1 %v13127_v52 }
 0x1f8   :  { %1575 = vmatpush1.bf16.msra.mxu0 %v13122_v63 }
 0x1f9   :  { %1576 = vmatprep.subr.bf16.mxu0 %v13130_v2  ;;  %1491 = vmatpush1.bf16.msra.mxu1 %v13125_v38 }
 0x1fa   :  { %1503 = vmatprep.subr.bf16.mxu1 %v13133_v10 }
 0x1fc   :  { %1577 = vmatpush1.bf16.msra.mxu0 %v13128_v4 }
 0x1fd   :  { %1589 = vmatprep.subr.bf16.mxu0 %v13136_v11 }
 0x28e   :  { %v642_v24 = vpop.f32.mrb[0].mxu1 }
 0x28f   :  { %v744_v25 = vadd.f32 %v14177_v17, %v642_v24  ;;  %v644_v26 = vpop.f32.mrb[1].mxu1 }
 0x290   :  { %v745_v30 = vadd.f32 %v14182_v21, %v644_v26  ;;  %v13131_v26 = vld [vmem:[%s16606_s6 + $0x280] ss:$20 sps:$4 sm:$0xff]  }
 0x291   :  { %v10522_v31 = vmul.f32 -1.442695, %v744_v25 }
 0x292   :  { %v10523_v34 = vmul.f32 -1.442695, %v745_v30  ;;  %v648_v45 = vpop.f32.mrb[2].mxu1  ;;  %v11536_v46 = vpop.f32.mrb[2].mxu0  ;;  %v13134_v30 = vld [vmem:[%s16606_s6 + $0x288] ss:$20 sps:$4 sm:$0xff]  }
 0x293   :  { %13183 = vpow2.f32 %v10522_v31  ;;  %v747_v35 = vadd.f32 %v14177_v17, %v648_v45  ;;  %v749_v37 = vadd.f32 %v11536_v46, %v14187_v27  ;;  %v650_v39 = vpop.f32.mrb[3].mxu1  ;;  %v719_v42 = vpop.f32.mrb[3].mxu0  ;;  %v13139_v31 = vld [vmem:[%s16606_s6 + $0x2ac] ss:$20 sps:$4 sm:$0xff]   ;;  %v13137_v46 = vld [vmem:[%s16606_s6 + $0x2a8] ss:$20 sps:$4 sm:$0xff]  }
 0x294   :  { %13185 = vpow2.f32 %v10523_v34  ;;  %v748_v43 = vadd.f32 %v14182_v21, %v650_v39  ;;  %v746_v41 = vadd.f32 %v14187_v27, %v719_v42  ;;  %v13142_v34 = vld [vmem:[%s16606_s6 + $0x2b4] ss:$20 sps:$4 sm:$0xff]   ;;  %v13148_v39 = vld [vmem:[%s16606_s6 + $0x2dc] ss:$20 sps:$4 sm:$0xff]   ;;  %v16615_v42 = vmov 0  }
 0x295   :  { %v10525_v14 = vmul.f32 -1.442695, %v747_v35  ;;  %v10527_v49 = vmul.f32 -1.442695, %v749_v37  ;;  %v13140_v35 = vld [vmem:[%s16606_s6 + $0x2b0] ss:$20 sps:$4 sm:$0xff]  }
 0x296   :  { %v10526_v53 = vmul.f32 -1.442695, %v748_v43  ;;  %v10524_v48 = vmul.f32 -1.442695, %v746_v41  ;;  %v13145_v37 = vld [vmem:[%s16606_s6 + $0x2d4] ss:$20 sps:$4 sm:$0xff]  }
 0x297   :  { %13187 = vpow2.f32 %v10525_v14  ;;  %v13143_v43 = vld [vmem:[%s16606_s6 + $0x2d0] ss:$20 sps:$4 sm:$0xff]   ;;  %v13146_v41 = vld [vmem:[%s16606_s6 + $0x2d8] ss:$20 sps:$4 sm:$0xff]  }
 0x298   :  { %13189 = vpow2.f32 %v10527_v49  ;;  %v13151_v14 = vld [vmem:[%s16606_s6 + $0x2fc] ss:$20 sps:$4 sm:$0xff]   ;;  %v13154_v49 = vld [vmem:[%s16606_s6 + $0x304] ss:$20 sps:$4 sm:$0xff]  }
 0x299   :  { %13191 = vpow2.f32 %v10526_v53  ;;  %v13149_v53 = vld [vmem:[%s16606_s6 + $0x2f8] ss:$20 sps:$4 sm:$0xff]  }
 0x29a   :  { %13193 = vpow2.f32 %v10524_v48  ;;  %v13152_v48 = vld [vmem:[%s16606_s6 + $0x300] ss:$20 sps:$4 sm:$0xff]  }
 0x29d   :  { %v13184_v50 = vpop.eup %13183 }
 0x29e   :  { %v13186_v5 = vpop.eup %13185  ;;  %v768_v55 = vadd.f32 1.0, %v13184_v50  ;;  %v13155_v50 = vld [vmem:[%s16606_s6 + $0x150] ss:$20 sps:$4 sm:$0xff]  }
 0x29f   :  { %v769_v56 = vadd.f32 1.0, %v13186_v5  ;;  %v13156_v5 = vld [vmem:[%s16606_s6 + $0x10] ss:$20 sps:$4 sm:$0xff]  }
 0x2a0   :  { %13195 = vrcp.f32 %v768_v55  ;;  %v13157_v55 = vld [vmem:[%s16606_s6 + $0x290] ss:$20 sps:$4 sm:$0xff]  }
 0x2a1   :  { %v13188_v57 = vpop.eup %13187  ;;  %13197 = vrcp.f32 %v769_v56  ;;  %v13158_v56 = vld [vmem:[%s16606_s6 + $0x178] ss:$20 sps:$4 sm:$0xff]  }
 0x2a2   :  { %v13190_v40 = vpop.eup %13189  ;;  %v771_v8 = vadd.f32 1.0, %v13188_v57  ;;  %v13159_v57 = vld [vmem:[%s16606_s6 + $0x38] ss:$20 sps:$4 sm:$0xff]  }
 0x2a3   :  { %v13192_v44 = vpop.eup %13191  ;;  %v773_v59 = vadd.f32 1.0, %v13190_v40  ;;  %v13160_v40 = vld [vmem:[%s16606_s6 + $0x2b8] ss:$20 sps:$4 sm:$0xff]  }
 0x2a4   :  { %v13194_v61 = vpop.eup %13193  ;;  %13199 = vrcp.f32 %v771_v8  ;;  %v772_v63 = vadd.f32 1.0, %v13192_v44  ;;  %v13161_v8 = vld [vmem:[%s16606_s6 + $0x1a0] ss:$20 sps:$4 sm:$0xff]  }
 0x2a5   :  { %13201 = vrcp.f32 %v773_v59  ;;  %v770_v52 = vadd.f32 1.0, %v13194_v61  ;;  %v13162_v44 = vld [vmem:[%s16606_s6 + $0x60] ss:$20 sps:$4 sm:$0xff]   ;;  %v13164_v61 = vld [vmem:[%s16606_s6 + $0x1c8] ss:$20 sps:$4 sm:$0xff]  }
 0x2a6   :  { %13203 = vrcp.f32 %v772_v63  ;;  %v13163_v59 = vld [vmem:[%s16606_s6 + $0x2e0] ss:$20 sps:$4 sm:$0xff]  }
 0x2a7   :  { %13205 = vrcp.f32 %v770_v52  ;;  %v1790_v63 = vld [vmem:[%s16608_s8 + $0x80] sm:$0xff]  ;;  %v1791_v52 = vld [vmem:[%s16608_s8 + $0x88] sm:$0xff] }
 0x2aa   :  { %v13196_v2 = vpop.eup %13195 }
 0x2ab   :  { %v13198_v38 = vpop.eup %13197 }
 0x2ae   :  { %v13200_v4 = vpop.eup %13199 }
 0x2af   :  { %v13202_v10 = vpop.eup %13201  ;;  %v14194_v11 = vpack.c.bf16 %v13200_v4, %v13196_v2  ;;  %v13165_v2 = vld [vmem:[%s16606_s6 + $0x88] ss:$20 sps:$4 sm:$0xff]   ;;  %v13167_v4 = vld [vmem:[%s16606_s6 + $0x1f0] ss:$20 sps:$4 sm:$0xff]  }
 0x2b0   :  { %v13204_v36 = vpop.eup %13203 }
 0x2b1   :  { %v13206_v24 = vpop.eup %13205  ;;  %v787_v25 = vpack.c.bf16 %v13204_v36, %v13198_v38  ;;  %v13166_v38 = vld [vmem:[%s16606_s6 + $0x308] ss:$20 sps:$4 sm:$0xff]   ;;  %v13168_v36 = vld [vmem:[%s16606_s6 + $0xb0] ss:$20 sps:$4 sm:$0xff]  }
 0x2b2   :  { %v14208_v45 = vpack.c.bf16 %v13202_v10, %v13206_v24  ;;  %v14299_v10 = vpack.c.bf16 %v1791_v52, %v1790_v63  ;;  %v13169_v24 = vld [vmem:[%s16606_s6 + $0x218] ss:$20 sps:$4 sm:$0xff]   ;;  %v1826_v52 = vld [vmem:[%s16608_s8 + $0x1a0] sm:$0xff] }
 0x2b3   :  { %1492 = vmatprep.mubr.bf16.mxu1 %v787_v25  ;;  %1578 = vmatprep.mubr.bf16.mxu0 %v787_v25  ;;  %v1795_v63 = vld [vmem:[%s16608_s8 + $0xa8] sm:$0xff] }
 0x2b4   :  { %1493 = vmatmul.mubr.bf16.vlgmr.msra.gmra.mrb[4].mxu1 %v14194_v11  ;;  %1579 = vmatmul.mubr.bf16.vlgmr.msra.gmra.mrb[4].mxu0 %v14194_v11 }
 0x2b5   :  { %1504 = vmatpush1.bf16.msra.mxu1 %v13131_v26  ;;  %1590 = vmatpush1.bf16.msra.mxu0 %v13134_v30  ;;  %v13171_v26 = vld [vmem:[%s16606_s6 + $0x240] ss:$20 sps:$4 sm:$0xff]  }
 0x2b6   :  { %1505 = vmatprep.subr.bf16.mxu1 %v13139_v31  ;;  %1591 = vmatprep.subr.bf16.mxu0 %v13142_v34  ;;  %v13172_v30 = vld [vmem:[%s16606_s6 + $0x100] ss:$20 sps:$4 sm:$0xff]   ;;  %v13173_v31 = vld [vmem:[%s16606_s6 + $0x268] ss:$20 sps:$4 sm:$0xff]  }
 0x2b7   :  { %1535 = vmatprep.mubr.bf16.mxu1 %v16615_v42  ;;  %1621 = vmatprep.mubr.bf16.mxu0 %v16615_v42  ;;  %v1822_v34 = vld [vmem:[%s16608_s8 + $0x180] sm:$0xff]  ;;  %v1789_v42 = vld [vmem:[%s16608_s8 + $0x78] sm:$0xff] }
 0x2b9   :  { %1506 = vmatpush1.bf16.msra.mxu1 %v13137_v46  ;;  %1592 = vmatpush1.bf16.msra.mxu0 %v13140_v35  ;;  %v13174_v46 = vld [vmem:[%s16606_s6 + $0x128] ss:$20 sps:$4 sm:$0xff]  }
 0x2ba   :  { %1507 = vmatprep.subr.bf16.mxu1 %v13145_v37  ;;  %1593 = vmatprep.subr.bf16.mxu0 %v13148_v39  ;;  %v1774_v37 = vld [vmem:[%s16608_s8] sm:$0xff]  ;;  %v1775_v39 = vld [vmem:[%s16608_s8 + $0x8] sm:$0xff] }
 0x2bd   :  { %1508 = vmatpush1.bf16.msra.mxu1 %v13143_v43  ;;  %1594 = vmatpush1.bf16.msra.mxu0 %v13146_v41  ;;  %v1806_v43 = vld [vmem:[%s16608_s8 + $0x100] sm:$0xff]  ;;  %v14344_v41 = vpack.c.bf16 %v1775_v39, %v1774_v37  ;;  %v1829_v39 = vld [vmem:[%s16608_s8 + $0x1b8] sm:$0xff] }
 0x2be   :  { %1509 = vmatprep.subr.bf16.mxu1 %v13151_v14  ;;  %1595 = vmatprep.subr.bf16.mxu0 %v13154_v49  ;;  %v1807_v14 = vld [vmem:[%s16608_s8 + $0x108] sm:$0xff] }
 0x2bf   :  { %v14349_v49 = vpack.c.bf16 %v1807_v14, %v1806_v43  ;;  %v1780_v43 = vld [vmem:[%s16608_s8 + $0x30] sm:$0xff]  ;;  %v1781_v14 = vld [vmem:[%s16608_s8 + $0x38] sm:$0xff] }
 0x2c1   :  { %1510 = vmatpush1.bf16.msra.mxu1 %v13149_v53  ;;  %1596 = vmatpush1.bf16.msra.mxu0 %v13152_v48  ;;  %v1793_v53 = vld [vmem:[%s16608_s8 + $0x98] sm:$0xff]  ;;  %v1824_v48 = vld [vmem:[%s16608_s8 + $0x190] sm:$0xff] }
 0x2c2   :  { %10913 = vmatprep.subr.bf16.mxu1 %v13155_v50  ;;  %11537 = vmatprep.subr.bf16.mxu0 %v16629_v29 }
 0x2c4   :  { %10628 = vmatmul.mubr.msk.bf16.vlgmr.msra.gmra.mrb[4].mxu1 %vm16662_vm2, %v14208_v45  ;;  %10629 = vmatmul.mubr.msk.bf16.vlgmr.msra.gmra.mrb[4].mxu0 %vm16662_vm2, %v14208_v45 }
 0x2c5   :  { %10914 = vmatpush3.bf16.msra.mxu1 %v13156_v5  ;;  %1664 = vmatprep.mubr.bf16.mxu1 %v787_v25  ;;  %v13170_v25 = vld [vmem:[%s16606_s6 + $0xd8] ss:$20 sps:$4 sm:$0xff]  }
 0x2c6   :  { %11538 = vmatpush3.bf16.msra.mxu0 %v13157_v55  ;;  %10915 = vmatprep.subr.bf16.mxu1 %v13158_v56  ;;  %v1825_v5 = vld [vmem:[%s16608_s8 + $0x198] sm:$0xff]  ;;  %v1776_v55 = vld [vmem:[%s16608_s8 + $0x10] sm:$0xff] }
 0x2c7   :  { %11539 = vmatprep.subr.bf16.mxu0 %v16629_v29  ;;  %11545 = vmatprep.mubr.msk.bf16.mxu0 %vm16706_vm5, %v16629_v29  ;;  %v1777_v56 = vld [vmem:[%s16608_s8 + $0x18] sm:$0xff] }
 0x2c9   :  { %10916 = vmatpush3.bf16.msra.mxu1 %v13159_v57  ;;  %v14373_v57 = vpack.c.bf16 %v1825_v5, %v1824_v48  ;;  %v1812_v48 = vld [vmem:[%s16608_s8 + $0x130] sm:$0xff]  ;;  %v1813_v5 = vld [vmem:[%s16608_s8 + $0x138] sm:$0xff] }
 0x2ca   :  { %11540 = vmatpush3.bf16.msra.mxu0 %v13160_v40  ;;  %10917 = vmatprep.subr.bf16.mxu1 %v13161_v8  ;;  %v14375_v40 = vpack.c.bf16 %v1777_v56, %v1776_v55  ;;  %v1808_v8 = vld [vmem:[%s16608_s8 + $0x110] sm:$0xff]  ;;  %v14456_v55 = vpack.c.bf16 %v1813_v5, %v1812_v48  ;;  %v1798_v56 = vld [vmem:[%s16608_s8 + $0xc0] sm:$0xff]  ;;  %v1785_v5 = vld [vmem:[%s16608_s8 + $0x58] sm:$0xff] }
 0x2cb   :  { %11541 = vmatprep.subr.bf16.mxu0 %v16629_v29  ;;  %16712 = vst [vmem:[#allocation6_spill] sm:$0xff] %v14373_v57  ;;  %v1784_v48 = vld [vmem:[%s16608_s8 + $0x50] sm:$0xff] }
 0x2cc   :  { %16717 = vst [vmem:[#allocation11_spill] sm:$0xff] %v14456_v55 }
 0x2cd   :  { %10918 = vmatpush3.bf16.msra.mxu1 %v13162_v44  ;;  %v1809_v44 = vld [vmem:[%s16608_s8 + $0x118] sm:$0xff] }
 0x2ce   :  { %11542 = vmatpush3.bf16.msra.mxu0 %v13163_v59  ;;  %10919 = vmatprep.subr.bf16.mxu1 %v13164_v61  ;;  %v14384_v59 = vpack.c.bf16 %v1809_v44, %v1808_v8  ;;  %v1794_v61 = vld [vmem:[%s16608_s8 + $0xa0] sm:$0xff]  ;;  %v1799_v8 = vld [vmem:[%s16608_s8 + $0xc8] sm:$0xff] }
 0x2cf   :  { %11543 = vmatprep.subr.bf16.mxu0 %v16629_v29  ;;  %v1830_v44 = vld [vmem:[%s16608_s8 + $0x1c0] sm:$0xff] }
 0x2d0   :  { %16713 = vst [vmem:[#allocation7_spill] sm:$0xff] %v14384_v59 }
 0x2d1   :  { %10920 = vmatpush3.bf16.msra.mxu1 %v13165_v2  ;;  %v14398_v2 = vpack.c.bf16 %v1795_v63, %v1794_v61  ;;  %v14470_v61 = vpack.c.bf16 %v1799_v8, %v1798_v56  ;;  %v1831_v63 = vld [vmem:[%s16608_s8 + $0x1c8] sm:$0xff]  ;;  %v14519_v8 = vpack.c.bf16 %v1785_v5, %v1784_v48 }
 0x2d2   :  { %11544 = vmatpush3.bf16.msra.mxu0 %v13166_v38  ;;  %10921 = vmatprep.subr.bf16.mxu1 %v13167_v4  ;;  %v1827_v38 = vld [vmem:[%s16608_s8 + $0x1a8] sm:$0xff]  ;;  %v1778_v4 = vld [vmem:[%s16608_s8 + $0x20] sm:$0xff] }
 0x2d3   :  { %12343 = vmatprep.subr.bf16.mxu0 %v14299_v10  ;;  %16723 = vst [vmem:[#allocation17_spill] sm:$0xff] %v14519_v8 }
 0x2d5   :  { %11546 = vmatmul.mubr.msk.bf16.vlgmr.msra.gmra.mrb[8].mxu0 %vm16662_vm2, %v14208_v45  ;;  %10922 = vmatpush3.bf16.msra.mxu1 %v13168_v36  ;;  %v1823_v45 = vld [vmem:[%s16608_s8 + $0x188] sm:$0xff] }
 0x2d6   :  { %10923 = vmatprep.subr.bf16.mxu1 %v13169_v24  ;;  %v14331_v35 = vpack.c.bf16 %v1823_v45, %v1822_v34  ;;  %12345 = vmatpush3.bf16.msra.mxu0 %v14344_v41  ;;  %v1779_v36 = vld [vmem:[%s16608_s8 + $0x28] sm:$0xff]  ;;  %v14409_v24 = vpack.c.bf16 %v1827_v38, %v1826_v52  ;;  %v1796_v34 = vld [vmem:[%s16608_s8 + $0xb0] sm:$0xff]  ;;  %v1797_v45 = vld [vmem:[%s16608_s8 + $0xb8] sm:$0xff] }
 0x2d7   :  { %v14434_v37 = vpack.c.bf16 %v1797_v45, %v1796_v34  ;;  %v1782_v52 = vld [vmem:[%s16608_s8 + $0x40] sm:$0xff]  ;;  %v1783_v38 = vld [vmem:[%s16608_s8 + $0x48] sm:$0xff]  ;;  %v1800_v45 = vld [vmem:[%s16608_s8 + $0xd0] sm:$0xff] }
 0x2d8   :  { %16714 = vst [vmem:[#allocation8_spill] sm:$0xff] %v14409_v24 }
 0x2d9   :  { %10924 = vmatpush3.bf16.msra.mxu1 %v13170_v25  ;;  %v14411_v25 = vpack.c.bf16 %v1779_v36, %v1778_v4  ;;  %v14481_v4 = vpack.c.bf16 %v1831_v63, %v1830_v44  ;;  %v14483_v36 = vpack.c.bf16 %v1783_v38, %v1782_v52  ;;  %v1816_v44 = vld [vmem:[%s16608_s8 + $0x150] sm:$0xff]  ;;  %v1817_v63 = vld [vmem:[%s16608_s8 + $0x158] sm:$0xff]  ;;  %v1802_v38 = vld [vmem:[%s16608_s8 + $0xe0] sm:$0xff] }
 0x2da   :  { %10925 = vmatprep.subr.bf16.mxu1 %v13171_v26  ;;  %v1810_v26 = vld [vmem:[%s16608_s8 + $0x120] sm:$0xff]  ;;  %v14528_v52 = vpack.c.bf16 %v1817_v63, %v1816_v44  ;;  %v1819_v63 = vld [vmem:[%s16608_s8 + $0x168] sm:$0xff] }
 0x2db   :  { %16718 = vst [vmem:[#allocation12_spill] sm:$0xff] %v14481_v4  ;;  %16719 = vst [vmem:[#allocation13_spill] sm:$0xff] %v14483_v36  ;;  %v1818_v44 = vld [vmem:[%s16608_s8 + $0x160] sm:$0xff] }
 0x2dc   :  { %16724 = vst [vmem:[#allocation18_spill] sm:$0xff] %v14528_v52 }
 0x2dd   :  { %10926 = vmatpush3.bf16.msra.mxu1 %v13172_v30  ;;  %v1811_v30 = vld [vmem:[%s16608_s8 + $0x128] sm:$0xff] }
 0x2de   :  { %10927 = vmatprep.subr.bf16.mxu1 %v13173_v31  ;;  %v14420_v31 = vpack.c.bf16 %v1811_v30, %v1810_v26  ;;  %v1814_v26 = vld [vmem:[%s16608_s8 + $0x140] sm:$0xff]  ;;  %v1815_v30 = vld [vmem:[%s16608_s8 + $0x148] sm:$0xff] }
 0x2df   :  { %v14492_v34 = vpack.c.bf16 %v1815_v30, %v1814_v26  ;;  %v1803_v26 = vld [vmem:[%s16608_s8 + $0xe8] sm:$0xff]  ;;  %v1834_v30 = vld [vmem:[%s16608_s8 + $0x1e0] sm:$0xff] }
 0x2e0   :  { %16715 = vst [vmem:[#allocation9_spill] sm:$0xff] %v14420_v31 }
 0x2e1   :  { %10928 = vmatpush3.bf16.msra.mxu1 %v13174_v46  ;;  %v1828_v46 = vld [vmem:[%s16608_s8 + $0x1b0] sm:$0xff]  ;;  %16720 = vst [vmem:[#allocation14_spill] sm:$0xff] %v14492_v34 }
 0x2e2   :  { %12375 = vmatprep.subr.bf16.mxu1 %v14331_v35 }
 0x2e4   :  { %1665 = vmatmul.mubr.bf16.vlgmr.msra.gmra.mrb[8].mxu1 %v14194_v11  ;;  %v1792_v11 = vld [vmem:[%s16608_s8 + $0x90] sm:$0xff] }
 0x2e5   :  { %12377 = vmatpush3.bf16.msra.mxu1 %v14349_v49  ;;  %v14362_v50 = vpack.c.bf16 %v1793_v53, %v1792_v11  ;;  %v14445_v11 = vpack.c.bf16 %v1829_v39, %v1828_v46  ;;  %v14447_v53 = vpack.c.bf16 %v1781_v14, %v1780_v43  ;;  %v1801_v46 = vld [vmem:[%s16608_s8 + $0xd8] sm:$0xff]  ;;  %v1832_v39 = vld [vmem:[%s16608_s8 + $0x1d0] sm:$0xff] }
 0x2e6   :  { %12379 = vmatprep.subr.bf16.mxu1 %v14373_v57  ;;  %v14506_v43 = vpack.c.bf16 %v1801_v46, %v1800_v45  ;;  %v1833_v14 = vld [vmem:[%s16608_s8 + $0x1d8] sm:$0xff]  ;;  %v14542_v45 = vpack.c.bf16 %v1803_v26, %v1802_v38  ;;  %v1835_v46 = vld [vmem:[%s16608_s8 + $0x1e8] sm:$0xff]  ;;  %v1804_v38 = vld [vmem:[%s16608_s8 + $0xf0] sm:$0xff]  ;;  %v14567_v26 = vpack.c.bf16 %v1819_v63, %v1818_v44 }
 0x2e7   :  { %12347 = vmatprep.subr.bf16.mxu0 %v14362_v50  ;;  %16716 = vst [vmem:[#allocation10_spill] sm:$0xff] %v14445_v11  ;;  %v14517_v56 = vpack.c.bf16 %v1833_v14, %v1832_v39  ;;  %v1786_v39 = vld [vmem:[%s16608_s8 + $0x60] sm:$0xff]  ;;  %v1787_v14 = vld [vmem:[%s16608_s8 + $0x68] sm:$0xff]  ;;  %v14553_v48 = vpack.c.bf16 %v1835_v46, %v1834_v30  ;;  %v1805_v30 = vld [vmem:[%s16608_s8 + $0xf8] sm:$0xff] }
 0x2e8   :  { %12349 = vmatpush3.bf16.msra.mxu0 %v14375_v40  ;;  %16721 = vst [vmem:[#allocation15_spill] sm:$0xff] %v14506_v43  ;;  %16725 = vst [vmem:[#allocation19_spill] sm:$0xff] %v14542_v45  ;;  %v14555_v5 = vpack.c.bf16 %v1787_v14, %v1786_v39  ;;  %v1836_v46 = vld [vmem:[%s16608_s8 + $0x1f0] sm:$0xff]  ;;  %v1837_v39 = vld [vmem:[%s16608_s8 + $0x1f8] sm:$0xff]  ;;  %v14580_v14 = vpack.c.bf16 %v1805_v30, %v1804_v38 }
 0x2e9   :  { %12381 = vmatpush3.bf16.msra.mxu1 %v14384_v59  ;;  %12351 = vmatprep.subr.bf16.mxu0 %v14398_v2  ;;  %16722 = vst [vmem:[#allocation16_spill] sm:$0xff] %v14517_v56  ;;  %16726 = vst [vmem:[#allocation20_spill] sm:$0xff] %v14553_v48  ;;  %v14582_v44 = vpack.c.bf16 %v1837_v39, %v1836_v46  ;;  %v1788_v63 = vld [vmem:[%s16608_s8 + $0x70] sm:$0xff]  ;;  %v1821_v38 = vld [vmem:[%s16608_s8 + $0x178] sm:$0xff] }
 0x2ea   :  { %12383 = vmatprep.subr.bf16.mxu1 %v14409_v24  ;;  %16727 = vst [vmem:[#allocation21_spill] sm:$0xff] %v14555_v5  ;;  %16728 = vst [vmem:[#allocation22_spill] sm:$0xff] %v14567_v26  ;;  %v14594_v0 = vpack.c.bf16 %v1789_v42, %v1788_v63  ;;  %v14601_v30 = vpack.c.bf16 %v1821_v38, %v1820_v12  ;;  %v1838_v46 = vld [vmem:[%s16608_s8 + $0x200] sm:$0xff]  ;;  %v1839_v42 = vld [vmem:[%s16608_s8 + $0x208] sm:$0xff]  ;;  %v925_v63 = vsub.s32 3, %v14168_v15 }
 0x2eb   :  { %16729 = vst [vmem:[#allocation23_spill] sm:$0xff] %v14580_v14  ;;  %16730 = vst [vmem:[#allocation24_spill] sm:$0xff] %v14582_v44  ;;  %v14611_v39 = vpack.c.bf16 %v1839_v42, %v1838_v46  ;;  %v14617_v12 = vld [vmem:[%s16607_s7] sm:$0x1f] }
 0x2ec   :  { %12353 = vmatpush3.bf16.msra.mxu0 %v14411_v25  ;;  %16731 = vst [vmem:[#allocation25_spill] sm:$0xff] %v14594_v0  ;;  %16732 = vst [vmem:[#allocation26_spill] sm:$0xff] %v14601_v30  ;;  %v14623_v38 = vrot.slane %v14617_v12, %v731_v16  ;;  %v14628_v62 = vrot.slane %v14617_v12, %v739_v19  ;;  %v14633_v46 = vrot.slane %v14617_v12, %v735_v1 }
 0x2ed   :  { %12385 = vmatpush3.bf16.msra.mxu1 %v14420_v31  ;;  %12355 = vmatprep.subr.bf16.mxu0 %v14434_v37  ;;  %16733 = vst [vmem:[#allocation27_spill] sm:$0xff] %v14611_v39  ;;  %v14636_v42 = vrot.slane %v14617_v12, %v925_v63 }
 0x2ee   :  { %12387 = vmatprep.subr.bf16.mxu1 %v14445_v11  ;;  %16734 = vst [vmem:[#allocation28_spill] sm:$0xff] %v14623_v38  ;;  %16735 = vst [vmem:[#allocation29_spill] sm:$0xff] %v14628_v62 }
 0x2ef   :  { %16736 = vst [vmem:[#allocation30_spill] sm:$0xff] %v14633_v46  ;;  %16737 = vst [vmem:[#allocation31_spill] sm:$0xff] %v14636_v42 }
 0x2f0   :  { %12357 = vmatpush3.bf16.msra.mxu0 %v14447_v53 }
 0x2f1   :  { %12389 = vmatpush3.bf16.msra.mxu1 %v14456_v55  ;;  %12359 = vmatprep.subr.bf16.mxu0 %v14470_v61 }
 0x2f2   :  { %12391 = vmatprep.subr.bf16.mxu1 %v14481_v4 }
 0x2f4   :  { %12361 = vmatpush3.bf16.msra.mxu0 %v14483_v36 }
 0x2f5   :  { %12393 = vmatpush3.bf16.msra.mxu1 %v14492_v34  ;;  %12363 = vmatprep.subr.bf16.mxu0 %v14506_v43 }
 0x2f6   :  { %12395 = vmatprep.subr.bf16.mxu1 %v14517_v56 }
 0x2f8   :  { %12365 = vmatpush3.bf16.msra.mxu0 %v14519_v8 }
 0x2f9   :  { %12397 = vmatpush3.bf16.msra.mxu1 %v14528_v52  ;;  %12367 = vmatprep.subr.bf16.mxu0 %v14542_v45 }
 0x2fa   :  { %12399 = vmatprep.subr.bf16.mxu1 %v14553_v48 }
 0x2fc   :  { %12369 = vmatpush3.bf16.msra.mxu0 %v14555_v5 }
 0x2fd   :  { %12401 = vmatpush3.bf16.msra.mxu1 %v14567_v26  ;;  %12371 = vmatprep.subr.bf16.mxu0 %v14580_v14 }
 0x2fe   :  { %12403 = vmatprep.subr.bf16.mxu1 %v14582_v44 }
 0x300   :  { %12373 = vmatpush3.bf16.msra.mxu0 %v14594_v0 }
 0x301   :  { %12405 = vmatpush3.bf16.msra.mxu1 %v14601_v30  ;;  %12407 = vmatprep.subr.bf16.mxu0 %v14611_v39 }
 0x397   :  { %v1537_v60 = vpop.f32.mrb[4].mxu1  ;;  %v1623_v58 = vpop.f32.mrb[4].mxu0 }
 0x398   :  { %v12932_v54 = vadd.f32 %v1537_v60, %v14623_v38  ;;  %v12936_v16 = vadd.f32 %v1623_v58, %v14628_v62  ;;  %v1539_v29 = vpop.f32.mrb[5].mxu1  ;;  %v1625_v51 = vpop.f32.mrb[5].mxu0 }
 0x399   :  { %v12933_v30 = vadd.f32 %v1539_v29, %v14633_v46  ;;  %v12937_v19 = vadd.f32 %v1625_v51, %v14636_v42  ;;  %v1541_v44 = vpop.f32.mrb[6].mxu1  ;;  %v1627_v26 = vpop.f32.mrb[6].mxu0 }
 0x39a   :  { %v10631_v48 = vmul.f32 -1.442695, %v12932_v54  ;;  %v10633_v1 = vmul.f32 -1.442695, %v12936_v16  ;;  %v12934_v52 = vadd.f32 %v1541_v44, %v14623_v38  ;;  %v12938_v63 = vadd.f32 %v1627_v26, %v14628_v62  ;;  %v1543_v56 = vpop.f32.mrb[7].mxu1  ;;  %v1629_v34 = vpop.f32.mrb[7].mxu0 }
 0x39b   :  { %v10632_v0 = vmul.f32 -1.442695, %v12933_v30  ;;  %v10634_v60 = vmul.f32 -1.442695, %v12937_v19  ;;  %v12935_v58 = vadd.f32 %v1543_v56, %v14633_v46  ;;  %v12939_v4 = vadd.f32 %v1629_v34, %v14636_v42 }
 0x39c   :  { %13207 = vpow2.f32 %v10631_v48  ;;  %v10636_v29 = vmul.f32 -1.442695, %v12934_v52  ;;  %v10638_v51 = vmul.f32 -1.442695, %v12938_v63 }
 0x39d   :  { %13209 = vpow2.f32 %v10633_v1  ;;  %v10637_v55 = vmul.f32 -1.442695, %v12935_v58  ;;  %v10639_v54 = vmul.f32 -1.442695, %v12939_v4 }
 0x39e   :  { %13211 = vpow2.f32 %v10632_v0 }
 0x39f   :  { %13213 = vpow2.f32 %v10634_v60 }
 0x3a0   :  { %13215 = vpow2.f32 %v10636_v29 }
 0x3a1   :  { %13217 = vpow2.f32 %v10638_v51 }
 0x3a2   :  { %13219 = vpow2.f32 %v10637_v55 }
 0x3a3   :  { %13221 = vpow2.f32 %v10639_v54 }
 0x3a6   :  { %v13208_v26 = vpop.eup %13207 }
 0x3a7   :  { %v13210_v44 = vpop.eup %13209  ;;  %v1744_v30 = vadd.f32 1.0, %v13208_v26  ;;  %v1840_v26 = vld [vmem:[%s16608_s8 + $0x210] sm:$0xff] }
 0x3a8   :  { %v13212_v16 = vpop.eup %13211  ;;  %v1707_v19 = vpop.f32.mrb[8].mxu0  ;;  %v1746_v46 = vadd.f32 1.0, %v13210_v44  ;;  %v1841_v44 = vld [vmem:[%s16608_s8 + $0x218] sm:$0xff] }
 0x3a9   :  { %v13214_v56 = vpop.eup %13213  ;;  %v1745_v34 = vadd.f32 1.0, %v13212_v16  ;;  %v11547_v48 = vpop.f32.mrb[9].mxu0  ;;  %13223 = vrcp.f32 %v1744_v30  ;;  %v929_v30 = vsub.s32 4, %v14168_v15 }
 0x3aa   :  { %v13216_v52 = vpop.eup %13215  ;;  %v1747_v1 = vadd.f32 1.0, %v13214_v56  ;;  %v1710_v0 = vpop.f32.mrb[10].mxu0  ;;  %v1842_v48 = vld [vmem:[%s16608_s8 + $0x220] sm:$0xff] }
 0x3ab   :  { %v13218_v63 = vpop.eup %13217  ;;  %13225 = vrcp.f32 %v1745_v34  ;;  %v1749_v4 = vadd.f32 1.0, %v13216_v52  ;;  %v11548_v60 = vpop.f32.mrb[11].mxu0  ;;  %v1843_v52 = vld [vmem:[%s16608_s8 + $0x228] sm:$0xff] }
 0x3ac   :  { %v13220_v58 = vpop.eup %13219  ;;  %13227 = vrcp.f32 %v1747_v1  ;;  %v1751_v29 = vadd.f32 1.0, %v13218_v63 }
 0x3ad   :  { %v13222_v55 = vpop.eup %13221  ;;  %13229 = vrcp.f32 %v1746_v46  ;;  %v1750_v51 = vadd.f32 1.0, %v13220_v58  ;;  %v14653_v46 = vpack.c.bf16 %v1841_v44, %v1840_v26 }
 0x3ae   :  { %13231 = vrcp.f32 %v1749_v4  ;;  %v1752_v54 = vadd.f32 1.0, %v13222_v55  ;;  %v14662_v4 = vrot.slane %v14617_v12, %v929_v30  ;;  %v1844_v12 = vld [vmem:[%s16608_s8 + $0x230] sm:$0xff]  ;;  %v1845_v30 = vld [vmem:[%s16608_s8 + $0x238] sm:$0xff] }
 0x3af   :  { %13233 = vrcp.f32 %v1750_v51  ;;  %16738 = vst [vmem:[#allocation32_spill] sm:$0xff] %v14653_v46 }
 0x3b0   :  { %13235 = vrcp.f32 %v1752_v54  ;;  %16739 = vst [vmem:[#allocation33_spill] sm:$0xff] %v14662_v4  ;;  %v14666_v54 = vpack.c.bf16 %v1843_v52, %v1842_v48 }
 0x3b1   :  { %13237 = vrcp.f32 %v1751_v29 }
 0x3b2   :  { %16740 = vst [vmem:[#allocation34_spill] sm:$0xff] %v14666_v54 }
 0x3b3   :  { %v13224_v16 = vpop.eup %13223 }
 0x3b5   :  { %v13226_v56 = vpop.eup %13225 }
 0x3b6   :  { %v13228_v34 = vpop.eup %13227  ;;  %1925 = vmatprep.mubr.f32.mxu0 %v13226_v56 }
 0x3b7   :  { %v13230_v1 = vpop.eup %13229  ;;  %2000 = vmatprep.mubr.f32.mxu1 %v13228_v34  ;;  %1926 = vmatmul.mubr.f32.vlgmr.msra.gmra.mrb[12].mxu0 %v13224_v16  ;;  %v10929_v63 = vpop.f32.mrb[8].mxu1 }
 0x3b8   :  { %v13232_v60 = vpop.eup %13231  ;;  %2001 = vmatmul.mubr.f32.vlgmr.msra.gmra.mrb[12].mxu1 %v13230_v1  ;;  %v10930_v58 = vpop.f32.mrb[9].mxu1  ;;  %12409 = vmatpush3.bf16.msra.mxu0 %v14611_v39  ;;  %v14678_v1 = vpack.c.bf16 %v1845_v30, %v1844_v12 }
 0x3b9   :  { %v13234_v55 = vpop.eup %13233  ;;  %v10931_v29 = vadd.f32 %v10930_v58, %v10929_v63  ;;  %v10932_v51 = vpop.f32.mrb[10].mxu1  ;;  %12411 = vmatprep.subr.bf16.mxu0 %v14653_v46  ;;  %v13489_v63 = vld [vmem:[%s16600_s0] sm:$0xff] }
 0x3ba   :  { %v13236_v26 = vpop.eup %13235  ;;  %1930 = vmatprep.mubr.f32.mxu0 %v13234_v55  ;;  %v10933_v44 = vpop.f32.mrb[11].mxu1  ;;  %16741 = vst [vmem:[#allocation35_spill] sm:$0xff] %v14678_v1 }
 0x3bb   :  { %v13238_v16 = vpop.eup %13237  ;;  %2005 = vmatprep.mubr.f32.mxu1 %v13236_v26  ;;  %v1667_v56 = vadd.f32 %v10931_v29, %v14662_v4  ;;  %v10934_v34 = vadd.f32 %v10933_v44, %v10932_v51  ;;  %1931 = vmatmul.mubr.f32.gmra.mrb[14].mxu0 %v13232_v60  ;;  %v1846_v60 = vld [vmem:[%s16608_s8 + $0x240] sm:$0xff]  ;;  %v1848_v26 = vld [vmem:[%s16608_s8 + $0x250] sm:$0xff] }
 0x3bc   :  { %2006 = vmatmul.mubr.f32.gmra.mrb[14].mxu1 %v13238_v16  ;;  %12413 = vmatpush3.bf16.msra.mxu0 %v14653_v46 }
 0x3bd   :  { %v1708_v48 = vadd.f32 %v1707_v19, %v1667_v56  ;;  %v1670_v52 = vadd.f32 %v10934_v34, %v14662_v4  ;;  %12415 = vmatprep.subr.bf16.mxu0 %v14666_v54  ;;  %11582 = vmatprep.mubr.msk.f32.mxu1 %vm16708_vm1, %v13489_v63  ;;  %v1847_v19 = vld [vmem:[%s16608_s8 + $0x248] sm:$0xff]  ;;  %v2102_v34 = vld [vmem:[%s16609_s9 + $0x20] sm:$0xff]  ;;  %v2104_v63 = vld [vmem:[%s16609_s9 + $0x30] sm:$0xff] }
 0x3be   :  { %v14692_v51 = vpack.c.bf16 %v1847_v19, %v1846_v60  ;;  %v2105_v60 = vld [vmem:[%s16609_s9 + $0x38] sm:$0x3f]  ;;  %v2098_v19 = vld [vmem:[%s16609_s9] sm:$0xff] }
 0x3bf   :  { %v10635_v58 = vmul.f32 -1.442695, %v1708_v48  ;;  %v1711_v55 = vadd.f32 %v1710_v0, %v1670_v52  ;;  %v2103_v48 = vld [vmem:[%s16609_s9 + $0x28] sm:$0xff] }
 0x3c0   :  { %12417 = vmatpush3.bf16.msra.mxu0 %v14666_v54  ;;  %16742 = vst [vmem:[#allocation36_spill] sm:$0xff] %v14692_v51  ;;  %v12426_v52 = vpack.c.bf16 %v2103_v48, %v2102_v34 }
 0x3c1   :  { %13239 = vpow2.f32 %v10635_v58  ;;  %v10640_v29 = vmul.f32 -1.442695, %v1711_v55  ;;  %12419 = vmatprep.subr.bf16.mxu0 %v14678_v1  ;;  %v12430_v58 = vpack.c.bf16 %v2105_v60, %v2104_v63  ;;  %v2099_v55 = vld [vmem:[%s16609_s9 + $0x8] sm:$0xff]  ;;  %v10641_v63 = vld [vmem:[%s16608_s8 + $0x258] ss:$0 sm:$0xff] }
 0x3c2   :  { %12427 = vmatprep.subr.bf16.mxu1 %v12426_v52 }
 0x3c3   :  { %13241 = vpow2.f32 %v10640_v29  ;;  %12429 = vmatpush3.bf16.msra.mxu1 %v12426_v52  ;;  %v12436_v29 = vpack.c.bf16 %v2099_v55, %v2098_v19 }
 0x3c4   :  { %12421 = vmatpush3.bf16.msra.mxu0 %v14678_v1  ;;  %12432 = vmatprep.subr.msk.bf16.mxu1 %vm13733_vm3, %v12430_v58 }
 0x3c5   :  { %12423 = vmatprep.subr.bf16.mxu0 %v14692_v51 }
 0x3c7   :  { %12435 = vmatpush3.bf16.msk.msra.mxu1 %vm13733_vm3, %v12430_v58 }
 0x3c8   :  { %12425 = vmatpush3.bf16.msra.mxu0 %v14692_v51  ;;  %12437 = vmatprep.subr.bf16.mxu1 %v12436_v29 }
 0x3c9   :  { %11569 = vmatprep.subr.mxu0 %v1848_v26 }
 0x3cb   :  { %v13240_v0 = vpop.eup %13239 }
 0x3cc   :  { %v1748_v44 = vadd.f32 1.0, %v13240_v0  ;;  %11570 = vmatpush3.msra.mxu0 %v1848_v26  ;;  %v2100_v26 = vld [vmem:[%s16609_s9 + $0x10] sm:$0xff]  ;;  %v2101_v0 = vld [vmem:[%s16609_s9 + $0x18] sm:$0x3f] }
 0x3cd   :  { %v13242_v12 = vpop.eup %13241 }
 0x3ce   :  { %13243 = vrcp.f32 %v1748_v44  ;;  %v1753_v30 = vadd.f32 1.0, %v13242_v12  ;;  %v12440_v44 = vpack.c.bf16 %v2101_v0, %v2100_v26  ;;  %v13490_v12 = vld [vmem:[%s16600_s0 + $0x8] sm:$0xff] }
 0x3cf   :  { %11583 = vmatmul.mubr.msk.f32.vlgmr.msra.gmra.mrb[16].mxu1 %vm16708_vm1, %v13490_v12 }
 0x3d0   :  { %13245 = vrcp.f32 %v1753_v30  ;;  %12439 = vmatpush3.bf16.msra.mxu1 %v12436_v29  ;;  %v2268_v30 = vld [vmem:[%s16609_s9 + $0x40] sm:$0xf] }
 0x3d1   :  { %12442 = vmatprep.subr.msk.bf16.mxu1 %vm13733_vm3, %v12440_v44 }
 0x3d4   :  { %12445 = vmatpush3.bf16.msk.msra.mxu1 %vm13733_vm3, %v12440_v44 }
 0x3d5   :  { %11596 = vmatprep.subr.msk.mxu1 %vm16705_vm4, %v2268_v30 }
 0x3d8   :  { %v13244_v16 = vpop.eup %13243 }
 0x3d9   :  { %11571 = vmatprep.mubr.msk.f32.mxu0 %vm16661_vm6, %v13244_v16  ;;  %v2367_v16 = vld [vmem:[%s16609_s9 + $0x90] sm:$0xff] }
 0x3da   :  { %v13246_v56 = vpop.eup %13245 }
 0x3db   :  { %11572 = vmatmul.mubr.msk.f32.vlgmr.msra.gmra.mrb[16].mxu0 %vm16661_vm6, %v13246_v56  ;;  %v2368_v56 = vld [vmem:[%s16609_s9 + $0x98] sm:$0xff] }
 0x3dc   :  { %v12446_v34 = vpack.c.bf16 %v2368_v56, %v2367_v16 }
 0x3de   :  { %12447 = vmatprep.subr.bf16.mxu0 %v12446_v34 }
 0x3df   :  { %12449 = vmatpush3.bf16.msra.mxu0 %v12446_v34 }
 0x48a   :  { %v10972_v48 = vpop.f32.mrb[12].mxu0 }
 0x48b   :  { %v11010_v52 = vpop.f32.mrb[12].mxu1  ;;  %v10973_v60 = vpop.f32.mrb[13].mxu0 }
 0x48c   :  { %v10974_v19 = vadd.f32 %v10973_v60, %v10972_v48  ;;  %v11011_v58 = vpop.f32.mrb[13].mxu1 }
 0x48d   :  { %v11012_v55 = vadd.f32 %v11011_v58, %v11010_v52 }
 0x48e   :  { %v1928_v29 = vadd.f32 %v10974_v19, %v10641_v63  ;;  %v10975_v26 = vpop.f32.mrb[14].mxu0 }
 0x48f   :  { %v11013_v0 = vpop.f32.mrb[14].mxu1  ;;  %v10976_v44 = vpop.f32.mrb[15].mxu0 }
 0x490   :  { %v10977_v12 = vadd.f32 %v10976_v44, %v10975_v26  ;;  %v11014_v51 = vpop.f32.mrb[15].mxu1  ;;  %v2003_v1 = vadd.f32 %v11012_v55, %v1928_v29  ;;  %v2370_v55 = vld [vmem:[%s16609_s9 + $0xa8] sm:$0xff]  ;;  %v2558_v26 = vld [vmem:[%s16609_s9 + $0xd0] sm:$0xff] }
 0x491   :  { %v11015_v16 = vadd.f32 %v11014_v51, %v11013_v0  ;;  %v2458_v51 = vld [vmem:[%s16609_s9 + $0xb0] sm:$0xff]  ;;  %v2559_v0 = vld [vmem:[%s16609_s9 + $0xd8] sm:$0xff] }
 0x492   :  { %v1933_v56 = vadd.f32 %v10977_v12, %v10641_v63  ;;  %v12468_v44 = vpack.c.bf16 %v2559_v0, %v2558_v26  ;;  %v10655_v12 = vld [vmem:[%s16610_s10] ss:$0 sm:$0xff]  ;;  %v16745_v26 = vmov 0  ;;  %v10656_v0 = vld [vmem:[%s16610_s10 + $0x30] ss:$0 sm:$0xff] }
 0x494   :  { %v2008_v34 = vadd.f32 %v11015_v16, %v1933_v56 }
 0x4ae   :  { %v11573_v54 = vpop.f32.mrb[16].mxu0 }
 0x4af   :  { %v2083_v4 = vadd.f32 %v11573_v54, %v2008_v34  ;;  %v2077_v46 = vpop.f32.mrb[17].mxu0  ;;  %v2459_v54 = vld [vmem:[%s16609_s9 + $0xb8] sm:$0xff] }
 0x4b0   :  { %v2078_v42 = vadd.f32 %v2077_v46, %v2003_v1  ;;  %v52_v46 = vld [vmem:[%s16601_s1 + $0x8] sm:$0xff] }
 0x4b1   :  { %v10645_v62 = vmul.f32 -1.442695, %v2083_v4  ;;  %v2460_v4 = vld [vmem:[%s16609_s9 + $0xc0] sm:$0xff]  ;;  %v2461_v1 = vld [vmem:[%s16609_s9 + $0xc8] sm:$0xff] }
 0x4b2   :  { %v10644_v38 = vmul.f32 -1.442695, %v2078_v42  ;;  %v12458_v58 = vpack.c.bf16 %v2461_v1, %v2460_v4  ;;  %v2564_v4 = vld [vmem:[%s16609_s9 + $0x100] sm:$0xff]  ;;  %v2565_v1 = vld [vmem:[%s16609_s9 + $0x108] sm:$0xff] }
 0x4b3   :  { %13247 = vpow2.f32 %v10645_v62  ;;  %v51_v62 = vld [vmem:[%s16601_s1] sm:$0xff] }
 0x4b4   :  { %13249 = vpow2.f32 %v10644_v38  ;;  %v12454_v38 = vpack.c.bf16 %v2459_v54, %v2458_v51  ;;  %v2561_v51 = vld [vmem:[%s16609_s9 + $0xe8] sm:$0xff] }
 0x4bd   :  { %v13248_v48 = vpop.eup %13247 }
 0x4be   :  { %v13250_v52 = vpop.eup %13249  ;;  %v2093_v60 = vadd.f32 1.0, %v13248_v48  ;;  %v2363_v48 = vld [vmem:[%s16610_s10 + $0x8] sm:$0xff] }
 0x4bf   :  { %v2092_v19 = vadd.f32 1.0, %v13250_v52  ;;  %v2364_v52 = vld [vmem:[%s16610_s10 + $0x10] sm:$0xff] }
 0x4c1   :  { %13251 = vrcp.f32 %v2092_v19  ;;  %v2560_v19 = vld [vmem:[%s16609_s9 + $0xe0] sm:$0xff] }
 0x4c2   :  { %13253 = vrcp.f32 %v2093_v60 }
 0x4cb   :  { %v13252_v63 = vpop.eup %13251 }
 0x4cc   :  { %v13254_v42 = vpop.eup %13253  ;;  %11593 = vmatprep.mubr.msk.f32.mxu1 %vm16708_vm1, %v13252_v63 }
 0x4cd   :  { %11594 = vmatmul.mubr.msk.f32.vlgmr.msra.gmra.mrb[16].mxu1 %vm16708_vm1, %v13254_v42  ;;  %v2563_v42 = vld [vmem:[%s16609_s9 + $0xf8] sm:$0xff] }
 0x4ce   :  { %11597 = vmatpush3.msk.msra.mxu1 %vm16705_vm4, %v2268_v30  ;;  %11598 = vmatprep.mubr.msk.f32.mxu1 %vm16660_vm7, %v51_v62  ;;  %v2369_v30 = vld [vmem:[%s16609_s9 + $0xa0] sm:$0xff]  ;;  %v12472_v62 = vpack.c.bf16 %v2561_v51, %v2560_v19 }
 0x4cf   :  { %12455 = vmatprep.subr.bf16.mxu1 %v12454_v38  ;;  %v12450_v29 = vpack.c.bf16 %v2370_v55, %v2369_v30  ;;  %v16743_v30 = vlaneseq }
 0x4d1   :  { %12451 = vmatprep.subr.bf16.mxu0 %v12450_v29  ;;  %v14834_v55 = vand.u32 127, %v16743_v30 }
 0x4d2   :  { %12453 = vmatpush3.bf16.msra.mxu0 %v12450_v29  ;;  %v10659_v29 = vld [vmem:[%s16610_s10 + $0x38] ss:$0 sm:$0xff] }
 0x4d3   :  { %16744 = vst [vmem:[#allocation37_spill] sm:$0xff] %v14834_v55  ;;  %vm3121_vm9 = vcmp.ge.s32.totalorder %v14834_v55, 16  ;;  %vm3122_vm10 = vcmp.lt.s32.totalorder %v14834_v55, 24  ;;  %vm2770_vm11 = vcmp.ge.s32.totalorder %v14834_v55, 8  ;;  %vm2771_vm13 = vcmp.lt.s32.totalorder %v14834_v55, 16 }
 0x4d4   :  { %vm3393_vm14 = vcmp.ge.s32.totalorder %v14834_v55, 24  ;;  %vm3394_vm15 = vcmp.lt.s32.totalorder %v14834_v55, 32  ;;  %vm14845_vm0 = vmand %vm3121_vm9, %vm3122_vm10  ;;  %vm16693_vm6 = vcmp.lt.s32.totalorder %v14834_v55, 8 }
 0x4d5   :  { %11599 = vmatmul.mubr.msk.f32.vlgmr.msra.gmra.mrb[16].mxu1 %vm16660_vm7, %v52_v46  ;;  %v16746_v26 = vsel %vm14845_vm0, 4294967295, %v16745_v26  ;;  %vm14852_vm7 = vmand %vm2770_vm11, %vm2771_vm13  ;;  %vm16692_vm13 = vcmask 130048  }
 0x4d6   :  { %12457 = vmatpush3.bf16.msra.mxu1 %v12454_v38  ;;  %v2562_v38 = vld [vmem:[%s16609_s9 + $0xf0] sm:$0xff]  ;;  %16747 = vst [vmem:[#allocation38_spill] sm:$0xff] %v16746_v26  ;;  %vm14857_vm2 = vmand %vm3393_vm14, %vm3394_vm15 }
 0x4d7   :  { %12459 = vmatprep.subr.bf16.mxu1 %v12458_v58  ;;  %v12482_v46 = vpack.c.bf16 %v2563_v42, %v2562_v38  ;;  %vm14875_vm9 = vmpackc.low %vm16704_vm8, %vm16704_vm8 }
 0x4da   :  { %12461 = vmatpush3.bf16.msra.mxu1 %v12458_v58  ;;  %v12486_v58 = vpack.c.bf16 %v2565_v1, %v2564_v4  ;;  %v16754_v4 = vmov 0 }
 0x4db   :  { %12469 = vmatprep.subr.bf16.mxu1 %v12468_v44  ;;  %v16755_v4 = vsel %vm14875_vm9, 4294967295, %v16754_v4 }
 0x4dc   :  { %16756 = vst [vmem:[#allocation41_spill] sm:$0xff] %v16755_v4 }
 0x5a8   :  { %v11600_v16 = vpop.f32.mrb[16].mxu1 }
 0x5a9   :  { %v2362_v56 = vadd.f32 %v11600_v16, %v10655_v12  ;;  %v2345_v34 = vpop.f32.mrb[17].mxu1 }
 0x5aa   :  { %v2361_v60 = vadd.f32 %v10655_v12, %v2345_v34 }
 0x5ab   :  { %v14803_v63 = vadd.f32 %v2364_v52, %v2362_v56  ;;  %v16751_v56 = vmov 0 }
 0x5ac   :  { %v14801_v54 = vadd.f32 %v2363_v48, %v2361_v60  ;;  %v16752_v56 = vsel %vm14857_vm2, 4294967295, %v16751_v56 }
 0x5ad   :  { %16753 = vst [vmem:[#allocation40_spill] sm:$0xff] %v16752_v56 }
 0x5ae   :  { %11609 = vmatprep.mubr.msk.f32.mxu0 %vm16704_vm8, %v14801_v54  ;;  %11620 = vmatprep.mubr.msk.f32.mxu1 %vm16704_vm8, %v14801_v54 }
 0x5af   :  { %11610 = vmatmul.mubr.msk.f32.vlgmr.msra.gmra.mrb[18].mxu0 %vm16704_vm8, %v14803_v63  ;;  %11621 = vmatmul.mubr.msk.f32.vlgmr.msra.gmra.mrb[18].mxu1 %vm16704_vm8, %v14803_v63 }
 0x5b0   :  { %12471 = vmatpush3.bf16.msra.mxu1 %v12468_v44  ;;  %11638 = vmatprep.mubr.msk.f32.mxu1 %vm16704_vm8, %v14801_v54  ;;  %v16748_v44 = vmov 0 }
 0x5b1   :  { %12473 = vmatprep.subr.bf16.mxu1 %v12472_v62  ;;  %v16749_v44 = vsel %vm14852_vm7, 4294967295, %v16748_v44 }
 0x5b2   :  { %16750 = vst [vmem:[#allocation39_spill] sm:$0xff] %v16749_v44 }
 0x5b4   :  { %12475 = vmatpush3.bf16.msra.mxu1 %v12472_v62 }
 0x5b5   :  { %12483 = vmatprep.subr.bf16.mxu1 %v12482_v46 }
 0x5b7   :  { %11639 = vmatmul.mubr.msk.f32.vlgmr.msra.gmra.mrb[20].mxu1 %vm16704_vm8, %v14803_v63 }
 0x5b8   :  { %12485 = vmatpush3.bf16.msra.mxu1 %v12482_v46  ;;  %11656 = vmatprep.mubr.msk.f32.mxu1 %vm16704_vm8, %v14801_v54 }
 0x5b9   :  { %12487 = vmatprep.subr.bf16.mxu1 %v12486_v58 }
 0x5bc   :  { %12489 = vmatpush3.bf16.msra.mxu1 %v12486_v58 }
 0x5bf   :  { %11657 = vmatmul.mubr.msk.f32.vlgmr.msra.gmra.mrb[22].mxu1 %vm16704_vm8, %v14803_v63 }
 0x682   :  { %v11611_v12 = vpop.f32.mrb[18].mxu0  ;;  %v11622_v16 = vpop.f32.mrb[18].mxu1 }
 0x683   :  { %v2539_v34 = vadd.f32 %v11622_v16, %v10659_v29  ;;  %v2449_v48 = vpop.f32.mrb[19].mxu0  ;;  %v2533_v52 = vpop.f32.mrb[19].mxu1 }
 0x684   :  { %v2450_v60 = vadd.f32 %v10656_v0, %v2449_v48  ;;  %v2534_v19 = vadd.f32 %v10659_v29, %v2533_v52 }
 0x685   :  { %v2580_v51 = vsel %vm16693_vm6, %v2539_v34, 0.0  ;;  %v3127_v62 = vsel %vm14845_vm0, %v2539_v34, 0.0  ;;  %v2776_v38 = vsel %vm14852_vm7, %v2539_v34, 0.0  ;;  %v3399_v42 = vsel %vm14857_vm2, %v2539_v34, 0.0 }
 0x686   :  { %11627 = vmatprep.mubr.msk.f32.mxu0 %vm16704_vm8, %v2450_v60  ;;  %11677 = vmatprep.mubr.msk.f32.mxu1 %vm16704_vm8, %v2450_v60  ;;  %v2579_v46 = vsel %vm16693_vm6, %v2534_v19, 0.0  ;;  %v3126_v1 = vsel %vm14845_vm0, %v2534_v19, 0.0  ;;  %v2775_v58 = vsel %vm14852_vm7, %v2534_v19, 0.0  ;;  %v3398_v30 = vsel %vm14857_vm2, %v2534_v19, 0.0 }
 0x687   :  { %v12462_v29 = vpack.c.bf16 %v2580_v51, %v2579_v46  ;;  %v12498_v16 = vpack.c.bf16 %v3127_v62, %v3126_v1  ;;  %v12476_v34 = vpack.c.bf16 %v2776_v38, %v2775_v58  ;;  %v12516_v48 = vpack.c.bf16 %v3399_v42, %v3398_v30 }
 0x688   :  { %v2455_v51 = vadd.f32 %v11611_v12, %v10656_v0  ;;  %v16670_v12 = vcvt.s32.f32 %v14834_v55  ;;  %v16673_v46 = vcvt.s32.f32 %v14168_v15 }
 0x689   :  { %12464 = vmatprep.subr.msk.bf16.mxu0 %vm14875_vm9, %v12462_v29  ;;  %12500 = vmatprep.subr.msk.bf16.mxu1 %vm14875_vm9, %v12498_v16 }
 0x68a   :  { %v11640_v52 = vpop.f32.mrb[20].mxu1  ;;  %12467 = vmatpush3.bf16.xpose.msk.msra.mxu0 %vm14875_vm9, %v12462_v29  ;;  %12503 = vmatpush3.bf16.xpose.msk.msra.mxu1 %vm14875_vm9, %v12498_v16  ;;  %v2554_v16 = vmul.f32 0.125, %v16670_v12  ;;  %v16760_v12 = vmov 0 }
 0x68b   :  { %v2761_v39 = vpop.f32.mrb[21].mxu1  ;;  %12478 = vmatprep.subr.msk.bf16.mxu0 %vm14875_vm9, %v12476_v34  ;;  %12518 = vmatprep.subr.msk.bf16.mxu1 %vm14875_vm9, %v12516_v48 }
 0x68c   :  { %v14897_v19 = vpack.c.bf16 %v11640_v52, %v2761_v39  ;;  %v14911_v39 = vadd.s32 8, %v14168_v15  ;;  %v2555_v52 = vfloor.f32 %v2554_v16  ;;  %v16763_v16 = vmov 0 }
 0x68e   :  { %16757 = vst [vmem:[#allocation42_spill] sm:$0xff] %v14911_v39  ;;  %v2548_v0 = vcvt.s32.f32 %v14911_v39 }
 0x690   :  { %v14916_v29 = vmul.f32 0.125, %v2548_v0 }
 0x691   :  { %11628 = vmatmul.mubr.msk.f32.vlgmr.msra.gmra.mrb[20].mxu0 %vm16704_vm8, %v2455_v51  ;;  %11678 = vmatmul.mubr.msk.f32.vlgmr.msra.gmra.mrb[24].mxu1 %vm16704_vm8, %v2455_v51 }
 0x692   :  { %v11658_v62 = vpop.f32.mrb[22].mxu1  ;;  %12481 = vmatpush3.bf16.xpose.msk.msra.mxu0 %vm14875_vm9, %v12476_v34  ;;  %11645 = vmatprep.mubr.msk.f32.mxu0 %vm16704_vm8, %v2450_v60  ;;  %16758 = vst [vmem:[#allocation43_spill] sm:$0xff] %v14916_v29  ;;  %v14922_v34 = vmul.f32 0.125, %v16673_v46 }
 0x693   :  { %v2950_v38 = vpop.f32.mrb[23].mxu1  ;;  %12521 = vmatpush3.bf16.xpose.msk.msra.mxu1 %vm14875_vm9, %v12516_v48  ;;  %11702 = vmatprep.mubr.msk.f32.mxu1 %vm16704_vm8, %v2450_v60  ;;  %v16671_v48 = vfloor.f32 %v14916_v29 }
 0x694   :  { %v12490_v42 = vpack.c.bf16 %v11658_v62, %v2950_v38  ;;  %16759 = vst [vmem:[#allocation44_spill] sm:$0xff] %v14922_v34 }
 0x695   :  { %vm14932_vm10 = vcmp.eq.f32.partialorder %v16671_v48, %v2555_v52 }
 0x696   :  { %12491 = vmatprep.subr.bf16.mxu0 %v12490_v42  ;;  %v16761_v12 = vsel %vm14932_vm10, 4294967295, %v16760_v12 }
 0x697   :  { %16762 = vst [vmem:[#allocation45_spill] sm:$0xff] %v16761_v12 }
 0x699   :  { %11646 = vmatmul.mubr.msk.f32.vlgmr.msra.gmra.mrb[22].mxu0 %vm16704_vm8, %v2455_v51 }
 0x69a   :  { %11703 = vmatmul.mubr.msk.f32.vlgmr.msra.gmra.mrb[26].mxu1 %vm16704_vm8, %v2455_v51  ;;  %12493 = vmatpush3.bf16.msra.mxu0 %v12490_v42  ;;  %v16672_v51 = vfloor.f32 %v14922_v34 }
 0x69b   :  { %12495 = vmatprep.subr.bf16.mxu0 %v14897_v19 }
 0x69c   :  { %vm14938_vm11 = vcmp.eq.f32.partialorder %v16672_v51, %v2555_v52 }
 0x69d   :  { %v16764_v16 = vsel %vm14938_vm11, 4294967295, %v16763_v16 }
 0x69e   :  { %16765 = vst [vmem:[#allocation46_spill] sm:$0xff] %v16764_v16 }
 0x764   :  { %v11629_v1 = vpop.f32.mrb[20].mxu0  ;;  %v11679_v60 = vpop.f32.mrb[24].mxu1 }
 0x765   :  { %v2659_v58 = vpop.f32.mrb[21].mxu0  ;;  %v3200_v30 = vpop.f32.mrb[25].mxu1  ;;  %v2669_v0 = vmul.f32 0.35355338, %v11629_v1 }
 0x766   :  { %v2668_v38 = vmul.f32 0.35355338, %v2659_v58 }
 0x767   :  { %v2671_v52 = vsel %vm14932_vm10, %v2669_v0, -1e+30 }
 0x768   :  { %v2670_v48 = vsel %vm14938_vm11, %v2668_v38, -1e+30 }
 0x769   :  { %v2673_v51 = vsel %vm16692_vm13, %v2670_v48, -inf }
 0x76c   :  { %v11647_v62 = vpop.f32.mrb[22].mxu0 }
 0x76d   :  { %v2859_v42 = vmul.f32 0.35355338, %v11647_v62  ;;  %v14926_v39 = vpop.f32.mrb[26].mxu1  ;;  %v2849_v4 = vpop.f32.mrb[23].mxu0 }
 0x76e   :  { %v2858_v14 = vmul.f32 0.35355338, %v2849_v4  ;;  %v14928_v5 = vpop.f32.mrb[27].mxu1 }
 0x76f   :  { %v2861_v58 = vsel %vm14932_vm10, %v2859_v42, -1e+30  ;;  %v2676_v42 = vsel %vm16692_vm13, %v2671_v52, -inf }
 0x770   :  { %v2865_v4 = vsel %vm16692_vm13, %v2861_v58, -inf  ;;  %v2860_v1 = vsel %vm14938_vm11, %v2858_v14, -1e+30 }
 0x771   :  { %2866 = vmax.xlane.f32.xlu0 %v2865_v4  ;;  %v2862_v62 = vsel %vm16692_vm13, %v2860_v1, -inf }
 0x772   :  { %2863 = vmax.xlane.f32.xlu1 %v2862_v62 }
 0x775   :  { %2674 = vmax.xlane.f32.xlu0 %v2673_v51 }
 0x776   :  { %2677 = vmax.xlane.f32.xlu1 %v2676_v42 }
 0x7fe   :  { %v2867_v46 = vpop.xlane.xlu0 %2866 }
 0x7ff   :  { %v2869_v34 = vsub.f32 %v2861_v58, %v2867_v46  ;;  %v2864_v29 = vpop.xlane.xlu1 %2863 }
 0x800   :  { %v2868_v14 = vsub.f32 %v2860_v1, %v2864_v29  ;;  %v3210_v29 = vmul.f32 0.35355338, %v11679_v60 }
 0x801   :  { %v2872_v4 = vmul.f32 1.442695, %v2869_v34  ;;  %v3209_v34 = vmul.f32 0.35355338, %v3200_v30 }
 0x802   :  { %v2870_v11 = vmul.f32 1.442695, %v2868_v14  ;;  %v2675_v31 = vpop.xlane.xlu0 %2674 }
 0x803   :  { %13255 = vpow2.f32 %v2872_v4  ;;  %v2679_v45 = vsub.f32 %v2670_v48, %v2675_v31  ;;  %v2678_v38 = vpop.xlane.xlu1 %2677 }
 0x804   :  { %13257 = vpow2.f32 %v2870_v11  ;;  %v2680_v62 = vsub.f32 %v2671_v52, %v2678_v38 }
 0x805   :  { %v2681_v8 = vmul.f32 1.442695, %v2679_v45  ;;  %v3211_v45 = vsel %vm14938_vm11, %v3209_v34, -1e+30  ;;  %v2567_v34 = vld [vmem:[%s16609_s9 + $0x118] sm:$0xff] }
 0x806   :  { %v2683_v0 = vmul.f32 1.442695, %v2680_v62  ;;  %v3213_v60 = vsel %vm16692_vm13, %v3211_v45, -inf }
 0x807   :  { %13259 = vpow2.f32 %v2681_v8  ;;  %v3212_v8 = vsel %vm14932_vm10, %v3210_v29, -1e+30  ;;  %v2566_v29 = vld [vmem:[%s16609_s9 + $0x110] sm:$0xff] }
 0x808   :  { %13261 = vpow2.f32 %v2683_v0  ;;  %v3216_v48 = vsel %vm16692_vm13, %v3212_v8, -inf }
 0x80d   :  { %v13256_v51 = vpop.eup %13255 }
 0x80e   :  { %v13258_v24 = vpop.eup %13257  ;;  %v2877_v42 = vsel %vm16692_vm13, %v13256_v51, 0.0 }
 0x80f   :  { %2878 = vadd.xlane.f32.xlu1 %v2877_v42  ;;  %v2874_v46 = vsel %vm16692_vm13, %v13258_v24, 0.0 }
 0x810   :  { %2875 = vadd.xlane.f32.xlu0 %v2874_v46 }
 0x811   :  { %v13260_v58 = vpop.eup %13259 }
 0x812   :  { %v13262_v1 = vpop.eup %13261  ;;  %v2685_v31 = vsel %vm16692_vm13, %v13260_v58, 0.0 }
 0x813   :  { %v2688_v11 = vsel %vm16692_vm13, %v13262_v1, 0.0 }
 0x814   :  { %2689 = vadd.xlane.f32.xlu1 %v2688_v11  ;;  %2686 = vadd.xlane.f32.xlu0 %v2685_v31 }
 0x818   :  { %3217 = vmax.xlane.f32.xlu1 %v3216_v48  ;;  %3214 = vmax.xlane.f32.xlu0 %v3213_v60 }
 0x89c   :  { %v2879_v30 = vpop.xlane.xlu1 %2878 }
 0x89d   :  { %13263 = vrcp.f32 %v2879_v30  ;;  %v2876_v52 = vpop.xlane.xlu0 %2875 }
 0x89e   :  { %13265 = vrcp.f32 %v2876_v52  ;;  %v12504_v52 = vpack.c.bf16 %v2567_v34, %v2566_v29 }
 0x8a1   :  { %v2690_v14 = vpop.xlane.xlu1 %2689  ;;  %v2687_v4 = vpop.xlane.xlu0 %2686 }
 0x8a2   :  { %13267 = vrcp.f32 %v2687_v4  ;;  %v2568_v4 = vld [vmem:[%s16609_s9 + $0x120] sm:$0xff] }
 0x8a3   :  { %13269 = vrcp.f32 %v2690_v14 }
 0x8a5   :  { %v3218_v38 = vpop.xlane.xlu1 %3217  ;;  %v3215_v62 = vpop.xlane.xlu0 %3214 }
 0x8a6   :  { %v3220_v0 = vsub.f32 %v3212_v8, %v3218_v38  ;;  %v3219_v42 = vsub.f32 %v3211_v45, %v3215_v62 }
 0x8a7   :  { %v13264_v46 = vpop.eup %13263 }
 0x8a8   :  { %v13266_v31 = vpop.eup %13265  ;;  %v3223_v11 = vmul.f32 1.442695, %v3220_v0  ;;  %v3221_v48 = vmul.f32 1.442695, %v3219_v42  ;;  %v2883_v30 = vmul.f32 %v13264_v46, %v13256_v51  ;;  %v3482_v51 = vmul.f32 0.35355338, %v14926_v39 }
 0x8a9   :  { %v2882_v60 = vmul.f32 %v13266_v31, %v13258_v24  ;;  %v2569_v24 = vld [vmem:[%s16609_s9 + $0x128] sm:$0xff]  ;;  %v3481_v0 = vmul.f32 0.35355338, %v14928_v5 }
 0x8aa   :  { %13271 = vpow2.f32 %v3223_v11  ;;  %v12508_v62 = vpack.c.bf16 %v2569_v24, %v2568_v4  ;;  %v3484_v39 = vsel %vm14932_vm10, %v3482_v51, -1e+30 }
 0x8ab   :  { %13273 = vpow2.f32 %v3221_v48  ;;  %11663 = vmatprep.mubr.msk.f32.mxu0 %vm16692_vm13, %v2882_v60  ;;  %v3483_v5 = vsel %vm14938_vm11, %v3481_v0, -1e+30  ;;  %v2571_v0 = vld [vmem:[%s16609_s9 + $0x138] sm:$0xff] }
 0x8ac   :  { %11664 = vmatmul.mubr.msk.f32.vlgmr.msra.gmra.mrb[24].mxu0 %vm16692_vm13, %v2883_v30  ;;  %v13268_v8 = vpop.eup %13267  ;;  %v3485_v29 = vsel %vm16692_vm13, %v3483_v5, -inf }
 0x8ad   :  { %12497 = vmatpush3.bf16.msra.mxu0 %v14897_v19  ;;  %v2693_v45 = vmul.f32 %v13268_v8, %v13260_v58  ;;  %v13270_v14 = vpop.eup %13269 }
 0x8ae   :  { %12505 = vmatprep.subr.bf16.mxu0 %v12504_v52  ;;  %v2694_v38 = vmul.f32 %v13270_v14, %v13262_v1  ;;  %v3488_v1 = vsel %vm16692_vm13, %v3484_v39, -inf }
 0x8af   :  { %11670 = vmatprep.mubr.msk.f32.mxu0 %vm16692_vm13, %v2693_v45 }
 0x8b4   :  { %v13272_v19 = vpop.eup %13271  ;;  %11671 = vmatmul.mubr.msk.f32.vlgmr.msra.gmra.mrb[24].mxu0 %vm16692_vm13, %v2694_v38 }
 0x8b5   :  { %v13274_v58 = vpop.eup %13273  ;;  %12507 = vmatpush3.bf16.msra.mxu0 %v12504_v52  ;;  %11688 = vmatprep.mubr.msk.f32.mxu0 %vm16704_vm8, %v14801_v54  ;;  %v3228_v42 = vsel %vm16692_vm13, %v13272_v19, 0.0 }
 0x8b6   :  { %3229 = vadd.xlane.f32.xlu1 %v3228_v42  ;;  %v3225_v46 = vsel %vm16692_vm13, %v13274_v58, 0.0  ;;  %12509 = vmatprep.subr.bf16.mxu0 %v12508_v62 }
 0x8b7   :  { %3226 = vadd.xlane.f32.xlu0 %v3225_v46 }
 0x8b9   :  { %12511 = vmatpush3.bf16.msra.mxu0 %v12508_v62  ;;  %v2570_v62 = vld [vmem:[%s16609_s9 + $0x130] sm:$0xff] }
 0x8ba   :  { %3489 = vmax.xlane.f32.xlu1 %v3488_v1  ;;  %v2572_v1 = vld [vmem:[%s16609_s9 + $0x140] sm:$0xff] }
 0x8bb   :  { %3486 = vmax.xlane.f32.xlu0 %v3485_v29  ;;  %v2573_v29 = vld [vmem:[%s16609_s9 + $0x148] sm:$0xff] }
 0x8bc   :  { %11689 = vmatmul.mubr.msk.f32.vlgmr.msra.gmra.mrb[26].mxu0 %vm16704_vm8, %v14803_v63 }
 0x943   :  { %v3230_v34 = vpop.xlane.xlu1 %3229 }
 0x944   :  { %v3227_v31 = vpop.xlane.xlu0 %3226 }
 0x945   :  { %13275 = vrcp.f32 %v3227_v31  ;;  %v12526_v31 = vpack.c.bf16 %v2573_v29, %v2572_v1 }
 0x947   :  { %v3490_v11 = vpop.xlane.xlu1 %3489 }
 0x948   :  { %v3492_v48 = vsub.f32 %v3484_v39, %v3490_v11  ;;  %v3487_v60 = vpop.xlane.xlu0 %3486  ;;  %v12522_v39 = vpack.c.bf16 %v2571_v0, %v2570_v62 }
 0x949   :  { %v3491_v30 = vsub.f32 %v3483_v5, %v3487_v60 }
 0x94a   :  { %v3495_v52 = vmul.f32 1.442695, %v3492_v48 }
 0x94b   :  { %v3493_v8 = vmul.f32 1.442695, %v3491_v30 }
 0x94c   :  { %13277 = vpow2.f32 %v3495_v52 }
 0x94d   :  { %13279 = vpow2.f32 %v3493_v8 }
 0x94e   :  { %13281 = vrcp.f32 %v3230_v34 }
 0x94f   :  { %v13276_v45 = vpop.eup %13275 }
 0x950   :  { %v3233_v14 = vmul.f32 %v13276_v45, %v13274_v58 }
 0x952   :  { %11695 = vmatprep.mubr.msk.f32.mxu0 %vm16692_vm13, %v3233_v14 }
 0x956   :  { %v13278_v4 = vpop.eup %13277 }
 0x957   :  { %v13280_v24 = vpop.eup %13279  ;;  %v3500_v51 = vsel %vm16692_vm13, %v13278_v4, 0.0 }
 0x958   :  { %3501 = vadd.xlane.f32.xlu1 %v3500_v51  ;;  %v3497_v38 = vsel %vm16692_vm13, %v13280_v24, 0.0  ;;  %v13282_v5 = vpop.eup %13281  ;;  %v10694_v51 = vld [vmem:[%s16610_s10 + $0x40] ss:$0 sm:$0xff] }
 0x959   :  { %3498 = vadd.xlane.f32.xlu0 %v3497_v38  ;;  %v3234_v34 = vmul.f32 %v13282_v5, %v13272_v19 }
 0x98f   :  { %v11690_v58 = vpop.f32.mrb[26].mxu0 }
 0x990   :  { %v3301_v42 = vpop.f32.mrb[27].mxu0 }
 0x991   :  { %v12512_v46 = vpack.c.bf16 %v11690_v58, %v3301_v42 }
 0x993   :  { %12513 = vmatprep.subr.bf16.mxu0 %v12512_v46 }
 0x994   :  { %12515 = vmatpush3.bf16.msra.mxu0 %v12512_v46 }
 0x995   :  { %12523 = vmatprep.subr.bf16.mxu0 %v12522_v39 }
 0x997   :  { %11696 = vmatmul.mubr.msk.f32.vlgmr.msra.gmra.mrb[24].mxu0 %vm16692_vm13, %v3234_v34 }
 0x998   :  { %12525 = vmatpush3.bf16.msra.mxu0 %v12522_v39  ;;  %11713 = vmatprep.mubr.msk.f32.mxu0 %vm16704_vm8, %v14801_v54 }
 0x999   :  { %12527 = vmatprep.subr.bf16.mxu0 %v12526_v31 }
 0x99c   :  { %12529 = vmatpush3.bf16.msra.mxu0 %v12526_v31 }
 0x99f   :  { %11714 = vmatmul.mubr.msk.f32.vlgmr.msra.gmra.mrb[28].mxu0 %vm16704_vm8, %v14803_v63 }
 0x9e5   :  { %v3502_v19 = vpop.xlane.xlu1 %3501 }
 0x9e6   :  { %v3499_v11 = vpop.xlane.xlu0 %3498 }
 0x9e7   :  { %13283 = vrcp.f32 %v3499_v11 }
 0x9e8   :  { %13285 = vrcp.f32 %v3502_v19  ;;  %v3716_v19 = vld [vmem:[%s16609_s9 + $0x158] sm:$0xff] }
 0x9f1   :  { %v13284_v48 = vpop.eup %13283 }
 0x9f2   :  { %v3505_v60 = vmul.f32 %v13284_v48, %v13280_v24  ;;  %v13286_v45 = vpop.eup %13285 }
 0x9f3   :  { %v3506_v14 = vmul.f32 %v13286_v45, %v13278_v4 }
 0x9f4   :  { %11720 = vmatprep.mubr.msk.f32.mxu0 %vm16692_vm13, %v3505_v60 }
 0xa72   :  { %v11715_v30 = vpop.f32.mrb[28].mxu0 }
 0xa73   :  { %v3573_v52 = vpop.f32.mrb[29].mxu0 }
 0xa74   :  { %v12530_v8 = vpack.c.bf16 %v11715_v30, %v3573_v52  ;;  %v3717_v30 = vld [vmem:[%s16609_s9 + $0x160] sm:$0xff] }
 0xa76   :  { %12531 = vmatprep.subr.bf16.mxu0 %v12530_v8 }
 0xa77   :  { %12533 = vmatpush3.bf16.msra.mxu0 %v12530_v8  ;;  %v3718_v8 = vld [vmem:[%s16609_s9 + $0x168] sm:$0xff] }
 0xa78   :  { %v12538_v45 = vpack.c.bf16 %v3718_v8, %v3717_v30  ;;  %v10697_v30 = vld [vmem:[%s16610_s10 + $0x48] ss:$0 sm:$0xff] }
 0xa7a   :  { %11721 = vmatmul.mubr.msk.f32.vlgmr.msra.gmra.mrb[24].mxu0 %vm16692_vm13, %v3506_v14 }
 0xb4d   :  { %v11722_v38 = vpop.f32.mrb[24].mxu0 }
 0xb4e   :  { %v3671_v62 = vadd.f32 %v11722_v38, %v10694_v51  ;;  %v3654_v24 = vpop.f32.mrb[25].mxu0 }
 0xb4f   :  { %v3670_v0 = vadd.f32 %v10694_v51, %v3654_v24 }
 0xb50   :  { %v3673_v58 = vadd.f32 %v3671_v62, %v14803_v63 }
 0xb51   :  { %v3672_v42 = vadd.f32 %v3670_v0, %v14801_v54  ;;  %v3715_v54 = vld [vmem:[%s16609_s9 + $0x150] sm:$0xff] }
 0xb52   :  { %v3677_v46 = vsel %vm16704_vm8, %v3673_v58, 0.0  ;;  %v12534_v52 = vpack.c.bf16 %v3716_v19, %v3715_v54  ;;  %v3826_v54 = vld [vmem:[%s16609_s9 + $0x188] sm:$0xff] }
 0xb53   :  { %3678 = vadd.xlane.f32.xlu1 %v3677_v46  ;;  %v3674_v39 = vsel %vm16704_vm8, %v3672_v42, 0.0 }
 0xb54   :  { %3675 = vadd.xlane.f32.xlu0 %v3674_v39  ;;  %12535 = vmatprep.subr.bf16.mxu1 %v12534_v52 }
 0xb55   :  { %12537 = vmatpush3.bf16.msra.mxu1 %v12534_v52 }
 0xb56   :  { %12539 = vmatprep.subr.bf16.mxu1 %v12538_v45 }
 0xb59   :  { %12541 = vmatpush3.bf16.msra.mxu1 %v12538_v45 }
 0xbe0   :  { %v3679_v4 = vpop.xlane.xlu1 %3678 }
 0xbe1   :  { %v3682_v5 = vmul.f32 0.03125, %v3679_v4  ;;  %v3676_v1 = vpop.xlane.xlu0 %3675 }
 0xbe2   :  { %v3681_v29 = vmul.f32 0.03125, %v3676_v1  ;;  %v10696_v1 = vld [vmem:[%s16610_s10 + $0x60] ss:$0 sm:$0xff] }
 0xbe3   :  { %v3684_v34 = vsub.f32 %v3673_v58, %v3682_v5 }
 0xbe4   :  { %v3683_v31 = vsub.f32 %v3672_v42, %v3681_v29  ;;  %v10695_v42 = vld [vmem:[%s16610_s10 + $0x58] ss:$0 sm:$0xff] }
 0xbe5   :  { %v3686_v11 = vmul.f32 %v3684_v34, %v3684_v34 }
 0xbe6   :  { %v3685_v48 = vmul.f32 %v3683_v31, %v3683_v31 }
 0xbe7   :  { %v3690_v60 = vsel %vm16704_vm8, %v3686_v11, 0.0 }
 0xbe8   :  { %3691 = vadd.xlane.f32.xlu1 %v3690_v60  ;;  %v3687_v63 = vsel %vm16704_vm8, %v3685_v48, 0.0  ;;  %v3823_v60 = vld [vmem:[%s16609_s9 + $0x170] sm:$0xff] }
 0xbe9   :  { %3688 = vadd.xlane.f32.xlu0 %v3687_v63  ;;  %v3825_v63 = vld [vmem:[%s16609_s9 + $0x180] sm:$0xff] }
 0xbea   :  { %v12546_v19 = vpack.c.bf16 %v3826_v54, %v3825_v63 }
 0xc75   :  { %v3692_v14 = vpop.xlane.xlu1 %3691 }
 0xc76   :  { %v3694_v51 = vmul.f32 0.03125, %v3692_v14  ;;  %v3689_v38 = vpop.xlane.xlu0 %3688 }
 0xc77   :  { %v3693_v62 = vmul.f32 0.03125, %v3689_v38 }
 0xc78   :  { %v3696_v24 = vadd.f32 1e-05, %v3694_v51 }
 0xc79   :  { %v3695_v0 = vadd.f32 1e-05, %v3693_v62 }
 0xc7a   :  { %13287 = vrsqrt.f32 %v3696_v24 }
 0xc7b   :  { %13289 = vrsqrt.f32 %v3695_v0 }
 0xc84   :  { %v13288_v58 = vpop.eup %13287 }
 0xc85   :  { %v13290_v46 = vpop.eup %13289  ;;  %v3700_v39 = vmul.f32 %v13288_v58, %v3684_v34  ;;  %v3824_v34 = vld [vmem:[%s16609_s9 + $0x178] sm:$0xff] }
 0xc86   :  { %v3699_v4 = vmul.f32 %v13290_v46, %v3683_v31  ;;  %v12542_v31 = vpack.c.bf16 %v3824_v34, %v3823_v60 }
 0xc87   :  { %v3707_v5 = vmul.f32 %v10695_v42, %v3700_v39 }
 0xc88   :  { %v3706_v29 = vmul.f32 %v10695_v42, %v3699_v4  ;;  %12543 = vmatprep.subr.bf16.mxu1 %v12542_v31 }
 0xc89   :  { %v3714_v48 = vadd.f32 %v10696_v1, %v3707_v5 }
 0xc8a   :  { %v3713_v11 = vadd.f32 %v10696_v1, %v3706_v29 }
 0xc8c   :  { %11731 = vmatprep.mubr.msk.f32.mxu1 %vm16704_vm8, %v3713_v11 }
 0xc8d   :  { %11732 = vmatmul.mubr.msk.f32.vlgmr.msra.gmra.mrb[28].mxu1 %vm16704_vm8, %v3714_v48 }
 0xc8e   :  { %12545 = vmatpush3.bf16.msra.mxu1 %v12542_v31 }
 0xc8f   :  { %12547 = vmatprep.subr.bf16.mxu1 %v12546_v19 }
 0xc92   :  { %12549 = vmatpush3.bf16.msra.mxu1 %v12546_v19  ;;  %v10700_v19 = vld [vmem:[%s16610_s10 + $0x50] ss:$0 sm:$0xff] }
 0xd60   :  { %v11733_v52 = vpop.f32.mrb[28].mxu1 }
 0xd61   :  { %v3802_v8 = vadd.f32 %v11733_v52, %v10697_v30  ;;  %v3796_v45 = vpop.f32.mrb[29].mxu1 }
 0xd62   :  { %v3797_v14 = vadd.f32 %v10697_v30, %v3796_v45 }
 0xd63   :  { %v3806_v51 = vmul.f32 %v3802_v8, %v3802_v8 }
 0xd64   :  { %v3805_v38 = vmul.f32 %v3797_v14, %v3797_v14 }
 0xd65   :  { %v3808_v62 = vmul.f32 %v3806_v51, %v3802_v8 }
 0xd66   :  { %v3807_v24 = vmul.f32 %v3805_v38, %v3797_v14 }
 0xd67   :  { %v3810_v0 = vmul.f32 0.044715, %v3808_v62 }
 0xd68   :  { %v3809_v58 = vmul.f32 0.044715, %v3807_v24 }
 0xd69   :  { %v3812_v42 = vadd.f32 %v3810_v0, %v3802_v8 }
 0xd6a   :  { %v3811_v46 = vadd.f32 %v3809_v58, %v3797_v14 }
 0xd6b   :  { %v3814_v39 = vmul.f32 0.7978846, %v3812_v42 }
 0xd6c   :  { %v3813_v4 = vmul.f32 0.7978846, %v3811_v46 }
 0xd6d   :  { %13291 = vtanh.f32 %v3814_v39 }
 0xd6e   :  { %13293 = vtanh.f32 %v3813_v4 }
 0xd77   :  { %v13292_v5 = vpop.eup %13291 }
 0xd78   :  { %v13294_v1 = vpop.eup %13293  ;;  %v3818_v29 = vadd.f32 1.0, %v13292_v5 }
 0xd79   :  { %v3817_v60 = vadd.f32 1.0, %v13294_v1 }
 0xd7a   :  { %v3820_v34 = vmul.f32 0.5, %v3818_v29  ;;  %v4126_v29 = vld [vmem:[%s16609_s9 + $0x2b8] sm:$0xff] }
 0xd7b   :  { %v3819_v31 = vmul.f32 0.5, %v3817_v60  ;;  %v4127_v60 = vld [vmem:[%s16609_s9 + $0x2c0] sm:$0xff] }
 0xd7c   :  { %v3822_v54 = vmul.f32 %v3820_v34, %v3802_v8 }
 0xd7d   :  { %v3821_v63 = vmul.f32 %v3819_v31, %v3797_v14  ;;  %v4128_v31 = vld [vmem:[%s16609_s9 + $0x2c8] sm:$0xff] }
 0xd7f   :  { %11742 = vmatprep.mubr.msk.f32.mxu1 %vm16704_vm8, %v3821_v63  ;;  %v12562_v63 = vpack.c.bf16 %v4128_v31, %v4127_v60 }
 0xd80   :  { %11743 = vmatmul.mubr.msk.f32.vlgmr.msra.gmra.mrb[30].mxu1 %vm16704_vm8, %v3822_v54  ;;  %v3955_v54 = vld [vmem:[%s16611_s11] sm:$0xff] }
 0xd81   :  { %11749 = vmatprep.mubr.msk.f32.mxu0 %vm16692_vm13, %v3955_v54  ;;  %v4039_v54 = vld [vmem:[%s16611_s11 + $0x18] sm:$0xff] }
 0xe53   :  { %v11744_v30 = vpop.f32.mrb[30].mxu1 }
 0xe54   :  { %v3910_v52 = vadd.f32 %v11744_v30, %v10700_v19  ;;  %v3904_v45 = vpop.f32.mrb[31].mxu1  ;;  %v4122_v30 = vld [vmem:[%s16609_s9 + $0x298] sm:$0xff] }
 0xe55   :  { %v3905_v51 = vadd.f32 %v10700_v19, %v3904_v45  ;;  %v4121_v19 = vld [vmem:[%s16609_s9 + $0x290] sm:$0xff] }
 0xe56   :  { %v3914_v38 = vadd.f32 %v3910_v52, %v3714_v48  ;;  %v12566_v52 = vpack.c.bf16 %v4122_v30, %v4121_v19  ;;  %v16766_v19 = vmov 0.0   ;;  %v4291_v30 = vld [vmem:[%s16609_s9 + $0x2d0] sm:$0xff] }
 0xe57   :  { %v3913_v62 = vadd.f32 %v3905_v51, %v3713_v11  ;;  %v4125_v11 = vld [vmem:[%s16609_s9 + $0x2b0] sm:$0xff] }
 0xe58   :  { %v3918_v24 = vsel %vm16704_vm8, %v3914_v38, 0.0  ;;  %v12558_v34 = vpack.c.bf16 %v4126_v29, %v4125_v11  ;;  %v4123_v11 = vld [vmem:[%s16609_s9 + $0x2a0] sm:$0xff]  ;;  %v4124_v29 = vld [vmem:[%s16609_s9 + $0x2a8] sm:$0xff] }
 0xe59   :  { %3919 = vadd.xlane.f32.xlu1 %v3918_v24  ;;  %v3915_v14 = vsel %vm16704_vm8, %v3913_v62, 0.0  ;;  %v12570_v31 = vpack.c.bf16 %v4124_v29, %v4123_v11 }
 0xe5a   :  { %3916 = vadd.xlane.f32.xlu0 %v3915_v14  ;;  %12559 = vmatprep.subr.bf16.mxu1 %v12558_v34 }
 0xe5b   :  { %12561 = vmatpush3.bf16.msra.mxu1 %v12558_v34 }
 0xe5c   :  { %12563 = vmatprep.subr.bf16.mxu1 %v12562_v63 }
 0xe5f   :  { %12565 = vmatpush3.bf16.msra.mxu1 %v12562_v63  ;;  %v4038_v63 = vld [vmem:[%s16611_s11 + $0x10] sm:$0xff] }
 0xe60   :  { %12567 = vmatprep.subr.bf16.mxu1 %v12566_v52 }
 0xee6   :  { %v3920_v8 = vpop.xlane.xlu1 %3919 }
 0xee7   :  { %v3922_v0 = vmul.f32 0.03125, %v3920_v8  ;;  %v3917_v58 = vpop.xlane.xlu0 %3916 }
 0xee8   :  { %v3921_v42 = vmul.f32 0.03125, %v3917_v58 }
 0xee9   :  { %v3924_v46 = vsub.f32 %v3914_v38, %v3922_v0  ;;  %v10703_v0 = vld [vmem:[%s16610_s10 + $0x68] ss:$0 sm:$0xff] }
 0xeea   :  { %v3923_v39 = vsub.f32 %v3913_v62, %v3921_v42 }
 0xeeb   :  { %v3926_v4 = vmul.f32 %v3924_v46, %v3924_v46 }
 0xeec   :  { %v3925_v5 = vmul.f32 %v3923_v39, %v3923_v39 }
 0xeed   :  { %v3930_v1 = vsel %vm16704_vm8, %v3926_v4, 0.0 }
 0xeee   :  { %3931 = vadd.xlane.f32.xlu1 %v3930_v1  ;;  %v3927_v48 = vsel %vm16704_vm8, %v3925_v5, 0.0  ;;  %v10704_v5 = vld [vmem:[%s16610_s10 + $0x70] ss:$0 sm:$0xff] }
 0xeef   :  { %3928 = vadd.xlane.f32.xlu0 %v3927_v48 }
 0xf7b   :  { %v3932_v45 = vpop.xlane.xlu1 %3931 }
 0xf7c   :  { %v3934_v51 = vmul.f32 0.03125, %v3932_v45  ;;  %v3929_v38 = vpop.xlane.xlu0 %3928 }
 0xf7d   :  { %v3933_v62 = vmul.f32 0.03125, %v3929_v38  ;;  %v4294_v38 = vld [vmem:[%s16609_s9 + $0x2e8] sm:$0xff] }
 0xf7e   :  { %v3936_v24 = vadd.f32 1e-05, %v3934_v51  ;;  %v4293_v51 = vld [vmem:[%s16609_s9 + $0x2e0] sm:$0xff] }
 0xf7f   :  { %v3935_v14 = vadd.f32 1e-05, %v3933_v62 }
 0xf80   :  { %13295 = vrsqrt.f32 %v3936_v24 }
 0xf81   :  { %13297 = vrsqrt.f32 %v3935_v14  ;;  %v12578_v14 = vpack.c.bf16 %v4294_v38, %v4293_v51  ;;  %v4471_v51 = vld [vmem:[%s16611_s11 + $0x28] sm:$0xff]  ;;  %v4545_v38 = vld [vmem:[%s16611_s11 + $0x30] sm:$0xff] }
 0xf8a   :  { %v13296_v8 = vpop.eup %13295 }
 0xf8b   :  { %v13298_v58 = vpop.eup %13297  ;;  %v3940_v42 = vmul.f32 %v13296_v8, %v3924_v46 }
 0xf8c   :  { %v3939_v4 = vmul.f32 %v13298_v58, %v3923_v39  ;;  %v3956_v39 = vld [vmem:[%s16611_s11 + $0x8] sm:$0xff]  ;;  %v16682_v58 = vmov 0.0|0.0  }
 0xf8d   :  { %v3947_v1 = vmul.f32 %v10703_v0, %v3940_v42  ;;  %v10715_v42 = vld [vmem:[%s16610_s10 + $0xc0] ss:$0 sm:$0xff] }
 0xf8e   :  { %v3946_v48 = vmul.f32 %v10703_v0, %v3939_v4 }
 0xf8f   :  { %v3954_v60 = vadd.f32 %v10704_v5, %v3947_v1 }
 0xf90   :  { %v3953_v34 = vadd.f32 %v10704_v5, %v3946_v48 }
 0xf92   :  { %11767 = vmatprep.mubr.msk.f32.mxu1 %vm16704_vm8, %v3953_v34  ;;  %v12550_v46 = vpack.c.bf16 %v3954_v60, %v3953_v34 }
 0xf93   :  { %11768 = vmatmul.mubr.msk.f32.vlgmr.msra.gmra.mrb[32].mxu1 %vm16704_vm8, %v3954_v60 }
 0xf94   :  { %12551 = vmatprep.subr.bf16.mxu0 %v12550_v46  ;;  %12569 = vmatpush3.bf16.msra.mxu1 %v12566_v52  ;;  %v4292_v52 = vld [vmem:[%s16609_s9 + $0x2d8] sm:$0xff] }
 0xf95   :  { %12553 = vmatpush3.bf16.msra.mxu0 %v12550_v46  ;;  %12571 = vmatprep.subr.bf16.mxu1 %v12570_v31  ;;  %v12574_v45 = vpack.c.bf16 %v4292_v52, %v4291_v30 }
 0xf96   :  { %12555 = vmatprep.subr.bf16.mxu0 %v12550_v46 }
 0xf98   :  { %11750 = vmatmul.mubr.msk.f32.vlgmr.msra.gmra.mrb[30].mxu0 %vm16692_vm13, %v3956_v39  ;;  %12573 = vmatpush3.bf16.msra.mxu1 %v12570_v31 }
 0xf99   :  { %12557 = vmatpush3.bf16.msra.mxu0 %v12550_v46  ;;  %11756 = vmatprep.mubr.msk.f32.mxu0 %vm16692_vm13, %v4038_v63 }
 0xf9a   :  { %12575 = vmatprep.subr.bf16.mxu1 %v12574_v45  ;;  %12582 = vmatprep.subr.bf16.mxu0 %v16682_v58 }
 0xf9c   :  { %11757 = vmatmul.mubr.msk.f32.vlgmr.msra.gmra.mrb[32].mxu0 %vm16692_vm13, %v4039_v54 }
 0xf9d   :  { %11796 = vmatprep.mubr.msk.f32.mxu0 %vm16706_vm5, %v16766_v19 }
0x106b   :  { %v11751_v62 = vpop.f32.mrb[30].mxu0 }
0x106c   :  { %v4029_v24 = vpop.f32.mrb[31].mxu0 }
0x106d   :  { %11778 = vmatprep.mubr.msk.f32.mxu1 %vm16704_vm8, %v4029_v24  ;;  %v4622_v24 = vld [vmem:[%s16609_s9 + $0x198] sm:$0xff] }
0x106e   :  { %11779 = vmatmul.mubr.msk.f32.vlgmr.msra.gmra.mrb[32].mxu1 %vm16704_vm8, %v11751_v62  ;;  %v4621_v62 = vld [vmem:[%s16609_s9 + $0x190] sm:$0xff] }
0x106f   :  { %12577 = vmatpush3.bf16.msra.mxu1 %v12574_v45  ;;  %v11758_v8 = vpop.f32.mrb[32].mxu0  ;;  %v4397_v45 = vld [vmem:[%s16611_s11 + $0x20] sm:$0xff] }
0x1070   :  { %12579 = vmatprep.subr.bf16.mxu1 %v12578_v14  ;;  %v4112_v0 = vpop.f32.mrb[33].mxu0 }
0x1071   :  { %11789 = vmatprep.mubr.msk.f32.mxu1 %vm16704_vm8, %v4112_v0  ;;  %v4624_v0 = vld [vmem:[%s16609_s9 + $0x1a8] sm:$0xff] }
0x1073   :  { %12581 = vmatpush3.bf16.msra.mxu1 %v12578_v14  ;;  %v12592_v14 = vpack.c.bf16 %v4622_v24, %v4621_v62  ;;  %v4787_v62 = vld [vmem:[%s16609_s9 + $0x1d0] sm:$0xff] }
0x1074   :  { %11835 = vmatprep.subr.mxu1 %v16766_v19 }
0x1076   :  { %11790 = vmatmul.mubr.msk.f32.vlgmr.msra.gmra.mrb[32].mxu1 %vm16704_vm8, %v11758_v8  ;;  %v4623_v8 = vld [vmem:[%s16609_s9 + $0x1a0] sm:$0xff] }
0x1077   :  { %11837 = vmatprep.mubr.msk.f32.mxu1 %vm16706_vm5, %v16766_v19 }
0x1149   :  { %v11791_v4 = vpop.f32.mrb[32].mxu1 }
0x114a   :  { %v4384_v5 = vadd.f32 %v11791_v4, %v10715_v42  ;;  %v4367_v1 = vpop.f32.mrb[33].mxu1 }
0x114b   :  { %v4383_v48 = vadd.f32 %v10715_v42, %v4367_v1  ;;  %v12595_v42 = vpack.c.bf16 %v4624_v0, %v4623_v8  ;;  %v4788_v8 = vld [vmem:[%s16609_s9 + $0x1d8] sm:$0xff]  ;;  %v4791_v0 = vld [vmem:[%s16609_s9 + $0x1f0] sm:$0xff] }
0x114c   :  { %v4388_v11 = vmin.f32 %v4384_v5, 0.0  ;;  %vm4386_vm14 = vcmp.gt.f32.partialorder %v4384_v5, 0.0 }
0x114d   :  { %v4387_v29 = vmin.f32 %v4383_v48, 0.0  ;;  %vm4385_vm15 = vcmp.gt.f32.partialorder %v4383_v48, 0.0 }
0x114e   :  { %v4391_v60 = vmul.f32 1.442695, %v4388_v11 }
0x114f   :  { %v4389_v34 = vmul.f32 1.442695, %v4387_v29  ;;  %v4703_v29 = vld [vmem:[%s16609_s9 + $0x1b0] sm:$0xff] }
0x1150   :  { %13299 = vpow2.f32 %v4391_v60  ;;  %v4704_v60 = vld [vmem:[%s16609_s9 + $0x1b8] sm:$0xff] }
0x1151   :  { %13301 = vpow2.f32 %v4389_v34 }
0x115a   :  { %v13300_v31 = vpop.eup %13299 }
0x115b   :  { %v13302_v46 = vpop.eup %13301  ;;  %v10717_v39 = vadd.f32 -1.0, %v13300_v31  ;;  %v12598_v31 = vpack.c.bf16 %v4704_v60, %v4703_v29  ;;  %v4789_v29 = vld [vmem:[%s16609_s9 + $0x1e0] sm:$0xff] }
0x115c   :  { %v10716_v63 = vadd.f32 -1.0, %v13302_v46 }
0x115d   :  { %v4396_v54 = vsel %vm4386_vm14, %v4384_v5, %v10717_v39 }
0x115e   :  { %v4395_v30 = vsel %vm4385_vm15, %v4383_v48, %v10716_v63  ;;  %v4705_v63 = vld [vmem:[%s16609_s9 + $0x1c0] sm:$0xff]  ;;  %vm16681_vm15 = vcmask 64512  }
0x115f   :  { %v12583_v52 = vpack.c.bf16 %v4396_v54, %v4395_v30  ;;  %v4706_v54 = vld [vmem:[%s16609_s9 + $0x1c8] sm:$0xff] }
0x1160   :  { %v12601_v30 = vpack.c.bf16 %v4706_v54, %v4705_v63 }
0x1161   :  { %12584 = vmatpush3.bf16.msra.mxu0 %v12583_v52 }
0x1162   :  { %12585 = vmatprep.subr.bf16.mxu0 %v16682_v58 }
0x1164   :  { %11797 = vmatmul.mubr.msk.f32.vlgmr.msra.gmra.mrb[34].mxu0 %vm16692_vm13, %v4397_v45 }
0x1165   :  { %12587 = vmatpush3.bf16.msra.mxu0 %v12583_v52  ;;  %11803 = vmatprep.mubr.msk.f32.mxu0 %vm16706_vm5, %v16766_v19 }
0x1166   :  { %12588 = vmatprep.subr.bf16.mxu0 %v16682_v58 }
0x1168   :  { %11804 = vmatmul.mubr.msk.f32.vlgmr.msra.gmra.mrb[36].mxu0 %vm16692_vm13, %v4471_v51  ;;  %v10723_v51 = vld [vmem:[%s16610_s10 + $0x80] ss:$0 sm:$0xff] }
0x1169   :  { %12590 = vmatpush3.bf16.msra.mxu0 %v12583_v52  ;;  %11810 = vmatprep.mubr.msk.f32.mxu0 %vm16706_vm5, %v16766_v19 }
0x116a   :  { %12591 = vmatprep.subr.bf16.mxu0 %v16682_v58 }
0x116c   :  { %11811 = vmatmul.mubr.msk.f32.vlgmr.msra.gmra.mrb[38].mxu0 %vm16692_vm13, %v4545_v38 }
0x116d   :  { %11821 = vmatprep.mubr.msk.f32.mxu0 %vm16706_vm5, %v16766_v19  ;;  %12593 = vmatpush3.bf16.msra.mxu0 %v12592_v14 }
0x116e   :  { %12594 = vmatprep.subr.bf16.mxu0 %v16682_v58 }
0x1171   :  { %12596 = vmatpush3.bf16.msra.mxu0 %v12595_v42  ;;  %v4792_v42 = vld [vmem:[%s16609_s9 + $0x1f8] sm:$0xff] }
0x1172   :  { %12597 = vmatprep.subr.bf16.mxu0 %v16682_v58 }
0x1237   :  { %v4467_v4 = vpop.f32.mrb[34].mxu0 }
0x1238   :  { %v11798_v5 = vpop.f32.mrb[35].mxu0 }
0x123b   :  { %v4541_v1 = vpop.f32.mrb[36].mxu0 }
0x123c   :  { %v4619_v48 = vmax.f32 %v4467_v4, %v4541_v1  ;;  %v11805_v11 = vpop.f32.mrb[37].mxu0  ;;  %v10721_v4 = vld [vmem:[%s16610_s10 + $0x78] ss:$0 sm:$0xff] }
0x123d   :  { %v12610_v11 = vpack.c.bf16 %v4792_v42, %v4791_v0 }
0x123f   :  { %v4615_v34 = vpop.f32.mrb[38].mxu0 }
0x1240   :  { %v15184_v46 = vmax.f32 %v4619_v48, %v4615_v34  ;;  %v11812_v39 = vpop.f32.mrb[39].mxu0  ;;  %v12604_v48 = vpack.c.bf16 %v4788_v8, %v4787_v62  ;;  %v4790_v34 = vld [vmem:[%s16609_s9 + $0x1e8] sm:$0xff] }
0x1241   :  { %v4794_v39 = vld [vmem:[%s16609_s9 + $0x208] sm:$0xff]  ;;  %v12607_v63 = vpack.c.bf16 %v4790_v34, %v4789_v29 }
0x1242   :  { %11822 = vmatmul.mubr.msk.f32.vlgmr.msra.gmra.mrb[40].mxu0 %vm16704_vm8, %v15184_v46 }
0x1243   :  { %12599 = vmatpush3.bf16.msra.mxu0 %v12598_v31  ;;  %11832 = vmatprep.mubr.msk.f32.mxu0 %vm16706_vm5, %v16766_v19  ;;  %v4793_v31 = vld [vmem:[%s16609_s9 + $0x200] sm:$0xff] }
0x1244   :  { %12600 = vmatprep.subr.bf16.mxu0 %v16682_v58  ;;  %v12613_v54 = vpack.c.bf16 %v4794_v39, %v4793_v31 }
0x1247   :  { %12602 = vmatpush3.bf16.msra.mxu0 %v12601_v30 }
0x1248   :  { %11851 = vmatprep.subr.mxu0 %v16766_v19 }
0x124a   :  { %11833 = vmatmul.mubr.msk.f32.vlgmr.msra.gmra.mrb[42].mxu0 %vm16704_vm8, %v15184_v46 }
0x124b   :  { %11853 = vmatprep.mubr.msk.f32.mxu0 %vm16706_vm5, %v16766_v19 }
0x1315   :  { %v4699_v52 = vpop.f32.mrb[40].mxu0 }
0x1316   :  { %v11823_v45 = vpop.f32.mrb[41].mxu0  ;;  %v15233_v60 = vadd.f32 %v10721_v4, %v4699_v52  ;;  %v16767_v52 = vcvt.s32.f32 %v14168_v15 }
0x1318   :  { %v4782_v45 = vmul.f32 0.25, %v16767_v52 }
0x131a   :  { %v4783_v62 = vfloor.f32 %v4782_v45 }
0x131d   :  { %v4778_v38 = vpop.f32.mrb[42].mxu0 }
0x131e   :  { %v15208_v24 = vadd.f32 %v10723_v51, %v4778_v38  ;;  %v11834_v14 = vpop.f32.mrb[43].mxu0  ;;  %v16768_v51 = vcvt.s32.f32 %v14834_v55 }
0x1320   :  { %v4803_v5 = vsel %vm16693_vm6, %v15208_v24, 0.0  ;;  %v4964_v1 = vsel %vm14852_vm7, %v15208_v24, 0.0  ;;  %v5267_v30 = vsel %vm14845_vm0, %v15208_v24, 0.0  ;;  %v4784_v38 = vmul.f32 0.25, %v16768_v51 }
0x1321   :  { %11836 = vmatpush3.xpose.msk.msra.mxu1 %vm16704_vm8, %v4803_v5  ;;  %11852 = vmatpush3.xpose.msk.msra.mxu0 %vm16704_vm8, %v4964_v1 }
0x1322   :  { %12603 = vmatprep.subr.bf16.mxu1 %v16682_v58  ;;  %12609 = vmatprep.subr.bf16.mxu0 %v16682_v58  ;;  %v15279_v14 = vfloor.f32 %v4784_v38 }
0x1324   :  { %11838 = vmatmul.mubr.msk.f32.vlgmr.msra.gmra.mrb[34].mxu1 %vm16704_vm8, %v15233_v60  ;;  %11854 = vmatmul.mubr.msk.f32.vlgmr.msra.gmra.mrb[44].mxu0 %vm16704_vm8, %v15233_v60  ;;  %16769 = vst [vmem:[#allocation47_spill] sm:$0xff] %v15279_v14  ;;  %vm15282_vm14 = vcmp.eq.f32.partialorder %v4783_v62, %v15279_v14 }
0x1325   :  { %12605 = vmatpush3.bf16.msra.mxu1 %v12604_v48  ;;  %12611 = vmatpush3.bf16.msra.mxu0 %v12610_v11 }
0x1326   :  { %12606 = vmatprep.subr.bf16.mxu1 %v16682_v58  ;;  %12612 = vmatprep.subr.bf16.mxu0 %v16682_v58 }
0x1327   :  { %11848 = vmatprep.mubr.msk.f32.mxu1 %vm16706_vm5, %v16766_v19  ;;  %11864 = vmatprep.mubr.msk.f32.mxu0 %vm16706_vm5, %v16766_v19 }
0x1329   :  { %12608 = vmatpush3.bf16.msra.mxu1 %v12607_v63  ;;  %12614 = vmatpush3.bf16.msra.mxu0 %v12613_v54 }
0x132a   :  { %11877 = vmatprep.subr.mxu0 %v16766_v19  ;;  %11867 = vmatprep.subr.mxu1 %v16766_v19 }
0x132c   :  { %11849 = vmatmul.mubr.msk.f32.vlgmr.msra.gmra.mrb[36].mxu1 %vm16704_vm8, %v15184_v46  ;;  %11865 = vmatmul.mubr.msk.f32.vlgmr.msra.gmra.mrb[46].mxu0 %vm16704_vm8, %v15184_v46 }
0x132d   :  { %11879 = vmatprep.mubr.msk.f32.mxu0 %vm16706_vm5, %v16766_v19  ;;  %11869 = vmatprep.mubr.msk.f32.mxu1 %vm16706_vm5, %v16766_v19 }
0x1332   :  { %11878 = vmatpush3.xpose.msk.msra.mxu0 %vm16704_vm8, %v5267_v30 }
0x1333   :  { %11893 = vmatprep.subr.mxu0 %v16766_v19 }
0x1335   :  { %11880 = vmatmul.mubr.msk.f32.vlgmr.msra.gmra.mrb[48].mxu0 %vm16704_vm8, %v15233_v60 }
0x1336   :  { %11895 = vmatprep.mubr.msk.f32.mxu0 %vm16706_vm5, %v16766_v19 }
0x13f7   :  { %v4876_v8 = vpop.f32.mrb[34].mxu1  ;;  %v5034_v0 = vpop.f32.mrb[44].mxu0 }
0x13f8   :  { %v4880_v4 = vmul.f32 0.35355338, %v4876_v8  ;;  %v5038_v5 = vmul.f32 0.35355338, %v5034_v0  ;;  %v11839_v1 = vpop.f32.mrb[35].mxu1  ;;  %v11855_v48 = vpop.f32.mrb[45].mxu0 }
0x13fa   :  { %v4881_v11 = vsel %vm15282_vm14, %v4880_v4, -1e+30  ;;  %v5039_v29 = vsel %vm15282_vm14, %v5038_v5, -1e+30 }
0x13fb   :  { %v4883_v34 = vsel %vm16681_vm15, %v4881_v11, -inf  ;;  %v5040_v31 = vsel %vm16681_vm15, %v5039_v29, -inf }
0x13fc   :  { %4884 = vmax.xlane.f32.xlu1 %v4883_v34  ;;  %5041 = vmax.xlane.f32.xlu0 %v5040_v31 }
0x13ff   :  { %v4960_v39 = vpop.f32.mrb[36].mxu1  ;;  %v5117_v63 = vpop.f32.mrb[46].mxu0 }
0x1400   :  { %v11850_v54 = vpop.f32.mrb[37].mxu1  ;;  %v11866_v30 = vpop.f32.mrb[47].mxu0  ;;  %11868 = vmatpush3.msra.mxu1 %v5117_v63 }
0x1401   :  { %11872 = vmatprep.subr.mxu1 %v16766_v19 }
0x1408   :  { %v5337_v52 = vpop.f32.mrb[48].mxu0 }
0x1409   :  { %v11881_v45 = vpop.f32.mrb[49].mxu0  ;;  %v5341_v5 = vmul.f32 0.35355338, %v5337_v52 }
0x140b   :  { %v5342_v63 = vsel %vm15282_vm14, %v5341_v5, -1e+30 }
0x140c   :  { %v5343_v54 = vsel %vm16681_vm15, %v5342_v63, -inf }
0x1489   :  { %v4885_v51 = vpop.xlane.xlu1 %4884  ;;  %v5042_v38 = vpop.xlane.xlu0 %5041 }
0x148a   :  { %v4886_v62 = vsub.f32 %v4881_v11, %v4885_v51  ;;  %v5043_v8 = vsub.f32 %v5039_v29, %v5042_v38 }
0x148c   :  { %v4887_v0 = vmul.f32 1.442695, %v4886_v62  ;;  %v5044_v4 = vmul.f32 1.442695, %v5043_v8  ;;  %v4795_v62 = vld [vmem:[%s16609_s9 + $0x210] sm:$0xff]  ;;  %v4796_v8 = vld [vmem:[%s16609_s9 + $0x218] sm:$0xff] }
0x148e   :  { %13303 = vpow2.f32 %v4887_v0 }
0x148f   :  { %13305 = vpow2.f32 %v5044_v4  ;;  %v12616_v4 = vpack.c.bf16 %v4796_v8, %v4795_v62 }
0x1498   :  { %v13304_v1 = vpop.eup %13303 }
0x1499   :  { %v13306_v48 = vpop.eup %13305  ;;  %v4889_v34 = vsel %vm16681_vm15, %v13304_v1, 0.0 }
0x149a   :  { %4890 = vadd.xlane.f32.xlu1 %v4889_v34  ;;  %v5046_v31 = vsel %vm16681_vm15, %v13306_v48, 0.0  ;;  %v4798_v34 = vld [vmem:[%s16609_s9 + $0x228] sm:$0xff] }
0x149b   :  { %5047 = vadd.xlane.f32.xlu0 %v5046_v31 }
0x149f   :  { %5344 = vmax.xlane.f32.xlu0 %v5343_v54  ;;  %v4800_v54 = vld [vmem:[%s16609_s9 + $0x238] sm:$0xff] }
0x1527   :  { %v4891_v11 = vpop.xlane.xlu1 %4890 }
0x1528   :  { %v5048_v29 = vpop.xlane.xlu0 %5047 }
0x1529   :  { %13307 = vrcp.f32 %v5048_v29  ;;  %v4801_v29 = vld [vmem:[%s16609_s9 + $0x240] sm:$0xff] }
0x152a   :  { %13309 = vrcp.f32 %v4891_v11 }
0x152c   :  { %v5345_v30 = vpop.xlane.xlu0 %5344 }
0x152d   :  { %v5346_v52 = vsub.f32 %v5342_v63, %v5345_v30  ;;  %v4799_v63 = vld [vmem:[%s16609_s9 + $0x230] sm:$0xff]  ;;  %v4802_v30 = vld [vmem:[%s16609_s9 + $0x248] sm:$0xff] }
0x152e   :  { %v12622_v11 = vpack.c.bf16 %v4800_v54, %v4799_v63 }
0x152f   :  { %v5347_v45 = vmul.f32 1.442695, %v5346_v52  ;;  %v12625_v52 = vpack.c.bf16 %v4802_v30, %v4801_v29 }
0x1531   :  { %13311 = vpow2.f32 %v5347_v45 }
0x1533   :  { %v13308_v51 = vpop.eup %13307 }
0x1534   :  { %v5050_v38 = vmul.f32 %v13308_v51, %v13306_v48  ;;  %v13310_v0 = vpop.eup %13309  ;;  %v4797_v48 = vld [vmem:[%s16609_s9 + $0x220] sm:$0xff] }
0x1535   :  { %v4893_v5 = vmul.f32 %v13310_v0, %v13304_v1 }
0x1536   :  { %11870 = vmatmul.mubr.msk.f32.vlgmr.msra.gmra.mrb[38].mxu1 %vm16681_vm15, %v5050_v38 }
0x1537   :  { %11873 = vmatpush3.msra.mxu1 %v4960_v39  ;;  %11874 = vmatprep.mubr.msk.f32.mxu1 %vm16706_vm5, %v16766_v19  ;;  %v12619_v39 = vpack.c.bf16 %v4798_v34, %v4797_v48 }
0x1538   :  { %12615 = vmatprep.subr.bf16.mxu1 %v16682_v58 }
0x153a   :  { %11875 = vmatmul.mubr.msk.f32.vlgmr.msra.gmra.mrb[40].mxu1 %vm16681_vm15, %v4893_v5 }
0x153b   :  { %v13312_v31 = vpop.eup %13311  ;;  %12617 = vmatpush3.bf16.msra.mxu1 %v12616_v4  ;;  %11890 = vmatprep.mubr.msk.f32.mxu1 %vm16706_vm5, %v16766_v19 }
0x153c   :  { %12618 = vmatprep.subr.bf16.mxu1 %v16682_v58  ;;  %v5349_v1 = vsel %vm16681_vm15, %v13312_v31, 0.0 }
0x153d   :  { %5350 = vadd.xlane.f32.xlu1 %v5349_v1 }
0x153f   :  { %12620 = vmatpush3.bf16.msra.mxu1 %v12619_v39  ;;  %v5498_v39 = vsel %vm14857_vm2, %v15208_v24, 0.0 }
0x1540   :  { %12621 = vmatprep.subr.bf16.mxu1 %v16682_v58 }
0x1542   :  { %11891 = vmatmul.mubr.msk.f32.vlgmr.msra.gmra.mrb[42].mxu1 %vm16704_vm8, %v15184_v46 }
0x1543   :  { %12623 = vmatpush3.bf16.msra.mxu1 %v12622_v11  ;;  %11911 = vmatprep.mubr.msk.f32.mxu1 %vm16706_vm5, %v16766_v19 }
0x1544   :  { %12624 = vmatprep.subr.bf16.mxu1 %v16682_v58 }
0x1547   :  { %12626 = vmatpush3.bf16.msra.mxu1 %v12625_v52 }
0x1548   :  { %12633 = vmatprep.subr.bf16.mxu1 %v16682_v58 }
0x154a   :  { %11912 = vmatmul.mubr.msk.f32.vlgmr.msra.gmra.mrb[44].mxu1 %vm16704_vm8, %v15184_v46 }
0x154b   :  { %11938 = vmatprep.mubr.msk.f32.mxu1 %vm16706_vm5, %v16766_v19 }
0x15ca   :  { %v5351_v45 = vpop.xlane.xlu1 %5350 }
0x15cb   :  { %13313 = vrcp.f32 %v5351_v45 }
0x15d5   :  { %v13314_v4 = vpop.eup %13313 }
0x15d6   :  { %v5353_v5 = vmul.f32 %v13314_v4, %v13312_v31 }
0x1609   :  { %v5190_v51 = vpop.f32.mrb[38].mxu1 }
0x160a   :  { %v11871_v38 = vpop.f32.mrb[39].mxu1 }
0x160d   :  { %v5263_v62 = vpop.f32.mrb[40].mxu1 }
0x160e   :  { %v5264_v8 = vadd.f32 %v5263_v62, %v5190_v51  ;;  %v11876_v0 = vpop.f32.mrb[41].mxu1 }
0x1615   :  { %v5420_v48 = vpop.f32.mrb[42].mxu1 }
0x1616   :  { %v11892_v34 = vpop.f32.mrb[43].mxu1  ;;  %11894 = vmatpush3.msra.mxu0 %v5420_v48  ;;  %v10741_v48 = vld [vmem:[%s16610_s10 + $0x88] ss:$0 sm:$0xff] }
0x1617   :  { %11896 = vmatmul.mubr.msk.f32.vlgmr.msra.gmra.mrb[50].mxu0 %vm16681_vm15, %v5353_v5  ;;  %11898 = vmatprep.subr.mxu0 %v16766_v19 }
0x1618   :  { %11900 = vmatprep.mubr.msk.f32.mxu0 %vm16706_vm5, %v16766_v19 }
0x161d   :  { %11899 = vmatpush3.xpose.msk.msra.mxu0 %vm16704_vm8, %v5498_v39  ;;  %v5651_v1 = vpop.f32.mrb[44].mxu1 }
0x161e   :  { %v11913_v63 = vpop.f32.mrb[45].mxu1  ;;  %11914 = vmatprep.subr.mxu0 %v16766_v19 }
0x1620   :  { %11901 = vmatmul.mubr.msk.f32.vlgmr.msra.gmra.mrb[52].mxu0 %vm16704_vm8, %v15233_v60 }
0x1621   :  { %11915 = vmatpush3.msra.mxu0 %v5651_v1  ;;  %11916 = vmatprep.mubr.msk.f32.mxu0 %vm16706_vm5, %v16766_v19 }
0x1622   :  { %12627 = vmatprep.subr.bf16.mxu0 %v16682_v58 }
0x16ea   :  { %v5493_v31 = vpop.f32.mrb[50].mxu0 }
0x16eb   :  { %v5497_v54 = vadd.f32 %v5493_v31, %v5264_v8  ;;  %v11897_v11 = vpop.f32.mrb[51].mxu0 }
0x16f3   :  { %v5568_v29 = vpop.f32.mrb[52].mxu0 }
0x16f4   :  { %v5572_v24 = vmul.f32 0.35355338, %v5568_v29  ;;  %v11902_v30 = vpop.f32.mrb[53].mxu0 }
0x16f6   :  { %v5573_v52 = vsel %vm15282_vm14, %v5572_v24, -1e+30 }
0x16f7   :  { %v5574_v45 = vsel %vm16681_vm15, %v5573_v52, -inf }
0x16f8   :  { %5575 = vmax.xlane.f32.xlu0 %v5574_v45  ;;  %v5761_v45 = vld [vmem:[%s16609_s9 + $0x250] sm:$0xff] }
0x1785   :  { %v5576_v51 = vpop.xlane.xlu0 %5575 }
0x1786   :  { %v5577_v60 = vsub.f32 %v5573_v52, %v5576_v51 }
0x1788   :  { %v5578_v38 = vmul.f32 1.442695, %v5577_v60  ;;  %v5764_v60 = vld [vmem:[%s16609_s9 + $0x268] sm:$0xff] }
0x178a   :  { %13315 = vpow2.f32 %v5578_v38 }
0x1794   :  { %v13316_v62 = vpop.eup %13315 }
0x1795   :  { %v5580_v0 = vsel %vm16681_vm15, %v13316_v62, 0.0 }
0x1796   :  { %5581 = vadd.xlane.f32.xlu1 %v5580_v0 }
0x1823   :  { %v5582_v4 = vpop.xlane.xlu1 %5581 }
0x1824   :  { %13317 = vrcp.f32 %v5582_v4 }
0x182e   :  { %v13318_v8 = vpop.eup %13317 }
0x182f   :  { %v5584_v5 = vmul.f32 %v13318_v8, %v13316_v62 }
0x1831   :  { %11917 = vmatmul.mubr.msk.f32.vlgmr.msra.gmra.mrb[54].mxu0 %vm16681_vm15, %v5584_v5  ;;  %v10742_v5 = vld [vmem:[%s16610_s10 + $0xa0] ss:$0 sm:$0xff] }
0x1832   :  { %11927 = vmatprep.mubr.msk.f32.mxu0 %vm16706_vm5, %v16766_v19 }
0x1904   :  { %v5724_v42 = vpop.f32.mrb[54].mxu0 }
0x1905   :  { %v5728_v34 = vadd.f32 %v5724_v42, %v5497_v54  ;;  %v11918_v39 = vpop.f32.mrb[55].mxu0  ;;  %v5762_v54 = vld [vmem:[%s16609_s9 + $0x258] sm:$0xff] }
0x1906   :  { %v12628_v51 = vpack.c.bf16 %v5762_v54, %v5761_v45 }
0x1907   :  { %v5734_v1 = vadd.f32 %v10741_v48, %v5728_v34  ;;  %v10743_v48 = vld [vmem:[%s16610_s10 + $0xa8] ss:$0 sm:$0xff] }
0x1908   :  { %12629 = vmatpush3.bf16.msra.mxu0 %v12628_v51 }
0x1909   :  { %v5735_v63 = vadd.f32 %v5734_v1, %v15184_v46  ;;  %12630 = vmatprep.subr.bf16.mxu0 %v16682_v58  ;;  %v5763_v46 = vld [vmem:[%s16609_s9 + $0x260] sm:$0xff] }
0x190a   :  { %v12631_v38 = vpack.c.bf16 %v5764_v60, %v5763_v46  ;;  %v15394_v1 = vld [vmem:[%s16602_s2] sm:$0xff] }
0x190b   :  { %v5736_v31 = vsel %vm16704_vm8, %v5735_v63, 0.0 }
0x190c   :  { %5737 = vadd.xlane.f32.xlu0 %v5736_v31  ;;  %12632 = vmatpush3.bf16.msra.mxu0 %v12631_v38  ;;  %v5853_v31 = vld [vmem:[%s16609_s9 + $0x278] sm:$0xff] }
0x190d   :  { %12640 = vmatprep.subr.bf16.mxu0 %v13721_v3 }
0x1999   :  { %v5738_v11 = vpop.xlane.xlu0 %5737 }
0x199a   :  { %v5739_v29 = vmul.f32 0.03125, %v5738_v11 }
0x199c   :  { %v5740_v24 = vsub.f32 %v5735_v63, %v5739_v29  ;;  %v15410_v63 = vld [vmem:[%s16602_s2 + $0x8] sm:$0xff] }
0x199d   :  { %v5855_v29 = vld [vmem:[%s16609_s9 + $0x288] sm:$0xff] }
0x199e   :  { %v5741_v30 = vmul.f32 %v5740_v24, %v5740_v24 }
0x19a0   :  { %v5742_v52 = vsel %vm16704_vm8, %v5741_v30, 0.0  ;;  %v10744_v30 = vld [vmem:[%s16610_s10 + $0x90] ss:$0 sm:$0xff] }
0x19a1   :  { %5743 = vadd.xlane.f32.xlu1 %v5742_v52 }
0x1a2e   :  { %v5744_v62 = vpop.xlane.xlu1 %5743 }
0x1a2f   :  { %v5745_v0 = vmul.f32 0.03125, %v5744_v62 }
0x1a31   :  { %v5746_v4 = vadd.f32 1e-05, %v5745_v0  ;;  %v13492_v0 = vld [vmem:[%s16604_s4 + $0x20] ss:$0 sm:$0xff] }
0x1a33   :  { %13319 = vrsqrt.f32 %v5746_v4 }
0x1a3d   :  { %v13320_v8 = vpop.eup %13319 }
0x1a3e   :  { %v5748_v42 = vmul.f32 %v13320_v8, %v5740_v24 }
0x1a40   :  { %v5754_v34 = vmul.f32 %v10742_v5, %v5748_v42 }
0x1a42   :  { %v15389_v39 = vadd.f32 %v10743_v48, %v5754_v34 }
0x1a44   :  { %16772 = vst [vmem:[#allocation48_spill] sm:$0xff] %v15389_v39  ;;  %11928 = vmatmul.mubr.msk.f32.vlgmr.msra.gmra.mrb[56].mxu0 %vm16704_vm8, %v15389_v39 }
0x1a45   :  { %12642 = vmatpush3.bf16.msra.mxu0 %v13721_v3  ;;  %11949 = vmatprep.mubr.msk.f32.mxu0 %vm16708_vm1, %v15394_v1  ;;  %v13491_v3 = vld [vmem:[%s16605_s5 + $0xb8] sm:$0xf] }
0x1a46   :  { %12645 = vmatprep.subr.msk.bf16.mxu0 %vm13733_vm3, %v13731_v6 }
0x1a49   :  { %12648 = vmatpush3.bf16.msk.msra.mxu0 %vm13733_vm3, %v13731_v6  ;;  %v5852_v6 = vld [vmem:[%s16609_s9 + $0x270] sm:$0xff] }
0x1a4a   :  { %12654 = vmatprep.subr.bf16.mxu0 %v13793_v23  ;;  %v12634_v11 = vpack.c.bf16 %v5853_v31, %v5852_v6  ;;  %v13493_v6 = vld [vmem:[%s16605_s5 + $0xb0] sm:$0xf]  ;;  %v13494_v31 = vld [vmem:[%s16605_s5 + $0xa8] sm:$0xf] }
0x1a4c   :  { %11950 = vmatmul.mubr.msk.f32.vlgmr.msra.gmra.mrb[58].mxu0 %vm16708_vm1, %v15410_v63  ;;  %12635 = vmatpush3.bf16.msra.mxu1 %v12634_v11 }
0x1a4d   :  { %12656 = vmatpush3.bf16.msra.mxu0 %v13793_v23  ;;  %12636 = vmatprep.subr.bf16.mxu1 %v16682_v58  ;;  %v5854_v23 = vld [vmem:[%s16609_s9 + $0x280] sm:$0xff] }
0x1a4e   :  { %11956 = vmatprep.subr.msk.mxu0 %vm16705_vm4, %v13491_v3  ;;  %v12637_v24 = vpack.c.bf16 %v5855_v29, %v5854_v23 }
0x1a50   :  { %12638 = vmatpush3.bf16.msra.mxu1 %v12637_v24 }
0x1a51   :  { %11957 = vmatpush3.msk.msra.mxu0 %vm16705_vm4, %v13491_v3  ;;  %12650 = vmatprep.subr.bf16.mxu1 %v13778_v18 }
0x1a52   :  { %12668 = vmatprep.subr.bf16.mxu0 %v13825_v33 }
0x1b17   :  { %v5839_v52 = vpop.f32.mrb[56].mxu0 }
0x1b18   :  { %v5840_v45 = vadd.f32 %v10744_v30, %v5839_v52  ;;  %v11929_v54 = vpop.f32.mrb[57].mxu0 }
0x1b1a   :  { %v5843_v51 = vmul.f32 %v5840_v45, %v5840_v45 }
0x1b1c   :  { %v5844_v46 = vmul.f32 %v5843_v51, %v5840_v45 }
0x1b1e   :  { %v5845_v60 = vmul.f32 0.044715, %v5844_v46 }
0x1b1f   :  { %v11951_v38 = vpop.f32.mrb[58].mxu0 }
0x1b20   :  { %v5846_v62 = vadd.f32 %v5845_v60, %v5840_v45  ;;  %v15442_v4 = vadd.f32 %v13492_v0, %v11951_v38  ;;  %v6061_v8 = vpop.f32.mrb[59].mxu0 }
0x1b21   :  { %v15444_v18 = vadd.f32 %v13492_v0, %v6061_v8 }
0x1b22   :  { %v5847_v5 = vmul.f32 0.7978846, %v5846_v62  ;;  %6074 = vrot.lane.b32.xlu1 %v15442_v4, %s13625_s27 }
0x1b23   :  { %6072 = vrot.lane.b32.xlu0 %v15444_v18, %s13625_s27  ;;  %s10486_s27 = sshll.u32 %s13636_s25, 4  ;;  %s10487_s27 = int_to_ptr.vmem [resolvable:$true] %s10486_s27 }
0x1b24   :  { %13321 = vtanh.f32 %v5847_v5  ;;  %s13600_s0 = scalar_lea.vmem %s10487_s27, 128  ;;  %p13605_p1 = scmp.lt.s32.totalorder %s10487_s27, %s10487_s27 }
0x1b25   :  { %p13601_p0 = scmp.ne.s32.totalorder %s10487_s27, %s13600_s0  ;;  %p13606_p2 = scmp.lt.s32.totalorder %s13600_s0, %s13600_s0 }
0x1b27   :  { %p13607_p3 = por %p13606_p2, %p13605_p1 }
0x1b29   :  { %p13608_p4 = pnand %p13607_p3, %p13601_p0 }
0x1b2e   :  { %v13322_v42 = vpop.eup %13321 }
0x1b2f   :  { %v5849_v48 = vadd.f32 1.0, %v13322_v42 }
0x1b31   :  { %v5850_v34 = vmul.f32 0.5, %v5849_v48 }
0x1b33   :  { %v5851_v3 = vmul.f32 %v5850_v34, %v5840_v45 }
0x1b35   :  { %11939 = vmatmul.mubr.msk.f32.vlgmr.msra.gmra.mrb[46].mxu1 %vm16704_vm8, %v5851_v3 }
0x1b36   :  { %12652 = vmatpush1.bf16.msra.mxu1 %v13783_v20  ;;  %6358 = vmatprep.mubr.f32.mxu1 %v16766_v19  ;;  %v13495_v20 = vld [vmem:[%s16604_s4 + $0x28] ss:$0 sm:$0xff] }
0x1b37   :  { %10763 = vmatprep.subr.msk.mxu1 %vm16705_vm4, %v13493_v6 }
0x1b3a   :  { %10764 = vmatpush1.msk.msra.mxu1 %vm16705_vm4, %v13494_v31 }
0x1b3b   :  { %12658 = vmatprep.subr.bf16.mxu1 %v13809_v28 }
0x1b94   :  { %v6075_v11 = vpop.permute.xlu1 %6074 }
0x1b95   :  { %v6079_v23 = vsub.f32 %v13495_v20, %v6075_v11  ;;  %v6073_v29 = vpop.permute.xlu0 %6072 }
0x1b96   :  { %v6078_v24 = vsub.f32 %v13495_v20, %v6073_v29  ;;  %v16773_v20 = vmov 683565275  }
0x1b97   :  { %v15465_v30 = vand.u32 2147483647, %v6079_v23 }
0x1b98   :  { %v15467_v52 = vand.u32 2147483647, %v6078_v24 }
0x1b99   :  { %v6184_v45 = vand.u32 2139095040, %v15465_v30  ;;  %v6188_v46 = vand.u32 8388607, %v15465_v30 }
0x1b9a   :  { %v6084_v54 = vand.u32 2139095040, %v15467_v52  ;;  %v6088_v8 = vand.u32 8388607, %v15467_v52 }
0x1b9b   :  { %v6185_v51 = vshrl.u32 %v6184_v45, 23  ;;  %v6189_v0 = vor.u32 8388608, %v6188_v46  ;;  %v16774_v45 = vmov 2475754826  }
0x1b9c   :  { %v6085_v28 = vshrl.u32 %v6084_v54, 23  ;;  %v6089_v31 = vor.u32 8388608, %v6088_v8 }
0x1b9d   :  { %v10759_v60 = vadd.s32 4294967169, %v6185_v51  ;;  %v15473_v6 = vshll.u32 %v6189_v0, 8  ;;  %v16775_v51 = vmov 2131351028  }
0x1b9e   :  { %v10755_v38 = vadd.s32 4294967169, %v6085_v28  ;;  %v16776_v28 = vmov 2102212464  }
0x1b9f   :  { %v6191_v62 = vadd.s32 1, %v10759_v60 }
0x1ba0   :  { %v6091_v5 = vadd.s32 1, %v10755_v38  ;;  %v16777_v38 = vmov 920167782  }
0x1ba1   :  { %vm6192_vm14 = vcmp.gt.s32.totalorder %v6191_v62, 0 }
0x1ba2   :  { %v6193_v42 = vsel %vm6192_vm14, %v6191_v62, 0  ;;  %vm6092_vm15 = vcmp.gt.s32.totalorder %v6091_v5, 0 }
0x1ba3   :  { %v6194_v48 = vshrl.u32 %v6193_v42, 5  ;;  %v6195_v34 = vand.u32 31, %v6193_v42  ;;  %v6093_v3 = vsel %vm6092_vm15, %v6091_v5, 0 }
0x1ba4   :  { %v15476_v29 = vshrl.u32 %v6093_v3, 5  ;;  %v6095_v24 = vand.u32 31, %v6093_v3  ;;  %v16778_v3 = vmov 1326507024  }
0x1ba5   :  { %v6196_v11 = vsub.s32 32, %v6195_v34  ;;  %v6198_v23 = vshll.u32 %v16773_v20, %v6195_v34  ;;  %v6201_v54 = vshll.u32 %v16774_v45, %v6195_v34  ;;  %v6204_v46 = vshll.u32 %v16775_v51, %v6195_v34 }
0x1ba6   :  { %v6207_v60 = vshll.u32 %v16776_v28, %v6195_v34  ;;  %v6210_v62 = vshll.u32 %v16777_v38, %v6195_v34  ;;  %vm6213_vm15 = vcmp.lt.s32.totalorder %v6194_v48, 1  ;;  %vm6214_vm14 = vcmp.lt.s32.totalorder %v6194_v48, 2 }
0x1ba7   :  { %v6199_v42 = vshrl.u32 %v16774_v45, %v6196_v11  ;;  %v6202_v0 = vshrl.u32 %v16775_v51, %v6196_v11  ;;  %v6205_v8 = vshrl.u32 %v16776_v28, %v6196_v11  ;;  %v6197_v5 = vshrl.u32 %v16773_v20, %v6196_v11 }
0x1ba8   :  { %v6208_v58 = vshrl.u32 %v16777_v38, %v6196_v11  ;;  %v6211_v14 = vshrl.u32 %v16778_v3, %v6196_v11  ;;  %v6096_v15 = vsub.s32 32, %v6095_v24  ;;  %vm6215_vm13 = vcmp.lt.s32.totalorder %v6194_v48, 3 }
0x1ba9   :  { %v6200_v39 = vor.u32 %v6199_v42, %v6198_v23  ;;  %v6203_v16 = vor.u32 %v6202_v0, %v6201_v54  ;;  %v6206_v12 = vor.u32 %v6205_v8, %v6204_v46  ;;  %vm6216_vm6 = vcmp.lt.s32.totalorder %v6194_v48, 4 }
0x1baa   :  { %v6209_v56 = vor.u32 %v6208_v58, %v6207_v60  ;;  %v6212_v34 = vor.u32 %v6211_v14, %v6210_v62  ;;  %v6098_v11 = vshll.u32 %v16773_v20, %v6095_v24  ;;  %v6099_v46 = vshrl.u32 %v16774_v45, %v6096_v15 }
0x1bab   :  { %v6217_v44 = vsel %vm6213_vm15, %v6197_v5, %v6200_v39  ;;  %v6218_v26 = vsel %vm6216_vm6, %v6206_v12, 2102212464  ;;  %v6221_v55 = vsel %vm6213_vm15, %v6200_v39, %v6203_v16  ;;  %v6225_v59 = vsel %vm6213_vm15, %v6203_v16, %v6206_v12 }
0x1bac   :  { %v6219_v43 = vsel %vm6215_vm13, %v6203_v16, %v6218_v26  ;;  %v6222_v36 = vsel %vm6216_vm6, %v6209_v56, 920167782  ;;  %v6226_v57 = vsel %vm6216_vm6, %v6212_v34, 1326507024  ;;  %v6101_v58 = vshll.u32 %v16774_v45, %v6095_v24 }
0x1bad   :  { %v6223_v23 = vsel %vm6215_vm13, %v6206_v12, %v6222_v36  ;;  %v6227_v54 = vsel %vm6215_vm13, %v6209_v56, %v6226_v57  ;;  %v6220_v14 = vsel %vm6214_vm14, %v6217_v44, %v6219_v43  ;;  %v6102_v39 = vshrl.u32 %v16775_v51, %v6096_v15 }
0x1bae   :  { %v6224_v60 = vsel %vm6214_vm14, %v6221_v55, %v6223_v23  ;;  %v6228_v62 = vsel %vm6214_vm14, %v6225_v59, %v6227_v54  ;;  %v6100_v57 = vor.u32 %v6099_v46, %v6098_v11  ;;  %v6104_v12 = vshll.u32 %v16775_v51, %v6095_v24 }
0x1baf   :  { %v15499_v26 = vmul.u32.u64.low %v15473_v6, %v6228_v62  ;;  %v15500_v16 = vmul.u32.u64.high %v15473_v6, %v6228_v62, %v15499_v26  ;;  %v15503_v42 = vmul.u32.u64.low %v15473_v6, %v6224_v60  ;;  %v15504_v36 = vmul.u32.u64.high %v15473_v6, %v6224_v60, %v15503_v42 }
0x1bb0   :  { %v6103_v56 = vor.u32 %v6102_v39, %v6101_v58  ;;  %v6105_v43 = vshrl.u32 %v16776_v28, %v6096_v15  ;;  %v6107_v55 = vshll.u32 %v16776_v28, %v6095_v24  ;;  %v6108_v59 = vshrl.u32 %v16777_v38, %v6096_v15 }
0x1bb1   :  { %v6111_v44 = vshrl.u32 %v16778_v3, %v6096_v15  ;;  %v6129_v48 = vshll.u32 %v6089_v31, 8  ;;  %v6236_v45 = vmul.u32 %v15473_v6, %v6220_v14  ;;  %v6097_v0 = vshrl.u32 %v16773_v20, %v6096_v15 }
0x1bb2   :  { %v6106_v8 = vor.u32 %v6105_v43, %v6104_v12  ;;  %v6110_v5 = vshll.u32 %v16777_v38, %v6095_v24  ;;  %vm6238_vm6 = vc.u32 %v15500_v16, %v15503_v42  ;;  %v6239_v51 = vadd.s32 1, %v15504_v36 }
0x1bb3   :  { %v6109_v34 = vor.u32 %v6108_v59, %v6107_v55  ;;  %vm6113_vm13 = vcmp.lt.s32.totalorder %v15476_v29, 1  ;;  %vm6115_vm15 = vcmp.lt.s32.totalorder %v15476_v29, 3  ;;  %vm6116_vm14 = vcmp.lt.s32.totalorder %v15476_v29, 4 }
0x1bb4   :  { %v6112_v28 = vor.u32 %v6111_v44, %v6110_v5  ;;  %v6121_v31 = vsel %vm6113_vm13, %v6100_v57, %v6103_v56  ;;  %v6240_v6 = vsel %vm6238_vm6, %v6239_v51, %v15504_v36  ;;  %v6118_v3 = vsel %vm6116_vm14, %v6106_v8, 2102212464 }
0x1bb5   :  { %v6122_v15 = vsel %vm6116_vm14, %v6109_v34, 920167782  ;;  %v6125_v20 = vsel %vm6113_vm13, %v6103_v56, %v6106_v8  ;;  %v6241_v11 = vadd.s32 %v6240_v6, %v6236_v45  ;;  %vm6114_vm8 = vcmp.lt.s32.totalorder %v15476_v29, 2 }
0x1bb6   :  { %v6123_v24 = vsel %vm6115_vm15, %v6106_v8, %v6122_v15  ;;  %v6126_v38 = vsel %vm6116_vm14, %v6112_v28, 1326507024  ;;  %v6117_v23 = vsel %vm6113_vm13, %v6097_v0, %v6100_v57  ;;  %v6119_v54 = vsel %vm6115_vm15, %v6103_v56, %v6118_v3 }
0x1bb7   :  { %v6124_v46 = vsel %vm6114_vm8, %v6121_v31, %v6123_v24  ;;  %v6127_v58 = vsel %vm6115_vm15, %v6109_v34, %v6126_v38  ;;  %v6242_v14 = vadd.s32 536870912, %v6241_v11  ;;  %v6120_v43 = vsel %vm6114_vm8, %v6117_v23, %v6119_v54 }
0x1bb8   :  { %v6128_v60 = vsel %vm6114_vm8, %v6125_v20, %v6127_v58  ;;  %v15521_v62 = vmul.u32.u64.low %v6129_v48, %v6124_v46  ;;  %v15522_v39 = vmul.u32.u64.high %v6129_v48, %v6124_v46, %v15521_v62  ;;  %v6136_v29 = vmul.u32 %v6129_v48, %v6120_v43 }
0x1bb9   :  { %v15524_v26 = vmul.u32.u64.low %v6129_v48, %v6128_v60  ;;  %v15525_v12 = vmul.u32.u64.high %v6129_v48, %v6128_v60, %v15524_v26  ;;  %v6243_v36 = vshrl.u32 %v6242_v14, 30  ;;  %v6237_v15 = vadd.s32 %v15503_v42, %v15500_v16 }
0x1bba   :  { %v6139_v59 = vadd.s32 1, %v15522_v39  ;;  %vm6183_vm15 = vcmp.le.f32.partialorder %v15465_v30, 0.7853982  ;;  %vm6083_vm14 = vcmp.le.f32.partialorder %v15467_v52, 0.7853982 }
0x1bbb   :  { %v6244_v55 = vshll.u32 %v6243_v36, 30  ;;  %vm6138_vm6 = vc.u32 %v15525_v12, %v15521_v62 }
0x1bbc   :  { %v6140_v56 = vsel %vm6138_vm6, %v6139_v59, %v15522_v39 }
0x1bbd   :  { %v6245_v57 = vsub.s32 %v6241_v11, %v6244_v55  ;;  %v6141_v44 = vadd.s32 %v6140_v56, %v6136_v29  ;;  %v6137_v55 = vadd.s32 %v15521_v62, %v15525_v12 }
0x1bbf   :  { %v6247_v45 = vsub.s32 0, %v6245_v57  ;;  %v6142_v0 = vadd.s32 536870912, %v6141_v44 }
0x1bc1   :  { %v10760_v8 = vmin.u32 %v6247_v45, %v6245_v57  ;;  %v6143_v5 = vshrl.u32 %v6142_v0, 30 }
0x1bc3   :  { %v6249_v51 = vclz %v10760_v8  ;;  %v6144_v34 = vshll.u32 %v6143_v5, 30 }
0x1bc5   :  { %v10761_v28 = vadd.s32 4294967294, %v6249_v51  ;;  %v6145_v31 = vsub.s32 %v6141_v44, %v6144_v34 }
0x1bc7   :  { %vm10762_vm13 = vcmp.lt.s32.totalorder %v10761_v28, 0  ;;  %v6147_v3 = vsub.s32 0, %v6145_v31 }
0x1bc8   :  { %v6252_v6 = vsel %vm10762_vm13, 0, %v10761_v28  ;;  %v6268_v28 = vsel %vm6183_vm15, 0, %v6243_v36 }
0x1bc9   :  { %v6253_v48 = vsub.s32 32, %v6252_v6  ;;  %v6257_v20 = vsub.s32 4294967266, %v6252_v6  ;;  %v10756_v24 = vmin.u32 %v6147_v3, %v6145_v31  ;;  %v6254_v11 = vshll.u32 %v6245_v57, %v6252_v6 }
0x1bca   :  { %v6272_v12 = vand.u32 3, %v6268_v28  ;;  %v13514_v28 = vld [vmem:[%s16606_s6 + $0xa0] ss:$20 sps:$4 sm:$0xff]  }
0x1bcb   :  { %v6255_v38 = vshrl.u32 %v6237_v15, %v6253_v48  ;;  %v6258_v23 = vadd.s32 127, %v6257_v20  ;;  %v6149_v54 = vclz %v10756_v24 }
0x1bcc   :  { %vm6274_vm6 = vcmp.eq.s32.totalorder %v6272_v12, 0  ;;  %vm6277_vm13 = vcmp.eq.s32.totalorder %v6272_v12, 2 }
0x1bcd   :  { %v6256_v46 = vor.u32 %v6255_v38, %v6254_v11  ;;  %v6259_v58 = vshll.u32 %v6258_v23, 23  ;;  %v10757_v14 = vadd.s32 4294967294, %v6149_v54  ;;  %v6168_v11 = vsel %vm6083_vm14, 0, %v6143_v5 }
0x1bce   :  { %v6172_v36 = vand.u32 3, %v6168_v11  ;;  %v13524_v11 = vld [vmem:[%s16606_s6 + $0x11c] ss:$20 sps:$4 sm:$0xff]  }
0x1bcf   :  { %v6260_v60 = vor.u32 4788187, %v6259_v58  ;;  %vm10758_vm8 = vcmp.lt.s32.totalorder %v10757_v14, 0  ;;  %v6263_v26 = vcvt.s32.f32 %v6256_v46 }
0x1bd0   :  { %v6152_v43 = vsel %vm10758_vm8, 0, %v10757_v14  ;;  %vm6273_vm8 = vcmp.lt.s32.totalorder %v6272_v12, 2  ;;  %vm6177_vm4 = vcmp.eq.s32.totalorder %v6172_v36, 2  ;;  %vm6174_vm5 = vcmp.eq.s32.totalorder %v6172_v36, 0  ;;  %v13517_v12 = vld [vmem:[%s16606_s6 + $0xd4] ss:$20 sps:$4 sm:$0xff]  }
0x1bd1   :  { %v6261_v39 = vand.u32 2147483647, %v6260_v60  ;;  %v6153_v59 = vsub.s32 32, %v6152_v43  ;;  %v6157_v29 = vsub.s32 4294967266, %v6152_v43  ;;  %v6154_v42 = vshll.u32 %v6145_v31, %v6152_v43 }
0x1bd2   :  { %vm6173_vm1 = vcmp.lt.s32.totalorder %v6172_v36, 2  ;;  %v13526_v36 = vld [vmem:[%s16606_s6 + $0x118] ss:$20 sps:$4 sm:$0xff]  }
0x1bd3   :  { %v6264_v16 = vmul.f32 %v6263_v26, %v6261_v39  ;;  %v6155_v57 = vshrl.u32 %v6137_v55, %v6153_v59  ;;  %v6158_v56 = vadd.s32 127, %v6157_v29 }
0x1bd5   :  { %v6267_v44 = vsel %vm6183_vm15, %v15465_v30, %v6264_v16  ;;  %v6156_v45 = vor.u32 %v6155_v57, %v6154_v42  ;;  %v6159_v0 = vshll.u32 %v6158_v56, 23  ;;  %vm6271_vm15 = vweird.f32 %v15465_v30  ;;  %v13506_v57 = vld [vmem:[%s16606_s6 + $0x50] ss:$20 sps:$4 sm:$0xff]   ;;  %v13507_v56 = vld [vmem:[%s16606_s6 + $0x58] ss:$20 sps:$4 sm:$0xff]  }
0x1bd6   :  { %13323 = vcosq.f32 %v6267_v44 }
0x1bd7   :  { %13325 = vsinq.f32 %v6267_v44  ;;  %v6160_v8 = vor.u32 4788187, %v6159_v0  ;;  %v6163_v34 = vcvt.s32.f32 %v6156_v45  ;;  %v13508_v44 = vld [vmem:[%s16606_s6 + $0x7c] ss:$20 sps:$4 sm:$0xff]   ;;  %v13509_v45 = vld [vmem:[%s16606_s6 + $0x84] ss:$20 sps:$4 sm:$0xff]  }
0x1bd8   :  { %v13510_v0 = vld [vmem:[%s16606_s6 + $0x78] ss:$20 sps:$4 sm:$0xff]  }
0x1bd9   :  { %v6161_v51 = vand.u32 2147483647, %v6160_v8  ;;  %v13511_v8 = vld [vmem:[%s16606_s6 + $0x80] ss:$20 sps:$4 sm:$0xff]  }
0x1bdb   :  { %v6164_v6 = vmul.f32 %v6163_v34, %v6161_v51  ;;  %v13512_v51 = vld [vmem:[%s16606_s6 + $0xa4] ss:$20 sps:$4 sm:$0xff]   ;;  %v13513_v34 = vld [vmem:[%s16606_s6 + $0xac] ss:$20 sps:$4 sm:$0xff]  }
0x1bdd   :  { %v6167_v62 = vsel %vm6083_vm14, %v15467_v52, %v6164_v6  ;;  %v13515_v6 = vld [vmem:[%s16606_s6 + $0xa8] ss:$20 sps:$4 sm:$0xff]   ;;  %vm16784_vm14 = vcmask 523264  }
0x1bde   :  { %13327 = vcosq.f32 %v6167_v62 }
0x1bdf   :  { %13329 = vsinq.f32 %v6167_v62  ;;  %v13516_v62 = vld [vmem:[%s16606_s6 + $0xcc] ss:$20 sps:$4 sm:$0xff]  }
0x1be0   :  { %v13324_v31 = vpop.eup %13323 }
0x1be1   :  { %v13326_v3 = vpop.eup %13325  ;;  %v6278_v15 = vxor.u32 2147483648, %v13324_v31 }
0x1be2   :  { %v6275_v48 = vxor.u32 2147483648, %v13326_v3 }
0x1be3   :  { %v6279_v24 = vsel %vm6277_vm13, %v6278_v15, %v13326_v3  ;;  %v13519_v3 = vld [vmem:[%s16606_s6 + $0xd0] ss:$20 sps:$4 sm:$0xff]   ;;  %v13520_v15 = vld [vmem:[%s16606_s6 + $0xf4] ss:$20 sps:$4 sm:$0xff]   ;;  %vm16785_vm13 = vmmov %vm16784_vm14 }
0x1be4   :  { %v6276_v20 = vsel %vm6274_vm6, %v13324_v31, %v6275_v48  ;;  %vm6171_vm6 = vweird.f32 %v15467_v52  ;;  %v13505_v52 = vld [vmem:[%s16606_s6 + $0x5c] ss:$20 sps:$4 sm:$0xff]  }
0x1be5   :  { %v6280_v38 = vsel %vm6273_vm8, %v6276_v20, %v6279_v24  ;;  %v13518_v31 = vld [vmem:[%s16606_s6 + $0xc8] ss:$20 sps:$4 sm:$0xff]   ;;  %v13522_v20 = vld [vmem:[%s16606_s6 + $0xf0] ss:$20 sps:$4 sm:$0xff]   ;;  %v13523_v24 = vld [vmem:[%s16606_s6 + $0xf8] ss:$20 sps:$4 sm:$0xff]  }
0x1be6   :  { %v6281_v46 = vsel %vm6271_vm15, nan, %v6280_v38  ;;  %v13521_v48 = vld [vmem:[%s16606_s6 + $0xfc] ss:$20 sps:$4 sm:$0xff]   ;;  %v13525_v38 = vld [vmem:[%s16606_s6 + $0x124] ss:$20 sps:$4 sm:$0xff]   ;;  %vm16786_vm8 = vmmov 0   ;;  %vm16787_vm15 = vmmov %vm16785_vm13 }
0x1be7   :  { %v6283_v26 = vmul.f32 %v6281_v46, %v15442_v4  ;;  %v13503_v4 = vld [vmem:[%s16606_s6 + $0x30] ss:$20 sps:$4 sm:$0xff]   ;;  %v13529_v46 = vld [vmem:[%s16606_s6 + $0x14c] ss:$20 sps:$4 sm:$0xff]  }
0x1be8   :  { %v13328_v23 = vpop.eup %13327 }
0x1be9   :  { %v13330_v54 = vpop.eup %13329  ;;  %v6178_v58 = vxor.u32 2147483648, %v13328_v23  ;;  %v6285_v59 = vmul.f32 %v6283_v26, %v13901_v9  ;;  %v13534_v26 = vld [vmem:[%s16606_s6 + $0x168] ss:$20 sps:$4 sm:$0xff]  }
0x1bea   :  { %v6175_v14 = vxor.u32 2147483648, %v13330_v54 }
0x1beb   :  { %v6179_v60 = vsel %vm6177_vm4, %v6178_v58, %v13330_v54  ;;  %v6287_v16 = vmax.f32 %v6285_v59, 0.0  ;;  %v13528_v54 = vld [vmem:[%s16606_s6 + $0x144] ss:$20 sps:$4 sm:$0xff]   ;;  %v13530_v58 = vld [vmem:[%s16606_s6 + $0x140] ss:$20 sps:$4 sm:$0xff]  }
0x1bec   :  { %v6176_v39 = vsel %vm6174_vm5, %v13328_v23, %v6175_v14  ;;  %v13527_v23 = vld [vmem:[%s16606_s6 + $0x120] ss:$20 sps:$4 sm:$0xff]   ;;  %v13531_v14 = vld [vmem:[%s16606_s6 + $0x148] ss:$20 sps:$4 sm:$0xff]   ;;  %v13538_v59 = vld [vmem:[%s16606_s6 + $0x190] ss:$20 sps:$4 sm:$0xff]  }
0x1bed   :  { %v6180_v5 = vsel %vm6173_vm1, %v6176_v39, %v6179_v60  ;;  %vm16779_vm1 = vcmask 244736   ;;  %v13532_v60 = vld [vmem:[%s16606_s6 + $0x16c] ss:$20 sps:$4 sm:$0xff]   ;;  %v13533_v39 = vld [vmem:[%s16606_s6 + $0x174] ss:$20 sps:$4 sm:$0xff]  }
0x1bee   :  { %v6181_v43 = vsel %vm6171_vm6, nan, %v6180_v5  ;;  %vm16780_vm4 = vmmov %vm16779_vm1  ;;  %v13535_v5 = vld [vmem:[%s16606_s6 + $0x170] ss:$20 sps:$4 sm:$0xff]  }
0x1bef   :  { %v6282_v55 = vmul.f32 %v6181_v43, %v15444_v18  ;;  %vm16782_vm5 = vmmov %vm16779_vm1  ;;  %v13504_v18 = vld [vmem:[%s16606_s6 + $0x54] ss:$20 sps:$4 sm:$0xff]  }
0x1bf0   :  { %v13536_v43 = vld [vmem:[%s16606_s6 + $0x194] ss:$20 sps:$4 sm:$0xff]   ;;  %vm16817_vm6 = vmmov %vm16779_vm1 }
0x1bf1   :  { %v6284_v30 = vmul.f32 %v6282_v55, %v13901_v9  ;;  %v13497_v9 = vld [vmem:[%s16606_s6 + $0xc] ss:$20 sps:$4 sm:$0xff]   ;;  %v13537_v55 = vld [vmem:[%s16606_s6 + $0x19c] ss:$20 sps:$4 sm:$0xff]  }
0x1bf3   :  { %v6286_v29 = vmax.f32 %v6284_v30, 0.0  ;;  %v13539_v30 = vld [vmem:[%s16606_s6 + $0x198] ss:$20 sps:$4 sm:$0xff]  }
0x1bf5   :  { %10765 = vmatmul.mubr.msk.f32.vlgmr.msra.gmra.mrb[48].mxu1 %vm398_vm12, %v6286_v29  ;;  %11958 = vmatprep.mubr.msk.f32.mxu0 %vm398_vm12, %v6286_v29  ;;  %v13540_v29 = vld [vmem:[%s16606_s6 + $0x1bc] ss:$20 sps:$4 sm:$0xff]  }
0x1bf6   :  { %11959 = vmatmul.mubr.msk.f32.vlgmr.msra.gmra.mrb[60].mxu0 %vm398_vm12, %v6287_v16  ;;  %12660 = vmatpush1.bf16.msra.mxu1 %v13917_v13  ;;  %v13498_v13 = vld [vmem:[%s16606_s6] ss:$20 sps:$4 sm:$0xff]  }
0x1bf7   :  { %12670 = vmatpush3.bf16.msra.mxu0 %v13825_v33  ;;  %6364 = vmatprep.mubr.f32.mxu1 %v16766_v19  ;;  %v13496_v33 = vld [vmem:[%s16606_s6 + $0x4] ss:$20 sps:$4 sm:$0xff]  }
0x1bf8   :  { %12663 = vmatprep.subr.msk.bf16.mxu1 %vm13733_vm3, %v13919_v22  ;;  %12673 = vmatprep.subr.msk.bf16.mxu0 %vm13733_vm3, %v13951_v47  ;;  %v13499_v22 = vld [vmem:[%s16606_s6 + $0x8] ss:$20 sps:$4 sm:$0xff]  }
0x1bf9   :  { %10766 = vmatmul.mubr.msk.f32.gmra.mrb[50].mxu1 %vm398_vm12, %v6287_v16  ;;  %11969 = vmatprep.mubr.msk.f32.mxu0 %vm16779_vm1, %v15394_v1  ;;  %vm16781_vm12 = vmmov %vm16779_vm1  ;;  %v13541_v16 = vld [vmem:[%s16606_s6 + $0x1c4] ss:$20 sps:$4 sm:$0xff]   ;;  %vm16820_vm1 = vcmask 719872  }
0x1bfa   :  { %12666 = vmatpush1.bf16.msk.msra.mxu1 %vm13733_vm3, %v13931_v32  ;;  %6510 = vmatprep.mubr.f32.mxu1 %v16766_v19  ;;  %v13500_v32 = vld [vmem:[%s16606_s6 + $0x2c] ss:$20 sps:$4 sm:$0xff]  }
0x1bfb   :  { %12676 = vmatpush3.bf16.msk.msra.mxu0 %vm13733_vm3, %v13951_v47  ;;  %6646 = vmatprep.subr.bf16.mxu1 %v13496_v33  ;;  %v13501_v47 = vld [vmem:[%s16606_s6 + $0x34] ss:$20 sps:$4 sm:$0xff]   ;;  %v13542_v33 = vld [vmem:[%s16606_s6 + $0x1b8] ss:$20 sps:$4 sm:$0xff]  }
0x1bfc   :  { %6732 = vmatprep.subr.bf16.mxu0 %v13497_v9  ;;  %v13543_v9 = vld [vmem:[%s16606_s6 + $0x1c0] ss:$20 sps:$4 sm:$0xff]  }
0x1bfd   :  { %10772 = vmatmul.mubr.msk.f32.vlgmr.msra.gmra.mrb[48].mxu1 %vm16780_vm4, %v15394_v1  ;;  %v13502_v1 = vld [vmem:[%s16606_s6 + $0x28] ss:$20 sps:$4 sm:$0xff]   ;;  %vm16821_vm4 = vmmov %vm16820_vm1 }
0x1bfe   :  { %11970 = vmatmul.mubr.msk.f32.vlgmr.msra.gmra.mrb[60].mxu0 %vm16781_vm12, %v15410_v63  ;;  %6516 = vmatprep.mubr.f32.mxu1 %v16766_v19  ;;  %vm16822_vm12 = vmmov %vm16782_vm5 }
0x1bff   :  { %6647 = vmatpush1.bf16.msra.mxu1 %v13498_v13  ;;  %6733 = vmatpush1.bf16.msra.mxu0 %v13499_v22  ;;  %v13544_v13 = vld [vmem:[%s16606_s6 + $0x1e4] ss:$20 sps:$4 sm:$0xff]   ;;  %v13545_v22 = vld [vmem:[%s16606_s6 + $0x1ec] ss:$20 sps:$4 sm:$0xff]  }
0x1c00   :  { %6648 = vmatprep.subr.bf16.mxu1 %v13500_v32  ;;  %6734 = vmatprep.subr.bf16.mxu0 %v13501_v47  ;;  %v13546_v32 = vld [vmem:[%s16606_s6 + $0x1e0] ss:$20 sps:$4 sm:$0xff]   ;;  %v13547_v47 = vld [vmem:[%s16606_s6 + $0x1e8] ss:$20 sps:$4 sm:$0xff]  }
0x1c01   :  { %10773 = vmatmul.mubr.msk.f32.gmra.mrb[50].mxu1 %vm16782_vm5, %v15410_v63  ;;  %vm16823_vm5 = vcmask 1043456  }
0x1c03   :  { %6649 = vmatpush1.bf16.msra.mxu1 %v13502_v1  ;;  %6735 = vmatpush1.bf16.msra.mxu0 %v13503_v4  ;;  %v13548_v1 = vld [vmem:[%s16606_s6 + $0x20c] ss:$20 sps:$4 sm:$0xff]   ;;  %v13549_v4 = vld [vmem:[%s16606_s6 + $0x214] ss:$20 sps:$4 sm:$0xff]  }
0x1c04   :  { %6650 = vmatprep.subr.bf16.mxu1 %v13504_v18  ;;  %6736 = vmatprep.subr.bf16.mxu0 %v13505_v52  ;;  %v13550_v18 = vld [vmem:[%s16606_s6 + $0x208] ss:$20 sps:$4 sm:$0xff]   ;;  %v13551_v52 = vld [vmem:[%s16606_s6 + $0x210] ss:$20 sps:$4 sm:$0xff]  }
0x1c07   :  { %6651 = vmatpush1.bf16.msra.mxu1 %v13506_v57  ;;  %6737 = vmatpush1.bf16.msra.mxu0 %v13507_v56  ;;  %v13553_v57 = vld [vmem:[%s16606_s6 + $0x23c] ss:$20 sps:$4 sm:$0xff]  }
0x1c08   :  { %v15601_v63 = vpop.f32.mrb[46].mxu1  ;;  %6652 = vmatprep.subr.bf16.mxu1 %v13508_v44  ;;  %6738 = vmatprep.subr.bf16.mxu0 %v13509_v45  ;;  %v13554_v56 = vld [vmem:[%s16606_s6 + $0x230] ss:$20 sps:$4 sm:$0xff]   ;;  %v13555_v44 = vld [vmem:[%s16606_s6 + $0x238] ss:$20 sps:$4 sm:$0xff]  }
0x1c09   :  { %v11940_v42 = vpop.f32.mrb[47].mxu1  ;;  %v13556_v45 = vld [vmem:[%s16606_s6 + $0x25c] ss:$20 sps:$4 sm:$0xff]  }
0x1c0a   :  { %v13552_v42 = vld [vmem:[%s16606_s6 + $0x234] ss:$20 sps:$4 sm:$0xff]  }
0x1c0b   :  { %6653 = vmatpush1.bf16.msra.mxu1 %v13510_v0  ;;  %6739 = vmatpush1.bf16.msra.mxu0 %v13511_v8  ;;  %v13557_v0 = vld [vmem:[%s16606_s6 + $0x264] ss:$20 sps:$4 sm:$0xff]  }
0x1c0c   :  { %6654 = vmatprep.subr.bf16.mxu1 %v13512_v51  ;;  %6740 = vmatprep.subr.bf16.mxu0 %v13513_v34  ;;  %v13558_v8 = vld [vmem:[%s16606_s6 + $0x258] ss:$20 sps:$4 sm:$0xff]   ;;  %v13559_v51 = vld [vmem:[%s16606_s6 + $0x260] ss:$20 sps:$4 sm:$0xff]  }
0x1c0d   :  { %v13560_v34 = vld [vmem:[%s16606_s6 + $0x284] ss:$20 sps:$4 sm:$0xff]  }
0x1c0f   :  { %6655 = vmatpush1.bf16.msra.mxu1 %v13514_v28  ;;  %6741 = vmatpush1.bf16.msra.mxu0 %v13515_v6  ;;  %v13561_v28 = vld [vmem:[%s16606_s6 + $0x28c] ss:$20 sps:$4 sm:$0xff]  }
0x1c10   :  { %6656 = vmatprep.subr.bf16.mxu1 %v13516_v62  ;;  %6742 = vmatprep.subr.bf16.mxu0 %v13517_v12 }
0x1c13   :  { %6657 = vmatpush1.bf16.msra.mxu1 %v13518_v31  ;;  %6743 = vmatpush1.bf16.msra.mxu0 %v13519_v3 }
0x1c14   :  { %6658 = vmatprep.subr.bf16.mxu1 %v13520_v15  ;;  %6744 = vmatprep.subr.bf16.mxu0 %v13521_v48 }
0x1c17   :  { %6659 = vmatpush1.bf16.msra.mxu1 %v13522_v20  ;;  %6745 = vmatpush1.bf16.msra.mxu0 %v13523_v24 }
0x1c18   :  { %6660 = vmatprep.subr.bf16.mxu1 %v13524_v11  ;;  %6746 = vmatprep.subr.bf16.mxu0 %v13525_v38 }
0x1c1b   :  { %6661 = vmatpush1.bf16.msra.mxu1 %v13526_v36  ;;  %6747 = vmatpush1.bf16.msra.mxu0 %v13527_v23 }
0x1c1c   :  { %6662 = vmatprep.subr.bf16.mxu1 %v13528_v54  ;;  %6748 = vmatprep.subr.bf16.mxu0 %v13529_v46 }
0x1c1f   :  { %6663 = vmatpush1.bf16.msra.mxu1 %v13530_v58  ;;  %6749 = vmatpush1.bf16.msra.mxu0 %v13531_v14 }
0x1c20   :  { %6664 = vmatprep.subr.bf16.mxu1 %v13532_v60  ;;  %6750 = vmatprep.subr.bf16.mxu0 %v13533_v39 }
0x1c23   :  { %6665 = vmatpush1.bf16.msra.mxu1 %v13534_v26  ;;  %6751 = vmatpush1.bf16.msra.mxu0 %v13535_v5 }
0x1c24   :  { %6666 = vmatprep.subr.bf16.mxu1 %v13536_v43  ;;  %6752 = vmatprep.subr.bf16.mxu0 %v13537_v55 }
0x1c27   :  { %6667 = vmatpush1.bf16.msra.mxu1 %v13538_v59  ;;  %6753 = vmatpush1.bf16.msra.mxu0 %v13539_v30 }
0x1c28   :  { %6668 = vmatprep.subr.bf16.mxu1 %v13540_v29  ;;  %6754 = vmatprep.subr.bf16.mxu0 %v13541_v16 }
0x1c2b   :  { %6669 = vmatpush1.bf16.msra.mxu1 %v13542_v33  ;;  %6755 = vmatpush1.bf16.msra.mxu0 %v13543_v9 }
0x1c2c   :  { %6670 = vmatprep.subr.bf16.mxu1 %v13544_v13  ;;  %6756 = vmatprep.subr.bf16.mxu0 %v13545_v22 }
0x1c2f   :  { %6671 = vmatpush1.bf16.msra.mxu1 %v13546_v32  ;;  %6757 = vmatpush1.bf16.msra.mxu0 %v13547_v47 }
0x1c30   :  { %6672 = vmatprep.subr.bf16.mxu1 %v13548_v1  ;;  %6758 = vmatprep.subr.bf16.mxu0 %v13549_v4 }
0x1c33   :  { %6673 = vmatpush1.bf16.msra.mxu1 %v13550_v18  ;;  %6759 = vmatpush1.bf16.msra.mxu0 %v13551_v52  ;;  %v13562_v52 = vld [vmem:[%s16606_s6 + $0x280] ss:$20 sps:$4 sm:$0xff]  }
0x1c34   :  { %6674 = vmatprep.subr.bf16.mxu1 %v13552_v42  ;;  %6760 = vmatprep.subr.bf16.mxu0 %v13553_v57  ;;  %v13563_v42 = vld [vmem:[%s16606_s6 + $0x288] ss:$20 sps:$4 sm:$0xff]   ;;  %v13564_v57 = vld [vmem:[%s16606_s6 + $0x2ac] ss:$20 sps:$4 sm:$0xff]  }
0x1c37   :  { %6675 = vmatpush1.bf16.msra.mxu1 %v13554_v56  ;;  %6761 = vmatpush1.bf16.msra.mxu0 %v13555_v44  ;;  %v13565_v56 = vld [vmem:[%s16606_s6 + $0x2b4] ss:$20 sps:$4 sm:$0xff]   ;;  %v16783_v44 = vmov 0  }
0x1c38   :  { %6676 = vmatprep.subr.bf16.mxu1 %v13556_v45  ;;  %6762 = vmatprep.subr.bf16.mxu0 %v13557_v0  ;;  %v13566_v45 = vld [vmem:[%s16606_s6 + $0x2a8] ss:$20 sps:$4 sm:$0xff]   ;;  %v13567_v0 = vld [vmem:[%s16606_s6 + $0x2b0] ss:$20 sps:$4 sm:$0xff]  }
0x1c3b   :  { %6677 = vmatpush1.bf16.msra.mxu1 %v13558_v8  ;;  %6763 = vmatpush1.bf16.msra.mxu0 %v13559_v51  ;;  %v13568_v8 = vld [vmem:[%s16606_s6 + $0x2d4] ss:$20 sps:$4 sm:$0xff]   ;;  %v13569_v51 = vld [vmem:[%s16606_s6 + $0x2dc] ss:$20 sps:$4 sm:$0xff]  }
0x1c3c   :  { %6689 = vmatprep.subr.bf16.mxu1 %v13560_v34  ;;  %6775 = vmatprep.subr.bf16.mxu0 %v13561_v28  ;;  %v13570_v34 = vld [vmem:[%s16606_s6 + $0x2d0] ss:$20 sps:$4 sm:$0xff]   ;;  %v13571_v28 = vld [vmem:[%s16606_s6 + $0x2d8] ss:$20 sps:$4 sm:$0xff]  }
0x1cd0   :  { %v6512_v6 = vpop.f32.mrb[48].mxu1 }
0x1cd1   :  { %v6598_v62 = vadd.f32 %v6512_v6, %v14177_v17  ;;  %v6514_v12 = vpop.f32.mrb[49].mxu1  ;;  %v11971_v31 = vpop.f32.mrb[60].mxu0  ;;  %v13572_v6 = vld [vmem:[%s16606_s6 + $0x2fc] ss:$20 sps:$4 sm:$0xff]  }
0x1cd2   :  { %v6599_v3 = vadd.f32 %v6514_v12, %v14182_v21  ;;  %v6603_v15 = vadd.f32 %v11971_v31, %v14187_v27  ;;  %v6589_v48 = vpop.f32.mrb[61].mxu0  ;;  %v13574_v12 = vld [vmem:[%s16606_s6 + $0x2f8] ss:$20 sps:$4 sm:$0xff]   ;;  %v13575_v31 = vld [vmem:[%s16606_s6 + $0x300] ss:$20 sps:$4 sm:$0xff]  }
0x1cd3   :  { %v10777_v20 = vmul.f32 -1.442695, %v6598_v62  ;;  %v6600_v24 = vadd.f32 %v6589_v48, %v14187_v27  ;;  %v13573_v62 = vld [vmem:[%s16606_s6 + $0x304] ss:$20 sps:$4 sm:$0xff]  }
0x1cd4   :  { %v10778_v11 = vmul.f32 -1.442695, %v6599_v3  ;;  %v10782_v38 = vmul.f32 -1.442695, %v6603_v15  ;;  %v6518_v36 = vpop.f32.mrb[50].mxu1 }
0x1cd5   :  { %13331 = vpow2.f32 %v10777_v20  ;;  %v10779_v23 = vmul.f32 -1.442695, %v6600_v24  ;;  %v6601_v54 = vadd.f32 %v6518_v36, %v14177_v17  ;;  %v6520_v46 = vpop.f32.mrb[51].mxu1  ;;  %v13576_v3 = vld [vmem:[%s16606_s6 + $0x150] ss:$20 sps:$4 sm:$0xff]  }
0x1cd6   :  { %13333 = vpow2.f32 %v10778_v11  ;;  %v6602_v58 = vadd.f32 %v6520_v46, %v14182_v21  ;;  %v13577_v15 = vld [vmem:[%s16606_s6 + $0x10] ss:$20 sps:$4 sm:$0xff]   ;;  %v13579_v20 = vld [vmem:[%s16606_s6 + $0x178] ss:$20 sps:$4 sm:$0xff]   ;;  %v13583_v36 = vld [vmem:[%s16606_s6 + $0x60] ss:$20 sps:$4 sm:$0xff]  }
0x1cd7   :  { %13335 = vpow2.f32 %v10782_v38  ;;  %v10780_v14 = vmul.f32 -1.442695, %v6601_v54  ;;  %v13578_v48 = vld [vmem:[%s16606_s6 + $0x290] ss:$20 sps:$4 sm:$0xff]   ;;  %v13580_v24 = vld [vmem:[%s16606_s6 + $0x38] ss:$20 sps:$4 sm:$0xff]  }
0x1cd8   :  { %13337 = vpow2.f32 %v10779_v23  ;;  %v10781_v60 = vmul.f32 -1.442695, %v6602_v58  ;;  %v13581_v11 = vld [vmem:[%s16606_s6 + $0x2b8] ss:$20 sps:$4 sm:$0xff]   ;;  %v13582_v38 = vld [vmem:[%s16606_s6 + $0x1a0] ss:$20 sps:$4 sm:$0xff]  }
0x1cd9   :  { %13339 = vpow2.f32 %v10780_v14  ;;  %v13584_v23 = vld [vmem:[%s16606_s6 + $0x2e0] ss:$20 sps:$4 sm:$0xff]   ;;  %v13585_v54 = vld [vmem:[%s16606_s6 + $0x1c8] ss:$20 sps:$4 sm:$0xff]   ;;  %v13588_v14 = vld [vmem:[%s16606_s6 + $0x1f0] ss:$20 sps:$4 sm:$0xff]  }
0x1cda   :  { %13341 = vpow2.f32 %v10781_v60  ;;  %v13586_v46 = vld [vmem:[%s16606_s6 + $0x88] ss:$20 sps:$4 sm:$0xff]   ;;  %v13589_v60 = vld [vmem:[%s16606_s6 + $0xb0] ss:$20 sps:$4 sm:$0xff]  }
0x1cdb   :  { %v13587_v58 = vld [vmem:[%s16606_s6 + $0x308] ss:$20 sps:$4 sm:$0xff]  }
0x1cdf   :  { %v13332_v39 = vpop.eup %13331 }
0x1ce0   :  { %v13334_v26 = vpop.eup %13333  ;;  %v6622_v27 = vadd.f32 1.0, %v13332_v39  ;;  %v13590_v39 = vld [vmem:[%s16606_s6 + $0x218] ss:$20 sps:$4 sm:$0xff]  }
0x1ce1   :  { %v13336_v5 = vpop.eup %13335  ;;  %v6623_v43 = vadd.f32 1.0, %v13334_v26  ;;  %v13592_v26 = vld [vmem:[%s16606_s6 + $0x240] ss:$20 sps:$4 sm:$0xff]  }
0x1ce2   :  { %v13338_v55 = vpop.eup %13337  ;;  %13343 = vrcp.f32 %v6622_v27  ;;  %v6627_v59 = vadd.f32 1.0, %v13336_v5  ;;  %v16791_v27 = vld [vmem:[#allocation7_spill] sm:$0xff]  ;;  %v16792_v5 = vld [vmem:[#allocation8_spill] sm:$0xff] }
0x1ce3   :  { %v13340_v30 = vpop.eup %13339  ;;  %13345 = vrcp.f32 %v6623_v43  ;;  %v6624_v17 = vadd.f32 1.0, %v13338_v55  ;;  %v16793_v43 = vld [vmem:[#allocation17_spill] sm:$0xff] }
0x1ce4   :  { %v13342_v29 = vpop.eup %13341  ;;  %13347 = vrcp.f32 %v6627_v59  ;;  %v6625_v21 = vadd.f32 1.0, %v13340_v30  ;;  %v16797_v55 = vld [vmem:[#allocation21_spill] sm:$0xff]  ;;  %v16799_v59 = vld [vmem:[#allocation11_spill] sm:$0xff]  ;;  %v16800_v30 = vld [vmem:[#allocation12_spill] sm:$0xff] }
0x1ce5   :  { %13349 = vrcp.f32 %v6624_v17  ;;  %v6626_v16 = vadd.f32 1.0, %v13342_v29  ;;  %v16801_v17 = vld [vmem:[#allocation25_spill] sm:$0xff]  ;;  %v16802_v29 = vld [vmem:[#allocation27_spill] sm:$0xff] }
0x1ce6   :  { %13351 = vrcp.f32 %v6625_v21  ;;  %v16803_v21 = vld [vmem:[#allocation14_spill] sm:$0xff] }
0x1ce7   :  { %13353 = vrcp.f32 %v6626_v16  ;;  %v16804_v16 = vld [vmem:[#allocation16_spill] sm:$0xff] }
0x1cec   :  { %v13344_v33 = vpop.eup %13343 }
0x1ced   :  { %v13346_v9 = vpop.eup %13345 }
0x1cee   :  { %v13348_v13 = vpop.eup %13347 }
0x1cef   :  { %v13350_v22 = vpop.eup %13349 }
0x1cf0   :  { %v13352_v32 = vpop.eup %13351  ;;  %v15777_v47 = vpack.c.bf16 %v13348_v13, %v13350_v22  ;;  %v16807_v13 = vld [vmem:[#allocation22_spill] sm:$0xff]  ;;  %v16808_v22 = vld [vmem:[#allocation24_spill] sm:$0xff] }
0x1cf1   :  { %v13354_v1 = vpop.eup %13353  ;;  %v15779_v4 = vpack.c.bf16 %v13352_v32, %v13344_v33  ;;  %v16805_v33 = vld [vmem:[#allocation18_spill] sm:$0xff] }
0x1cf2   :  { %v6641_v18 = vpack.c.bf16 %v13354_v1, %v13346_v9  ;;  %v16806_v9 = vld [vmem:[#allocation20_spill] sm:$0xff]  ;;  %v16809_v32 = vld [vmem:[#allocation26_spill] sm:$0xff] }
0x1cf4   :  { %6678 = vmatprep.mubr.bf16.mxu1 %v6641_v18  ;;  %6764 = vmatprep.mubr.bf16.mxu0 %v6641_v18 }
0x1cf5   :  { %6679 = vmatmul.mubr.bf16.vlgmr.msra.gmra.mrb[52].mxu1 %v15779_v4  ;;  %6765 = vmatmul.mubr.bf16.vlgmr.msra.gmra.mrb[64].mxu0 %v15779_v4 }
0x1cf6   :  { %6690 = vmatpush1.bf16.msra.mxu1 %v13562_v52  ;;  %6776 = vmatpush1.bf16.msra.mxu0 %v13563_v42  ;;  %v16811_v52 = vld [vmem:[#allocation29_spill] sm:$0xff] }
0x1cf7   :  { %6691 = vmatprep.subr.bf16.mxu1 %v13564_v57  ;;  %6777 = vmatprep.subr.bf16.mxu0 %v13565_v56 }
0x1cf8   :  { %6721 = vmatprep.mubr.bf16.mxu1 %v16783_v44  ;;  %6807 = vmatprep.mubr.bf16.mxu0 %v16783_v44  ;;  %v16812_v44 = vld [vmem:[#allocation30_spill] sm:$0xff] }
0x1cfa   :  { %6692 = vmatpush1.bf16.msra.mxu1 %v13566_v45  ;;  %6778 = vmatpush1.bf16.msra.mxu0 %v13567_v0  ;;  %v16813_v0 = vld [vmem:[#allocation31_spill] sm:$0xff] }
0x1cfb   :  { %6693 = vmatprep.subr.bf16.mxu1 %v13568_v8  ;;  %6779 = vmatprep.subr.bf16.mxu0 %v13569_v51 }
0x1cfe   :  { %6694 = vmatpush1.bf16.msra.mxu1 %v13570_v34  ;;  %6780 = vmatpush1.bf16.msra.mxu0 %v13571_v28 }
0x1cff   :  { %6695 = vmatprep.subr.bf16.mxu1 %v13572_v6  ;;  %6781 = vmatprep.subr.bf16.mxu0 %v13573_v62 }
0x1d02   :  { %6696 = vmatpush1.bf16.msra.mxu1 %v13574_v12  ;;  %6782 = vmatpush1.bf16.msra.mxu0 %v13575_v31 }
0x1d03   :  { %11232 = vmatprep.subr.bf16.mxu1 %v13576_v3  ;;  %11972 = vmatprep.subr.bf16.mxu0 %v16766_v19 }
0x1d05   :  { %10783 = vmatmul.mubr.msk.bf16.vlgmr.msra.gmra.mrb[52].mxu1 %vm16784_vm14, %v15777_v47  ;;  %10784 = vmatmul.mubr.msk.bf16.vlgmr.msra.gmra.mrb[64].mxu0 %vm16785_vm13, %v15777_v47  ;;  %vm16826_vm13 = vmmov %vm16823_vm5 }
0x1d06   :  { %11233 = vmatpush3.bf16.msra.mxu1 %v13577_v15  ;;  %6850 = vmatprep.mubr.bf16.mxu1 %v6641_v18 }
0x1d07   :  { %11973 = vmatpush3.bf16.msra.mxu0 %v13578_v48  ;;  %11234 = vmatprep.subr.bf16.mxu1 %v13579_v20 }
0x1d08   :  { %11974 = vmatprep.subr.bf16.mxu0 %v16766_v19  ;;  %11980 = vmatprep.mubr.msk.bf16.mxu0 %vm16786_vm8, %v16766_v19 }
0x1d0a   :  { %11235 = vmatpush3.bf16.msra.mxu1 %v13580_v24 }
0x1d0b   :  { %11975 = vmatpush3.bf16.msra.mxu0 %v13581_v11  ;;  %11236 = vmatprep.subr.bf16.mxu1 %v13582_v38 }
0x1d0c   :  { %11976 = vmatprep.subr.bf16.mxu0 %v16766_v19 }
0x1d0e   :  { %11237 = vmatpush3.bf16.msra.mxu1 %v13583_v36 }
0x1d0f   :  { %11977 = vmatpush3.bf16.msra.mxu0 %v13584_v23  ;;  %11238 = vmatprep.subr.bf16.mxu1 %v13585_v54 }
0x1d10   :  { %11978 = vmatprep.subr.bf16.mxu0 %v16766_v19 }
0x1d12   :  { %11239 = vmatpush3.bf16.msra.mxu1 %v13586_v46 }
0x1d13   :  { %11979 = vmatpush3.bf16.msra.mxu0 %v13587_v58  ;;  %11240 = vmatprep.subr.bf16.mxu1 %v13588_v14 }
0x1d14   :  { %12678 = vmatprep.subr.bf16.mxu0 %v14299_v10  ;;  %v13591_v10 = vld [vmem:[%s16606_s6 + $0xd8] ss:$20 sps:$4 sm:$0xff]  }
0x1d16   :  { %11981 = vmatmul.mubr.msk.bf16.vlgmr.msra.gmra.mrb[68].mxu0 %vm16787_vm15, %v15777_v47  ;;  %11241 = vmatpush3.bf16.msra.mxu1 %v13589_v60  ;;  %vm16827_vm15 = vcmask 31744  }
0x1d17   :  { %11242 = vmatprep.subr.bf16.mxu1 %v13590_v39  ;;  %12680 = vmatpush3.bf16.msra.mxu0 %v14344_v41  ;;  %v13593_v41 = vld [vmem:[%s16606_s6 + $0x100] ss:$20 sps:$4 sm:$0xff]  }
0x1d18   :  { %12682 = vmatprep.subr.bf16.mxu0 %v14362_v50  ;;  %v13594_v50 = vld [vmem:[%s16606_s6 + $0x268] ss:$20 sps:$4 sm:$0xff]  }
0x1d1a   :  { %11243 = vmatpush3.bf16.msra.mxu1 %v13591_v10 }
0x1d1b   :  { %11244 = vmatprep.subr.bf16.mxu1 %v13592_v26  ;;  %12684 = vmatpush3.bf16.msra.mxu0 %v14375_v40  ;;  %v13595_v40 = vld [vmem:[%s16606_s6 + $0x128] ss:$20 sps:$4 sm:$0xff]  }
0x1d1c   :  { %12686 = vmatprep.subr.bf16.mxu0 %v14398_v2  ;;  %v16788_v2 = vld [vmem:[#allocation6_spill] sm:$0xff] }
0x1d1e   :  { %11245 = vmatpush3.bf16.msra.mxu1 %v13593_v41 }
0x1d1f   :  { %11246 = vmatprep.subr.bf16.mxu1 %v13594_v50  ;;  %12688 = vmatpush3.bf16.msra.mxu0 %v14411_v25  ;;  %v16789_v25 = vld [vmem:[#allocation13_spill] sm:$0xff] }
0x1d20   :  { %12690 = vmatprep.subr.bf16.mxu0 %v14434_v37  ;;  %v16790_v37 = vld [vmem:[#allocation15_spill] sm:$0xff] }
0x1d22   :  { %11247 = vmatpush3.bf16.msra.mxu1 %v13595_v40 }
0x1d23   :  { %12710 = vmatprep.subr.bf16.mxu1 %v14331_v35  ;;  %12692 = vmatpush3.bf16.msra.mxu0 %v14447_v53  ;;  %v16794_v35 = vld [vmem:[#allocation19_spill] sm:$0xff]  ;;  %v16795_v53 = vld [vmem:[#allocation9_spill] sm:$0xff] }
0x1d24   :  { %12694 = vmatprep.subr.bf16.mxu0 %v14470_v61  ;;  %v16796_v61 = vld [vmem:[#allocation10_spill] sm:$0xff] }
0x1d25   :  { %6851 = vmatmul.mubr.bf16.vlgmr.msra.gmra.mrb[56].mxu1 %v15779_v4  ;;  %v16810_v4 = vld [vmem:[#allocation28_spill] sm:$0xff] }
0x1d26   :  { %12712 = vmatpush3.bf16.msra.mxu1 %v14349_v49  ;;  %v16798_v49 = vld [vmem:[#allocation23_spill] sm:$0xff] }
0x1d27   :  { %12714 = vmatprep.subr.bf16.mxu1 %v16788_v2  ;;  %12696 = vmatpush3.bf16.msra.mxu0 %v16789_v25 }
0x1d28   :  { %12698 = vmatprep.subr.bf16.mxu0 %v16790_v37 }
0x1d2a   :  { %12716 = vmatpush3.bf16.msra.mxu1 %v16791_v27 }
0x1d2b   :  { %12718 = vmatprep.subr.bf16.mxu1 %v16792_v5  ;;  %12700 = vmatpush3.bf16.msra.mxu0 %v16793_v43 }
0x1d2c   :  { %12702 = vmatprep.subr.bf16.mxu0 %v16794_v35 }
0x1d2e   :  { %12720 = vmatpush3.bf16.msra.mxu1 %v16795_v53 }
0x1d2f   :  { %12722 = vmatprep.subr.bf16.mxu1 %v16796_v61  ;;  %12704 = vmatpush3.bf16.msra.mxu0 %v16797_v55 }
0x1d30   :  { %12706 = vmatprep.subr.bf16.mxu0 %v16798_v49 }
0x1d32   :  { %12724 = vmatpush3.bf16.msra.mxu1 %v16799_v59 }
0x1d33   :  { %12726 = vmatprep.subr.bf16.mxu1 %v16800_v30  ;;  %12708 = vmatpush3.bf16.msra.mxu0 %v16801_v17 }
0x1d34   :  { %12742 = vmatprep.subr.bf16.mxu0 %v16802_v29 }
0x1d36   :  { %12728 = vmatpush3.bf16.msra.mxu1 %v16803_v21 }
0x1d37   :  { %12730 = vmatprep.subr.bf16.mxu1 %v16804_v16 }
0x1d3a   :  { %12732 = vmatpush3.bf16.msra.mxu1 %v16805_v33 }
0x1d3b   :  { %12734 = vmatprep.subr.bf16.mxu1 %v16806_v9 }
0x1d3e   :  { %12736 = vmatpush3.bf16.msra.mxu1 %v16807_v13 }
0x1d3f   :  { %12738 = vmatprep.subr.bf16.mxu1 %v16808_v22  ;;  %v16814_v22 = vld [vmem:[#allocation32_spill] sm:$0xff] }
0x1d42   :  { %12740 = vmatpush3.bf16.msra.mxu1 %v16809_v32 }
0x1dd8   :  { %v6723_v47 = vpop.f32.mrb[52].mxu1  ;;  %v6809_v1 = vpop.f32.mrb[64].mxu0 }
0x1dd9   :  { %v12940_v18 = vadd.f32 %v6723_v47, %v16810_v4  ;;  %v12944_v42 = vadd.f32 %v6809_v1, %v16811_v52  ;;  %v6725_v57 = vpop.f32.mrb[53].mxu1  ;;  %v6811_v56 = vpop.f32.mrb[65].mxu0 }
0x1dda   :  { %v12941_v45 = vadd.f32 %v6725_v57, %v16812_v44  ;;  %v12945_v8 = vadd.f32 %v6811_v56, %v16813_v0  ;;  %v6727_v51 = vpop.f32.mrb[54].mxu1  ;;  %v6813_v34 = vpop.f32.mrb[66].mxu0  ;;  %v16816_v57 = vld [vmem:[#allocation34_spill] sm:$0xff]  ;;  %v13596_v56 = vld [vmem:[%s16602_s2] sm:$0xff] }
0x1ddb   :  { %v10786_v28 = vmul.f32 -1.442695, %v12940_v18  ;;  %v10788_v6 = vmul.f32 -1.442695, %v12944_v42  ;;  %v12942_v62 = vadd.f32 %v6727_v51, %v16810_v4  ;;  %v12946_v12 = vadd.f32 %v6813_v34, %v16811_v52  ;;  %v6729_v31 = vpop.f32.mrb[55].mxu1  ;;  %v6815_v3 = vpop.f32.mrb[67].mxu0 }
0x1ddc   :  { %v10787_v15 = vmul.f32 -1.442695, %v12941_v45  ;;  %v10789_v48 = vmul.f32 -1.442695, %v12945_v8  ;;  %v12943_v20 = vadd.f32 %v6729_v31, %v16812_v44  ;;  %v12947_v24 = vadd.f32 %v6815_v3, %v16813_v0  ;;  %v16815_v4 = vld [vmem:[#allocation33_spill] sm:$0xff]  ;;  %v16818_v8 = vld [vmem:[#allocation35_spill] sm:$0xff] }
0x1ddd   :  { %13355 = vpow2.f32 %v10786_v28  ;;  %v10791_v11 = vmul.f32 -1.442695, %v12942_v62  ;;  %v10793_v38 = vmul.f32 -1.442695, %v12946_v12  ;;  %v16819_v51 = vld [vmem:[#allocation36_spill] sm:$0xff]  ;;  %v13597_v34 = vld [vmem:[%s16608_s8 + $0x250] sm:$0xff] }
0x1dde   :  { %13357 = vpow2.f32 %v10788_v6  ;;  %v10792_v36 = vmul.f32 -1.442695, %v12943_v20  ;;  %v10794_v23 = vmul.f32 -1.442695, %v12947_v24  ;;  %v7209_v24 = vld [vmem:[%s16609_s9 + $0x78] sm:$0xff] }
0x1ddf   :  { %13359 = vpow2.f32 %v10787_v15  ;;  %v7207_v15 = vld [vmem:[%s16609_s9 + $0x68] sm:$0xff] }
0x1de0   :  { %13361 = vpow2.f32 %v10789_v48  ;;  %v7208_v48 = vld [vmem:[%s16609_s9 + $0x70] sm:$0xff] }
0x1de1   :  { %13363 = vpow2.f32 %v10791_v11  ;;  %v12761_v20 = vpack.c.bf16 %v7208_v48, %v7207_v15  ;;  %v7210_v11 = vld [vmem:[%s16609_s9 + $0x80] sm:$0x3f]  ;;  %v7564_v15 = vld [vmem:[%s16609_s9 + $0x328] sm:$0xff] }
0x1de2   :  { %13365 = vpow2.f32 %v10793_v38  ;;  %v7203_v38 = vld [vmem:[%s16609_s9 + $0x48] sm:$0xff] }
0x1de3   :  { %13367 = vpow2.f32 %v10792_v36  ;;  %12762 = vmatprep.subr.bf16.mxu1 %v12761_v20  ;;  %v12765_v36 = vpack.c.bf16 %v7210_v11, %v7209_v24  ;;  %v7649_v11 = vld [vmem:[%s16609_s9 + $0x330] sm:$0xff] }
0x1de4   :  { %13369 = vpow2.f32 %v10794_v23  ;;  %v7204_v23 = vld [vmem:[%s16609_s9 + $0x50] sm:$0xff] }
0x1de7   :  { %v13356_v54 = vpop.eup %13355 }
0x1de8   :  { %v13358_v46 = vpop.eup %13357  ;;  %v6930_v58 = vadd.f32 1.0, %v13356_v54  ;;  %v12771_v54 = vpack.c.bf16 %v7204_v23, %v7203_v38  ;;  %v7650_v38 = vld [vmem:[%s16609_s9 + $0x338] sm:$0xff]  ;;  %v7651_v23 = vld [vmem:[%s16609_s9 + $0x340] sm:$0xff] }
0x1de9   :  { %v13360_v14 = vpop.eup %13359  ;;  %v6893_v60 = vpop.f32.mrb[68].mxu0  ;;  %v6932_v10 = vadd.f32 1.0, %v13358_v46  ;;  %v7205_v46 = vld [vmem:[%s16609_s9 + $0x58] sm:$0xff] }
0x1dea   :  { %v13362_v39 = vpop.eup %13361  ;;  %v6931_v26 = vadd.f32 1.0, %v13360_v14  ;;  %v11982_v41 = vpop.f32.mrb[69].mxu0  ;;  %13371 = vrcp.f32 %v6930_v58  ;;  %v7206_v58 = vld [vmem:[%s16609_s9 + $0x60] sm:$0x3f] }
0x1deb   :  { %v13364_v50 = vpop.eup %13363  ;;  %v6933_v40 = vadd.f32 1.0, %v13362_v39  ;;  %v6896_v2 = vpop.f32.mrb[70].mxu0  ;;  %v12775_v14 = vpack.c.bf16 %v7206_v58, %v7205_v46  ;;  %v7373_v39 = vld [vmem:[%s16609_s9 + $0x88] sm:$0xf]  ;;  %v7653_v58 = vld [vmem:[%s16609_s9 + $0x350] sm:$0xff] }
0x1dec   :  { %v13366_v25 = vpop.eup %13365  ;;  %13373 = vrcp.f32 %v6931_v26  ;;  %v6935_v37 = vadd.f32 1.0, %v13364_v50  ;;  %v11983_v27 = vpop.f32.mrb[71].mxu0  ;;  %v7472_v26 = vld [vmem:[%s16609_s9 + $0x2f8] sm:$0xff] }
0x1ded   :  { %v13368_v5 = vpop.eup %13367  ;;  %13375 = vrcp.f32 %v6933_v40  ;;  %v6937_v35 = vadd.f32 1.0, %v13366_v25  ;;  %v13599_v27 = vld [vmem:[%s16608_s8 + $0x258] ss:$0 sm:$0xff] }
0x1dee   :  { %v13370_v43 = vpop.eup %13369  ;;  %13377 = vrcp.f32 %v6932_v10  ;;  %v6936_v53 = vadd.f32 1.0, %v13368_v5  ;;  %v7471_v10 = vld [vmem:[%s16609_s9 + $0x2f0] sm:$0xff] }
0x1def   :  { %13379 = vrcp.f32 %v6935_v37  ;;  %v6938_v61 = vadd.f32 1.0, %v13370_v43  ;;  %v12781_v41 = vpack.c.bf16 %v7472_v26, %v7471_v10  ;;  %v7656_v10 = vld [vmem:[%s16609_s9 + $0x368] sm:$0xff] }
0x1df0   :  { %13381 = vrcp.f32 %v6936_v53 }
0x1df1   :  { %13383 = vrcp.f32 %v6938_v61 }
0x1df2   :  { %13385 = vrcp.f32 %v6937_v35 }
0x1df4   :  { %v13372_v55 = vpop.eup %13371 }
0x1df6   :  { %v13374_v49 = vpop.eup %13373 }
0x1df7   :  { %v13376_v59 = vpop.eup %13375  ;;  %7030 = vmatprep.mubr.f32.mxu0 %v13374_v49 }
0x1df8   :  { %v13378_v30 = vpop.eup %13377  ;;  %7105 = vmatprep.mubr.f32.mxu1 %v13376_v59  ;;  %7031 = vmatmul.mubr.f32.vlgmr.msra.gmra.mrb[62].mxu0 %v13372_v55  ;;  %v11248_v17 = vpop.f32.mrb[56].mxu1 }
0x1df9   :  { %v13380_v21 = vpop.eup %13379  ;;  %7106 = vmatmul.mubr.f32.vlgmr.msra.gmra.mrb[60].mxu1 %v13378_v30  ;;  %v11249_v16 = vpop.f32.mrb[57].mxu1  ;;  %12744 = vmatpush3.bf16.msra.mxu0 %v16802_v29 }
0x1dfa   :  { %v13382_v33 = vpop.eup %13381  ;;  %v11250_v9 = vadd.f32 %v11249_v16, %v11248_v17  ;;  %v11251_v13 = vpop.f32.mrb[58].mxu1  ;;  %12746 = vmatprep.subr.bf16.mxu0 %v16814_v22  ;;  %12764 = vmatpush3.bf16.msra.mxu1 %v12761_v20 }
0x1dfb   :  { %v13384_v32 = vpop.eup %13383  ;;  %7035 = vmatprep.mubr.f32.mxu0 %v13382_v33  ;;  %v11252_v47 = vpop.f32.mrb[59].mxu1  ;;  %12767 = vmatprep.subr.msk.bf16.mxu1 %vm13733_vm3, %v12765_v36 }
0x1dfc   :  { %v13386_v1 = vpop.eup %13385  ;;  %7110 = vmatprep.mubr.f32.mxu1 %v13384_v32  ;;  %v6853_v18 = vadd.f32 %v11250_v9, %v16815_v4  ;;  %v11253_v52 = vadd.f32 %v11252_v47, %v11251_v13  ;;  %7036 = vmatmul.mubr.f32.gmra.mrb[72].mxu0 %v13380_v21 }
0x1dfd   :  { %7111 = vmatmul.mubr.f32.gmra.mrb[62].mxu1 %v13386_v1  ;;  %12748 = vmatpush3.bf16.msra.mxu0 %v16814_v22 }
0x1dfe   :  { %v6894_v42 = vadd.f32 %v6893_v60, %v6853_v18  ;;  %v6856_v29 = vadd.f32 %v11253_v52, %v16815_v4  ;;  %12750 = vmatprep.subr.bf16.mxu0 %v16816_v57  ;;  %12017 = vmatprep.mubr.msk.f32.mxu1 %vm16817_vm6, %v13596_v56  ;;  %v13598_v60 = vld [vmem:[%s16602_s2 + $0x8] sm:$0xff]  ;;  %v5987_v52 = vld [vmem:[%s16603_s3] sm:$0xff] }
0x1dff   :  { %12770 = vmatpush3.bf16.msk.msra.mxu1 %vm13733_vm3, %v12765_v36  ;;  %v7474_v56 = vld [vmem:[%s16609_s9 + $0x308] sm:$0xff]  ;;  %v12803_v36 = vpack.c.bf16 %v7650_v38, %v7649_v11 }
0x1e00   :  { %v10790_v44 = vmul.f32 -1.442695, %v6894_v42  ;;  %v6897_v45 = vadd.f32 %v6896_v2, %v6856_v29  ;;  %12772 = vmatprep.subr.bf16.mxu1 %v12771_v54  ;;  %v5988_v29 = vld [vmem:[%s16603_s3 + $0x8] sm:$0xff] }
0x1e01   :  { %12752 = vmatpush3.bf16.msra.mxu0 %v16816_v57  ;;  %v7473_v57 = vld [vmem:[%s16609_s9 + $0x300] sm:$0xff] }
0x1e02   :  { %13387 = vpow2.f32 %v10790_v44  ;;  %v10795_v0 = vmul.f32 -1.442695, %v6897_v45  ;;  %12754 = vmatprep.subr.bf16.mxu0 %v16818_v8  ;;  %12018 = vmatmul.mubr.msk.f32.vlgmr.msra.gmra.mrb[64].mxu1 %vm16822_vm12, %v13598_v60  ;;  %v12785_v44 = vpack.c.bf16 %v7474_v56, %v7473_v57  ;;  %v7561_v45 = vld [vmem:[%s16609_s9 + $0x310] sm:$0xff] }
0x1e03   :  { %12774 = vmatpush3.bf16.msra.mxu1 %v12771_v54  ;;  %v7652_v54 = vld [vmem:[%s16609_s9 + $0x348] sm:$0xff]  ;;  %v16851_v56 = vld [vmem:[#allocation42_spill] sm:$0xff] }
0x1e04   :  { %13389 = vpow2.f32 %v10795_v0  ;;  %12777 = vmatprep.subr.msk.bf16.mxu1 %vm13733_vm3, %v12775_v14  ;;  %v7562_v0 = vld [vmem:[%s16609_s9 + $0x318] sm:$0xff]  ;;  %v12807_v46 = vpack.c.bf16 %v7652_v54, %v7651_v23 }
0x1e05   :  { %12756 = vmatpush3.bf16.msra.mxu0 %v16818_v8  ;;  %v12789_v8 = vpack.c.bf16 %v7562_v0, %v7561_v45 }
0x1e06   :  { %12758 = vmatprep.subr.bf16.mxu0 %v16819_v51 }
0x1e07   :  { %12780 = vmatpush3.bf16.msk.msra.mxu1 %vm13733_vm3, %v12775_v14  ;;  %vm16824_vm3 = vmmov %vm16817_vm6  ;;  %v7654_v14 = vld [vmem:[%s16609_s9 + $0x358] sm:$0xff] }
0x1e08   :  { %12031 = vmatprep.subr.msk.mxu1 %vm16823_vm5, %v7373_v39  ;;  %vm16825_vm14 = vmmov %vm16824_vm3  ;;  %v12817_v60 = vpack.c.bf16 %v7654_v14, %v7653_v58 }
0x1e09   :  { %12760 = vmatpush3.bf16.msra.mxu0 %v16819_v51  ;;  %vm16828_vm6 = vmmov %vm16827_vm15  ;;  %v10809_v51 = vld [vmem:[%s16610_s10 + $0x18] ss:$0 sm:$0xff] }
0x1e0a   :  { %12004 = vmatprep.subr.mxu0 %v13597_v34 }
0x1e0c   :  { %v13388_v28 = vpop.eup %13387 }
0x1e0d   :  { %v6934_v6 = vadd.f32 1.0, %v13388_v28  ;;  %12005 = vmatpush3.msra.mxu0 %v13597_v34 }
0x1e0e   :  { %v13390_v62 = vpop.eup %13389  ;;  %12782 = vmatprep.subr.bf16.mxu0 %v12781_v41 }
0x1e0f   :  { %13391 = vrcp.f32 %v6934_v6  ;;  %v6939_v12 = vadd.f32 1.0, %v13390_v62  ;;  %v7467_v62 = vld [vmem:[%s16610_s10 + $0x20] sm:$0xff] }
0x1e11   :  { %13393 = vrcp.f32 %v6939_v12  ;;  %v7468_v12 = vld [vmem:[%s16610_s10 + $0x28] sm:$0xff] }
0x1e19   :  { %v13392_v31 = vpop.eup %13391 }
0x1e1a   :  { %12006 = vmatprep.mubr.msk.f32.mxu0 %vm16820_vm1, %v13392_v31  ;;  %vm16829_vm1 = vcmask 261120  }
0x1e1b   :  { %v13394_v3 = vpop.eup %13393  ;;  %vm16831_vm12 = vmmov %vm16829_vm1 }
0x1e1c   :  { %12007 = vmatmul.mubr.msk.f32.vlgmr.msra.gmra.mrb[74].mxu0 %vm16821_vm4, %v13394_v3  ;;  %v7563_v3 = vld [vmem:[%s16609_s9 + $0x320] sm:$0xff]  ;;  %vm16830_vm4 = vmmov %vm16829_vm1 }
0x1e1d   :  { %12784 = vmatpush3.bf16.msra.mxu0 %v12781_v41  ;;  %v12793_v24 = vpack.c.bf16 %v7564_v15, %v7563_v3  ;;  %vm16832_vm5 = vmmov %vm16829_vm1  ;;  %v10810_v41 = vld [vmem:[%s16610_s10 + $0xc8] ss:$0 sm:$0xff] }
0x1e1e   :  { %12786 = vmatprep.subr.bf16.mxu0 %v12785_v44 }
0x1e21   :  { %12788 = vmatpush3.bf16.msra.mxu0 %v12785_v44  ;;  %v16852_v44 = vld [vmem:[#allocation5_spill] sm:$0xff] }
0x1e22   :  { %12790 = vmatprep.subr.bf16.mxu0 %v12789_v8 }
0x1ecb   :  { %v11291_v50 = vpop.f32.mrb[62].mxu0 }
0x1ecc   :  { %v11329_v40 = vpop.f32.mrb[60].mxu1  ;;  %v11292_v2 = vpop.f32.mrb[63].mxu0 }
0x1ecd   :  { %v11293_v25 = vadd.f32 %v11292_v2, %v11291_v50  ;;  %v11330_v37 = vpop.f32.mrb[61].mxu1 }
0x1ece   :  { %v11331_v7 = vadd.f32 %v11330_v37, %v11329_v40 }
0x1ecf   :  { %v7033_v5 = vadd.f32 %v13599_v27, %v11293_v25  ;;  %v11294_v43 = vpop.f32.mrb[72].mxu0  ;;  %v10813_v25 = vld [vmem:[%s16610_s10 + $0xd0] ss:$0 sm:$0xff] }
0x1ed0   :  { %v11332_v35 = vpop.f32.mrb[62].mxu1  ;;  %v11295_v53 = vpop.f32.mrb[73].mxu0 }
0x1ed1   :  { %v11296_v61 = vadd.f32 %v11295_v53, %v11294_v43  ;;  %v11333_v55 = vpop.f32.mrb[63].mxu1  ;;  %v7108_v49 = vadd.f32 %v11331_v7, %v7033_v5  ;;  %v16838_v43 = vld [vmem:[#allocation37_spill] sm:$0xff]  ;;  %v8970_v53 = vld [vmem:[%s16609_s9 + $0x450] sm:$0xff] }
0x1ed2   :  { %v11334_v59 = vadd.f32 %v11333_v55, %v11332_v35  ;;  %v8964_v55 = vld [vmem:[%s16609_s9 + $0x420] sm:$0xff] }
0x1ed3   :  { %v7038_v30 = vadd.f32 %v13599_v27, %v11296_v61 }
0x1ed5   :  { %v7113_v17 = vadd.f32 %v11334_v59, %v7038_v30  ;;  %v8972_v59 = vld [vmem:[%s16609_s9 + $0x460] sm:$0xff] }
0x1eef   :  { %v12008_v21 = vpop.f32.mrb[74].mxu0 }
0x1ef0   :  { %v7188_v16 = vadd.f32 %v12008_v21, %v7113_v17  ;;  %v7182_v33 = vpop.f32.mrb[75].mxu0 }
0x1ef1   :  { %v7183_v9 = vadd.f32 %v7182_v33, %v7108_v49 }
0x1ef2   :  { %v10799_v13 = vmul.f32 -1.442695, %v7188_v16 }
0x1ef3   :  { %v10798_v22 = vmul.f32 -1.442695, %v7183_v9 }
0x1ef4   :  { %13395 = vpow2.f32 %v10799_v13 }
0x1ef5   :  { %13397 = vpow2.f32 %v10798_v22 }
0x1efe   :  { %v13396_v32 = vpop.eup %13395 }
0x1eff   :  { %v13398_v47 = vpop.eup %13397  ;;  %v7198_v1 = vadd.f32 1.0, %v13396_v32 }
0x1f00   :  { %v7197_v4 = vadd.f32 1.0, %v13398_v47 }
0x1f02   :  { %13399 = vrcp.f32 %v7197_v4 }
0x1f03   :  { %13401 = vrcp.f32 %v7198_v1 }
0x1f0c   :  { %v13400_v18 = vpop.eup %13399 }
0x1f0d   :  { %v13402_v42 = vpop.eup %13401  ;;  %12028 = vmatprep.mubr.msk.f32.mxu1 %vm16824_vm3, %v13400_v18  ;;  %vm16833_vm3 = vmmov %vm16829_vm1 }
0x1f0e   :  { %12029 = vmatmul.mubr.msk.f32.vlgmr.msra.gmra.mrb[64].mxu1 %vm16825_vm14, %v13402_v42  ;;  %vm16834_vm14 = vmmov %vm16829_vm1 }
0x1f0f   :  { %12032 = vmatpush3.msk.msra.mxu1 %vm16826_vm13, %v7373_v39  ;;  %12033 = vmatprep.mubr.msk.f32.mxu1 %vm16827_vm15, %v5987_v52  ;;  %v7655_v39 = vld [vmem:[%s16609_s9 + $0x360] sm:$0xff]  ;;  %vm16835_vm13 = vmmov %vm16829_vm1 }
0x1f10   :  { %v12821_v26 = vpack.c.bf16 %v7656_v10, %v7655_v39  ;;  %vm16836_vm15 = vmmov %vm16829_vm1 }
0x1f16   :  { %12034 = vmatmul.mubr.msk.f32.vlgmr.msra.gmra.mrb[64].mxu1 %vm16828_vm6, %v5988_v29  ;;  %vm16837_vm6 = vmmov %vm16829_vm1 }
0x1fe9   :  { %v12035_v34 = vpop.f32.mrb[64].mxu1 }
0x1fea   :  { %v7466_v28 = vadd.f32 %v12035_v34, %v10809_v51  ;;  %v7449_v6 = vpop.f32.mrb[65].mxu1 }
0x1feb   :  { %v7465_v31 = vadd.f32 %v10809_v51, %v7449_v6 }
0x1fec   :  { %v16050_v20 = vadd.f32 %v7468_v12, %v7466_v28  ;;  %v7657_v12 = vld [vmem:[%s16609_s9 + $0x370] sm:$0xff] }
0x1fed   :  { %v16048_v48 = vadd.f32 %v7467_v62, %v7465_v31 }
0x1fef   :  { %12044 = vmatprep.mubr.msk.f32.mxu0 %vm16829_vm1, %v16048_v48 }
0x1ff0   :  { %12045 = vmatmul.mubr.msk.f32.vlgmr.msra.gmra.mrb[76].mxu0 %vm16830_vm4, %v16050_v20  ;;  %vm16839_vm4 = vcmp.lt.s32.totalorder %v16838_v43, 8 }
0x1ff1   :  { %12792 = vmatpush3.bf16.msra.mxu0 %v12789_v8  ;;  %12055 = vmatprep.mubr.msk.f32.mxu0 %vm16831_vm12, %v16048_v48  ;;  %vm16843_vm12 = vmmov %vm16839_vm4 }
0x1ff2   :  { %12794 = vmatprep.subr.bf16.mxu0 %v12793_v24 }
0x1ff5   :  { %12796 = vmatpush3.bf16.msra.mxu0 %v12793_v24 }
0x1ff6   :  { %12804 = vmatprep.subr.bf16.mxu0 %v12803_v36 }
0x1ff8   :  { %12056 = vmatmul.mubr.msk.f32.vlgmr.msra.gmra.mrb[78].mxu0 %vm16832_vm5, %v16050_v20  ;;  %vm16845_vm5 = vmmov %vm16829_vm1 }
0x1ff9   :  { %12806 = vmatpush3.bf16.msra.mxu0 %v12803_v36  ;;  %12073 = vmatprep.mubr.msk.f32.mxu0 %vm16833_vm3, %v16048_v48  ;;  %vm16846_vm3 = vmmov %vm16829_vm1 }
0x1ffa   :  { %12808 = vmatprep.subr.bf16.mxu0 %v12807_v46 }
0x1ffd   :  { %12810 = vmatpush3.bf16.msra.mxu0 %v12807_v46 }
0x1ffe   :  { %12818 = vmatprep.subr.bf16.mxu0 %v12817_v60 }
0x2000   :  { %12074 = vmatmul.mubr.msk.f32.vlgmr.msra.gmra.mrb[80].mxu0 %vm16834_vm14, %v16050_v20  ;;  %vm16847_vm14 = vmmov %vm16829_vm1 }
0x2001   :  { %12820 = vmatpush3.bf16.msra.mxu0 %v12817_v60  ;;  %12091 = vmatprep.mubr.msk.f32.mxu0 %vm16835_vm13, %v16048_v48  ;;  %vm16848_vm13 = vmmov %vm16829_vm1 }
0x2002   :  { %12822 = vmatprep.subr.bf16.mxu0 %v12821_v26 }
0x2005   :  { %12824 = vmatpush3.bf16.msra.mxu0 %v12821_v26 }
0x2008   :  { %12092 = vmatmul.mubr.msk.f32.vlgmr.msra.gmra.mrb[82].mxu0 %vm16836_vm15, %v16050_v20  ;;  %vm16849_vm15 = vmmov %vm16829_vm1 }
0x20c3   :  { %v12046_v50 = vpop.f32.mrb[76].mxu0 }
0x20c4   :  { %v7552_v40 = vpop.f32.mrb[77].mxu0  ;;  %v7558_v52 = vadd.f32 %v12046_v50, %v10810_v41 }
0x20c5   :  { %v7553_v2 = vadd.f32 %v10810_v41, %v7552_v40 }
0x20c7   :  { %12062 = vmatprep.mubr.msk.f32.mxu1 %vm16837_vm6, %v7553_v2  ;;  %12112 = vmatprep.mubr.msk.f32.mxu0 %vm16829_vm1, %v7553_v2  ;;  %vm16850_vm6 = vmmov %vm16829_vm1  ;;  %vm7646_vm1 = vcmp.le.s32.totalorder %v16838_v43, %v16851_v56 }
0x20cb   :  { %v12057_v37 = vpop.f32.mrb[78].mxu0 }
0x20cc   :  { %v7642_v7 = vadd.f32 %v12057_v37, %v10813_v25  ;;  %v7636_v27 = vpop.f32.mrb[79].mxu0 }
0x20cd   :  { %v7637_v5 = vadd.f32 %v10813_v25, %v7636_v27 }
0x20ce   :  { %v7666_v35 = vsel %vm16839_vm4, %v7642_v7, 0.0  ;;  %v8202_v61 = vsel %vm14845_vm0, %v7642_v7, 0.0  ;;  %v7856_v49 = vsel %vm14852_vm7, %v7642_v7, 0.0  ;;  %v8469_v30 = vsel %vm14857_vm2, %v7642_v7, 0.0 }
0x20cf   :  { %v7665_v17 = vsel %vm16843_vm12, %v7637_v5, 0.0  ;;  %v8201_v21 = vsel %vm14845_vm0, %v7637_v5, 0.0  ;;  %v7855_v16 = vsel %vm14852_vm7, %v7637_v5, 0.0  ;;  %v8468_v33 = vsel %vm14857_vm2, %v7637_v5, 0.0 }
0x20d0   :  { %v12797_v9 = vpack.c.bf16 %v7666_v35, %v7665_v17  ;;  %v12833_v13 = vpack.c.bf16 %v8202_v61, %v8201_v21  ;;  %v12811_v22 = vpack.c.bf16 %v7856_v49, %v7855_v16  ;;  %v12851_v32 = vpack.c.bf16 %v8469_v30, %v8468_v33 }
0x20d1   :  { %vm7645_vm4 = vcmp.le.s32.totalorder %v16838_v43, %v16852_v44 }
0x20d2   :  { %12799 = vmatprep.subr.msk.bf16.mxu1 %vm14875_vm9, %v12797_v9  ;;  %12835 = vmatprep.subr.msk.bf16.mxu0 %vm14875_vm9, %v12833_v13  ;;  %vm16153_vm12 = vmand %vm14938_vm11, %vm7645_vm4 }
0x20d3   :  { %12802 = vmatpush3.bf16.xpose.msk.msra.mxu1 %vm14875_vm9, %v12797_v9  ;;  %v12075_v1 = vpop.f32.mrb[80].mxu0  ;;  %12838 = vmatpush3.bf16.xpose.msk.msra.mxu0 %vm14875_vm9, %v12833_v13 }
0x20d4   :  { %v7846_v4 = vpop.f32.mrb[81].mxu0  ;;  %12813 = vmatprep.subr.msk.bf16.mxu1 %vm14875_vm9, %v12811_v22  ;;  %12853 = vmatprep.subr.msk.bf16.mxu0 %vm14875_vm9, %v12851_v32 }
0x20d5   :  { %v16128_v18 = vpack.c.bf16 %v12075_v1, %v7846_v4 }
0x20da   :  { %12063 = vmatmul.mubr.msk.f32.vlgmr.msra.gmra.mrb[66].mxu1 %vm16845_vm5, %v7558_v52  ;;  %12113 = vmatmul.mubr.msk.f32.vlgmr.msra.gmra.mrb[84].mxu0 %vm16846_vm3, %v7558_v52 }
0x20db   :  { %12816 = vmatpush3.bf16.xpose.msk.msra.mxu1 %vm14875_vm9, %v12811_v22  ;;  %12080 = vmatprep.mubr.msk.f32.mxu1 %vm16847_vm14, %v7553_v2  ;;  %v12093_v42 = vpop.f32.mrb[82].mxu0 }
0x20dc   :  { %12856 = vmatpush3.bf16.xpose.msk.msra.mxu0 %vm14875_vm9, %v12851_v32  ;;  %12137 = vmatprep.mubr.msk.f32.mxu0 %vm16848_vm13, %v7553_v2  ;;  %v8030_v29 = vpop.f32.mrb[83].mxu0  ;;  %vm16147_vm9 = vmand %vm14932_vm10, %vm7646_vm1  ;;  %vm16859_vm10 = vcmask 130048  }
0x20dd   :  { %v12825_v57 = vpack.c.bf16 %v12093_v42, %v8030_v29  ;;  %vm16860_vm11 = vmmov %vm16859_vm10 }
0x20de   :  { %vm16861_vm5 = vmmov %vm16859_vm10 }
0x20df   :  { %12826 = vmatprep.subr.bf16.mxu1 %v12825_v57  ;;  %vm16862_vm3 = vmmov %vm16861_vm5 }
0x20e0   :  { %vm16863_vm14 = vmmov %vm16862_vm3 }
0x20e1   :  { %vm16864_vm13 = vmmov %vm16862_vm3 }
0x20e2   :  { %12081 = vmatmul.mubr.msk.f32.vlgmr.msra.gmra.mrb[68].mxu1 %vm16849_vm15, %v7558_v52  ;;  %vm16865_vm15 = vmmov %vm16862_vm3 }
0x20e3   :  { %12138 = vmatmul.mubr.msk.f32.vlgmr.msra.gmra.mrb[86].mxu0 %vm16850_vm6, %v7558_v52  ;;  %12828 = vmatpush3.bf16.msra.mxu1 %v12825_v57  ;;  %vm16866_vm6 = vmmov %vm16862_vm3 }
0x20e4   :  { %12830 = vmatprep.subr.bf16.mxu1 %v16128_v18  ;;  %vm16867_vm1 = vmmov %vm16862_vm3 }
0x20e5   :  { %vm16868_vm4 = vmmov %vm16867_vm1 }
0x21ad   :  { %v12064_v45 = vpop.f32.mrb[66].mxu1  ;;  %v12114_v0 = vpop.f32.mrb[84].mxu0 }
0x21ae   :  { %v8285_v34 = vmul.f32 0.35355338, %v12114_v0  ;;  %v7745_v28 = vpop.f32.mrb[67].mxu1  ;;  %v8275_v6 = vpop.f32.mrb[85].mxu0  ;;  %v7755_v24 = vmul.f32 0.35355338, %v12064_v45 }
0x21af   :  { %v8284_v31 = vmul.f32 0.35355338, %v8275_v6  ;;  %v7754_v38 = vmul.f32 0.35355338, %v7745_v28 }
0x21b0   :  { %v16159_v3 = vsel %vm16147_vm9, %v8285_v34, -1e+30  ;;  %v7757_v25 = vsel %vm16147_vm9, %v7755_v24, -1e+30 }
0x21b1   :  { %v16163_v15 = vsel %vm16153_vm12, %v8284_v31, -1e+30  ;;  %v7756_v40 = vsel %vm16153_vm12, %v7754_v38, -1e+30  ;;  %v7761_v7 = vsel %vm16862_vm3, %v7757_v25, -inf  ;;  %v8291_v57 = vsel %vm16867_vm1, %v16159_v3, -inf  ;;  %vm16874_vm3 = vmmov %vm16867_vm1 }
0x21b2   :  { %v7758_v37 = vsel %vm16861_vm5, %v7756_v40, -inf  ;;  %v8288_v56 = vsel %vm16868_vm4, %v16163_v15, -inf  ;;  %v7658_v31 = vld [vmem:[%s16609_s9 + $0x378] sm:$0xff]  ;;  %vm16873_vm5 = vcmask 261120   ;;  %vm16879_vm4 = vmmov %vm16867_vm1 }
0x21b5   :  { %v12082_v11 = vpop.f32.mrb[68].mxu1 }
0x21b6   :  { %v7939_v36 = vmul.f32 0.35355338, %v12082_v11  ;;  %v12139_v23 = vpop.f32.mrb[86].mxu0  ;;  %v7929_v54 = vpop.f32.mrb[69].mxu1 }
0x21b7   :  { %v8552_v46 = vmul.f32 0.35355338, %v12139_v23  ;;  %v7938_v58 = vmul.f32 0.35355338, %v7929_v54  ;;  %v8542_v14 = vpop.f32.mrb[87].mxu0  ;;  %v12839_v54 = vpack.c.bf16 %v7658_v31, %v7657_v12 }
0x21b8   :  { %v8551_v60 = vmul.f32 0.35355338, %v8542_v14  ;;  %v7941_v39 = vsel %vm16147_vm9, %v7939_v36, -1e+30  ;;  %v7660_v14 = vld [vmem:[%s16609_s9 + $0x388] sm:$0xff] }
0x21b9   :  { %v7945_v10 = vsel %vm16859_vm10, %v7941_v39, -inf  ;;  %v7940_v26 = vsel %vm16153_vm12, %v7938_v58, -1e+30  ;;  %v16172_v41 = vsel %vm16147_vm9, %v8552_v46, -1e+30  ;;  %vm16869_vm9 = vmmov %vm16867_vm1  ;;  %v7659_v58 = vld [vmem:[%s16609_s9 + $0x380] sm:$0xff] }
0x21ba   :  { %7946 = vmax.xlane.f32.xlu0 %v7945_v10  ;;  %v7942_v50 = vsel %vm16860_vm11, %v7940_v26, -inf  ;;  %v16179_v2 = vsel %vm16153_vm12, %v8551_v60, -1e+30  ;;  %vm16870_vm12 = vmmov %vm16867_vm1 }
0x21bb   :  { %7943 = vmax.xlane.f32.xlu1 %v7942_v50  ;;  %vm16871_vm10 = vmmov %vm16867_vm1 }
0x21bc   :  { %vm16872_vm11 = vmmov %vm16867_vm1 }
0x21be   :  { %7759 = vmax.xlane.f32.xlu0 %v7758_v37 }
0x21bf   :  { %7762 = vmax.xlane.f32.xlu1 %v7761_v7 }
0x2247   :  { %v7947_v27 = vpop.xlane.xlu0 %7946 }
0x2248   :  { %v7949_v5 = vsub.f32 %v7941_v39, %v7947_v27  ;;  %v7944_v35 = vpop.xlane.xlu1 %7943  ;;  %v12843_v39 = vpack.c.bf16 %v7660_v14, %v7659_v58  ;;  %v10848_v14 = vld [vmem:[%s16610_s10 + $0xd8] ss:$0 sm:$0xff] }
0x2249   :  { %v7948_v61 = vsub.f32 %v7940_v26, %v7944_v35 }
0x224a   :  { %v7952_v49 = vmul.f32 1.442695, %v7949_v5 }
0x224b   :  { %v7950_v30 = vmul.f32 1.442695, %v7948_v61  ;;  %v7760_v17 = vpop.xlane.xlu0 %7759 }
0x224c   :  { %13403 = vpow2.f32 %v7952_v49  ;;  %v7764_v21 = vsub.f32 %v7756_v40, %v7760_v17  ;;  %v7763_v16 = vpop.xlane.xlu1 %7762 }
0x224d   :  { %13405 = vpow2.f32 %v7950_v30  ;;  %v7765_v33 = vsub.f32 %v7757_v25, %v7763_v16  ;;  %v10746_v16 = vld [vmem:[%s16610_s10 + $0x98] ss:$0 sm:$0xff] }
0x224e   :  { %v7766_v9 = vmul.f32 1.442695, %v7764_v21 }
0x224f   :  { %v7768_v13 = vmul.f32 1.442695, %v7765_v33  ;;  %v5931_v33 = vadd.f32 %v10746_v16, %v15601_v63  ;;  %v7662_v63 = vld [vmem:[%s16609_s9 + $0x398] sm:$0xff] }
0x2250   :  { %13407 = vpow2.f32 %v7766_v9 }
0x2251   :  { %13409 = vpow2.f32 %v7768_v13 }
0x2256   :  { %v13404_v22 = vpop.eup %13403 }
0x2257   :  { %v13406_v32 = vpop.eup %13405  ;;  %v7957_v47 = vsel %vm16863_vm14, %v13404_v22, 0.0  ;;  %vm16875_vm14 = vmmov %vm16867_vm1 }
0x2258   :  { %7958 = vadd.xlane.f32.xlu1 %v7957_v47  ;;  %v7954_v1 = vsel %vm16864_vm13, %v13406_v32, 0.0  ;;  %vm16876_vm13 = vmmov %vm16867_vm1 }
0x2259   :  { %7955 = vadd.xlane.f32.xlu0 %v7954_v1  ;;  %v8558_v40 = vsel %vm16876_vm13, %v16172_v41, -inf  ;;  %v7661_v1 = vld [vmem:[%s16609_s9 + $0x390] sm:$0xff]  ;;  %vm16887_vm13 = vmmov %vm16867_vm1 }
0x225a   :  { %v13408_v4 = vpop.eup %13407 }
0x225b   :  { %v13410_v52 = vpop.eup %13409  ;;  %v7770_v42 = vsel %vm16865_vm15, %v13408_v4, 0.0  ;;  %vm16877_vm15 = vmmov %vm16867_vm1 }
0x225c   :  { %v7773_v29 = vsel %vm16866_vm6, %v13410_v52, 0.0  ;;  %v8555_v25 = vsel %vm16877_vm15, %v16179_v2, -inf  ;;  %vm16878_vm6 = vmmov %vm16873_vm5 }
0x225d   :  { %7774 = vadd.xlane.f32.xlu1 %v7773_v29  ;;  %7771 = vadd.xlane.f32.xlu0 %v7770_v42  ;;  %v12857_v29 = vpack.c.bf16 %v7662_v63, %v7661_v1  ;;  %v8784_v1 = vld [vmem:[%s16609_s9 + $0x3b0] sm:$0xff]  ;;  %v8785_v63 = vld [vmem:[%s16609_s9 + $0x3b8] sm:$0xff] }
0x2261   :  { %8292 = vmax.xlane.f32.xlu1 %v8291_v57  ;;  %8289 = vmax.xlane.f32.xlu0 %v8288_v56  ;;  %v7663_v56 = vld [vmem:[%s16609_s9 + $0x3a0] sm:$0xff] }
0x22e5   :  { %v7959_v44 = vpop.xlane.xlu1 %7958 }
0x22e6   :  { %13411 = vrcp.f32 %v7959_v44  ;;  %v7956_v45 = vpop.xlane.xlu0 %7955  ;;  %v7664_v44 = vld [vmem:[%s16609_s9 + $0x3a8] sm:$0xff] }
0x22e7   :  { %13413 = vrcp.f32 %v7956_v45 }
0x22ea   :  { %v7775_v0 = vpop.xlane.xlu1 %7774  ;;  %v7772_v8 = vpop.xlane.xlu0 %7771 }
0x22eb   :  { %13415 = vrcp.f32 %v7772_v8 }
0x22ec   :  { %13417 = vrcp.f32 %v7775_v0  ;;  %v12861_v0 = vpack.c.bf16 %v7664_v44, %v7663_v56 }
0x22ee   :  { %v8293_v51 = vpop.xlane.xlu1 %8292  ;;  %v8290_v34 = vpop.xlane.xlu0 %8289 }
0x22ef   :  { %v8295_v28 = vsub.f32 %v16159_v3, %v8293_v51  ;;  %v8294_v6 = vsub.f32 %v16163_v15, %v8290_v34 }
0x22f0   :  { %v13412_v62 = vpop.eup %13411 }
0x22f1   :  { %v13414_v24 = vpop.eup %13413  ;;  %v8298_v11 = vmul.f32 1.442695, %v8295_v28  ;;  %v8296_v38 = vmul.f32 1.442695, %v8294_v6  ;;  %v7963_v23 = vmul.f32 %v13412_v62, %v13404_v22  ;;  %v16881_v22 = vld [vmem:[#allocation48_spill] sm:$0xff] }
0x22f2   :  { %v7962_v36 = vmul.f32 %v13414_v24, %v13406_v32  ;;  %v5934_v32 = vadd.f32 %v5931_v33, %v16881_v22 }
0x22f3   :  { %13419 = vpow2.f32 %v8298_v11 }
0x22f4   :  { %13421 = vpow2.f32 %v8296_v38  ;;  %12098 = vmatprep.mubr.msk.f32.mxu1 %vm16869_vm9, %v7962_v36  ;;  %vm16880_vm9 = vmmov %vm16867_vm1 }
0x22f5   :  { %12099 = vmatmul.mubr.msk.f32.vlgmr.msra.gmra.mrb[70].mxu1 %vm16870_vm12, %v7963_v23  ;;  %v13416_v3 = vpop.eup %13415  ;;  %vm16882_vm12 = vmmov %vm16873_vm5 }
0x22f6   :  { %12832 = vmatpush3.bf16.msra.mxu1 %v16128_v18  ;;  %v7778_v15 = vmul.f32 %v13416_v3, %v13408_v4  ;;  %v13418_v46 = vpop.eup %13417  ;;  %v5935_v47 = vsel %vm16882_vm12, %v5934_v32, 0.0 }
0x22f7   :  { %12840 = vmatprep.subr.bf16.mxu1 %v12839_v54  ;;  %v7779_v60 = vmul.f32 %v13418_v46, %v13410_v52 }
0x22f8   :  { %12105 = vmatprep.mubr.msk.f32.mxu1 %vm16871_vm10, %v7778_v15  ;;  %vm16883_vm10 = vmmov %vm16867_vm1 }
0x22fd   :  { %v13420_v10 = vpop.eup %13419  ;;  %12106 = vmatmul.mubr.msk.f32.vlgmr.msra.gmra.mrb[70].mxu1 %vm16872_vm11, %v7779_v60  ;;  %vm16884_vm11 = vmmov %vm16873_vm5 }
0x22fe   :  { %v13422_v26 = vpop.eup %13421  ;;  %12842 = vmatpush3.bf16.msra.mxu1 %v12839_v54  ;;  %12123 = vmatprep.mubr.msk.f32.mxu1 %vm16873_vm5, %v16048_v48  ;;  %v8303_v18 = vsel %vm16874_vm3, %v13420_v10, 0.0  ;;  %vm16885_vm3 = vmmov %vm16873_vm5 }
0x22ff   :  { %8304 = vadd.xlane.f32.xlu1 %v8303_v18  ;;  %v8300_v50 = vsel %vm16875_vm14, %v13422_v26, 0.0  ;;  %12844 = vmatprep.subr.bf16.mxu1 %v12843_v39  ;;  %vm16886_vm14 = vmmov %vm16867_vm1 }
0x2300   :  { %8301 = vadd.xlane.f32.xlu0 %v8300_v50  ;;  %vm16888_vm15 = vmmov %vm16885_vm3 }
0x2302   :  { %12846 = vmatpush3.bf16.msra.mxu1 %v12843_v39  ;;  %v10748_v39 = vld [vmem:[%s16610_s10 + $0xb0] ss:$0 sm:$0xff] }
0x2303   :  { %8559 = vmax.xlane.f32.xlu1 %v8558_v40 }
0x2304   :  { %8556 = vmax.xlane.f32.xlu0 %v8555_v25 }
0x2305   :  { %12124 = vmatmul.mubr.msk.f32.vlgmr.msra.gmra.mrb[72].mxu1 %vm16878_vm6, %v16050_v20  ;;  %vm16889_vm6 = vmmov %vm16885_vm3 }
0x238c   :  { %v8305_v37 = vpop.xlane.xlu1 %8304 }
0x238d   :  { %v8302_v7 = vpop.xlane.xlu0 %8301 }
0x238e   :  { %13423 = vrcp.f32 %v8302_v7 }
0x2390   :  { %v8560_v27 = vpop.xlane.xlu1 %8559 }
0x2391   :  { %v8562_v5 = vsub.f32 %v16172_v41, %v8560_v27  ;;  %v8557_v35 = vpop.xlane.xlu0 %8556 }
0x2392   :  { %v8561_v61 = vsub.f32 %v16179_v2, %v8557_v35 }
0x2393   :  { %v8565_v49 = vmul.f32 1.442695, %v8562_v5 }
0x2394   :  { %v8563_v30 = vmul.f32 1.442695, %v8561_v61 }
0x2395   :  { %13425 = vpow2.f32 %v8565_v49 }
0x2396   :  { %13427 = vpow2.f32 %v8563_v30 }
0x2397   :  { %13429 = vrcp.f32 %v8305_v37  ;;  %v10749_v37 = vld [vmem:[%s16610_s10 + $0xb8] ss:$0 sm:$0xff] }
0x2398   :  { %v13424_v17 = vpop.eup %13423 }
0x2399   :  { %v8308_v21 = vmul.f32 %v13424_v17, %v13422_v26 }
0x239b   :  { %12130 = vmatprep.mubr.msk.f32.mxu1 %vm16867_vm1, %v8308_v21  ;;  %vm16890_vm1 = vmmov %vm16885_vm3 }
0x239c   :  { %vm16893_vm12 = vmmov %vm16890_vm1 }
0x239f   :  { %v13426_v9 = vpop.eup %13425 }
0x23a0   :  { %v13428_v13 = vpop.eup %13427  ;;  %v8570_v41 = vsel %vm16879_vm4, %v13426_v9, 0.0  ;;  %vm16891_vm4 = vmmov %vm16890_vm1 }
0x23a1   :  { %8571 = vadd.xlane.f32.xlu1 %v8570_v41  ;;  %v8567_v2 = vsel %vm16880_vm9, %v13428_v13, 0.0  ;;  %v13430_v57 = vpop.eup %13429  ;;  %vm16892_vm9 = vmmov %vm16890_vm1 }
0x23a2   :  { %8568 = vadd.xlane.f32.xlu0 %v8567_v2  ;;  %v8309_v45 = vmul.f32 %v13430_v57, %v13420_v10  ;;  %v16894_v57 = vmov 0.0|0.0  }
0x23a6   :  { %5936 = vadd.xlane.f32.xlu0 %v5935_v47 }
0x23d8   :  { %v12125_v4 = vpop.f32.mrb[72].mxu1 }
0x23d9   :  { %v8376_v52 = vpop.f32.mrb[73].mxu1 }
0x23da   :  { %v12847_v42 = vpack.c.bf16 %v12125_v4, %v8376_v52  ;;  %v12869_v4 = vpack.c.bf16 %v8785_v63, %v8784_v1  ;;  %v8786_v52 = vld [vmem:[%s16609_s9 + $0x3c0] sm:$0xff] }
0x23dc   :  { %12848 = vmatprep.subr.bf16.mxu1 %v12847_v42  ;;  %12870 = vmatprep.subr.bf16.mxu0 %v12869_v4 }
0x23dd   :  { %12850 = vmatpush3.bf16.msra.mxu1 %v12847_v42  ;;  %12872 = vmatpush3.bf16.msra.mxu0 %v12869_v4  ;;  %v8787_v42 = vld [vmem:[%s16609_s9 + $0x3c8] sm:$0xff]  ;;  %v8971_v4 = vld [vmem:[%s16609_s9 + $0x458] sm:$0xff] }
0x23de   :  { %12858 = vmatprep.subr.bf16.mxu1 %v12857_v29 }
0x23e0   :  { %12131 = vmatmul.mubr.msk.f32.vlgmr.msra.gmra.mrb[70].mxu1 %vm16883_vm10, %v8309_v45  ;;  %vm16895_vm10 = vmmov %vm16890_vm1 }
0x23e1   :  { %12860 = vmatpush3.bf16.msra.mxu1 %v12857_v29  ;;  %12148 = vmatprep.mubr.msk.f32.mxu1 %vm16884_vm11, %v16048_v48  ;;  %v12873_v29 = vpack.c.bf16 %v8787_v42, %v8786_v52  ;;  %vm16896_vm11 = vmmov %vm16890_vm1  ;;  %v12902_v52 = vpack.c.bf16 %v8971_v4, %v8970_v53  ;;  %v8973_v42 = vld [vmem:[%s16609_s9 + $0x468] sm:$0xff] }
0x23e2   :  { %12862 = vmatprep.subr.bf16.mxu1 %v12861_v0 }
0x23e3   :  { %12874 = vmatprep.subr.bf16.mxu0 %v12873_v29 }
0x23e4   :  { %12876 = vmatpush3.bf16.msra.mxu0 %v12873_v29  ;;  %v12905_v29 = vpack.c.bf16 %v8973_v42, %v8972_v59 }
0x23e5   :  { %12864 = vmatpush3.bf16.msra.mxu1 %v12861_v0  ;;  %12877 = vmatprep.subr.bf16.mxu0 %v16894_v57 }
0x23e8   :  { %12149 = vmatmul.mubr.msk.f32.vlgmr.msra.gmra.mrb[74].mxu1 %vm16873_vm5, %v16050_v20  ;;  %vm16897_vm5 = vmmov %vm16890_vm1 }
0x242e   :  { %v8572_v24 = vpop.xlane.xlu1 %8571 }
0x242f   :  { %v8569_v8 = vpop.xlane.xlu0 %8568 }
0x2430   :  { %13431 = vrcp.f32 %v8569_v8 }
0x2431   :  { %13433 = vrcp.f32 %v8572_v24 }
0x2433   :  { %v5937_v51 = vpop.xlane.xlu0 %5936 }
0x2434   :  { %v5938_v34 = vmul.f32 0.03125, %v5937_v51 }
0x2436   :  { %v5939_v28 = vsub.f32 %v5934_v32, %v5938_v34 }
0x2438   :  { %v5940_v6 = vmul.f32 %v5939_v28, %v5939_v28 }
0x243a   :  { %v13432_v62 = vpop.eup %13431  ;;  %v5941_v12 = vsel %vm16885_vm3, %v5940_v6, 0.0  ;;  %vm16898_vm3 = vmmov %vm16890_vm1 }
0x243b   :  { %5942 = vadd.xlane.f32.xlu1 %v5941_v12  ;;  %v8575_v31 = vmul.f32 %v13432_v62, %v13428_v13  ;;  %v13434_v23 = vpop.eup %13433  ;;  %v10849_v12 = vld [vmem:[%s16610_s10 + $0x108] ss:$0 sm:$0xff] }
0x243c   :  { %v8576_v54 = vmul.f32 %v13434_v23, %v13426_v9  ;;  %v8874_v23 = vld [vmem:[%s16609_s9 + $0x3d0] sm:$0xff] }
0x243d   :  { %12155 = vmatprep.mubr.msk.f32.mxu1 %vm16886_vm14, %v8575_v31  ;;  %vm16899_vm14 = vmmov %vm16890_vm1 }
0x24bb   :  { %v12150_v11 = vpop.f32.mrb[74].mxu1 }
0x24bc   :  { %v8643_v38 = vpop.f32.mrb[75].mxu1 }
0x24bd   :  { %v12865_v36 = vpack.c.bf16 %v12150_v11, %v8643_v38 }
0x24bf   :  { %12866 = vmatprep.subr.bf16.mxu1 %v12865_v36 }
0x24c0   :  { %12868 = vmatpush3.bf16.msra.mxu1 %v12865_v36  ;;  %v10850_v36 = vld [vmem:[%s16610_s10 + $0x110] ss:$0 sm:$0xff] }
0x24c3   :  { %12156 = vmatmul.mubr.msk.f32.vlgmr.msra.gmra.mrb[70].mxu1 %vm16887_vm13, %v8576_v54  ;;  %v8875_v54 = vld [vmem:[%s16609_s9 + $0x3d8] sm:$0xff]  ;;  %vm16900_vm13 = vcmp.lt.s32.totalorder %v16838_v43, 8  ;;  %v8961_v43 = vld [vmem:[%s16609_s9 + $0x408] sm:$0xff] }
0x24c8   :  { %v5943_v3 = vpop.xlane.xlu1 %5942 }
0x24c9   :  { %v5944_v15 = vmul.f32 0.03125, %v5943_v3 }
0x24cb   :  { %v5945_v46 = vadd.f32 1e-05, %v5944_v15 }
0x24cd   :  { %13435 = vrsqrt.f32 %v5945_v46 }
0x24d7   :  { %v13436_v58 = vpop.eup %13435 }
0x24d8   :  { %v5947_v60 = vmul.f32 %v13436_v58, %v5939_v28  ;;  %v12878_v58 = vpack.c.bf16 %v8875_v54, %v8874_v23 }
0x24da   :  { %v5953_v40 = vmul.f32 %v10748_v39, %v5947_v60  ;;  %v8876_v39 = vld [vmem:[%s16609_s9 + $0x3e0] sm:$0xff] }
0x24dc   :  { %v5959_v35 = vadd.f32 %v10749_v37, %v5953_v40  ;;  %v10751_v40 = vld [vmem:[%s16610_s10 + $0x140] ss:$0 sm:$0xff] }
0x24dd   :  { %v10851_v37 = vld [vmem:[%s16610_s10 + $0xe0] ss:$0 sm:$0xff] }
0x24de   :  { %v5960_v61 = vsel %vm16890_vm1, %v5959_v35, 0.0 }
0x2596   :  { %v12157_v10 = vpop.f32.mrb[70].mxu1 }
0x2597   :  { %v8741_v26 = vadd.f32 %v12157_v10, %v10848_v14  ;;  %v8724_v18 = vpop.f32.mrb[71].mxu1  ;;  %v8877_v10 = vld [vmem:[%s16609_s9 + $0x3e8] sm:$0xff] }
0x2598   :  { %v8740_v50 = vadd.f32 %v10848_v14, %v8724_v18  ;;  %v12881_v18 = vpack.c.bf16 %v8877_v10, %v8876_v39 }
0x2599   :  { %v8743_v25 = vadd.f32 %v8741_v26, %v16050_v20  ;;  %v10750_v26 = vld [vmem:[%s16610_s10 + $0x138] ss:$0 sm:$0xff] }
0x259a   :  { %v8742_v7 = vadd.f32 %v8740_v50, %v16048_v48 }
0x259b   :  { %v8747_v27 = vsel %vm16888_vm15, %v8743_v25, 0.0  ;;  %vm16901_vm15 = vmmov %vm16890_vm1 }
0x259c   :  { %8748 = vadd.xlane.f32.xlu1 %v8747_v27  ;;  %v8744_v5 = vsel %vm16889_vm6, %v8742_v7, 0.0  ;;  %vm16902_vm6 = vmmov %vm16890_vm1 }
0x259d   :  { %8745 = vadd.xlane.f32.xlu0 %v8744_v5 }
0x25a1   :  { %5961 = vadd.xlane.f32.xlu0 %v5960_v61 }
0x2629   :  { %v8749_v49 = vpop.xlane.xlu1 %8748 }
0x262a   :  { %v8751_v30 = vmul.f32 0.03125, %v8749_v49  ;;  %v8746_v17 = vpop.xlane.xlu0 %8745 }
0x262b   :  { %v8750_v20 = vmul.f32 0.03125, %v8746_v17  ;;  %v8958_v17 = vld [vmem:[%s16609_s9 + $0x3f0] sm:$0xff] }
0x262c   :  { %v8753_v21 = vsub.f32 %v8743_v25, %v8751_v30 }
0x262d   :  { %v8752_v16 = vsub.f32 %v8742_v7, %v8750_v20  ;;  %v8959_v20 = vld [vmem:[%s16609_s9 + $0x3f8] sm:$0xff] }
0x262e   :  { %v5962_v33 = vpop.xlane.xlu0 %5961  ;;  %v8755_v9 = vmul.f32 %v8753_v21, %v8753_v21 }
0x262f   :  { %v5963_v13 = vmul.f32 0.03125, %v5962_v33  ;;  %v8754_v48 = vmul.f32 %v8752_v16, %v8752_v16 }
0x2630   :  { %v8759_v41 = vsel %vm16891_vm4, %v8755_v9, 0.0  ;;  %vm16903_vm4 = vmmov %vm16890_vm1 }
0x2631   :  { %v5964_v2 = vsub.f32 %v5959_v35, %v5963_v13  ;;  %8760 = vadd.xlane.f32.xlu0 %v8759_v41  ;;  %v8756_v22 = vsel %vm16892_vm9, %v8754_v48, 0.0  ;;  %v10854_v35 = vld [vmem:[%s16610_s10 + $0xe8] ss:$0 sm:$0xff]  ;;  %v12884_v13 = vpack.c.bf16 %v8959_v20, %v8958_v17  ;;  %v8960_v41 = vld [vmem:[%s16609_s9 + $0x400] sm:$0xff]  ;;  %vm16905_vm9 = vmmov %vm16890_vm1 }
0x2632   :  { %8757 = vadd.xlane.f32.xlu1 %v8756_v22  ;;  %v8965_v22 = vld [vmem:[%s16609_s9 + $0x428] sm:$0xff] }
0x2633   :  { %v5965_v32 = vmul.f32 %v5964_v2, %v5964_v2 }
0x2635   :  { %v5966_v47 = vsel %vm16893_vm12, %v5965_v32, 0.0  ;;  %v12887_v32 = vpack.c.bf16 %v8961_v43, %v8960_v41  ;;  %vm16906_vm12 = vmmov %vm16890_vm1 }
0x2636   :  { %5967 = vadd.xlane.f32.xlu1 %v5966_v47  ;;  %v12893_v47 = vpack.c.bf16 %v8965_v22, %v8964_v55 }
0x26be   :  { %v8761_v56 = vpop.xlane.xlu0 %8760 }
0x26bf   :  { %v8763_v44 = vmul.f32 0.03125, %v8761_v56  ;;  %v8758_v45 = vpop.xlane.xlu1 %8757 }
0x26c0   :  { %v8762_v0 = vmul.f32 0.03125, %v8758_v45  ;;  %v16917_v45 = vld [vmem:[#allocation47_spill] sm:$0xff] }
0x26c1   :  { %v8765_v8 = vadd.f32 1e-05, %v8763_v44 }
0x26c2   :  { %v8764_v51 = vadd.f32 1e-05, %v8762_v0  ;;  %v16918_v0 = vld [vmem:[#allocation43_spill] sm:$0xff] }
0x26c3   :  { %13437 = vrsqrt.f32 %v8765_v8  ;;  %v5968_v34 = vpop.xlane.xlu1 %5967  ;;  %v16919_v8 = vfloor.f32 %v16918_v0 }
0x26c4   :  { %13439 = vrsqrt.f32 %v8764_v51  ;;  %v5969_v28 = vmul.f32 0.03125, %v5968_v34 }
0x26c6   :  { %v5970_v6 = vadd.f32 1e-05, %v5969_v28 }
0x26c8   :  { %13441 = vrsqrt.f32 %v5970_v6 }
0x26cd   :  { %v13438_v62 = vpop.eup %13437 }
0x26ce   :  { %v13440_v31 = vpop.eup %13439  ;;  %v8769_v24 = vmul.f32 %v13438_v62, %v8753_v21  ;;  %v8962_v21 = vld [vmem:[%s16609_s9 + $0x410] sm:$0xff] }
0x26cf   :  { %v8768_v11 = vmul.f32 %v13440_v31, %v8752_v16  ;;  %v8963_v16 = vld [vmem:[%s16609_s9 + $0x418] sm:$0xff] }
0x26d0   :  { %v8776_v38 = vmul.f32 %v10849_v12, %v8769_v24  ;;  %v12890_v48 = vpack.c.bf16 %v8963_v16, %v8962_v21 }
0x26d1   :  { %v8775_v3 = vmul.f32 %v10849_v12, %v8768_v11  ;;  %v16922_v12 = vld [vmem:[#allocation44_spill] sm:$0xff] }
0x26d2   :  { %v13442_v15 = vpop.eup %13441  ;;  %v16297_v60 = vadd.f32 %v10850_v36, %v8776_v38  ;;  %v16923_v31 = vfloor.f32 %v16922_v12 }
0x26d3   :  { %v16295_v46 = vadd.f32 %v10850_v36, %v8775_v3  ;;  %v5972_v14 = vmul.f32 %v13442_v15, %v5964_v2 }
0x26d5   :  { %12166 = vmatprep.mubr.msk.f32.mxu0 %vm16895_vm10, %v16295_v46  ;;  %v5978_v50 = vmul.f32 %v10750_v26, %v5972_v14  ;;  %vm16907_vm10 = vmmov %vm16890_vm1 }
0x26d6   :  { %12167 = vmatmul.mubr.msk.f32.vlgmr.msra.gmra.mrb[88].mxu0 %vm16896_vm11, %v16297_v60  ;;  %vm16908_vm11 = vmmov %vm16890_vm1 }
0x26d7   :  { %12879 = vmatpush3.bf16.msra.mxu0 %v12878_v58  ;;  %12177 = vmatprep.mubr.msk.f32.mxu0 %vm16786_vm8, %v16766_v19  ;;  %v16318_v25 = vadd.f32 %v10751_v40, %v5978_v50 }
0x26d8   :  { %12880 = vmatprep.subr.bf16.mxu0 %v16894_v57 }
0x26db   :  { %12882 = vmatpush3.bf16.msra.mxu0 %v12881_v18 }
0x26de   :  { %12178 = vmatmul.mubr.msk.f32.vlgmr.msra.gmra.mrb[90].mxu0 %vm16897_vm5, %v16318_v25  ;;  %vm16909_vm5 = vmmov %vm16890_vm1 }
0x27a9   :  { %v12168_v7 = vpop.f32.mrb[88].mxu0 }
0x27aa   :  { %v8865_v27 = vpop.f32.mrb[89].mxu0  ;;  %v8871_v2 = vadd.f32 %v12168_v7, %v10851_v37 }
0x27ab   :  { %v8866_v5 = vadd.f32 %v10851_v37, %v8865_v27 }
0x27ad   :  { %12182 = vmatprep.mubr.msk.f32.mxu1 %vm16898_vm3, %v8866_v5  ;;  %12198 = vmatprep.mubr.msk.f32.mxu0 %vm16899_vm14, %v8866_v5  ;;  %vm16910_vm3 = vmmov %vm16890_vm1 }
0x27ae   :  { %vm16911_vm14 = vmmov %vm16890_vm1 }
0x27b1   :  { %v8952_v61 = vpop.f32.mrb[90].mxu0 }
0x27b2   :  { %v8953_v49 = vadd.f32 %v10854_v35, %v8952_v61  ;;  %v12179_v30 = vpop.f32.mrb[91].mxu0 }
0x27b4   :  { %v8974_v33 = vsel %vm16900_vm13, %v8953_v49, 0.0  ;;  %v9155_v9 = vsel %vm14852_vm7, %v8953_v49, 0.0  ;;  %vm16904_vm7 = vmmov %vm16890_vm1  ;;  %v9492_v1 = vsel %vm14845_vm0, %v8953_v49, 0.0  ;;  %v9750_v63 = vsel %vm14857_vm2, %v8953_v49, 0.0 }
0x27b5   :  { %12180 = vmatprep.subr.msk.mxu1 %vm16901_vm15, %v8974_v33  ;;  %12196 = vmatprep.subr.msk.mxu0 %vm16902_vm6, %v9155_v9  ;;  %vm16912_vm0 = vmmov %vm16890_vm1 }
0x27b6   :  { %12181 = vmatpush3.xpose.msk.msra.mxu1 %vm16890_vm1, %v8974_v33  ;;  %12197 = vmatpush3.xpose.msk.msra.mxu0 %vm16903_vm4, %v9155_v9  ;;  %vm16913_vm13 = vmmov %vm16912_vm0  ;;  %vm16409_vm1 = vcmp.eq.f32.partialorder %v16919_v8, %v16917_v45  ;;  %vm16416_vm4 = vcmp.eq.f32.partialorder %v16923_v31, %v16917_v45 }
0x27b7   :  { %12883 = vmatprep.subr.bf16.mxu1 %v16894_v57  ;;  %12889 = vmatprep.subr.bf16.mxu0 %v16894_v57  ;;  %vm16914_vm15 = vmmov %vm16912_vm0 }
0x27b8   :  { %vm16915_vm2 = vmmov %vm16912_vm0 }
0x27b9   :  { %12183 = vmatmul.mubr.msk.f32.vlgmr.msra.gmra.mrb[76].mxu1 %vm16904_vm7, %v8871_v2  ;;  %12199 = vmatmul.mubr.msk.f32.vlgmr.msra.gmra.mrb[92].mxu0 %vm16905_vm9, %v8871_v2  ;;  %vm16916_vm6 = vmmov %vm16912_vm0  ;;  %vm16926_vm7 = vcmask 64512  }
0x27ba   :  { %12885 = vmatpush3.bf16.msra.mxu1 %v12884_v13  ;;  %12891 = vmatpush3.bf16.msra.mxu0 %v12890_v48  ;;  %vm16927_vm9 = vmmov %vm16926_vm7 }
0x27bb   :  { %12886 = vmatprep.subr.bf16.mxu1 %v16894_v57  ;;  %12892 = vmatprep.subr.bf16.mxu0 %v16894_v57 }
0x27bc   :  { %12193 = vmatprep.mubr.msk.f32.mxu1 %vm16786_vm8, %v16766_v19  ;;  %12209 = vmatprep.mubr.msk.f32.mxu0 %vm16786_vm8, %v16766_v19 }
0x27be   :  { %12888 = vmatpush3.bf16.msra.mxu1 %v12887_v32  ;;  %12894 = vmatpush3.bf16.msra.mxu0 %v12893_v47 }
0x27bf   :  { %12222 = vmatprep.subr.msk.mxu0 %vm16906_vm12, %v9492_v1  ;;  %vm16928_vm12 = vmmov %vm16926_vm7 }
0x27c1   :  { %12194 = vmatmul.mubr.msk.f32.vlgmr.msra.gmra.mrb[78].mxu1 %vm16907_vm10, %v16318_v25  ;;  %12210 = vmatmul.mubr.msk.f32.vlgmr.msra.gmra.mrb[94].mxu0 %vm16908_vm11, %v16318_v25  ;;  %vm16929_vm10 = vmmov %vm16926_vm7 }
0x27c2   :  { %12224 = vmatprep.mubr.msk.f32.mxu0 %vm16909_vm5, %v8866_v5  ;;  %vm16930_vm11 = vmmov %vm16926_vm7 }
0x27c3   :  { %vm16931_vm5 = vmmov %vm16926_vm7 }
0x27c7   :  { %12223 = vmatpush3.xpose.msk.msra.mxu0 %vm16910_vm3, %v9492_v1  ;;  %vm16932_vm3 = vmmov %vm16931_vm5 }
0x27c8   :  { %12243 = vmatprep.subr.msk.mxu0 %vm16911_vm14, %v9750_v63  ;;  %vm16933_vm14 = vmmov %vm16932_vm3 }
0x27ca   :  { %12225 = vmatmul.mubr.msk.f32.vlgmr.msra.gmra.mrb[96].mxu0 %vm16912_vm0, %v8871_v2  ;;  %vm16934_vm0 = vmmov %vm16932_vm3 }
0x27cb   :  { %12244 = vmatpush3.xpose.msk.msra.mxu0 %vm16913_vm13, %v9750_v63  ;;  %12245 = vmatprep.mubr.msk.f32.mxu0 %vm16914_vm15, %v8866_v5  ;;  %vm16935_vm13 = vmmov %vm16934_vm0 }
0x27cc   :  { %12901 = vmatprep.subr.bf16.mxu0 %v16894_v57  ;;  %vm16936_vm15 = vmmov %vm16934_vm0 }
0x27ce   :  { %12246 = vmatmul.mubr.msk.f32.vlgmr.msra.gmra.mrb[98].mxu0 %vm16915_vm2, %v8871_v2  ;;  %vm16937_vm2 = vmmov %vm16934_vm0 }
0x27cf   :  { %12903 = vmatpush3.bf16.msra.mxu0 %v12902_v52  ;;  %12256 = vmatprep.mubr.msk.f32.mxu0 %vm16786_vm8, %v16766_v19 }
0x27d0   :  { %12904 = vmatprep.subr.bf16.mxu0 %v16894_v57 }
0x27d3   :  { %12906 = vmatpush3.bf16.msra.mxu0 %v12905_v29 }
0x27d6   :  { %12257 = vmatmul.mubr.msk.f32.vlgmr.msra.gmra.mrb[100].mxu0 %vm16916_vm6, %v16318_v25  ;;  %vm16938_vm6 = vmmov %vm16934_vm0 }
0x288c   :  { %v12184_v56 = vpop.f32.mrb[76].mxu1  ;;  %v12200_v44 = vpop.f32.mrb[92].mxu0 }
0x288d   :  { %v9060_v34 = vmul.f32 0.35355338, %v12184_v56  ;;  %v9235_v28 = vmul.f32 0.35355338, %v12200_v44  ;;  %v9050_v6 = vpop.f32.mrb[77].mxu1  ;;  %v9225_v62 = vpop.f32.mrb[93].mxu0 }
0x288e   :  { %v9059_v11 = vmul.f32 0.35355338, %v9050_v6  ;;  %v9234_v38 = vmul.f32 0.35355338, %v9225_v62 }
0x288f   :  { %v9237_v36 = vsel %vm16409_vm1, %v9235_v28, -1e+30  ;;  %v9062_v15 = vsel %vm16409_vm1, %v9060_v34, -1e+30 }
0x2890   :  { %v9241_v23 = vsel %vm16926_vm7, %v9237_v36, -inf  ;;  %v9236_v54 = vsel %vm16416_vm4, %v9234_v38, -1e+30  ;;  %v9061_v58 = vsel %vm16416_vm4, %v9059_v11, -1e+30  ;;  %v9066_v10 = vsel %vm16928_vm12, %v9062_v15, -inf  ;;  %vm16941_vm7 = vmmov %vm16934_vm0 }
0x2891   :  { %9242 = vmax.xlane.f32.xlu1 %v9241_v23  ;;  %v9238_v3 = vsel %vm16927_vm9, %v9236_v54, -inf  ;;  %v9063_v50 = vsel %vm16929_vm10, %v9061_v58, -inf  ;;  %vm16942_vm9 = vmmov %vm16934_vm0 }
0x2892   :  { %9239 = vmax.xlane.f32.xlu0 %v9238_v3  ;;  %vm16943_vm12 = vmmov %vm16934_vm0 }
0x2893   :  { %vm16944_vm10 = vmmov %vm16934_vm0 }
0x2894   :  { %v16430_v14 = vpop.f32.mrb[78].mxu1  ;;  %v9326_v39 = vpop.f32.mrb[94].mxu0 }
0x2895   :  { %v12211_v26 = vpop.f32.mrb[95].mxu0  ;;  %12212 = vmatprep.subr.mxu1 %v9326_v39  ;;  %9067 = vmax.xlane.f32.xlu1 %v9066_v10  ;;  %v12195_v18 = vpop.f32.mrb[79].mxu1 }
0x2896   :  { %12213 = vmatpush3.msra.mxu1 %v9326_v39  ;;  %9064 = vmax.xlane.f32.xlu0 %v9063_v50 }
0x2897   :  { %12217 = vmatprep.subr.mxu1 %v16430_v14 }
0x289d   :  { %v12226_v40 = vpop.f32.mrb[96].mxu0 }
0x289e   :  { %v9572_v37 = vmul.f32 0.35355338, %v12226_v40  ;;  %v9562_v7 = vpop.f32.mrb[97].mxu0 }
0x289f   :  { %v9571_v27 = vmul.f32 0.35355338, %v9562_v7  ;;  %v8966_v7 = vld [vmem:[%s16609_s9 + $0x430] sm:$0xff] }
0x28a0   :  { %v9574_v5 = vsel %vm16409_vm1, %v9572_v37, -1e+30 }
0x28a1   :  { %v12247_v35 = vpop.f32.mrb[98].mxu0  ;;  %v9573_v61 = vsel %vm16416_vm4, %v9571_v27, -1e+30  ;;  %v9578_v45 = vsel %vm16934_vm0, %v9574_v5, -inf  ;;  %v8967_v27 = vld [vmem:[%s16609_s9 + $0x438] sm:$0xff] }
0x28a2   :  { %v9830_v49 = vmul.f32 0.35355338, %v12247_v35  ;;  %v9820_v30 = vpop.f32.mrb[99].mxu0  ;;  %v9575_v0 = vsel %vm16935_vm13, %v9573_v61, -inf  ;;  %v12896_v35 = vpack.c.bf16 %v8967_v27, %v8966_v7  ;;  %vm16949_vm13 = vmmov %vm16934_vm0  ;;  %v10881_v7 = vld [vmem:[%s16610_s10 + $0x118] ss:$0 sm:$0xff] }
0x28a3   :  { %v9829_v17 = vmul.f32 0.35355338, %v9820_v30 }
0x28a4   :  { %v16441_v20 = vsel %vm16409_vm1, %v9830_v49, -1e+30  ;;  %vm16939_vm1 = vmmov %vm16934_vm0  ;;  %v8969_v49 = vld [vmem:[%s16609_s9 + $0x448] sm:$0xff] }
0x28a5   :  { %v16445_v21 = vsel %vm16416_vm4, %v9829_v17, -1e+30  ;;  %v9836_v8 = vsel %vm16936_vm15, %v16441_v20, -inf  ;;  %vm16940_vm4 = vmmov %vm16934_vm0 }
0x28a6   :  { %v9833_v51 = vsel %vm16937_vm2, %v16445_v21, -inf }
0x28a9   :  { %v16447_v16 = vpop.f32.mrb[100].mxu0 }
0x28aa   :  { %v12258_v33 = vpop.f32.mrb[101].mxu0 }
0x291e   :  { %v9243_v9 = vpop.xlane.xlu1 %9242 }
0x291f   :  { %v9245_v13 = vsub.f32 %v9237_v36, %v9243_v9  ;;  %v9240_v48 = vpop.xlane.xlu0 %9239 }
0x2920   :  { %v9244_v41 = vsub.f32 %v9236_v54, %v9240_v48 }
0x2921   :  { %v9248_v2 = vmul.f32 1.442695, %v9245_v13 }
0x2922   :  { %v9246_v43 = vmul.f32 1.442695, %v9244_v41  ;;  %v9068_v55 = vpop.xlane.xlu1 %9067 }
0x2923   :  { %13443 = vpow2.f32 %v9248_v2  ;;  %v9070_v22 = vsub.f32 %v9062_v15, %v9068_v55  ;;  %v9065_v32 = vpop.xlane.xlu0 %9064 }
0x2924   :  { %13445 = vpow2.f32 %v9246_v43  ;;  %v9069_v47 = vsub.f32 %v9061_v58, %v9065_v32 }
0x2925   :  { %v9073_v1 = vmul.f32 1.442695, %v9070_v22 }
0x2926   :  { %v9071_v63 = vmul.f32 1.442695, %v9069_v47 }
0x2927   :  { %13447 = vpow2.f32 %v9073_v1 }
0x2928   :  { %13449 = vpow2.f32 %v9071_v63 }
0x292d   :  { %v13444_v53 = vpop.eup %13443 }
0x292e   :  { %v13446_v4 = vpop.eup %13445  ;;  %v9253_v52 = vsel %vm16930_vm11, %v13444_v53, 0.0  ;;  %vm16945_vm11 = vmmov %vm16934_vm0 }
0x292f   :  { %9254 = vadd.xlane.f32.xlu1 %v9253_v52  ;;  %v9250_v59 = vsel %vm16931_vm5, %v13446_v4, 0.0  ;;  %vm16946_vm5 = vcmask 261120  }
0x2930   :  { %9251 = vadd.xlane.f32.xlu0 %v9250_v59  ;;  %vm16950_vm15 = vmmov %vm16946_vm5 }
0x2931   :  { %v13448_v42 = vpop.eup %13447  ;;  %vm16951_vm2 = vmmov %vm16946_vm5 }
0x2932   :  { %v13450_v29 = vpop.eup %13449  ;;  %v9078_v56 = vsel %vm16932_vm3, %v13448_v42, 0.0  ;;  %vm16947_vm3 = vmmov %vm16934_vm0 }
0x2933   :  { %9079 = vadd.xlane.f32.xlu1 %v9078_v56  ;;  %v9075_v44 = vsel %vm16933_vm14, %v13450_v29, 0.0  ;;  %vm16948_vm14 = vmmov %vm16934_vm0 }
0x2934   :  { %9076 = vadd.xlane.f32.xlu0 %v9075_v44 }
0x2937   :  { %9579 = vmax.xlane.f32.xlu1 %v9578_v45 }
0x2938   :  { %9576 = vmax.xlane.f32.xlu0 %v9575_v0 }
0x293b   :  { %9837 = vmax.xlane.f32.xlu1 %v9836_v8 }
0x293c   :  { %9834 = vmax.xlane.f32.xlu0 %v9833_v51 }
0x29bc   :  { %v9255_v34 = vpop.xlane.xlu1 %9254 }
0x29bd   :  { %13451 = vrcp.f32 %v9255_v34  ;;  %v9252_v28 = vpop.xlane.xlu0 %9251 }
0x29be   :  { %13453 = vrcp.f32 %v9252_v28 }
0x29c0   :  { %v9080_v6 = vpop.xlane.xlu1 %9079 }
0x29c1   :  { %v9077_v62 = vpop.xlane.xlu0 %9076 }
0x29c2   :  { %13455 = vrcp.f32 %v9077_v62 }
0x29c3   :  { %13457 = vrcp.f32 %v9080_v6 }
0x29c4   :  { %v9580_v12 = vpop.xlane.xlu1 %9579 }
0x29c5   :  { %v9582_v31 = vsub.f32 %v9574_v5, %v9580_v12  ;;  %v9577_v24 = vpop.xlane.xlu0 %9576 }
0x29c6   :  { %v9581_v11 = vsub.f32 %v9573_v61, %v9577_v24 }
0x29c7   :  { %v13452_v38 = vpop.eup %13451  ;;  %v9585_v36 = vmul.f32 1.442695, %v9582_v31 }
0x29c8   :  { %v13454_v23 = vpop.eup %13453  ;;  %v9583_v54 = vmul.f32 1.442695, %v9581_v11  ;;  %v9838_v3 = vpop.xlane.xlu1 %9837  ;;  %v9259_v10 = vmul.f32 %v13452_v38, %v13444_v53 }
0x29c9   :  { %13459 = vpow2.f32 %v9585_v36  ;;  %v9840_v15 = vsub.f32 %v16441_v20, %v9838_v3  ;;  %v9835_v58 = vpop.xlane.xlu0 %9834  ;;  %v9258_v39 = vmul.f32 %v13454_v23, %v13446_v4  ;;  %v10058_v23 = vld [vmem:[%s16609_s9 + $0x478] sm:$0xff]  ;;  %v10059_v3 = vld [vmem:[%s16609_s9 + $0x480] sm:$0xff] }
0x29ca   :  { %13461 = vpow2.f32 %v9583_v54  ;;  %v9839_v26 = vsub.f32 %v16445_v21, %v9835_v58 }
0x29cb   :  { %v9843_v18 = vmul.f32 1.442695, %v9840_v15  ;;  %12214 = vmatprep.mubr.msk.f32.mxu1 %vm16938_vm6, %v9258_v39  ;;  %vm16952_vm6 = vmmov %vm16951_vm2  ;;  %v10060_v15 = vld [vmem:[%s16609_s9 + $0x488] sm:$0xff] }
0x29cc   :  { %v13456_v50 = vpop.eup %13455  ;;  %v9841_v40 = vmul.f32 1.442695, %v9839_v26  ;;  %12215 = vmatmul.mubr.msk.f32.vlgmr.msra.gmra.mrb[80].mxu1 %vm16939_vm1, %v9259_v10  ;;  %vm16953_vm1 = vmmov %vm16951_vm2  ;;  %v12911_v58 = vpack.c.bf16 %v10060_v15, %v10059_v3 }
0x29cd   :  { %13463 = vpow2.f32 %v9843_v18  ;;  %12218 = vmatpush3.msra.mxu1 %v16430_v14  ;;  %v9083_v37 = vmul.f32 %v13456_v50, %v13450_v29  ;;  %v13458_v5 = vpop.eup %13457  ;;  %v8968_v14 = vld [vmem:[%s16609_s9 + $0x440] sm:$0xff]  ;;  %v10880_v29 = vld [vmem:[%s16610_s10 + $0xf0] ss:$0 sm:$0xff] }
0x29ce   :  { %13465 = vpow2.f32 %v9841_v40  ;;  %12895 = vmatprep.subr.bf16.mxu1 %v16894_v57  ;;  %v9084_v61 = vmul.f32 %v13458_v5, %v13448_v42  ;;  %v12899_v33 = vpack.c.bf16 %v8969_v49, %v8968_v14  ;;  %v10882_v14 = vld [vmem:[%s16610_s10 + $0x120] ss:$0 sm:$0xff] }
0x29cf   :  { %12219 = vmatprep.mubr.msk.f32.mxu1 %vm16940_vm4, %v9083_v37  ;;  %vm16954_vm4 = vmmov %vm16953_vm1 }
0x29d3   :  { %v13460_v30 = vpop.eup %13459 }
0x29d4   :  { %v13462_v17 = vpop.eup %13461  ;;  %12220 = vmatmul.mubr.msk.f32.vlgmr.msra.gmra.mrb[80].mxu1 %vm16941_vm7, %v9084_v61  ;;  %v9590_v20 = vsel %vm16942_vm9, %v13460_v30, 0.0  ;;  %vm16955_vm7 = vmmov %vm16953_vm1 }
0x29d5   :  { %12897 = vmatpush3.bf16.msra.mxu1 %v12896_v35  ;;  %9591 = vadd.xlane.f32.xlu1 %v9590_v20  ;;  %v9587_v21 = vsel %vm16943_vm12, %v13462_v17, 0.0  ;;  %v10165_v20 = vld [vmem:[%s16609_s9 + $0x490] sm:$0xff]  ;;  %vm16956_vm9 = vmmov %vm16953_vm1 }
0x29d6   :  { %9588 = vadd.xlane.f32.xlu0 %v9587_v21  ;;  %12898 = vmatprep.subr.bf16.mxu1 %v16894_v57  ;;  %v10166_v21 = vld [vmem:[%s16609_s9 + $0x498] sm:$0xff]  ;;  %vm16957_vm12 = vmmov %vm16953_vm1 }
0x29d7   :  { %v13464_v9 = vpop.eup %13463  ;;  %12235 = vmatprep.mubr.msk.f32.mxu1 %vm16786_vm8, %v16766_v19 }
0x29d8   :  { %v13466_v13 = vpop.eup %13465  ;;  %v9848_v48 = vsel %vm16944_vm10, %v13464_v9, 0.0  ;;  %vm16958_vm10 = vmmov %vm16953_vm1 }
0x29d9   :  { %12900 = vmatpush3.bf16.msra.mxu1 %v12899_v33  ;;  %9849 = vadd.xlane.f32.xlu1 %v9848_v48  ;;  %v9845_v41 = vsel %vm16945_vm11, %v13466_v13, 0.0  ;;  %v12915_v33 = vpack.c.bf16 %v10166_v21, %v10165_v20  ;;  %vm16959_vm11 = vmmov %vm16953_vm1 }
0x29da   :  { %9846 = vadd.xlane.f32.xlu0 %v9845_v41  ;;  %v10883_v41 = vld [vmem:[%s16610_s10 + $0xf8] ss:$0 sm:$0xff] }
0x29dc   :  { %12236 = vmatmul.mubr.msk.f32.vlgmr.msra.gmra.mrb[82].mxu1 %vm16946_vm5, %v16318_v25  ;;  %vm16961_vm5 = vmmov %vm16953_vm1 }
0x2a62   :  { %v9592_v22 = vpop.xlane.xlu1 %9591 }
0x2a63   :  { %v9589_v2 = vpop.xlane.xlu0 %9588 }
0x2a64   :  { %13467 = vrcp.f32 %v9589_v2 }
0x2a65   :  { %13469 = vrcp.f32 %v9592_v22 }
0x2a66   :  { %v9850_v47 = vpop.xlane.xlu1 %9849 }
0x2a67   :  { %v9847_v32 = vpop.xlane.xlu0 %9846 }
0x2a68   :  { %13471 = vrcp.f32 %v9847_v32 }
0x2a69   :  { %13473 = vrcp.f32 %v9850_v47 }
0x2a6e   :  { %v13468_v43 = vpop.eup %13467 }
0x2a6f   :  { %v9595_v55 = vmul.f32 %v13468_v43, %v13462_v17  ;;  %v13470_v1 = vpop.eup %13469 }
0x2a70   :  { %v9596_v4 = vmul.f32 %v13470_v1, %v13460_v30 }
0x2a71   :  { %12240 = vmatprep.mubr.msk.f32.mxu1 %vm16947_vm3, %v9595_v55  ;;  %vm16962_vm3 = vcmask 130048  }
0x2a72   :  { %v13472_v63 = vpop.eup %13471 }
0x2a73   :  { %v9853_v25 = vmul.f32 %v13472_v63, %v13466_v13  ;;  %v13474_v59 = vpop.eup %13473  ;;  %v10168_v13 = vld [vmem:[%s16609_s9 + $0x4a8] sm:$0xff] }
0x2a74   :  { %v9854_v42 = vmul.f32 %v13474_v59, %v13464_v9  ;;  %v10167_v9 = vld [vmem:[%s16609_s9 + $0x4a0] sm:$0xff] }
0x2a75   :  { %v12919_v48 = vpack.c.bf16 %v10168_v13, %v10167_v9 }
0x2aaf   :  { %v9663_v53 = vpop.f32.mrb[82].mxu1 }
0x2ab0   :  { %v12237_v52 = vpop.f32.mrb[83].mxu1  ;;  %12238 = vmatprep.subr.mxu1 %v9663_v53 }
0x2ab1   :  { %12239 = vmatpush3.msra.mxu1 %v9663_v53 }
0x2ab2   :  { %12241 = vmatmul.mubr.msk.f32.vlgmr.msra.gmra.mrb[80].mxu1 %vm16948_vm14, %v9596_v4  ;;  %12259 = vmatprep.subr.mxu1 %v16447_v16  ;;  %vm16963_vm14 = vmmov %vm16953_vm1 }
0x2ab3   :  { %12260 = vmatpush3.msra.mxu1 %v16447_v16  ;;  %12261 = vmatprep.mubr.msk.f32.mxu1 %vm16934_vm0, %v9853_v25  ;;  %vm16964_vm0 = vmmov %vm16953_vm1 }
0x2ab4   :  { %12916 = vmatprep.subr.bf16.mxu1 %v12915_v33 }
0x2aba   :  { %12262 = vmatmul.mubr.msk.f32.vlgmr.msra.gmra.mrb[80].mxu1 %vm16949_vm13, %v9854_v42  ;;  %vm16965_vm13 = vmmov %vm16964_vm0 }
0x2abb   :  { %12918 = vmatpush3.bf16.msra.mxu1 %v12915_v33  ;;  %v10297_v33 = vld [vmem:[%s16612_s12] sm:$0xff] }
0x2abc   :  { %12920 = vmatprep.subr.bf16.mxu1 %v12919_v48 }
0x2abf   :  { %12922 = vmatpush3.bf16.msra.mxu1 %v12919_v48 }
0x2ac0   :  { %12926 = vmatprep.subr.bf16.mxu1 %v16894_v57 }
0x2b8d   :  { %v12263_v56 = vpop.f32.mrb[80].mxu1 }
0x2b8e   :  { %v10014_v44 = vadd.f32 %v12263_v56, %v10880_v29  ;;  %v9997_v45 = vpop.f32.mrb[81].mxu1 }
0x2b8f   :  { %v10013_v0 = vadd.f32 %v10880_v29, %v9997_v45 }
0x2b90   :  { %v10016_v8 = vadd.f32 %v10014_v44, %v16297_v60 }
0x2b91   :  { %v10015_v51 = vadd.f32 %v10013_v0, %v16295_v46  ;;  %v10057_v46 = vld [vmem:[%s16609_s9 + $0x470] sm:$0xff] }
0x2b92   :  { %v10020_v16 = vsel %vm16950_vm15, %v10016_v8, 0.0  ;;  %v12907_v54 = vpack.c.bf16 %v10058_v23, %v10057_v46  ;;  %vm10478_vm15 = vcmask 80896  }
0x2b93   :  { %10021 = vadd.xlane.f32.xlu1 %v10020_v16  ;;  %v10017_v34 = vsel %vm16951_vm2, %v10015_v51, 0.0 }
0x2b94   :  { %10018 = vadd.xlane.f32.xlu0 %v10017_v34  ;;  %12908 = vmatprep.subr.bf16.mxu0 %v12907_v54  ;;  %v10886_v34 = vld [vmem:[%s16610_s10 + $0x100] ss:$0 sm:$0xff] }
0x2b95   :  { %12910 = vmatpush3.bf16.msra.mxu0 %v12907_v54 }
0x2b96   :  { %12912 = vmatprep.subr.bf16.mxu0 %v12911_v58 }
0x2b99   :  { %12914 = vmatpush3.bf16.msra.mxu0 %v12911_v58 }
0x2b9a   :  { %12923 = vmatprep.subr.bf16.mxu0 %v16894_v57 }
0x2c20   :  { %v10022_v28 = vpop.xlane.xlu1 %10021 }
0x2c21   :  { %v10024_v6 = vmul.f32 0.03125, %v10022_v28  ;;  %v10019_v62 = vpop.xlane.xlu0 %10018 }
0x2c22   :  { %v10023_v12 = vmul.f32 0.03125, %v10019_v62 }
0x2c23   :  { %v10026_v31 = vsub.f32 %v10016_v8, %v10024_v6 }
0x2c24   :  { %v10025_v24 = vsub.f32 %v10015_v51, %v10023_v12 }
0x2c25   :  { %v10028_v11 = vmul.f32 %v10026_v31, %v10026_v31 }
0x2c26   :  { %v10027_v38 = vmul.f32 %v10025_v24, %v10025_v24 }
0x2c27   :  { %v10032_v36 = vsel %vm16952_vm6, %v10028_v11, 0.0 }
0x2c28   :  { %10033 = vadd.xlane.f32.xlu1 %v10032_v36  ;;  %v10029_v60 = vsel %vm16953_vm1, %v10027_v38, 0.0 }
0x2c29   :  { %10030 = vadd.xlane.f32.xlu0 %v10029_v60 }
0x2cb5   :  { %v10034_v39 = vpop.xlane.xlu1 %10033 }
0x2cb6   :  { %v10036_v10 = vmul.f32 0.03125, %v10034_v39  ;;  %v10031_v26 = vpop.xlane.xlu0 %10030 }
0x2cb7   :  { %v10035_v18 = vmul.f32 0.03125, %v10031_v26 }
0x2cb8   :  { %v10038_v50 = vadd.f32 1e-05, %v10036_v10 }
0x2cb9   :  { %v10037_v40 = vadd.f32 1e-05, %v10035_v18 }
0x2cba   :  { %13475 = vrsqrt.f32 %v10038_v50 }
0x2cbb   :  { %13477 = vrsqrt.f32 %v10037_v40 }
0x2cc4   :  { %v13476_v37 = vpop.eup %13475 }
0x2cc5   :  { %v13478_v27 = vpop.eup %13477  ;;  %v10042_v5 = vmul.f32 %v13476_v37, %v10026_v31 }
0x2cc6   :  { %v10041_v35 = vmul.f32 %v13478_v27, %v10025_v24  ;;  %v10889_v27 = vld [vmem:[%s16610_s10 + $0x128] ss:$0 sm:$0xff] }
0x2cc7   :  { %v10049_v61 = vmul.f32 %v10881_v7, %v10042_v5 }
0x2cc8   :  { %v10048_v49 = vmul.f32 %v10881_v7, %v10041_v35 }
0x2cc9   :  { %v10056_v17 = vadd.f32 %v10882_v14, %v10049_v61 }
0x2cca   :  { %v10055_v30 = vadd.f32 %v10882_v14, %v10048_v49  ;;  %v10890_v14 = vld [vmem:[%s16610_s10 + $0x130] ss:$0 sm:$0xff] }
0x2ccc   :  { %12272 = vmatprep.mubr.msk.f32.mxu0 %vm16954_vm4, %v10055_v30 }
0x2ccd   :  { %12273 = vmatmul.mubr.msk.f32.vlgmr.msra.gmra.mrb[102].mxu0 %vm16955_vm7, %v10056_v17 }
0x2cce   :  { %12290 = vmatprep.mubr.msk.f32.mxu0 %vm16786_vm8, %v16766_v19 }
0x2da0   :  { %v12274_v2 = vpop.f32.mrb[102].mxu0 }
0x2da1   :  { %v10144_v43 = vadd.f32 %v12274_v2, %v10883_v41  ;;  %v10138_v55 = vpop.f32.mrb[103].mxu0 }
0x2da2   :  { %v10139_v22 = vadd.f32 %v10883_v41, %v10138_v55 }
0x2da3   :  { %v10148_v32 = vmul.f32 %v10144_v43, %v10144_v43 }
0x2da4   :  { %v10147_v47 = vmul.f32 %v10139_v22, %v10139_v22 }
0x2da5   :  { %v10150_v1 = vmul.f32 %v10148_v32, %v10144_v43  ;;  %v10396_v32 = vld [vmem:[%s16613_s13] sm:$0xff] }
0x2da6   :  { %v10149_v63 = vmul.f32 %v10147_v47, %v10139_v22  ;;  %v10397_v47 = vld [vmem:[%s16613_s13 + $0x8] sm:$0xff] }
0x2da7   :  { %v10152_v53 = vmul.f32 0.044715, %v10150_v1  ;;  %v12927_v1 = vpack.c.bf16 %v10397_v47, %v10396_v32 }
0x2da8   :  { %v10151_v4 = vmul.f32 0.044715, %v10149_v63  ;;  %v10398_v63 = vld [vmem:[%s16613_s13 + $0x10] sm:$0xff] }
0x2da9   :  { %v10154_v52 = vadd.f32 %v10152_v53, %v10144_v43  ;;  %v10399_v53 = vld [vmem:[%s16613_s13 + $0x18] sm:$0xff] }
0x2daa   :  { %v10153_v25 = vadd.f32 %v10151_v4, %v10139_v22  ;;  %v12930_v4 = vpack.c.bf16 %v10399_v53, %v10398_v63 }
0x2dab   :  { %v10156_v59 = vmul.f32 0.7978846, %v10154_v52 }
0x2dac   :  { %v10155_v42 = vmul.f32 0.7978846, %v10153_v25 }
0x2dad   :  { %13479 = vtanh.f32 %v10156_v59 }
0x2dae   :  { %13481 = vtanh.f32 %v10155_v42 }
0x2db7   :  { %v13480_v29 = vpop.eup %13479 }
0x2db8   :  { %v13482_v56 = vpop.eup %13481  ;;  %v10160_v44 = vadd.f32 1.0, %v13480_v29  ;;  %v10892_v29 = vld [vmem:[%s16610_s10 + $0x148] ss:$0 sm:$0xff] }
0x2db9   :  { %v10159_v45 = vadd.f32 1.0, %v13482_v56  ;;  %v10893_v56 = vld [vmem:[%s16610_s10 + $0x150] ss:$0 sm:$0xff] }
0x2dba   :  { %v10162_v0 = vmul.f32 0.5, %v10160_v44 }
0x2dbb   :  { %v10161_v8 = vmul.f32 0.5, %v10159_v45 }
0x2dbc   :  { %v10164_v16 = vmul.f32 %v10162_v0, %v10144_v43  ;;  %v10894_v0 = vld [vmem:[%s16613_s13 + $0x20] ss:$0 sm:$0xff] }
0x2dbd   :  { %v10163_v51 = vmul.f32 %v10161_v8, %v10139_v22 }
0x2dbf   :  { %12283 = vmatprep.mubr.msk.f32.mxu1 %vm16956_vm9, %v10163_v51 }
0x2dc0   :  { %12284 = vmatmul.mubr.msk.f32.vlgmr.msra.gmra.mrb[84].mxu1 %vm16957_vm12, %v10164_v16 }
0x2dc1   :  { %12301 = vmatprep.mubr.msk.f32.mxu1 %vm16786_vm8, %v16766_v19  ;;  %vm16960_vm8 = vmmov %vm16953_vm1  ;;  %12928 = vmatpush3.bf16.msra.mxu1 %v12927_v1 }
0x2dc2   :  { %12929 = vmatprep.subr.bf16.mxu1 %v16894_v57 }
0x2dc5   :  { %12931 = vmatpush3.bf16.msra.mxu1 %v12930_v4 }
0x2e93   :  { %v12285_v28 = vpop.f32.mrb[84].mxu1 }
0x2e94   :  { %v10252_v6 = vadd.f32 %v12285_v28, %v10886_v34  ;;  %v10246_v62 = vpop.f32.mrb[85].mxu1 }
0x2e95   :  { %v10247_v12 = vadd.f32 %v10886_v34, %v10246_v62 }
0x2e96   :  { %v10256_v31 = vadd.f32 %v10252_v6, %v10056_v17 }
0x2e97   :  { %v10255_v24 = vadd.f32 %v10247_v12, %v10055_v30 }
0x2e98   :  { %v10260_v11 = vsel %vm16958_vm10, %v10256_v31, 0.0 }
0x2e99   :  { %10261 = vadd.xlane.f32.xlu1 %v10260_v11  ;;  %v10257_v38 = vsel %vm16959_vm11, %v10255_v24, 0.0 }
0x2e9a   :  { %10258 = vadd.xlane.f32.xlu0 %v10257_v38 }
0x2f26   :  { %v10262_v36 = vpop.xlane.xlu1 %10261 }
0x2f27   :  { %v10264_v60 = vmul.f32 0.03125, %v10262_v36  ;;  %v10259_v46 = vpop.xlane.xlu0 %10258 }
0x2f28   :  { %v10263_v19 = vmul.f32 0.03125, %v10259_v46 }
0x2f29   :  { %v10266_v23 = vsub.f32 %v10256_v31, %v10264_v60 }
0x2f2a   :  { %v10265_v54 = vsub.f32 %v10255_v24, %v10263_v19 }
0x2f2b   :  { %v10268_v3 = vmul.f32 %v10266_v23, %v10266_v23 }
0x2f2c   :  { %v10267_v15 = vmul.f32 %v10265_v54, %v10265_v54 }
0x2f2d   :  { %v10272_v58 = vsel %vm16960_vm8, %v10268_v3, 0.0 }
0x2f2e   :  { %10273 = vadd.xlane.f32.xlu1 %v10272_v58  ;;  %v10269_v39 = vsel %vm16961_vm5, %v10267_v15, 0.0 }
0x2f2f   :  { %10270 = vadd.xlane.f32.xlu0 %v10269_v39 }
0x2fbb   :  { %v10274_v10 = vpop.xlane.xlu1 %10273 }
0x2fbc   :  { %v10276_v26 = vmul.f32 0.03125, %v10274_v10  ;;  %v10271_v18 = vpop.xlane.xlu0 %10270 }
0x2fbd   :  { %v10275_v50 = vmul.f32 0.03125, %v10271_v18 }
0x2fbe   :  { %v10278_v40 = vadd.f32 1e-05, %v10276_v26 }
0x2fbf   :  { %v10277_v37 = vadd.f32 1e-05, %v10275_v50 }
0x2fc0   :  { %13483 = vrsqrt.f32 %v10278_v40 }
0x2fc1   :  { %13485 = vrsqrt.f32 %v10277_v37 }
0x2fca   :  { %v13484_v7 = vpop.eup %13483 }
0x2fcb   :  { %v13486_v5 = vpop.eup %13485  ;;  %v10282_v35 = vmul.f32 %v13484_v7, %v10266_v23 }
0x2fcc   :  { %v10281_v61 = vmul.f32 %v13486_v5, %v10265_v54 }
0x2fcd   :  { %v10289_v49 = vmul.f32 %v10889_v27, %v10282_v35 }
0x2fce   :  { %v10288_v30 = vmul.f32 %v10889_v27, %v10281_v61 }
0x2fcf   :  { %v10296_v17 = vadd.f32 %v10890_v14, %v10289_v49 }
0x2fd0   :  { %v10295_v20 = vadd.f32 %v10890_v14, %v10288_v30 }
0x2fd2   :  { %v12924_v21 = vpack.c.bf16 %v10296_v17, %v10295_v20 }
0x2fd4   :  { %12925 = vmatpush3.bf16.msra.mxu0 %v12924_v21 }
0x2fd7   :  { %12291 = vmatmul.mubr.msk.f32.vlgmr.msra.gmra.mrb[104].mxu0 %vm16962_vm3, %v10297_v33 }
0x30aa   :  { %v10367_v9 = vpop.f32.mrb[104].mxu0 }
0x30ab   :  { %v10371_v13 = vsel %vm16963_vm14, %v10367_v9, 0.0  ;;  %v12292_v48 = vpop.f32.mrb[105].mxu0 }
0x30ac   :  { %10372 = vadd.xlane.f32.xlu0 %v10371_v13 }
0x3139   :  { %v10373_v41 = vpop.xlane.xlu0 %10372 }
0x313a   :  { %v10374_v2 = vmul.f32 0.03125, %v10373_v41 }
0x313c   :  { %v10375_v43 = vsub.f32 %v10367_v9, %v10374_v2 }
0x313e   :  { %v10376_v55 = vmul.f32 %v10375_v43, %v10375_v43 }
0x3140   :  { %v10377_v22 = vsel %vm16964_vm0, %v10376_v55, 0.0 }
0x3141   :  { %10378 = vadd.xlane.f32.xlu1 %v10377_v22 }
0x31ce   :  { %v10379_v52 = vpop.xlane.xlu1 %10378 }
0x31cf   :  { %v10380_v25 = vmul.f32 0.03125, %v10379_v52 }
0x31d1   :  { %v10381_v59 = vadd.f32 1e-05, %v10380_v25 }
0x31d3   :  { %13487 = vrsqrt.f32 %v10381_v59 }
0x31dd   :  { %v13488_v42 = vpop.eup %13487 }
0x31de   :  { %v10383_v57 = vmul.f32 %v13488_v42, %v10375_v43 }
0x31e0   :  { %v10389_v44 = vmul.f32 %v10892_v29, %v10383_v57 }
0x31e2   :  { %v10395_v45 = vadd.f32 %v10893_v56, %v10389_v44 }
0x31e4   :  { %12302 = vmatmul.mubr.msk.f32.vlgmr.msra.gmra.mrb[86].mxu1 %vm16965_vm13, %v10395_v45 }
0x32b7   :  { %v10474_v8 = vpop.f32.mrb[86].mxu1 }
0x32b8   :  { %v10475_v51 = vadd.f32 %v10894_v0, %v10474_v8  ;;  %v12303_v16 = vpop.f32.mrb[87].mxu1 }
0x32ba   :  { %10479 = vst.msk [vmem:[#allocation2] sm:$0xff] %vm10478_vm15, %v10475_v51 }
0x32bb   :  { %13611 = shalt.err (!%p13608_p4)
}
0x32bc   :  { %s13612_s5 = scalar_lea.hbm %s16614_s14, 128 }
0x32bd   :  { %p13613_p5 = scmp.ne.s32.totalorder %s16614_s14, %s13612_s5  ;;  %p13616_p6 = scmp.lt.u32.totalorder %s13612_s5, %s16614_s14 }
0x32bf   :  { %p13618_p7 = pnand %p13616_p6, %p13613_p5 }
0x32c1   :  { %13621 = shalt.err (!%p13618_p7)
}
0x32c2   :  { %10489 = dma.vmem_to_hbm [thread:$0]  %s10487_s27, 128, %s16614_s14, [#allocation3]  }
0x32c3   :  { %13622 = dma.done.wait [#allocation3], 128  }
0x32c4   :  { %13623 = vsyncadd [#allocation3], 4294967168 }
0x32c5   :  { %10493 = vsyncpa [#allocation3], 1 }

</bundles_post_ra>
